<compile_context>
chip_gen: v7x
topology: tpu7x:2x2x1
jax: 0.10.0
libtpu: 0.0.40
codegen_flags: <defaults>
</compile_context>

<pallas_src>
import jax
import jax.numpy as jnp
from jax.experimental import pallas as pl
from jax.experimental.pallas import tpu as pltpu


def _round_up(x, m):
    return (x + m - 1) // m * m


_VMEM_LIMIT = 32 * 1024 * 1024  # explicit; safe on v5e/v6e/v7x


# ---------------------------------------------------------------------------
# Pallas kernels
# ---------------------------------------------------------------------------
def _conv_mm_stats_kernel(a_ref, b_ref, y_ref, sum_ref, ssq_ref):
    """y = A @ B (no bias; BN cancels it) + fused per-channel batch stats."""
    y = jnp.dot(a_ref[...], b_ref[...], preferred_element_type=jnp.float32)
    y_ref[...] = y
    sum_ref[...] = jnp.sum(y, axis=0, keepdims=True)
    ssq_ref[...] = jnp.sum(y * y, axis=0, keepdims=True)


def conv_matmul_stats(a, b):
    """a: [M, Kp], b: [Kp, N] (Kp zero-padded identically on both sides).

    Returns (y [M, N], col_sum [N], col_sumsq [N]) from a single-step
    pallas_call with full-array blocks (everything fits in VMEM).
    """
    M, K = a.shape
    Kb, N = b.shape
    assert K == Kb
    y, s, ss = pl.pallas_call(
        _conv_mm_stats_kernel,
        out_shape=(
            jax.ShapeDtypeStruct((M, N), jnp.float32),
            jax.ShapeDtypeStruct((1, N), jnp.float32),
            jax.ShapeDtypeStruct((1, N), jnp.float32),
        ),
        grid_spec=pltpu.PrefetchScalarGridSpec(
            num_scalar_prefetch=0,
            grid=(1,),
            in_specs=[
                pl.BlockSpec((M, K), lambda i: (0, 0)),
                pl.BlockSpec((K, N), lambda i: (0, 0)),
            ],
            out_specs=(
                pl.BlockSpec((M, N), lambda i: (0, 0)),
                pl.BlockSpec((1, N), lambda i: (0, 0)),
                pl.BlockSpec((1, N), lambda i: (0, 0)),
            ),
        ),
        compiler_params=pltpu.CompilerParams(vmem_limit_bytes=_VMEM_LIMIT),
    )(a, b)
    return y, s[0], ss[0]


def _mm_bias_kernel(a_ref, b_ref, bias_ref, o_ref):
    o_ref[...] = (
        jnp.dot(a_ref[...], b_ref[...], preferred_element_type=jnp.float32)
        + bias_ref[...]
    )


def matmul_bias(a, b, bias):
    """Single-step full-block matmul + bias (used for the tiny FC layer)."""
    M, K = a.shape
    _, N = b.shape
    return pl.pallas_call(
        _mm_bias_kernel,
        out_shape=jax.ShapeDtypeStruct((M, N), jnp.float32),
        grid_spec=pltpu.PrefetchScalarGridSpec(
            num_scalar_prefetch=0,
            grid=(1,),
            in_specs=[
                pl.BlockSpec((M, K), lambda i: (0, 0)),
                pl.BlockSpec((K, N), lambda i: (0, 0)),
                pl.BlockSpec((1, N), lambda i: (0, 0)),
            ],
            out_specs=pl.BlockSpec((M, N), lambda i: (0, 0)),
        ),
        compiler_params=pltpu.CompilerParams(vmem_limit_bytes=_VMEM_LIMIT),
    )(a, b, bias.reshape(1, N))


def _bn_relu_kernel(x_ref, scale_ref, shift_ref, o_ref):
    y = x_ref[...] * scale_ref[...] + shift_ref[...]       # folded BatchNorm
    o_ref[...] = jnp.maximum(y, 0.0)                        # ReLU


def _bn_drop_relu_kernel(x_ref, scale_ref, shift_ref, mask_ref, o_ref):
    # mask_ref holds precomputed dropout keep-scale values (0.0 or 2.0).
    y = (x_ref[...] * scale_ref[...] + shift_ref[...]) * mask_ref[...]
    o_ref[...] = jnp.maximum(y, 0.0)


def bn_relu(x2d, scale, shift):
    M, C = x2d.shape
    return pl.pallas_call(
        _bn_relu_kernel,
        out_shape=jax.ShapeDtypeStruct((M, C), jnp.float32),
        grid_spec=pltpu.PrefetchScalarGridSpec(
            num_scalar_prefetch=0,
            grid=(1,),
            in_specs=[
                pl.BlockSpec((M, C), lambda i: (0, 0)),
                pl.BlockSpec((1, C), lambda i: (0, 0)),
                pl.BlockSpec((1, C), lambda i: (0, 0)),
            ],
            out_specs=pl.BlockSpec((M, C), lambda i: (0, 0)),
        ),
    )(x2d, scale.reshape(1, C), shift.reshape(1, C))


def bn_dropout_relu(x2d, scale, shift, mask2d):
    """mask2d: float32 [M, C] of dropout keep-scales (0.0 dropped, 2.0 kept)."""
    M, C = x2d.shape
    return pl.pallas_call(
        _bn_drop_relu_kernel,
        out_shape=jax.ShapeDtypeStruct((M, C), jnp.float32),
        grid_spec=pltpu.PrefetchScalarGridSpec(
            num_scalar_prefetch=0,
            grid=(1,),
            in_specs=[
                pl.BlockSpec((M, C), lambda i: (0, 0)),
                pl.BlockSpec((1, C), lambda i: (0, 0)),
                pl.BlockSpec((1, C), lambda i: (0, 0)),
                pl.BlockSpec((M, C), lambda i: (0, 0)),
            ],
            out_specs=pl.BlockSpec((M, C), lambda i: (0, 0)),
        ),
    )(x2d, scale.reshape(1, C), shift.reshape(1, C), mask2d)


def _max9_kernel(*refs):
    # refs = 9 input taps + 1 output
    o_ref = refs[-1]
    m = refs[0][...]
    for r in refs[1:9]:
        m = jnp.maximum(m, r[...])
    o_ref[...] = m


def maxpool_3x3_s2_p1(x):
    """x: NHWC, post-ReLU (>= 0), so zero padding == -inf padding for max."""
    N, H, W, C = x.shape
    OH = (H + 2 - 3) // 2 + 1
    OW = (W + 2 - 3) // 2 + 1
    xp = jnp.pad(x, ((0, 0), (1, 1), (1, 1), (0, 0)))
    M = N * OH * OW
    taps = [
        xp[:, dy:dy + 2 * OH:2, dx:dx + 2 * OW:2, :].reshape(M, C)
        for dy in range(3) for dx in range(3)
    ]
    spec = pl.BlockSpec((M, C), lambda i: (0, 0))
    out = pl.pallas_call(
        _max9_kernel,
        out_shape=jax.ShapeDtypeStruct((M, C), jnp.float32),
        grid_spec=pltpu.PrefetchScalarGridSpec(
            num_scalar_prefetch=0,
            grid=(1,),
            in_specs=[spec] * 9,
            out_specs=spec,
        ),
    )(*taps)
    return out.reshape(N, OH, OW, C)


# ---------------------------------------------------------------------------
# Conv-as-im2col glue (plain JAX; matmul hot path is the Pallas kernel above)
# ---------------------------------------------------------------------------
def im2col(x, k, s, p, k_pad_to):
    """Returns col [N*OH*OW, k_pad_to] with K zero-padded inside the concat
    (no extra full-array padding pass). Tap order is (dy, dx, cin), matching
    the HWIO weight reshape."""
    # TODO(synk): at large N/H lower via lax.conv_general_dilated_patches or a
    # (dy,dx) K-axis grid instead of materializing k*k concatenated slices.
    N, H, W, C = x.shape
    OH = (H + 2 * p - k) // s + 1
    OW = (W + 2 * p - k) // s + 1
    xp = jnp.pad(x, ((0, 0), (p, p), (p, p), (0, 0)))
    cols = [
        xp[:, dy:dy + s * OH:s, dx:dx + s * OW:s, :]
        for dy in range(k) for dx in range(k)
    ]
    K = k * k * C
    if k_pad_to > K:
        cols.append(jnp.zeros((N, OH, OW, k_pad_to - K), jnp.float32))
    col = jnp.concatenate(cols, axis=-1)
    return col.reshape(N * OH * OW, k_pad_to), OH, OW


def conv2d_bn_stats(x, w2d, k, s, p):
    """Conv via im2col + single-step Pallas matmul with fused BN batch stats.
    The conv bias is intentionally omitted (BatchNorm cancels it exactly)."""
    col, OH, OW = im2col(x, k, s, p, k_pad_to=w2d.shape[0])
    y, ssum, ssq = conv_matmul_stats(col, w2d)
    return y, OH, OW, ssum, ssq


def _bn_fold_from_stats(ssum, ssq, count, gamma, beta, eps=1e-5):
    """BatchNorm2d training-mode fold from fused sum / sum-of-squares."""
    mean = ssum / count
    var = jnp.maximum(ssq / count - mean * mean, 0.0)   # biased batch variance
    scale = gamma * jax.lax.rsqrt(var + eps)
    shift = beta - mean * scale
    return scale, shift


def _dropout_mask(key, shape, p=0.5):
    """Float keep-scale mask: 0.0 (dropped) or 1/(1-p) (kept)."""
    keep = jax.random.bernoulli(key, 1.0 - p, shape)
    return jnp.where(keep, 1.0 / (1.0 - p), 0.0).astype(jnp.float32)


# ---------------------------------------------------------------------------
# Parameters (deterministic synthetic init; weights pre-packed/padded once)
# ---------------------------------------------------------------------------
def init_params(key, bits=10):
    ks = jax.random.split(key, 8)

    def conv_w(k, kh, cin, cout):
        std = (2.0 / (kh * kh * cin)) ** 0.5
        w = jax.random.normal(k, (kh, kh, cin, cout), jnp.float32) * std
        w2d = w.reshape(kh * kh * cin, cout)              # (dy, dx, cin) order
        kp = _round_up(w2d.shape[0], 128)                 # K zero-pad once
        return jnp.zeros((kp, cout), jnp.float32).at[: w2d.shape[0]].set(w2d)

    nfc = _round_up(bits, 128)                            # lane-dense FC output
    wfc = jax.random.normal(ks[4], (512, bits), jnp.float32) * (1.0 / 512 ** 0.5)
    bfc = jax.random.normal(ks[5], (bits,), jnp.float32) * 0.01

    # Conv biases (conv2-4 in the PyTorch module) are omitted: the BatchNorm
    # immediately following each conv subtracts the batch mean, cancelling the
    # bias exactly, so the forward output is identical.
    return {
        "w1": conv_w(ks[0], 7, 3, 64),
        "g1": jnp.ones((64,), jnp.float32), "b1": jnp.zeros((64,), jnp.float32),
        "w2": conv_w(ks[1], 3, 64, 128),
        "g2": jnp.ones((128,), jnp.float32), "b2": jnp.zeros((128,), jnp.float32),
        "w3": conv_w(ks[2], 3, 128, 256),
        "g3": jnp.ones((256,), jnp.float32), "b3": jnp.zeros((256,), jnp.float32),
        "w4": conv_w(ks[3], 3, 256, 512),
        "g4": jnp.ones((512,), jnp.float32), "b4": jnp.zeros((512,), jnp.float32),
        "wfc": jnp.zeros((512, nfc), jnp.float32).at[:, :bits].set(wfc),
        "bfc": jnp.zeros((nfc,), jnp.float32).at[:bits].set(bfc),
    }


# ---------------------------------------------------------------------------
# Forward pass
# ---------------------------------------------------------------------------
def rgression_net_forward(x_nchw, params, drop_key, bits=10):
    x = jnp.transpose(x_nchw, (0, 2, 3, 1)).astype(jnp.float32)   # NHWC
    N = x.shape[0]
    dkey1, dkey2 = jax.random.split(drop_key)

    # conv1 (bias=False) -> bn1 -> relu
    y, OH, OW, s, q = conv2d_bn_stats(x, params["w1"], 7, 2, 3)
    sc, sh = _bn_fold_from_stats(s, q, y.shape[0], params["g1"], params["b1"])
    y = bn_relu(y, sc, sh).reshape(N, OH, OW, -1)

    # maxpool 3x3 / s2 / p1
    y = maxpool_3x3_s2_p1(y)

    # conv2 -> bn2 -> dropout(0.5) -> relu
    y, OH, OW, s, q = conv2d_bn_stats(y, params["w2"], 3, 2, 1)
    sc, sh = _bn_fold_from_stats(s, q, y.shape[0], params["g2"], params["b2"])
    y = bn_dropout_relu(y, sc, sh, _dropout_mask(dkey1, y.shape))
    y = y.reshape(N, OH, OW, -1)

    # conv3 -> bn3 -> relu
    y, OH, OW, s, q = conv2d_bn_stats(y, params["w3"], 3, 2, 1)
    sc, sh = _bn_fold_from_stats(s, q, y.shape[0], params["g3"], params["b3"])
    y = bn_relu(y, sc, sh).reshape(N, OH, OW, -1)

    # conv4 -> bn4 -> dropout(0.5) -> relu
    y, OH, OW, s, q = conv2d_bn_stats(y, params["w4"], 3, 2, 1)
    sc, sh = _bn_fold_from_stats(s, q, y.shape[0], params["g4"], params["b4"])
    y = bn_dropout_relu(y, sc, sh, _dropout_mask(dkey2, y.shape))
    y = y.reshape(N, OH, OW, -1)

    # AvgPool2d(out.size(2)) over the full spatial extent, then view(-1, 512)
    y = jnp.mean(y, axis=(1, 2)).reshape(-1, 512)

    # fc: Linear(512, bits); weight/bias pre-padded to lane width at init.
    logits = matmul_bias(y, params["wfc"], params["bfc"])[:, :bits]
    return logits


if __name__ == "__main__":
    key = jax.random.PRNGKey(0)
    pkey, xkey, dkey = jax.random.split(key, 3)

    bits = 10
    params = init_params(pkey, bits=bits)
    # NCHW, 3 channels, 32x32 spatial (32 -> 16 -> 8 -> 4 -> 2 -> 1 through
    # the stride-2 stages).
    x = jax.random.normal(xkey, (2, 3, 32, 32), jnp.float32)

    fwd = jax.jit(rgression_net_forward, static_argnames=("bits",))
    logits = fwd(x, params, dkey, bits=bits)
    logits = jax.block_until_ready(logits)
    assert logits.shape == (2, bits) and bool(jnp.all(jnp.isfinite(logits)))
    print("KERNEL_OK")
</pallas_src>

<mosaic_0001>
module attributes {stable_mosaic.version = 11 : i64} {
  func.func @_conv_mm_stats_kernel(%arg0: i32, %arg1: memref<512x256xf32, #tpu.memory_space<vmem>>, %arg2: memref<256x64xf32, #tpu.memory_space<vmem>>, %arg3: memref<512x64xf32, #tpu.memory_space<vmem>>, %arg4: memref<1x64xf32, #tpu.memory_space<vmem>>, %arg5: memref<1x64xf32, #tpu.memory_space<vmem>>) attributes {dimension_semantics = [#tpu.dimension_semantics<arbitrary>], iteration_bounds = array<i64: 1>, scalar_prefetch = 0 : i64, scratch_operands = 0 : i64, tpu.core_type = #tpu.core_type<tc>, window_params = [{pipeline_mode = #tpu.pipeline_mode<synchronous>, transform_indices = @transform_0, window_bounds = array<i64: 512, 256>}, {pipeline_mode = #tpu.pipeline_mode<synchronous>, transform_indices = @transform_1, window_bounds = array<i64: 256, 64>}, {pipeline_mode = #tpu.pipeline_mode<synchronous>, transform_indices = @transform_2, window_bounds = array<i64: 512, 64>}, {pipeline_mode = #tpu.pipeline_mode<synchronous>, transform_indices = @transform_3, window_bounds = array<i64: 1, 64>}, {pipeline_mode = #tpu.pipeline_mode<synchronous>, transform_indices = @transform_4, window_bounds = array<i64: 1, 64>}]} {
    %c0 = arith.constant 0 : index
    %c0_0 = arith.constant 0 : index
    %0 = vector.load %arg1[%c0, %c0_0] : memref<512x256xf32, #tpu.memory_space<vmem>>, vector<512x256xf32>
    %c0_1 = arith.constant 0 : index
    %c0_2 = arith.constant 0 : index
    %1 = vector.load %arg2[%c0_1, %c0_2] : memref<256x64xf32, #tpu.memory_space<vmem>>, vector<256x64xf32>
    %cst = arith.constant dense<0.000000e+00> : vector<512x64xf32>
    %2 = tpu.matmul %0, %1, %cst {dimension_numbers = #tpu.dot_dimension_numbers<[1], [0], [0], [1], [0, 0, 1, 1], [], []>} : vector<512x256xf32>, vector<256x64xf32>, vector<512x64xf32> -> vector<512x64xf32>
    %c0_3 = arith.constant 0 : index
    %c0_4 = arith.constant 0 : index
    %3 = vector.load %arg3[%c0_3, %c0_4] : memref<512x64xf32, #tpu.memory_space<vmem>>, vector<512x64xf32>
    tpu.vector_store %arg3[%c0_3, %c0_4], %2 {strides = array<i32>} : memref<512x64xf32, #tpu.memory_space<vmem>>, vector<512x64xf32>,
    %cst_5 = arith.constant dense<0.000000e+00> : vector<64xf32>
    %4 = vector.multi_reduction <add>, %2, %cst_5 [0] : vector<512x64xf32> to vector<64xf32>
    %5 = vector.shape_cast %4 : vector<64xf32> to vector<1x64xf32>
    %c0_6 = arith.constant 0 : index
    %c0_7 = arith.constant 0 : index
    %6 = vector.load %arg4[%c0_6, %c0_7] : memref<1x64xf32, #tpu.memory_space<vmem>>, vector<1x64xf32>
    tpu.vector_store %arg4[%c0_6, %c0_7], %5 {strides = array<i32>} : memref<1x64xf32, #tpu.memory_space<vmem>>, vector<1x64xf32>,
    %7 = arith.mulf %2, %2 : vector<512x64xf32>
    %cst_8 = arith.constant dense<0.000000e+00> : vector<64xf32>
    %8 = vector.multi_reduction <add>, %7, %cst_8 [0] : vector<512x64xf32> to vector<64xf32>
    %9 = vector.shape_cast %8 : vector<64xf32> to vector<1x64xf32>
    %c0_9 = arith.constant 0 : index
    %c0_10 = arith.constant 0 : index
    %10 = vector.load %arg5[%c0_9, %c0_10] : memref<1x64xf32, #tpu.memory_space<vmem>>, vector<1x64xf32>
    tpu.vector_store %arg5[%c0_9, %c0_10], %9 {strides = array<i32>} : memref<1x64xf32, #tpu.memory_space<vmem>>, vector<1x64xf32>,
    return
  }
  func.func @transform_0(%arg0: i32) -> (i32, i32) {
    %c0_i32 = arith.constant 0 : i32
    %c0_i32_0 = arith.constant 0 : i32
    %c0_i32_1 = arith.constant 0 : i32
    return %c0_i32, %c0_i32_0 : i32, i32
  }
  func.func @transform_1(%arg0: i32) -> (i32, i32) {
    %c0_i32 = arith.constant 0 : i32
    %c0_i32_0 = arith.constant 0 : i32
    %c0_i32_1 = arith.constant 0 : i32
    return %c0_i32, %c0_i32_0 : i32, i32
  }
  func.func @transform_2(%arg0: i32) -> (i32, i32) {
    %c0_i32 = arith.constant 0 : i32
    %c0_i32_0 = arith.constant 0 : i32
    %c0_i32_1 = arith.constant 0 : i32
    return %c0_i32, %c0_i32_0 : i32, i32
  }
  func.func @transform_3(%arg0: i32) -> (i32, i32) {
    %c0_i32 = arith.constant 0 : i32
    %c0_i32_0 = arith.constant 0 : i32
    %c0_i32_1 = arith.constant 0 : i32
    return %c0_i32, %c0_i32_0 : i32, i32
  }
  func.func @transform_4(%arg0: i32) -> (i32, i32) {
    %c0_i32 = arith.constant 0 : i32
    %c0_i32_0 = arith.constant 0 : i32
    %c0_i32_1 = arith.constant 0 : i32
    return %c0_i32, %c0_i32_0 : i32, i32
  }
}

module attributes {stable_mosaic.version = 11 : i64} {
  func.func @_bn_relu_kernel(%arg0: i32, %arg1: memref<512x64xf32, #tpu.memory_space<vmem>>, %arg2: memref<1x64xf32, #tpu.memory_space<vmem>>, %arg3: memref<1x64xf32, #tpu.memory_space<vmem>>, %arg4: memref<512x64xf32, #tpu.memory_space<vmem>>) attributes {dimension_semantics = [#tpu.dimension_semantics<arbitrary>], iteration_bounds = array<i64: 1>, scalar_prefetch = 0 : i64, scratch_operands = 0 : i64, tpu.core_type = #tpu.core_type<tc>, window_params = [{pipeline_mode = #tpu.pipeline_mode<synchronous>, transform_indices = @transform_0, window_bounds = array<i64: 512, 64>}, {pipeline_mode = #tpu.pipeline_mode<synchronous>, transform_indices = @transform_1, window_bounds = array<i64: 1, 64>}, {pipeline_mode = #tpu.pipeline_mode<synchronous>, transform_indices = @transform_2, window_bounds = array<i64: 1, 64>}, {pipeline_mode = #tpu.pipeline_mode<synchronous>, transform_indices = @transform_3, window_bounds = array<i64: 512, 64>}]} {
    %c0 = arith.constant 0 : index
    %c0_0 = arith.constant 0 : index
    %0 = vector.load %arg1[%c0, %c0_0] : memref<512x64xf32, #tpu.memory_space<vmem>>, vector<512x64xf32>
    %c0_1 = arith.constant 0 : index
    %c0_2 = arith.constant 0 : index
    %1 = vector.load %arg2[%c0_1, %c0_2] : memref<1x64xf32, #tpu.memory_space<vmem>>, vector<1x64xf32>
    %2 = vector.broadcast %1 : vector<1x64xf32> to vector<512x64xf32>
    %3 = arith.mulf %0, %2 : vector<512x64xf32>
    %c0_3 = arith.constant 0 : index
    %c0_4 = arith.constant 0 : index
    %4 = vector.load %arg3[%c0_3, %c0_4] : memref<1x64xf32, #tpu.memory_space<vmem>>, vector<1x64xf32>
    %5 = vector.broadcast %4 : vector<1x64xf32> to vector<512x64xf32>
    %6 = arith.addf %3, %5 : vector<512x64xf32>
    %cst = arith.constant 0.000000e+00 : f32
    %7 = vector.broadcast %cst : f32 to vector<512x64xf32>
    %8 = arith.maximumf %6, %7 : vector<512x64xf32>
    %c0_5 = arith.constant 0 : index
    %c0_6 = arith.constant 0 : index
    %9 = vector.load %arg4[%c0_5, %c0_6] : memref<512x64xf32, #tpu.memory_space<vmem>>, vector<512x64xf32>
    tpu.vector_store %arg4[%c0_5, %c0_6], %8 {strides = array<i32>} : memref<512x64xf32, #tpu.memory_space<vmem>>, vector<512x64xf32>,
    return
  }
  func.func @transform_0(%arg0: i32) -> (i32, i32) {
    %c0_i32 = arith.constant 0 : i32
    %c0_i32_0 = arith.constant 0 : i32
    %c0_i32_1 = arith.constant 0 : i32
    return %c0_i32, %c0_i32_0 : i32, i32
  }
  func.func @transform_1(%arg0: i32) -> (i32, i32) {
    %c0_i32 = arith.constant 0 : i32
    %c0_i32_0 = arith.constant 0 : i32
    %c0_i32_1 = arith.constant 0 : i32
    return %c0_i32, %c0_i32_0 : i32, i32
  }
  func.func @transform_2(%arg0: i32) -> (i32, i32) {
    %c0_i32 = arith.constant 0 : i32
    %c0_i32_0 = arith.constant 0 : i32
    %c0_i32_1 = arith.constant 0 : i32
    return %c0_i32, %c0_i32_0 : i32, i32
  }
  func.func @transform_3(%arg0: i32) -> (i32, i32) {
    %c0_i32 = arith.constant 0 : i32
    %c0_i32_0 = arith.constant 0 : i32
    %c0_i32_1 = arith.constant 0 : i32
    return %c0_i32, %c0_i32_0 : i32, i32
  }
}

module attributes {stable_mosaic.version = 11 : i64} {
  func.func @_max9_kernel(%arg0: i32, %arg1: memref<128x64xf32, #tpu.memory_space<vmem>>, %arg2: memref<128x64xf32, #tpu.memory_space<vmem>>, %arg3: memref<128x64xf32, #tpu.memory_space<vmem>>, %arg4: memref<128x64xf32, #tpu.memory_space<vmem>>, %arg5: memref<128x64xf32, #tpu.memory_space<vmem>>, %arg6: memref<128x64xf32, #tpu.memory_space<vmem>>, %arg7: memref<128x64xf32, #tpu.memory_space<vmem>>, %arg8: memref<128x64xf32, #tpu.memory_space<vmem>>, %arg9: memref<128x64xf32, #tpu.memory_space<vmem>>, %arg10: memref<128x64xf32, #tpu.memory_space<vmem>>) attributes {dimension_semantics = [#tpu.dimension_semantics<arbitrary>], iteration_bounds = array<i64: 1>, scalar_prefetch = 0 : i64, scratch_operands = 0 : i64, tpu.core_type = #tpu.core_type<tc>, window_params = [{pipeline_mode = #tpu.pipeline_mode<synchronous>, transform_indices = @transform_0, window_bounds = array<i64: 128, 64>}, {pipeline_mode = #tpu.pipeline_mode<synchronous>, transform_indices = @transform_1, window_bounds = array<i64: 128, 64>}, {pipeline_mode = #tpu.pipeline_mode<synchronous>, transform_indices = @transform_2, window_bounds = array<i64: 128, 64>}, {pipeline_mode = #tpu.pipeline_mode<synchronous>, transform_indices = @transform_3, window_bounds = array<i64: 128, 64>}, {pipeline_mode = #tpu.pipeline_mode<synchronous>, transform_indices = @transform_4, window_bounds = array<i64: 128, 64>}, {pipeline_mode = #tpu.pipeline_mode<synchronous>, transform_indices = @transform_5, window_bounds = array<i64: 128, 64>}, {pipeline_mode = #tpu.pipeline_mode<synchronous>, transform_indices = @transform_6, window_bounds = array<i64: 128, 64>}, {pipeline_mode = #tpu.pipeline_mode<synchronous>, transform_indices = @transform_7, window_bounds = array<i64: 128, 64>}, {pipeline_mode = #tpu.pipeline_mode<synchronous>, transform_indices = @transform_8, window_bounds = array<i64: 128, 64>}, {pipeline_mode = #tpu.pipeline_mode<synchronous>, transform_indices = @transform_9, window_bounds = array<i64: 128, 64>}]} {
    %c0 = arith.constant 0 : index
    %c0_0 = arith.constant 0 : index
    %0 = vector.load %arg1[%c0, %c0_0] : memref<128x64xf32, #tpu.memory_space<vmem>>, vector<128x64xf32>
    %c0_1 = arith.constant 0 : index
    %c0_2 = arith.constant 0 : index
    %1 = vector.load %arg2[%c0_1, %c0_2] : memref<128x64xf32, #tpu.memory_space<vmem>>, vector<128x64xf32>
    %2 = arith.maximumf %0, %1 : vector<128x64xf32>
    %c0_3 = arith.constant 0 : index
    %c0_4 = arith.constant 0 : index
    %3 = vector.load %arg3[%c0_3, %c0_4] : memref<128x64xf32, #tpu.memory_space<vmem>>, vector<128x64xf32>
    %4 = arith.maximumf %2, %3 : vector<128x64xf32>
    %c0_5 = arith.constant 0 : index
    %c0_6 = arith.constant 0 : index
    %5 = vector.load %arg4[%c0_5, %c0_6] : memref<128x64xf32, #tpu.memory_space<vmem>>, vector<128x64xf32>
    %6 = arith.maximumf %4, %5 : vector<128x64xf32>
    %c0_7 = arith.constant 0 : index
    %c0_8 = arith.constant 0 : index
    %7 = vector.load %arg5[%c0_7, %c0_8] : memref<128x64xf32, #tpu.memory_space<vmem>>, vector<128x64xf32>
    %8 = arith.maximumf %6, %7 : vector<128x64xf32>
    %c0_9 = arith.constant 0 : index
    %c0_10 = arith.constant 0 : index
    %9 = vector.load %arg6[%c0_9, %c0_10] : memref<128x64xf32, #tpu.memory_space<vmem>>, vector<128x64xf32>
    %10 = arith.maximumf %8, %9 : vector<128x64xf32>
    %c0_11 = arith.constant 0 : index
    %c0_12 = arith.constant 0 : index
    %11 = vector.load %arg7[%c0_11, %c0_12] : memref<128x64xf32, #tpu.memory_space<vmem>>, vector<128x64xf32>
    %12 = arith.maximumf %10, %11 : vector<128x64xf32>
    %c0_13 = arith.constant 0 : index
    %c0_14 = arith.constant 0 : index
    %13 = vector.load %arg8[%c0_13, %c0_14] : memref<128x64xf32, #tpu.memory_space<vmem>>, vector<128x64xf32>
    %14 = arith.maximumf %12, %13 : vector<128x64xf32>
    %c0_15 = arith.constant 0 : index
    %c0_16 = arith.constant 0 : index
    %15 = vector.load %arg9[%c0_15, %c0_16] : memref<128x64xf32, #tpu.memory_space<vmem>>, vector<128x64xf32>
    %16 = arith.maximumf %14, %15 : vector<128x64xf32>
    %c0_17 = arith.constant 0 : index
    %c0_18 = arith.constant 0 : index
    %17 = vector.load %arg10[%c0_17, %c0_18] : memref<128x64xf32, #tpu.memory_space<vmem>>, vector<128x64xf32>
    tpu.vector_store %arg10[%c0_17, %c0_18], %16 {strides = array<i32>} : memref<128x64xf32, #tpu.memory_space<vmem>>, vector<128x64xf32>,
    return
  }
  func.func @transform_0(%arg0: i32) -> (i32, i32) {
    %c0_i32 = arith.constant 0 : i32
    %c0_i32_0 = arith.constant 0 : i32
    %c0_i32_1 = arith.constant 0 : i32
    return %c0_i32, %c0_i32_0 : i32, i32
  }
  func.func @transform_1(%arg0: i32) -> (i32, i32) {
    %c0_i32 = arith.constant 0 : i32
    %c0_i32_0 = arith.constant 0 : i32
    %c0_i32_1 = arith.constant 0 : i32
    return %c0_i32, %c0_i32_0 : i32, i32
  }
  func.func @transform_2(%arg0: i32) -> (i32, i32) {
    %c0_i32 = arith.constant 0 : i32
    %c0_i32_0 = arith.constant 0 : i32
    %c0_i32_1 = arith.constant 0 : i32
    return %c0_i32, %c0_i32_0 : i32, i32
  }
  func.func @transform_3(%arg0: i32) -> (i32, i32) {
    %c0_i32 = arith.constant 0 : i32
    %c0_i32_0 = arith.constant 0 : i32
    %c0_i32_1 = arith.constant 0 : i32
    return %c0_i32, %c0_i32_0 : i32, i32
  }
  func.func @transform_4(%arg0: i32) -> (i32, i32) {
    %c0_i32 = arith.constant 0 : i32
    %c0_i32_0 = arith.constant 0 : i32
    %c0_i32_1 = arith.constant 0 : i32
    return %c0_i32, %c0_i32_0 : i32, i32
  }
  func.func @transform_5(%arg0: i32) -> (i32, i32) {
    %c0_i32 = arith.constant 0 : i32
    %c0_i32_0 = arith.constant 0 : i32
    %c0_i32_1 = arith.constant 0 : i32
    return %c0_i32, %c0_i32_0 : i32, i32
  }
  func.func @transform_6(%arg0: i32) -> (i32, i32) {
    %c0_i32 = arith.constant 0 : i32
    %c0_i32_0 = arith.constant 0 : i32
    %c0_i32_1 = arith.constant 0 : i32
    return %c0_i32, %c0_i32_0 : i32, i32
  }
  func.func @transform_7(%arg0: i32) -> (i32, i32) {
    %c0_i32 = arith.constant 0 : i32
    %c0_i32_0 = arith.constant 0 : i32
    %c0_i32_1 = arith.constant 0 : i32
    return %c0_i32, %c0_i32_0 : i32, i32
  }
  func.func @transform_8(%arg0: i32) -> (i32, i32) {
    %c0_i32 = arith.constant 0 : i32
    %c0_i32_0 = arith.constant 0 : i32
    %c0_i32_1 = arith.constant 0 : i32
    return %c0_i32, %c0_i32_0 : i32, i32
  }
  func.func @transform_9(%arg0: i32) -> (i32, i32) {
    %c0_i32 = arith.constant 0 : i32
    %c0_i32_0 = arith.constant 0 : i32
    %c0_i32_1 = arith.constant 0 : i32
    return %c0_i32, %c0_i32_0 : i32, i32
  }
}

module attributes {stable_mosaic.version = 11 : i64} {
  func.func @_conv_mm_stats_kernel(%arg0: i32, %arg1: memref<32x640xf32, #tpu.memory_space<vmem>>, %arg2: memref<640x128xf32, #tpu.memory_space<vmem>>, %arg3: memref<32x128xf32, #tpu.memory_space<vmem>>, %arg4: memref<1x128xf32, #tpu.memory_space<vmem>>, %arg5: memref<1x128xf32, #tpu.memory_space<vmem>>) attributes {dimension_semantics = [#tpu.dimension_semantics<arbitrary>], iteration_bounds = array<i64: 1>, scalar_prefetch = 0 : i64, scratch_operands = 0 : i64, tpu.core_type = #tpu.core_type<tc>, window_params = [{pipeline_mode = #tpu.pipeline_mode<synchronous>, transform_indices = @transform_0, window_bounds = array<i64: 32, 640>}, {pipeline_mode = #tpu.pipeline_mode<synchronous>, transform_indices = @transform_1, window_bounds = array<i64: 640, 128>}, {pipeline_mode = #tpu.pipeline_mode<synchronous>, transform_indices = @transform_2, window_bounds = array<i64: 32, 128>}, {pipeline_mode = #tpu.pipeline_mode<synchronous>, transform_indices = @transform_3, window_bounds = array<i64: 1, 128>}, {pipeline_mode = #tpu.pipeline_mode<synchronous>, transform_indices = @transform_4, window_bounds = array<i64: 1, 128>}]} {
    %c0 = arith.constant 0 : index
    %c0_0 = arith.constant 0 : index
    %0 = vector.load %arg1[%c0, %c0_0] : memref<32x640xf32, #tpu.memory_space<vmem>>, vector<32x640xf32>
    %c0_1 = arith.constant 0 : index
    %c0_2 = arith.constant 0 : index
    %1 = vector.load %arg2[%c0_1, %c0_2] : memref<640x128xf32, #tpu.memory_space<vmem>>, vector<640x128xf32>
    %cst = arith.constant dense<0.000000e+00> : vector<32x128xf32>
    %2 = tpu.matmul %0, %1, %cst {dimension_numbers = #tpu.dot_dimension_numbers<[1], [0], [0], [1], [0, 0, 1, 1], [], []>} : vector<32x640xf32>, vector<640x128xf32>, vector<32x128xf32> -> vector<32x128xf32>
    %c0_3 = arith.constant 0 : index
    %c0_4 = arith.constant 0 : index
    %3 = vector.load %arg3[%c0_3, %c0_4] : memref<32x128xf32, #tpu.memory_space<vmem>>, vector<32x128xf32>
    tpu.vector_store %arg3[%c0_3, %c0_4], %2 {strides = array<i32>} : memref<32x128xf32, #tpu.memory_space<vmem>>, vector<32x128xf32>,
    %cst_5 = arith.constant dense<0.000000e+00> : vector<128xf32>
    %4 = vector.multi_reduction <add>, %2, %cst_5 [0] : vector<32x128xf32> to vector<128xf32>
    %5 = vector.shape_cast %4 : vector<128xf32> to vector<1x128xf32>
    %c0_6 = arith.constant 0 : index
    %c0_7 = arith.constant 0 : index
    %6 = vector.load %arg4[%c0_6, %c0_7] : memref<1x128xf32, #tpu.memory_space<vmem>>, vector<1x128xf32>
    tpu.vector_store %arg4[%c0_6, %c0_7], %5 {strides = array<i32>} : memref<1x128xf32, #tpu.memory_space<vmem>>, vector<1x128xf32>,
    %7 = arith.mulf %2, %2 : vector<32x128xf32>
    %cst_8 = arith.constant dense<0.000000e+00> : vector<128xf32>
    %8 = vector.multi_reduction <add>, %7, %cst_8 [0] : vector<32x128xf32> to vector<128xf32>
    %9 = vector.shape_cast %8 : vector<128xf32> to vector<1x128xf32>
    %c0_9 = arith.constant 0 : index
    %c0_10 = arith.constant 0 : index
    %10 = vector.load %arg5[%c0_9, %c0_10] : memref<1x128xf32, #tpu.memory_space<vmem>>, vector<1x128xf32>
    tpu.vector_store %arg5[%c0_9, %c0_10], %9 {strides = array<i32>} : memref<1x128xf32, #tpu.memory_space<vmem>>, vector<1x128xf32>,
    return
  }
  func.func @transform_0(%arg0: i32) -> (i32, i32) {
    %c0_i32 = arith.constant 0 : i32
    %c0_i32_0 = arith.constant 0 : i32
    %c0_i32_1 = arith.constant 0 : i32
    return %c0_i32, %c0_i32_0 : i32, i32
  }
  func.func @transform_1(%arg0: i32) -> (i32, i32) {
    %c0_i32 = arith.constant 0 : i32
    %c0_i32_0 = arith.constant 0 : i32
    %c0_i32_1 = arith.constant 0 : i32
    return %c0_i32, %c0_i32_0 : i32, i32
  }
  func.func @transform_2(%arg0: i32) -> (i32, i32) {
    %c0_i32 = arith.constant 0 : i32
    %c0_i32_0 = arith.constant 0 : i32
    %c0_i32_1 = arith.constant 0 : i32
    return %c0_i32, %c0_i32_0 : i32, i32
  }
  func.func @transform_3(%arg0: i32) -> (i32, i32) {
    %c0_i32 = arith.constant 0 : i32
    %c0_i32_0 = arith.constant 0 : i32
    %c0_i32_1 = arith.constant 0 : i32
    return %c0_i32, %c0_i32_0 : i32, i32
  }
  func.func @transform_4(%arg0: i32) -> (i32, i32) {
    %c0_i32 = arith.constant 0 : i32
    %c0_i32_0 = arith.constant 0 : i32
    %c0_i32_1 = arith.constant 0 : i32
    return %c0_i32, %c0_i32_0 : i32, i32
  }
}

module attributes {stable_mosaic.version = 11 : i64} {
  func.func @_bn_drop_relu_kernel(%arg0: i32, %arg1: memref<32x128xf32, #tpu.memory_space<vmem>>, %arg2: memref<1x128xf32, #tpu.memory_space<vmem>>, %arg3: memref<1x128xf32, #tpu.memory_space<vmem>>, %arg4: memref<32x128xf32, #tpu.memory_space<vmem>>, %arg5: memref<32x128xf32, #tpu.memory_space<vmem>>) attributes {dimension_semantics = [#tpu.dimension_semantics<arbitrary>], iteration_bounds = array<i64: 1>, scalar_prefetch = 0 : i64, scratch_operands = 0 : i64, tpu.core_type = #tpu.core_type<tc>, window_params = [{pipeline_mode = #tpu.pipeline_mode<synchronous>, transform_indices = @transform_0, window_bounds = array<i64: 32, 128>}, {pipeline_mode = #tpu.pipeline_mode<synchronous>, transform_indices = @transform_1, window_bounds = array<i64: 1, 128>}, {pipeline_mode = #tpu.pipeline_mode<synchronous>, transform_indices = @transform_2, window_bounds = array<i64: 1, 128>}, {pipeline_mode = #tpu.pipeline_mode<synchronous>, transform_indices = @transform_3, window_bounds = array<i64: 32, 128>}, {pipeline_mode = #tpu.pipeline_mode<synchronous>, transform_indices = @transform_4, window_bounds = array<i64: 32, 128>}]} {
    %c0 = arith.constant 0 : index
    %c0_0 = arith.constant 0 : index
    %0 = vector.load %arg1[%c0, %c0_0] : memref<32x128xf32, #tpu.memory_space<vmem>>, vector<32x128xf32>
    %c0_1 = arith.constant 0 : index
    %c0_2 = arith.constant 0 : index
    %1 = vector.load %arg2[%c0_1, %c0_2] : memref<1x128xf32, #tpu.memory_space<vmem>>, vector<1x128xf32>
    %2 = vector.broadcast %1 : vector<1x128xf32> to vector<32x128xf32>
    %3 = arith.mulf %0, %2 : vector<32x128xf32>
    %c0_3 = arith.constant 0 : index
    %c0_4 = arith.constant 0 : index
    %4 = vector.load %arg3[%c0_3, %c0_4] : memref<1x128xf32, #tpu.memory_space<vmem>>, vector<1x128xf32>
    %5 = vector.broadcast %4 : vector<1x128xf32> to vector<32x128xf32>
    %6 = arith.addf %3, %5 : vector<32x128xf32>
    %c0_5 = arith.constant 0 : index
    %c0_6 = arith.constant 0 : index
    %7 = vector.load %arg4[%c0_5, %c0_6] : memref<32x128xf32, #tpu.memory_space<vmem>>, vector<32x128xf32>
    %8 = arith.mulf %6, %7 : vector<32x128xf32>
    %cst = arith.constant 0.000000e+00 : f32
    %9 = vector.broadcast %cst : f32 to vector<32x128xf32>
    %10 = arith.maximumf %8, %9 : vector<32x128xf32>
    %c0_7 = arith.constant 0 : index
    %c0_8 = arith.constant 0 : index
    %11 = vector.load %arg5[%c0_7, %c0_8] : memref<32x128xf32, #tpu.memory_space<vmem>>, vector<32x128xf32>
    tpu.vector_store %arg5[%c0_7, %c0_8], %10 {strides = array<i32>} : memref<32x128xf32, #tpu.memory_space<vmem>>, vector<32x128xf32>,
    return
  }
  func.func @transform_0(%arg0: i32) -> (i32, i32) {
    %c0_i32 = arith.constant 0 : i32
    %c0_i32_0 = arith.constant 0 : i32
    %c0_i32_1 = arith.constant 0 : i32
    return %c0_i32, %c0_i32_0 : i32, i32
  }
  func.func @transform_1(%arg0: i32) -> (i32, i32) {
    %c0_i32 = arith.constant 0 : i32
    %c0_i32_0 = arith.constant 0 : i32
    %c0_i32_1 = arith.constant 0 : i32
    return %c0_i32, %c0_i32_0 : i32, i32
  }
  func.func @transform_2(%arg0: i32) -> (i32, i32) {
    %c0_i32 = arith.constant 0 : i32
    %c0_i32_0 = arith.constant 0 : i32
    %c0_i32_1 = arith.constant 0 : i32
    return %c0_i32, %c0_i32_0 : i32, i32
  }
  func.func @transform_3(%arg0: i32) -> (i32, i32) {
    %c0_i32 = arith.constant 0 : i32
    %c0_i32_0 = arith.constant 0 : i32
    %c0_i32_1 = arith.constant 0 : i32
    return %c0_i32, %c0_i32_0 : i32, i32
  }
  func.func @transform_4(%arg0: i32) -> (i32, i32) {
    %c0_i32 = arith.constant 0 : i32
    %c0_i32_0 = arith.constant 0 : i32
    %c0_i32_1 = arith.constant 0 : i32
    return %c0_i32, %c0_i32_0 : i32, i32
  }
}

module attributes {stable_mosaic.version = 11 : i64} {
  func.func @_conv_mm_stats_kernel(%arg0: i32, %arg1: memref<8x1152xf32, #tpu.memory_space<vmem>>, %arg2: memref<1152x256xf32, #tpu.memory_space<vmem>>, %arg3: memref<8x256xf32, #tpu.memory_space<vmem>>, %arg4: memref<1x256xf32, #tpu.memory_space<vmem>>, %arg5: memref<1x256xf32, #tpu.memory_space<vmem>>) attributes {dimension_semantics = [#tpu.dimension_semantics<arbitrary>], iteration_bounds = array<i64: 1>, scalar_prefetch = 0 : i64, scratch_operands = 0 : i64, tpu.core_type = #tpu.core_type<tc>, window_params = [{pipeline_mode = #tpu.pipeline_mode<synchronous>, transform_indices = @transform_0, window_bounds = array<i64: 8, 1152>}, {pipeline_mode = #tpu.pipeline_mode<synchronous>, transform_indices = @transform_1, window_bounds = array<i64: 1152, 256>}, {pipeline_mode = #tpu.pipeline_mode<synchronous>, transform_indices = @transform_2, window_bounds = array<i64: 8, 256>}, {pipeline_mode = #tpu.pipeline_mode<synchronous>, transform_indices = @transform_3, window_bounds = array<i64: 1, 256>}, {pipeline_mode = #tpu.pipeline_mode<synchronous>, transform_indices = @transform_4, window_bounds = array<i64: 1, 256>}]} {
    %c0 = arith.constant 0 : index
    %c0_0 = arith.constant 0 : index
    %0 = vector.load %arg1[%c0, %c0_0] : memref<8x1152xf32, #tpu.memory_space<vmem>>, vector<8x1152xf32>
    %c0_1 = arith.constant 0 : index
    %c0_2 = arith.constant 0 : index
    %1 = vector.load %arg2[%c0_1, %c0_2] : memref<1152x256xf32, #tpu.memory_space<vmem>>, vector<1152x256xf32>
    %cst = arith.constant dense<0.000000e+00> : vector<8x256xf32>
    %2 = tpu.matmul %0, %1, %cst {dimension_numbers = #tpu.dot_dimension_numbers<[1], [0], [0], [1], [0, 0, 1, 1], [], []>} : vector<8x1152xf32>, vector<1152x256xf32>, vector<8x256xf32> -> vector<8x256xf32>
    %c0_3 = arith.constant 0 : index
    %c0_4 = arith.constant 0 : index
    %3 = vector.load %arg3[%c0_3, %c0_4] : memref<8x256xf32, #tpu.memory_space<vmem>>, vector<8x256xf32>
    tpu.vector_store %arg3[%c0_3, %c0_4], %2 {strides = array<i32>} : memref<8x256xf32, #tpu.memory_space<vmem>>, vector<8x256xf32>,
    %cst_5 = arith.constant dense<0.000000e+00> : vector<256xf32>
    %4 = vector.multi_reduction <add>, %2, %cst_5 [0] : vector<8x256xf32> to vector<256xf32>
    %5 = vector.shape_cast %4 : vector<256xf32> to vector<1x256xf32>
    %c0_6 = arith.constant 0 : index
    %c0_7 = arith.constant 0 : index
    %6 = vector.load %arg4[%c0_6, %c0_7] : memref<1x256xf32, #tpu.memory_space<vmem>>, vector<1x256xf32>
    tpu.vector_store %arg4[%c0_6, %c0_7], %5 {strides = array<i32>} : memref<1x256xf32, #tpu.memory_space<vmem>>, vector<1x256xf32>,
    %7 = arith.mulf %2, %2 : vector<8x256xf32>
    %cst_8 = arith.constant dense<0.000000e+00> : vector<256xf32>
    %8 = vector.multi_reduction <add>, %7, %cst_8 [0] : vector<8x256xf32> to vector<256xf32>
    %9 = vector.shape_cast %8 : vector<256xf32> to vector<1x256xf32>
    %c0_9 = arith.constant 0 : index
    %c0_10 = arith.constant 0 : index
    %10 = vector.load %arg5[%c0_9, %c0_10] : memref<1x256xf32, #tpu.memory_space<vmem>>, vector<1x256xf32>
    tpu.vector_store %arg5[%c0_9, %c0_10], %9 {strides = array<i32>} : memref<1x256xf32, #tpu.memory_space<vmem>>, vector<1x256xf32>,
    return
  }
  func.func @transform_0(%arg0: i32) -> (i32, i32) {
    %c0_i32 = arith.constant 0 : i32
    %c0_i32_0 = arith.constant 0 : i32
    %c0_i32_1 = arith.constant 0 : i32
    return %c0_i32, %c0_i32_0 : i32, i32
  }
  func.func @transform_1(%arg0: i32) -> (i32, i32) {
    %c0_i32 = arith.constant 0 : i32
    %c0_i32_0 = arith.constant 0 : i32
    %c0_i32_1 = arith.constant 0 : i32
    return %c0_i32, %c0_i32_0 : i32, i32
  }
  func.func @transform_2(%arg0: i32) -> (i32, i32) {
    %c0_i32 = arith.constant 0 : i32
    %c0_i32_0 = arith.constant 0 : i32
    %c0_i32_1 = arith.constant 0 : i32
    return %c0_i32, %c0_i32_0 : i32, i32
  }
  func.func @transform_3(%arg0: i32) -> (i32, i32) {
    %c0_i32 = arith.constant 0 : i32
    %c0_i32_0 = arith.constant 0 : i32
    %c0_i32_1 = arith.constant 0 : i32
    return %c0_i32, %c0_i32_0 : i32, i32
  }
  func.func @transform_4(%arg0: i32) -> (i32, i32) {
    %c0_i32 = arith.constant 0 : i32
    %c0_i32_0 = arith.constant 0 : i32
    %c0_i32_1 = arith.constant 0 : i32
    return %c0_i32, %c0_i32_0 : i32, i32
  }
}

module attributes {stable_mosaic.version = 11 : i64} {
  func.func @_bn_relu_kernel(%arg0: i32, %arg1: memref<8x256xf32, #tpu.memory_space<vmem>>, %arg2: memref<1x256xf32, #tpu.memory_space<vmem>>, %arg3: memref<1x256xf32, #tpu.memory_space<vmem>>, %arg4: memref<8x256xf32, #tpu.memory_space<vmem>>) attributes {dimension_semantics = [#tpu.dimension_semantics<arbitrary>], iteration_bounds = array<i64: 1>, scalar_prefetch = 0 : i64, scratch_operands = 0 : i64, tpu.core_type = #tpu.core_type<tc>, window_params = [{pipeline_mode = #tpu.pipeline_mode<synchronous>, transform_indices = @transform_0, window_bounds = array<i64: 8, 256>}, {pipeline_mode = #tpu.pipeline_mode<synchronous>, transform_indices = @transform_1, window_bounds = array<i64: 1, 256>}, {pipeline_mode = #tpu.pipeline_mode<synchronous>, transform_indices = @transform_2, window_bounds = array<i64: 1, 256>}, {pipeline_mode = #tpu.pipeline_mode<synchronous>, transform_indices = @transform_3, window_bounds = array<i64: 8, 256>}]} {
    %c0 = arith.constant 0 : index
    %c0_0 = arith.constant 0 : index
    %0 = vector.load %arg1[%c0, %c0_0] : memref<8x256xf32, #tpu.memory_space<vmem>>, vector<8x256xf32>
    %c0_1 = arith.constant 0 : index
    %c0_2 = arith.constant 0 : index
    %1 = vector.load %arg2[%c0_1, %c0_2] : memref<1x256xf32, #tpu.memory_space<vmem>>, vector<1x256xf32>
    %2 = vector.broadcast %1 : vector<1x256xf32> to vector<8x256xf32>
    %3 = arith.mulf %0, %2 : vector<8x256xf32>
    %c0_3 = arith.constant 0 : index
    %c0_4 = arith.constant 0 : index
    %4 = vector.load %arg3[%c0_3, %c0_4] : memref<1x256xf32, #tpu.memory_space<vmem>>, vector<1x256xf32>
    %5 = vector.broadcast %4 : vector<1x256xf32> to vector<8x256xf32>
    %6 = arith.addf %3, %5 : vector<8x256xf32>
    %cst = arith.constant 0.000000e+00 : f32
    %7 = vector.broadcast %cst : f32 to vector<8x256xf32>
    %8 = arith.maximumf %6, %7 : vector<8x256xf32>
    %c0_5 = arith.constant 0 : index
    %c0_6 = arith.constant 0 : index
    %9 = vector.load %arg4[%c0_5, %c0_6] : memref<8x256xf32, #tpu.memory_space<vmem>>, vector<8x256xf32>
    tpu.vector_store %arg4[%c0_5, %c0_6], %8 {strides = array<i32>} : memref<8x256xf32, #tpu.memory_space<vmem>>, vector<8x256xf32>,
    return
  }
  func.func @transform_0(%arg0: i32) -> (i32, i32) {
    %c0_i32 = arith.constant 0 : i32
    %c0_i32_0 = arith.constant 0 : i32
    %c0_i32_1 = arith.constant 0 : i32
    return %c0_i32, %c0_i32_0 : i32, i32
  }
  func.func @transform_1(%arg0: i32) -> (i32, i32) {
    %c0_i32 = arith.constant 0 : i32
    %c0_i32_0 = arith.constant 0 : i32
    %c0_i32_1 = arith.constant 0 : i32
    return %c0_i32, %c0_i32_0 : i32, i32
  }
  func.func @transform_2(%arg0: i32) -> (i32, i32) {
    %c0_i32 = arith.constant 0 : i32
    %c0_i32_0 = arith.constant 0 : i32
    %c0_i32_1 = arith.constant 0 : i32
    return %c0_i32, %c0_i32_0 : i32, i32
  }
  func.func @transform_3(%arg0: i32) -> (i32, i32) {
    %c0_i32 = arith.constant 0 : i32
    %c0_i32_0 = arith.constant 0 : i32
    %c0_i32_1 = arith.constant 0 : i32
    return %c0_i32, %c0_i32_0 : i32, i32
  }
}

module attributes {stable_mosaic.version = 11 : i64} {
  func.func @_conv_mm_stats_kernel(%arg0: i32, %arg1: memref<2x2304xf32, #tpu.memory_space<vmem>>, %arg2: memref<2304x512xf32, #tpu.memory_space<vmem>>, %arg3: memref<2x512xf32, #tpu.memory_space<vmem>>, %arg4: memref<1x512xf32, #tpu.memory_space<vmem>>, %arg5: memref<1x512xf32, #tpu.memory_space<vmem>>) attributes {dimension_semantics = [#tpu.dimension_semantics<arbitrary>], iteration_bounds = array<i64: 1>, scalar_prefetch = 0 : i64, scratch_operands = 0 : i64, tpu.core_type = #tpu.core_type<tc>, window_params = [{pipeline_mode = #tpu.pipeline_mode<synchronous>, transform_indices = @transform_0, window_bounds = array<i64: 2, 2304>}, {pipeline_mode = #tpu.pipeline_mode<synchronous>, transform_indices = @transform_1, window_bounds = array<i64: 2304, 512>}, {pipeline_mode = #tpu.pipeline_mode<synchronous>, transform_indices = @transform_2, window_bounds = array<i64: 2, 512>}, {pipeline_mode = #tpu.pipeline_mode<synchronous>, transform_indices = @transform_3, window_bounds = array<i64: 1, 512>}, {pipeline_mode = #tpu.pipeline_mode<synchronous>, transform_indices = @transform_4, window_bounds = array<i64: 1, 512>}]} {
    %c0 = arith.constant 0 : index
    %c0_0 = arith.constant 0 : index
    %0 = vector.load %arg1[%c0, %c0_0] : memref<2x2304xf32, #tpu.memory_space<vmem>>, vector<2x2304xf32>
    %c0_1 = arith.constant 0 : index
    %c0_2 = arith.constant 0 : index
    %1 = vector.load %arg2[%c0_1, %c0_2] : memref<2304x512xf32, #tpu.memory_space<vmem>>, vector<2304x512xf32>
    %cst = arith.constant dense<0.000000e+00> : vector<2x512xf32>
    %2 = tpu.matmul %0, %1, %cst {dimension_numbers = #tpu.dot_dimension_numbers<[1], [0], [0], [1], [0, 0, 1, 1], [], []>} : vector<2x2304xf32>, vector<2304x512xf32>, vector<2x512xf32> -> vector<2x512xf32>
    %c0_3 = arith.constant 0 : index
    %c0_4 = arith.constant 0 : index
    %3 = vector.load %arg3[%c0_3, %c0_4] : memref<2x512xf32, #tpu.memory_space<vmem>>, vector<2x512xf32>
    tpu.vector_store %arg3[%c0_3, %c0_4], %2 {strides = array<i32>} : memref<2x512xf32, #tpu.memory_space<vmem>>, vector<2x512xf32>,
    %cst_5 = arith.constant dense<0.000000e+00> : vector<512xf32>
    %4 = vector.multi_reduction <add>, %2, %cst_5 [0] : vector<2x512xf32> to vector<512xf32>
    %5 = vector.shape_cast %4 : vector<512xf32> to vector<1x512xf32>
    %c0_6 = arith.constant 0 : index
    %c0_7 = arith.constant 0 : index
    %6 = vector.load %arg4[%c0_6, %c0_7] : memref<1x512xf32, #tpu.memory_space<vmem>>, vector<1x512xf32>
    tpu.vector_store %arg4[%c0_6, %c0_7], %5 {strides = array<i32>} : memref<1x512xf32, #tpu.memory_space<vmem>>, vector<1x512xf32>,
    %7 = arith.mulf %2, %2 : vector<2x512xf32>
    %cst_8 = arith.constant dense<0.000000e+00> : vector<512xf32>
    %8 = vector.multi_reduction <add>, %7, %cst_8 [0] : vector<2x512xf32> to vector<512xf32>
    %9 = vector.shape_cast %8 : vector<512xf32> to vector<1x512xf32>
    %c0_9 = arith.constant 0 : index
    %c0_10 = arith.constant 0 : index
    %10 = vector.load %arg5[%c0_9, %c0_10] : memref<1x512xf32, #tpu.memory_space<vmem>>, vector<1x512xf32>
    tpu.vector_store %arg5[%c0_9, %c0_10], %9 {strides = array<i32>} : memref<1x512xf32, #tpu.memory_space<vmem>>, vector<1x512xf32>,
    return
  }
  func.func @transform_0(%arg0: i32) -> (i32, i32) {
    %c0_i32 = arith.constant 0 : i32
    %c0_i32_0 = arith.constant 0 : i32
    %c0_i32_1 = arith.constant 0 : i32
    return %c0_i32, %c0_i32_0 : i32, i32
  }
  func.func @transform_1(%arg0: i32) -> (i32, i32) {
    %c0_i32 = arith.constant 0 : i32
    %c0_i32_0 = arith.constant 0 : i32
    %c0_i32_1 = arith.constant 0 : i32
    return %c0_i32, %c0_i32_0 : i32, i32
  }
  func.func @transform_2(%arg0: i32) -> (i32, i32) {
    %c0_i32 = arith.constant 0 : i32
    %c0_i32_0 = arith.constant 0 : i32
    %c0_i32_1 = arith.constant 0 : i32
    return %c0_i32, %c0_i32_0 : i32, i32
  }
  func.func @transform_3(%arg0: i32) -> (i32, i32) {
    %c0_i32 = arith.constant 0 : i32
    %c0_i32_0 = arith.constant 0 : i32
    %c0_i32_1 = arith.constant 0 : i32
    return %c0_i32, %c0_i32_0 : i32, i32
  }
  func.func @transform_4(%arg0: i32) -> (i32, i32) {
    %c0_i32 = arith.constant 0 : i32
    %c0_i32_0 = arith.constant 0 : i32
    %c0_i32_1 = arith.constant 0 : i32
    return %c0_i32, %c0_i32_0 : i32, i32
  }
}

module attributes {stable_mosaic.version = 11 : i64} {
  func.func @_bn_drop_relu_kernel(%arg0: i32, %arg1: memref<2x512xf32, #tpu.memory_space<vmem>>, %arg2: memref<1x512xf32, #tpu.memory_space<vmem>>, %arg3: memref<1x512xf32, #tpu.memory_space<vmem>>, %arg4: memref<2x512xf32, #tpu.memory_space<vmem>>, %arg5: memref<2x512xf32, #tpu.memory_space<vmem>>) attributes {dimension_semantics = [#tpu.dimension_semantics<arbitrary>], iteration_bounds = array<i64: 1>, scalar_prefetch = 0 : i64, scratch_operands = 0 : i64, tpu.core_type = #tpu.core_type<tc>, window_params = [{pipeline_mode = #tpu.pipeline_mode<synchronous>, transform_indices = @transform_0, window_bounds = array<i64: 2, 512>}, {pipeline_mode = #tpu.pipeline_mode<synchronous>, transform_indices = @transform_1, window_bounds = array<i64: 1, 512>}, {pipeline_mode = #tpu.pipeline_mode<synchronous>, transform_indices = @transform_2, window_bounds = array<i64: 1, 512>}, {pipeline_mode = #tpu.pipeline_mode<synchronous>, transform_indices = @transform_3, window_bounds = array<i64: 2, 512>}, {pipeline_mode = #tpu.pipeline_mode<synchronous>, transform_indices = @transform_4, window_bounds = array<i64: 2, 512>}]} {
    %c0 = arith.constant 0 : index
    %c0_0 = arith.constant 0 : index
    %0 = vector.load %arg1[%c0, %c0_0] : memref<2x512xf32, #tpu.memory_space<vmem>>, vector<2x512xf32>
    %c0_1 = arith.constant 0 : index
    %c0_2 = arith.constant 0 : index
    %1 = vector.load %arg2[%c0_1, %c0_2] : memref<1x512xf32, #tpu.memory_space<vmem>>, vector<1x512xf32>
    %2 = vector.broadcast %1 : vector<1x512xf32> to vector<2x512xf32>
    %3 = arith.mulf %0, %2 : vector<2x512xf32>
    %c0_3 = arith.constant 0 : index
    %c0_4 = arith.constant 0 : index
    %4 = vector.load %arg3[%c0_3, %c0_4] : memref<1x512xf32, #tpu.memory_space<vmem>>, vector<1x512xf32>
    %5 = vector.broadcast %4 : vector<1x512xf32> to vector<2x512xf32>
    %6 = arith.addf %3, %5 : vector<2x512xf32>
    %c0_5 = arith.constant 0 : index
    %c0_6 = arith.constant 0 : index
    %7 = vector.load %arg4[%c0_5, %c0_6] : memref<2x512xf32, #tpu.memory_space<vmem>>, vector<2x512xf32>
    %8 = arith.mulf %6, %7 : vector<2x512xf32>
    %cst = arith.constant 0.000000e+00 : f32
    %9 = vector.broadcast %cst : f32 to vector<2x512xf32>
    %10 = arith.maximumf %8, %9 : vector<2x512xf32>
    %c0_7 = arith.constant 0 : index
    %c0_8 = arith.constant 0 : index
    %11 = vector.load %arg5[%c0_7, %c0_8] : memref<2x512xf32, #tpu.memory_space<vmem>>, vector<2x512xf32>
    tpu.vector_store %arg5[%c0_7, %c0_8], %10 {strides = array<i32>} : memref<2x512xf32, #tpu.memory_space<vmem>>, vector<2x512xf32>,
    return
  }
  func.func @transform_0(%arg0: i32) -> (i32, i32) {
    %c0_i32 = arith.constant 0 : i32
    %c0_i32_0 = arith.constant 0 : i32
    %c0_i32_1 = arith.constant 0 : i32
    return %c0_i32, %c0_i32_0 : i32, i32
  }
  func.func @transform_1(%arg0: i32) -> (i32, i32) {
    %c0_i32 = arith.constant 0 : i32
    %c0_i32_0 = arith.constant 0 : i32
    %c0_i32_1 = arith.constant 0 : i32
    return %c0_i32, %c0_i32_0 : i32, i32
  }
  func.func @transform_2(%arg0: i32) -> (i32, i32) {
    %c0_i32 = arith.constant 0 : i32
    %c0_i32_0 = arith.constant 0 : i32
    %c0_i32_1 = arith.constant 0 : i32
    return %c0_i32, %c0_i32_0 : i32, i32
  }
  func.func @transform_3(%arg0: i32) -> (i32, i32) {
    %c0_i32 = arith.constant 0 : i32
    %c0_i32_0 = arith.constant 0 : i32
    %c0_i32_1 = arith.constant 0 : i32
    return %c0_i32, %c0_i32_0 : i32, i32
  }
  func.func @transform_4(%arg0: i32) -> (i32, i32) {
    %c0_i32 = arith.constant 0 : i32
    %c0_i32_0 = arith.constant 0 : i32
    %c0_i32_1 = arith.constant 0 : i32
    return %c0_i32, %c0_i32_0 : i32, i32
  }
}

module attributes {stable_mosaic.version = 11 : i64} {
  func.func @_mm_bias_kernel(%arg0: i32, %arg1: memref<2x512xf32, #tpu.memory_space<vmem>>, %arg2: memref<512x128xf32, #tpu.memory_space<vmem>>, %arg3: memref<1x128xf32, #tpu.memory_space<vmem>>, %arg4: memref<2x128xf32, #tpu.memory_space<vmem>>) attributes {dimension_semantics = [#tpu.dimension_semantics<arbitrary>], iteration_bounds = array<i64: 1>, scalar_prefetch = 0 : i64, scratch_operands = 0 : i64, tpu.core_type = #tpu.core_type<tc>, window_params = [{pipeline_mode = #tpu.pipeline_mode<synchronous>, transform_indices = @transform_0, window_bounds = array<i64: 2, 512>}, {pipeline_mode = #tpu.pipeline_mode<synchronous>, transform_indices = @transform_1, window_bounds = array<i64: 512, 128>}, {pipeline_mode = #tpu.pipeline_mode<synchronous>, transform_indices = @transform_2, window_bounds = array<i64: 1, 128>}, {pipeline_mode = #tpu.pipeline_mode<synchronous>, transform_indices = @transform_3, window_bounds = array<i64: 2, 128>}]} {
    %c0 = arith.constant 0 : index
    %c0_0 = arith.constant 0 : index
    %0 = vector.load %arg1[%c0, %c0_0] : memref<2x512xf32, #tpu.memory_space<vmem>>, vector<2x512xf32>
    %c0_1 = arith.constant 0 : index
    %c0_2 = arith.constant 0 : index
    %1 = vector.load %arg2[%c0_1, %c0_2] : memref<512x128xf32, #tpu.memory_space<vmem>>, vector<512x128xf32>
    %cst = arith.constant dense<0.000000e+00> : vector<2x128xf32>
    %2 = tpu.matmul %0, %1, %cst {dimension_numbers = #tpu.dot_dimension_numbers<[1], [0], [0], [1], [0, 0, 1, 1], [], []>} : vector<2x512xf32>, vector<512x128xf32>, vector<2x128xf32> -> vector<2x128xf32>
    %c0_3 = arith.constant 0 : index
    %c0_4 = arith.constant 0 : index
    %3 = vector.load %arg3[%c0_3, %c0_4] : memref<1x128xf32, #tpu.memory_space<vmem>>, vector<1x128xf32>
    %4 = vector.broadcast %3 : vector<1x128xf32> to vector<2x128xf32>
    %5 = arith.addf %2, %4 : vector<2x128xf32>
    %c0_5 = arith.constant 0 : index
    %c0_6 = arith.constant 0 : index
    %6 = vector.load %arg4[%c0_5, %c0_6] : memref<2x128xf32, #tpu.memory_space<vmem>>, vector<2x128xf32>
    tpu.vector_store %arg4[%c0_5, %c0_6], %5 {strides = array<i32>} : memref<2x128xf32, #tpu.memory_space<vmem>>, vector<2x128xf32>,
    return
  }
  func.func @transform_0(%arg0: i32) -> (i32, i32) {
    %c0_i32 = arith.constant 0 : i32
    %c0_i32_0 = arith.constant 0 : i32
    %c0_i32_1 = arith.constant 0 : i32
    return %c0_i32, %c0_i32_0 : i32, i32
  }
  func.func @transform_1(%arg0: i32) -> (i32, i32) {
    %c0_i32 = arith.constant 0 : i32
    %c0_i32_0 = arith.constant 0 : i32
    %c0_i32_1 = arith.constant 0 : i32
    return %c0_i32, %c0_i32_0 : i32, i32
  }
  func.func @transform_2(%arg0: i32) -> (i32, i32) {
    %c0_i32 = arith.constant 0 : i32
    %c0_i32_0 = arith.constant 0 : i32
    %c0_i32_1 = arith.constant 0 : i32
    return %c0_i32, %c0_i32_0 : i32, i32
  }
  func.func @transform_3(%arg0: i32) -> (i32, i32) {
    %c0_i32 = arith.constant 0 : i32
    %c0_i32_0 = arith.constant 0 : i32
    %c0_i32_1 = arith.constant 0 : i32
    return %c0_i32, %c0_i32_0 : i32, i32
  }
}

</mosaic_0001>

<bundles_post_ra>
// kernel: rgression_net_forward.13
= control target key start
LH: loop header
LB: loop body
LE: loop exit
PB: predicated region body
PF: predicated region fallthrough
CT: control target
= control target key end

     0   :  { %vm284_vm0 = vcmask 523264   ;;  %s961_s0 = inlined_call_operand.vmem [shape: f32[512,64], index: 0, kind: input, shape index: {}]   ;;  %s962_s1 = inlined_call_operand.vmem [shape: f32[1,64], index: 1, kind: input, shape index: {}]   ;;  %s963_s2 = inlined_call_operand.vmem [shape: f32[1,64], index: 2, kind: input, shape index: {}]   ;;  %s964_s3 = inlined_call_operand.vmem [shape: f32[512,64], index: 3, kind: output, shape index: {}]  }
   0x1   :  { %v14_v0 = vld [vmem:[%s961_s0] sm:$0xff]  ;;  %v15_v4 = vld [vmem:[%s961_s0 + $0x8] sm:$0xff]  ;;  %v16_v5 = vld [vmem:[%s961_s0 + $0x10] sm:$0xff] }
   0x2   :  { %v381_v1 = vld [vmem:[%s962_s1] ss:$0 sm:$0xff]  ;;  %v17_v6 = vld [vmem:[%s961_s0 + $0x18] sm:$0xff]  ;;  %v19_v11 = vld [vmem:[%s961_s0 + $0x28] sm:$0xff] }
   0x3   :  { %v386_v2 = vld [vmem:[%s963_s2] ss:$0 sm:$0xff]  ;;  %v85_v3 = vmul.f32 %v381_v1, %v14_v0  ;;  %v86_v7 = vmul.f32 %v381_v1, %v15_v4  ;;  %v87_v8 = vmul.f32 %v381_v1, %v16_v5  ;;  %v88_v9 = vmul.f32 %v381_v1, %v17_v6  ;;  %v20_v12 = vld [vmem:[%s961_s0 + $0x30] sm:$0xff]  ;;  %v21_v17 = vld [vmem:[%s961_s0 + $0x38] sm:$0xff] }
   0x4   :  { %v18_v10 = vld [vmem:[%s961_s0 + $0x20] sm:$0xff]  ;;  %v90_v15 = vmul.f32 %v381_v1, %v19_v11  ;;  %v91_v16 = vmul.f32 %v381_v1, %v20_v12  ;;  %v92_v21 = vmul.f32 %v381_v1, %v21_v17  ;;  %v23_v27 = vld [vmem:[%s961_s0 + $0x48] sm:$0xff]  ;;  %v24_v28 = vld [vmem:[%s961_s0 + $0x50] sm:$0xff] }
   0x5   :  { %v156_v13 = vadd.f32 %v386_v2, %v85_v3  ;;  %v89_v14 = vmul.f32 %v381_v1, %v18_v10  ;;  %v157_v18 = vadd.f32 %v386_v2, %v86_v7  ;;  %v158_v19 = vadd.f32 %v386_v2, %v87_v8  ;;  %v22_v22 = vld [vmem:[%s961_s0 + $0x40] sm:$0xff]  ;;  %v25_v29 = vld [vmem:[%s961_s0 + $0x58] sm:$0xff]  ;;  %v27_v35 = vld [vmem:[%s961_s0 + $0x68] sm:$0xff] }
   0x6   :  { %v159_v20 = vadd.f32 %v386_v2, %v88_v9  ;;  %v161_v25 = vadd.f32 %v386_v2, %v90_v15  ;;  %v162_v26 = vadd.f32 %v386_v2, %v91_v16  ;;  %v163_v33 = vadd.f32 %v386_v2, %v92_v21  ;;  %v26_v34 = vld [vmem:[%s961_s0 + $0x60] sm:$0xff]  ;;  %v28_v36 = vld [vmem:[%s961_s0 + $0x70] sm:$0xff]  ;;  %v29_v41 = vld [vmem:[%s961_s0 + $0x78] sm:$0xff] }
   0x7   :  { %v220_v23 = vmax.f32 %v156_v13, 0.0  ;;  %v160_v24 = vadd.f32 %v386_v2, %v89_v14  ;;  %v221_v30 = vmax.f32 %v157_v18, 0.0  ;;  %v222_v31 = vmax.f32 %v158_v19, 0.0  ;;  %v30_v54 = vld [vmem:[%s961_s0 + $0x80] sm:$0xff]  ;;  %v31_v59 = vld [vmem:[%s961_s0 + $0x88] sm:$0xff]  ;;  %v32_v60 = vld [vmem:[%s961_s0 + $0x90] sm:$0xff] }
   0x8   :  { %v223_v32 = vmax.f32 %v159_v20, 0.0  ;;  %v225_v38 = vmax.f32 %v161_v25, 0.0  ;;  %v226_v39 = vmax.f32 %v162_v26, 0.0  ;;  %v93_v40 = vmul.f32 %v381_v1, %v22_v22  ;;  %v33_v61 = vld [vmem:[%s961_s0 + $0x98] sm:$0xff]  ;;  %v34_v4 = vld [vmem:[%s961_s0 + $0xa0] sm:$0xff]  ;;  %v35_v5 = vld [vmem:[%s961_s0 + $0xa8] sm:$0xff] }
   0x9   :  { %285 = vst.msk [vmem:[%s964_s3] sm:$0xff] %vm284_vm0, %v220_v23  ;;  %v224_v37 = vmax.f32 %v160_v24, 0.0  ;;  %286 = vst.msk [vmem:[%s964_s3 + $0x8] sm:$0xff] %vm284_vm0, %v221_v30  ;;  %v227_v42 = vmax.f32 %v163_v33, 0.0  ;;  %v94_v43 = vmul.f32 %v381_v1, %v23_v27  ;;  %v95_v44 = vmul.f32 %v381_v1, %v24_v28  ;;  %v36_v6 = vld [vmem:[%s961_s0 + $0xb0] sm:$0xff]  ;;  %v37_v11 = vld [vmem:[%s961_s0 + $0xb8] sm:$0xff] }
   0xa   :  { %287 = vst.msk [vmem:[%s964_s3 + $0x10] sm:$0xff] %vm284_vm0, %v222_v31  ;;  %288 = vst.msk [vmem:[%s964_s3 + $0x18] sm:$0xff] %vm284_vm0, %v223_v32  ;;  %v96_v45 = vmul.f32 %v381_v1, %v25_v29  ;;  %v164_v46 = vadd.f32 %v386_v2, %v93_v40  ;;  %v97_v47 = vmul.f32 %v381_v1, %v26_v34  ;;  %v38_v24 = vld [vmem:[%s961_s0 + $0xc0] sm:$0xff]  ;;  %v39_v29 = vld [vmem:[%s961_s0 + $0xc8] sm:$0xff] }
   0xb   :  { %289 = vst.msk [vmem:[%s964_s3 + $0x20] sm:$0xff] %vm284_vm0, %v224_v37  ;;  %290 = vst.msk [vmem:[%s964_s3 + $0x28] sm:$0xff] %vm284_vm0, %v225_v38  ;;  %v98_v48 = vmul.f32 %v381_v1, %v27_v35  ;;  %v99_v49 = vmul.f32 %v381_v1, %v28_v36  ;;  %v165_v50 = vadd.f32 %v386_v2, %v94_v43  ;;  %v40_v30 = vld [vmem:[%s961_s0 + $0xd0] sm:$0xff]  ;;  %v41_v31 = vld [vmem:[%s961_s0 + $0xd8] sm:$0xff] }
   0xc   :  { %291 = vst.msk [vmem:[%s964_s3 + $0x30] sm:$0xff] %vm284_vm0, %v226_v39  ;;  %292 = vst.msk [vmem:[%s964_s3 + $0x38] sm:$0xff] %vm284_vm0, %v227_v42  ;;  %v166_v51 = vadd.f32 %v386_v2, %v95_v44  ;;  %v167_v52 = vadd.f32 %v386_v2, %v96_v45  ;;  %v100_v53 = vmul.f32 %v381_v1, %v29_v41  ;;  %v228_v55 = vmax.f32 %v164_v46, 0.0  ;;  %v42_v36 = vld [vmem:[%s961_s0 + $0xe0] sm:$0xff]  ;;  %v43_v37 = vld [vmem:[%s961_s0 + $0xe8] sm:$0xff] }
   0xd   :  { %v168_v56 = vadd.f32 %v386_v2, %v97_v47  ;;  %v169_v57 = vadd.f32 %v386_v2, %v98_v48  ;;  %v170_v58 = vadd.f32 %v386_v2, %v99_v49  ;;  %v229_v62 = vmax.f32 %v165_v50, 0.0  ;;  %v44_v38 = vld [vmem:[%s961_s0 + $0xf0] sm:$0xff]  ;;  %v45_v43 = vld [vmem:[%s961_s0 + $0xf8] sm:$0xff] }
   0xe   :  { %v230_v63 = vmax.f32 %v166_v51, 0.0  ;;  %v231_v0 = vmax.f32 %v167_v52, 0.0  ;;  %v171_v3 = vadd.f32 %v386_v2, %v100_v53  ;;  %293 = vst.msk [vmem:[%s964_s3 + $0x40] sm:$0xff] %vm284_vm0, %v228_v55  ;;  %v101_v10 = vmul.f32 %v381_v1, %v30_v54 }
   0xf   :  { %v232_v7 = vmax.f32 %v168_v56, 0.0  ;;  %v233_v8 = vmax.f32 %v169_v57, 0.0  ;;  %v234_v9 = vmax.f32 %v170_v58, 0.0  ;;  %294 = vst.msk [vmem:[%s964_s3 + $0x48] sm:$0xff] %vm284_vm0, %v229_v62  ;;  %v102_v13 = vmul.f32 %v381_v1, %v31_v59  ;;  %v46_v56 = vld [vmem:[%s961_s0 + $0x100] sm:$0xff]  ;;  %v48_v62 = vld [vmem:[%s961_s0 + $0x110] sm:$0xff] }
  0x10   :  { %295 = vst.msk [vmem:[%s964_s3 + $0x50] sm:$0xff] %vm284_vm0, %v230_v63  ;;  %296 = vst.msk [vmem:[%s964_s3 + $0x58] sm:$0xff] %vm284_vm0, %v231_v0  ;;  %v235_v12 = vmax.f32 %v171_v3, 0.0  ;;  %v103_v14 = vmul.f32 %v381_v1, %v32_v60  ;;  %v104_v15 = vmul.f32 %v381_v1, %v33_v61  ;;  %v172_v16 = vadd.f32 %v386_v2, %v101_v10  ;;  %v47_v61 = vld [vmem:[%s961_s0 + $0x108] sm:$0xff]  ;;  %v49_v63 = vld [vmem:[%s961_s0 + $0x118] sm:$0xff] }
  0x11   :  { %297 = vst.msk [vmem:[%s964_s3 + $0x60] sm:$0xff] %vm284_vm0, %v232_v7  ;;  %298 = vst.msk [vmem:[%s964_s3 + $0x68] sm:$0xff] %vm284_vm0, %v233_v8  ;;  %v105_v17 = vmul.f32 %v381_v1, %v34_v4  ;;  %v106_v18 = vmul.f32 %v381_v1, %v35_v5  ;;  %v107_v19 = vmul.f32 %v381_v1, %v36_v6  ;;  %v50_v6 = vld [vmem:[%s961_s0 + $0x120] sm:$0xff]  ;;  %v51_v7 = vld [vmem:[%s961_s0 + $0x128] sm:$0xff] }
  0x12   :  { %299 = vst.msk [vmem:[%s964_s3 + $0x70] sm:$0xff] %vm284_vm0, %v234_v9  ;;  %300 = vst.msk [vmem:[%s964_s3 + $0x78] sm:$0xff] %vm284_vm0, %v235_v12  ;;  %v173_v20 = vadd.f32 %v386_v2, %v102_v13  ;;  %v174_v21 = vadd.f32 %v386_v2, %v103_v14  ;;  %v175_v22 = vadd.f32 %v386_v2, %v104_v15  ;;  %v236_v25 = vmax.f32 %v172_v16, 0.0  ;;  %v52_v8 = vld [vmem:[%s961_s0 + $0x130] sm:$0xff]  ;;  %v53_v13 = vld [vmem:[%s961_s0 + $0x138] sm:$0xff] }
  0x13   :  { %v108_v23 = vmul.f32 %v381_v1, %v37_v11  ;;  %v176_v26 = vadd.f32 %v386_v2, %v105_v17  ;;  %v177_v27 = vadd.f32 %v386_v2, %v106_v18  ;;  %v178_v28 = vadd.f32 %v386_v2, %v107_v19 }
  0x14   :  { %v237_v32 = vmax.f32 %v173_v20, 0.0  ;;  %v238_v33 = vmax.f32 %v174_v21, 0.0  ;;  %v239_v34 = vmax.f32 %v175_v22, 0.0  ;;  %301 = vst.msk [vmem:[%s964_s3 + $0x80] sm:$0xff] %vm284_vm0, %v236_v25  ;;  %v109_v42 = vmul.f32 %v381_v1, %v38_v24 }
  0x15   :  { %v179_v35 = vadd.f32 %v386_v2, %v108_v23  ;;  %v240_v39 = vmax.f32 %v176_v26, 0.0  ;;  %v241_v40 = vmax.f32 %v177_v27, 0.0  ;;  %v242_v41 = vmax.f32 %v178_v28, 0.0  ;;  %v54_v26 = vld [vmem:[%s961_s0 + $0x140] sm:$0xff] }
  0x16   :  { %302 = vst.msk [vmem:[%s964_s3 + $0x88] sm:$0xff] %vm284_vm0, %v237_v32  ;;  %303 = vst.msk [vmem:[%s964_s3 + $0x90] sm:$0xff] %vm284_vm0, %v238_v33  ;;  %v110_v45 = vmul.f32 %v381_v1, %v39_v29  ;;  %v111_v46 = vmul.f32 %v381_v1, %v40_v30  ;;  %v112_v47 = vmul.f32 %v381_v1, %v41_v31  ;;  %v55_v31 = vld [vmem:[%s961_s0 + $0x148] sm:$0xff]  ;;  %v56_v32 = vld [vmem:[%s961_s0 + $0x150] sm:$0xff] }
  0x17   :  { %304 = vst.msk [vmem:[%s964_s3 + $0x98] sm:$0xff] %vm284_vm0, %v239_v34  ;;  %v243_v44 = vmax.f32 %v179_v35, 0.0  ;;  %305 = vst.msk [vmem:[%s964_s3 + $0xa0] sm:$0xff] %vm284_vm0, %v240_v39  ;;  %v180_v48 = vadd.f32 %v386_v2, %v109_v42  ;;  %v113_v49 = vmul.f32 %v381_v1, %v42_v36  ;;  %v114_v50 = vmul.f32 %v381_v1, %v43_v37  ;;  %v57_v33 = vld [vmem:[%s961_s0 + $0x158] sm:$0xff]  ;;  %v59_v39 = vld [vmem:[%s961_s0 + $0x168] sm:$0xff] }
  0x18   :  { %306 = vst.msk [vmem:[%s964_s3 + $0xa8] sm:$0xff] %vm284_vm0, %v241_v40  ;;  %307 = vst.msk [vmem:[%s964_s3 + $0xb0] sm:$0xff] %vm284_vm0, %v242_v41  ;;  %v115_v51 = vmul.f32 %v381_v1, %v44_v38  ;;  %v181_v52 = vadd.f32 %v386_v2, %v110_v45  ;;  %v182_v53 = vadd.f32 %v386_v2, %v111_v46  ;;  %v58_v38 = vld [vmem:[%s961_s0 + $0x160] sm:$0xff]  ;;  %v60_v40 = vld [vmem:[%s961_s0 + $0x170] sm:$0xff] }
  0x19   :  { %308 = vst.msk [vmem:[%s964_s3 + $0xb8] sm:$0xff] %vm284_vm0, %v243_v44  ;;  %v183_v54 = vadd.f32 %v386_v2, %v112_v47  ;;  %v116_v55 = vmul.f32 %v381_v1, %v45_v43  ;;  %v244_v57 = vmax.f32 %v180_v48, 0.0  ;;  %v184_v58 = vadd.f32 %v386_v2, %v113_v49  ;;  %v61_v45 = vld [vmem:[%s961_s0 + $0x178] sm:$0xff] }
  0x1a   :  { %v185_v59 = vadd.f32 %v386_v2, %v114_v50  ;;  %v186_v60 = vadd.f32 %v386_v2, %v115_v51  ;;  %v245_v0 = vmax.f32 %v181_v52, 0.0  ;;  %v246_v3 = vmax.f32 %v182_v53, 0.0 }
  0x1b   :  { %v247_v4 = vmax.f32 %v183_v54, 0.0  ;;  %v187_v5 = vadd.f32 %v386_v2, %v116_v55  ;;  %309 = vst.msk [vmem:[%s964_s3 + $0xc0] sm:$0xff] %vm284_vm0, %v244_v57  ;;  %v248_v9 = vmax.f32 %v184_v58, 0.0  ;;  %v117_v12 = vmul.f32 %v381_v1, %v46_v56  ;;  %v62_v58 = vld [vmem:[%s961_s0 + $0x180] sm:$0xff] }
  0x1c   :  { %v249_v10 = vmax.f32 %v185_v59, 0.0  ;;  %v250_v11 = vmax.f32 %v186_v60, 0.0  ;;  %310 = vst.msk [vmem:[%s964_s3 + $0xc8] sm:$0xff] %vm284_vm0, %v245_v0  ;;  %311 = vst.msk [vmem:[%s964_s3 + $0xd0] sm:$0xff] %vm284_vm0, %v246_v3  ;;  %v118_v15 = vmul.f32 %v381_v1, %v47_v61  ;;  %v119_v16 = vmul.f32 %v381_v1, %v48_v62  ;;  %v64_v0 = vld [vmem:[%s961_s0 + $0x190] sm:$0xff]  ;;  %v65_v3 = vld [vmem:[%s961_s0 + $0x198] sm:$0xff] }
  0x1d   :  { %312 = vst.msk [vmem:[%s964_s3 + $0xd8] sm:$0xff] %vm284_vm0, %v247_v4  ;;  %v251_v14 = vmax.f32 %v187_v5, 0.0  ;;  %v120_v17 = vmul.f32 %v381_v1, %v49_v63  ;;  %313 = vst.msk [vmem:[%s964_s3 + $0xe0] sm:$0xff] %vm284_vm0, %v248_v9  ;;  %v188_v18 = vadd.f32 %v386_v2, %v117_v12  ;;  %v121_v19 = vmul.f32 %v381_v1, %v50_v6  ;;  %v63_v63 = vld [vmem:[%s961_s0 + $0x188] sm:$0xff] }
  0x1e   :  { %314 = vst.msk [vmem:[%s964_s3 + $0xe8] sm:$0xff] %vm284_vm0, %v249_v10  ;;  %315 = vst.msk [vmem:[%s964_s3 + $0xf0] sm:$0xff] %vm284_vm0, %v250_v11  ;;  %v122_v20 = vmul.f32 %v381_v1, %v51_v7  ;;  %v123_v21 = vmul.f32 %v381_v1, %v52_v8  ;;  %v189_v22 = vadd.f32 %v386_v2, %v118_v15  ;;  %v66_v8 = vld [vmem:[%s961_s0 + $0x1a0] sm:$0xff]  ;;  %v67_v9 = vld [vmem:[%s961_s0 + $0x1a8] sm:$0xff] }
  0x1f   :  { %316 = vst.msk [vmem:[%s964_s3 + $0xf8] sm:$0xff] %vm284_vm0, %v251_v14  ;;  %v190_v23 = vadd.f32 %v386_v2, %v119_v16  ;;  %v191_v24 = vadd.f32 %v386_v2, %v120_v17  ;;  %v124_v25 = vmul.f32 %v381_v1, %v53_v13  ;;  %v252_v27 = vmax.f32 %v188_v18, 0.0  ;;  %v68_v10 = vld [vmem:[%s961_s0 + $0x1b0] sm:$0xff]  ;;  %v69_v15 = vld [vmem:[%s961_s0 + $0x1b8] sm:$0xff] }
  0x20   :  { %v192_v28 = vadd.f32 %v386_v2, %v121_v19  ;;  %v193_v29 = vadd.f32 %v386_v2, %v122_v20  ;;  %v194_v30 = vadd.f32 %v386_v2, %v123_v21  ;;  %v253_v34 = vmax.f32 %v189_v22, 0.0 }
  0x21   :  { %v254_v35 = vmax.f32 %v190_v23, 0.0  ;;  %v255_v36 = vmax.f32 %v191_v24, 0.0  ;;  %v195_v37 = vadd.f32 %v386_v2, %v124_v25  ;;  %317 = vst.msk [vmem:[%s964_s3 + $0x100] sm:$0xff] %vm284_vm0, %v252_v27  ;;  %v125_v44 = vmul.f32 %v381_v1, %v54_v26 }
  0x22   :  { %v256_v41 = vmax.f32 %v192_v28, 0.0  ;;  %v257_v42 = vmax.f32 %v193_v29, 0.0  ;;  %v258_v43 = vmax.f32 %v194_v30, 0.0  ;;  %318 = vst.msk [vmem:[%s964_s3 + $0x108] sm:$0xff] %vm284_vm0, %v253_v34  ;;  %v126_v47 = vmul.f32 %v381_v1, %v55_v31  ;;  %v70_v28 = vld [vmem:[%s961_s0 + $0x1c0] sm:$0xff]  ;;  %v72_v34 = vld [vmem:[%s961_s0 + $0x1d0] sm:$0xff] }
  0x23   :  { %319 = vst.msk [vmem:[%s964_s3 + $0x110] sm:$0xff] %vm284_vm0, %v254_v35  ;;  %320 = vst.msk [vmem:[%s964_s3 + $0x118] sm:$0xff] %vm284_vm0, %v255_v36  ;;  %v259_v46 = vmax.f32 %v195_v37, 0.0  ;;  %v127_v48 = vmul.f32 %v381_v1, %v56_v32  ;;  %v128_v49 = vmul.f32 %v381_v1, %v57_v33  ;;  %v196_v50 = vadd.f32 %v386_v2, %v125_v44  ;;  %v71_v33 = vld [vmem:[%s961_s0 + $0x1c8] sm:$0xff]  ;;  %v73_v35 = vld [vmem:[%s961_s0 + $0x1d8] sm:$0xff] }
  0x24   :  { %321 = vst.msk [vmem:[%s964_s3 + $0x120] sm:$0xff] %vm284_vm0, %v256_v41  ;;  %322 = vst.msk [vmem:[%s964_s3 + $0x128] sm:$0xff] %vm284_vm0, %v257_v42  ;;  %v129_v51 = vmul.f32 %v381_v1, %v58_v38  ;;  %v130_v52 = vmul.f32 %v381_v1, %v59_v39  ;;  %v131_v53 = vmul.f32 %v381_v1, %v60_v40  ;;  %v74_v40 = vld [vmem:[%s961_s0 + $0x1e0] sm:$0xff]  ;;  %v75_v41 = vld [vmem:[%s961_s0 + $0x1e8] sm:$0xff] }
  0x25   :  { %323 = vst.msk [vmem:[%s964_s3 + $0x130] sm:$0xff] %vm284_vm0, %v258_v43  ;;  %324 = vst.msk [vmem:[%s964_s3 + $0x138] sm:$0xff] %vm284_vm0, %v259_v46  ;;  %v197_v54 = vadd.f32 %v386_v2, %v126_v47  ;;  %v198_v55 = vadd.f32 %v386_v2, %v127_v48  ;;  %v199_v56 = vadd.f32 %v386_v2, %v128_v49  ;;  %v260_v59 = vmax.f32 %v196_v50, 0.0  ;;  %v76_v42 = vld [vmem:[%s961_s0 + $0x1f0] sm:$0xff]  ;;  %v77_v47 = vld [vmem:[%s961_s0 + $0x1f8] sm:$0xff] }
  0x26   :  { %v132_v57 = vmul.f32 %v381_v1, %v61_v45  ;;  %v200_v60 = vadd.f32 %v386_v2, %v129_v51  ;;  %v201_v61 = vadd.f32 %v386_v2, %v130_v52  ;;  %v202_v62 = vadd.f32 %v386_v2, %v131_v53 }
  0x27   :  { %v261_v4 = vmax.f32 %v197_v54, 0.0  ;;  %v262_v5 = vmax.f32 %v198_v55, 0.0  ;;  %v263_v6 = vmax.f32 %v199_v56, 0.0  ;;  %325 = vst.msk [vmem:[%s964_s3 + $0x140] sm:$0xff] %vm284_vm0, %v260_v59  ;;  %v133_v14 = vmul.f32 %v381_v1, %v62_v58 }
  0x28   :  { %v203_v7 = vadd.f32 %v386_v2, %v132_v57  ;;  %v264_v11 = vmax.f32 %v200_v60, 0.0  ;;  %v265_v12 = vmax.f32 %v201_v61, 0.0  ;;  %v266_v13 = vmax.f32 %v202_v62, 0.0 }
  0x29   :  { %326 = vst.msk [vmem:[%s964_s3 + $0x148] sm:$0xff] %vm284_vm0, %v261_v4  ;;  %327 = vst.msk [vmem:[%s964_s3 + $0x150] sm:$0xff] %vm284_vm0, %v262_v5  ;;  %v134_v17 = vmul.f32 %v381_v1, %v63_v63  ;;  %v135_v18 = vmul.f32 %v381_v1, %v64_v0  ;;  %v136_v19 = vmul.f32 %v381_v1, %v65_v3 }
  0x2a   :  { %328 = vst.msk [vmem:[%s964_s3 + $0x158] sm:$0xff] %vm284_vm0, %v263_v6  ;;  %v267_v16 = vmax.f32 %v203_v7, 0.0  ;;  %329 = vst.msk [vmem:[%s964_s3 + $0x160] sm:$0xff] %vm284_vm0, %v264_v11  ;;  %v204_v20 = vadd.f32 %v386_v2, %v133_v14  ;;  %v137_v21 = vmul.f32 %v381_v1, %v66_v8  ;;  %v138_v22 = vmul.f32 %v381_v1, %v67_v9 }
  0x2b   :  { %330 = vst.msk [vmem:[%s964_s3 + $0x168] sm:$0xff] %vm284_vm0, %v265_v12  ;;  %331 = vst.msk [vmem:[%s964_s3 + $0x170] sm:$0xff] %vm284_vm0, %v266_v13  ;;  %v139_v23 = vmul.f32 %v381_v1, %v68_v10  ;;  %v205_v24 = vadd.f32 %v386_v2, %v134_v17  ;;  %v206_v25 = vadd.f32 %v386_v2, %v135_v18 }
  0x2c   :  { %332 = vst.msk [vmem:[%s964_s3 + $0x178] sm:$0xff] %vm284_vm0, %v267_v16  ;;  %v207_v26 = vadd.f32 %v386_v2, %v136_v19  ;;  %v140_v27 = vmul.f32 %v381_v1, %v69_v15  ;;  %v268_v29 = vmax.f32 %v204_v20, 0.0  ;;  %v208_v30 = vadd.f32 %v386_v2, %v137_v21 }
  0x2d   :  { %v209_v31 = vadd.f32 %v386_v2, %v138_v22  ;;  %v210_v32 = vadd.f32 %v386_v2, %v139_v23  ;;  %v269_v36 = vmax.f32 %v205_v24, 0.0  ;;  %v270_v37 = vmax.f32 %v206_v25, 0.0 }
  0x2e   :  { %v271_v38 = vmax.f32 %v207_v26, 0.0  ;;  %v211_v39 = vadd.f32 %v386_v2, %v140_v27  ;;  %333 = vst.msk [vmem:[%s964_s3 + $0x180] sm:$0xff] %vm284_vm0, %v268_v29  ;;  %v272_v43 = vmax.f32 %v208_v30, 0.0  ;;  %v141_v46 = vmul.f32 %v381_v1, %v70_v28 }
  0x2f   :  { %v273_v44 = vmax.f32 %v209_v31, 0.0  ;;  %v274_v45 = vmax.f32 %v210_v32, 0.0  ;;  %334 = vst.msk [vmem:[%s964_s3 + $0x188] sm:$0xff] %vm284_vm0, %v269_v36  ;;  %335 = vst.msk [vmem:[%s964_s3 + $0x190] sm:$0xff] %vm284_vm0, %v270_v37  ;;  %v142_v49 = vmul.f32 %v381_v1, %v71_v33  ;;  %v143_v50 = vmul.f32 %v381_v1, %v72_v34 }
  0x30   :  { %336 = vst.msk [vmem:[%s964_s3 + $0x198] sm:$0xff] %vm284_vm0, %v271_v38  ;;  %v275_v48 = vmax.f32 %v211_v39, 0.0  ;;  %v144_v51 = vmul.f32 %v381_v1, %v73_v35  ;;  %337 = vst.msk [vmem:[%s964_s3 + $0x1a0] sm:$0xff] %vm284_vm0, %v272_v43  ;;  %v212_v52 = vadd.f32 %v386_v2, %v141_v46  ;;  %v145_v53 = vmul.f32 %v381_v1, %v74_v40 }
  0x31   :  { %338 = vst.msk [vmem:[%s964_s3 + $0x1a8] sm:$0xff] %vm284_vm0, %v273_v44  ;;  %339 = vst.msk [vmem:[%s964_s3 + $0x1b0] sm:$0xff] %vm284_vm0, %v274_v45  ;;  %v146_v54 = vmul.f32 %v381_v1, %v75_v41  ;;  %v147_v55 = vmul.f32 %v381_v1, %v76_v42  ;;  %v213_v56 = vadd.f32 %v386_v2, %v142_v49 }
  0x32   :  { %340 = vst.msk [vmem:[%s964_s3 + $0x1b8] sm:$0xff] %vm284_vm0, %v275_v48  ;;  %v214_v57 = vadd.f32 %v386_v2, %v143_v50  ;;  %v215_v58 = vadd.f32 %v386_v2, %v144_v51  ;;  %v148_v59 = vmul.f32 %v381_v1, %v77_v47  ;;  %v276_v60 = vmax.f32 %v212_v52, 0.0 }
  0x33   :  { %v216_v61 = vadd.f32 %v386_v2, %v145_v53  ;;  %v217_v62 = vadd.f32 %v386_v2, %v146_v54  ;;  %v218_v63 = vadd.f32 %v386_v2, %v147_v55  ;;  %v277_v0 = vmax.f32 %v213_v56, 0.0 }
  0x34   :  { %v278_v3 = vmax.f32 %v214_v57, 0.0  ;;  %v279_v4 = vmax.f32 %v215_v58, 0.0  ;;  %v219_v5 = vadd.f32 %v386_v2, %v148_v59  ;;  %341 = vst.msk [vmem:[%s964_s3 + $0x1c0] sm:$0xff] %vm284_vm0, %v276_v60 }
  0x35   :  { %v280_v6 = vmax.f32 %v216_v61, 0.0  ;;  %v281_v7 = vmax.f32 %v217_v62, 0.0  ;;  %v282_v1 = vmax.f32 %v218_v63, 0.0  ;;  %342 = vst.msk [vmem:[%s964_s3 + $0x1c8] sm:$0xff] %vm284_vm0, %v277_v0 }
  0x36   :  { %343 = vst.msk [vmem:[%s964_s3 + $0x1d0] sm:$0xff] %vm284_vm0, %v278_v3  ;;  %344 = vst.msk [vmem:[%s964_s3 + $0x1d8] sm:$0xff] %vm284_vm0, %v279_v4  ;;  %v283_v2 = vmax.f32 %v219_v5, 0.0 }
  0x37   :  { %345 = vst.msk [vmem:[%s964_s3 + $0x1e0] sm:$0xff] %vm284_vm0, %v280_v6  ;;  %346 = vst.msk [vmem:[%s964_s3 + $0x1e8] sm:$0xff] %vm284_vm0, %v281_v7 }
  0x38   :  { %347 = vst.msk [vmem:[%s964_s3 + $0x1f0] sm:$0xff] %vm284_vm0, %v282_v1  ;;  %348 = vst.msk [vmem:[%s964_s3 + $0x1f8] sm:$0xff] %vm284_vm0, %v283_v2 }

// kernel: rgression_net_forward.12
= control target key start
LH: loop header
LB: loop body
LE: loop exit
PB: predicated region body
PF: predicated region fallthrough
CT: control target
= control target key end

     0   :  { %v1050_v0 = vmov 0.0|0.0   ;;  %vm559_vm0 = vcmask 523264   ;;  %vm757_vm1 = vcmask 516096   ;;  %s2170_s1 = inlined_call_operand.vmem [shape: f32[256,64], index: 1, kind: input, shape index: {}]   ;;  %s2171_s0 = inlined_call_operand.vmem [shape: f32[512,256], index: 0, kind: input, shape index: {}]   ;;  %s2172_s2 = inlined_call_operand.vmem [shape: f32[512,64], index: 2, kind: output, shape index: {0}]   ;;  %s2173_s3 = inlined_call_operand.vmem [shape: f32[1,64], index: 3, kind: output, shape index: {1}]   ;;  %s2174_s4 = inlined_call_operand.vmem [shape: f32[1,64], index: 4, kind: output, shape index: {2}]  }
   0x1   :  { %969 = vmatprep.subr.bf16.mxu0 %v1050_v0  ;;  %v142_v1 = vld [vmem:[%s2170_s1] sm:$0xff]  ;;  %v143_v2 = vld [vmem:[%s2170_s1 + $0x8] sm:$0xff]  ;;  %v144_v3 = vld [vmem:[%s2170_s1 + $0x10] sm:$0xff]  ;;  %1017 = vmatprep.subr.bf16.mxu1 %v1050_v0 }
   0x2   :  { %v970_v4 = vpack.c.bf16 %v143_v2, %v142_v1  ;;  %v145_v5 = vld [vmem:[%s2170_s1 + $0x18] sm:$0xff]  ;;  %v146_v7 = vld [vmem:[%s2170_s1 + $0x20] sm:$0xff]  ;;  %v147_v8 = vld [vmem:[%s2170_s1 + $0x28] sm:$0xff] }
   0x3   :  { %v973_v6 = vpack.c.bf16 %v145_v5, %v144_v3  ;;  %v976_v9 = vpack.c.bf16 %v147_v8, %v146_v7  ;;  %v148_v10 = vld [vmem:[%s2170_s1 + $0x30] sm:$0xff]  ;;  %v149_v11 = vld [vmem:[%s2170_s1 + $0x38] sm:$0xff]  ;;  %v15_v12 = vld [vmem:[%s2171_s0 + $0x8] sm:$0xff] }
   0x4   :  { %971 = vmatpush1.bf16.msra.mxu0 %v970_v4  ;;  %1033 = vmatpush1.bf16.msra.mxu1 %v970_v4  ;;  %v979_v13 = vpack.c.bf16 %v149_v11, %v148_v10  ;;  %v150_v14 = vld [vmem:[%s2170_s1 + $0x40] sm:$0xff]  ;;  %v151_v15 = vld [vmem:[%s2170_s1 + $0x48] sm:$0xff]  ;;  %v152_v17 = vld [vmem:[%s2170_s1 + $0x50] sm:$0xff] }
   0x5   :  { %972 = vmatprep.subr.bf16.mxu0 %v1050_v0  ;;  %1018 = vmatprep.subr.bf16.mxu1 %v1050_v0  ;;  %v982_v16 = vpack.c.bf16 %v151_v15, %v150_v14  ;;  %v153_v18 = vld [vmem:[%s2170_s1 + $0x58] sm:$0xff]  ;;  %v154_v20 = vld [vmem:[%s2170_s1 + $0x60] sm:$0xff]  ;;  %v155_v21 = vld [vmem:[%s2170_s1 + $0x68] sm:$0xff] }
   0x6   :  { %238 = vmatprep.mubr.f32.mxu0 %v15_v12  ;;  %v985_v19 = vpack.c.bf16 %v153_v18, %v152_v17  ;;  %v79_v22 = vld [vmem:[%s2171_s0 + $0x208] sm:$0xff]  ;;  %v988_v23 = vpack.c.bf16 %v155_v21, %v154_v20  ;;  %v156_v24 = vld [vmem:[%s2170_s1 + $0x70] sm:$0xff]  ;;  %v157_v25 = vld [vmem:[%s2170_s1 + $0x78] sm:$0xff] }
   0x7   :  { %398 = vmatprep.mubr.f32.mxu1 %v79_v22  ;;  %v991_v26 = vpack.c.bf16 %v157_v25, %v156_v24  ;;  %v158_v27 = vld [vmem:[%s2170_s1 + $0x80] sm:$0xff]  ;;  %v159_v28 = vld [vmem:[%s2170_s1 + $0x88] sm:$0xff]  ;;  %v160_v30 = vld [vmem:[%s2170_s1 + $0x90] sm:$0xff] }
   0x8   :  { %974 = vmatpush1.bf16.msra.mxu0 %v973_v6  ;;  %1034 = vmatpush1.bf16.msra.mxu1 %v973_v6  ;;  %v994_v29 = vpack.c.bf16 %v159_v28, %v158_v27  ;;  %v161_v31 = vld [vmem:[%s2170_s1 + $0x98] sm:$0xff]  ;;  %v162_v33 = vld [vmem:[%s2170_s1 + $0xa0] sm:$0xff]  ;;  %v163_v34 = vld [vmem:[%s2170_s1 + $0xa8] sm:$0xff] }
   0x9   :  { %975 = vmatprep.subr.bf16.mxu0 %v1050_v0  ;;  %1019 = vmatprep.subr.bf16.mxu1 %v1050_v0  ;;  %v997_v32 = vpack.c.bf16 %v161_v31, %v160_v30  ;;  %v1000_v35 = vpack.c.bf16 %v163_v34, %v162_v33  ;;  %v164_v36 = vld [vmem:[%s2170_s1 + $0xb0] sm:$0xff]  ;;  %v165_v37 = vld [vmem:[%s2170_s1 + $0xb8] sm:$0xff]  ;;  %v166_v39 = vld [vmem:[%s2170_s1 + $0xc0] sm:$0xff] }
   0xa   :  { %v1003_v38 = vpack.c.bf16 %v165_v37, %v164_v36  ;;  %v167_v40 = vld [vmem:[%s2170_s1 + $0xc8] sm:$0xff]  ;;  %v168_v42 = vld [vmem:[%s2170_s1 + $0xd0] sm:$0xff]  ;;  %v169_v43 = vld [vmem:[%s2170_s1 + $0xd8] sm:$0xff] }
   0xb   :  { %v1006_v41 = vpack.c.bf16 %v167_v40, %v166_v39  ;;  %v1009_v44 = vpack.c.bf16 %v169_v43, %v168_v42  ;;  %v170_v45 = vld [vmem:[%s2170_s1 + $0xe0] sm:$0xff]  ;;  %v171_v46 = vld [vmem:[%s2170_s1 + $0xe8] sm:$0xff]  ;;  %v172_v48 = vld [vmem:[%s2170_s1 + $0xf0] sm:$0xff] }
   0xc   :  { %977 = vmatpush1.bf16.msra.mxu0 %v976_v9  ;;  %1035 = vmatpush1.bf16.msra.mxu1 %v976_v9  ;;  %v1012_v47 = vpack.c.bf16 %v171_v46, %v170_v45  ;;  %v173_v49 = vld [vmem:[%s2170_s1 + $0xf8] sm:$0xff]  ;;  %v14_v51 = vld [vmem:[%s2171_s0] sm:$0xff]  ;;  %v16_v55 = vld [vmem:[%s2171_s0 + $0x10] sm:$0xff] }
   0xd   :  { %978 = vmatprep.subr.bf16.mxu0 %v1050_v0  ;;  %1020 = vmatprep.subr.bf16.mxu1 %v1050_v0  ;;  %v1015_v50 = vpack.c.bf16 %v173_v49, %v172_v48  ;;  %v17_v52 = vld [vmem:[%s2171_s0 + $0x18] sm:$0xff]  ;;  %v78_v53 = vld [vmem:[%s2171_s0 + $0x200] sm:$0xff]  ;;  %v19_v56 = vld [vmem:[%s2171_s0 + $0x28] sm:$0xff] }
   0xe   :  { %v81_v54 = vld [vmem:[%s2171_s0 + $0x218] sm:$0xff]  ;;  %v80_v57 = vld [vmem:[%s2171_s0 + $0x210] sm:$0xff]  ;;  %v83_v58 = vld [vmem:[%s2171_s0 + $0x228] sm:$0xff] }
   0xf   :  { %v18_v59 = vld [vmem:[%s2171_s0 + $0x20] sm:$0xff]  ;;  %v21_v60 = vld [vmem:[%s2171_s0 + $0x38] sm:$0xff]  ;;  %v20_v63 = vld [vmem:[%s2171_s0 + $0x30] sm:$0xff] }
  0x10   :  { %980 = vmatpush1.bf16.msra.mxu0 %v979_v13  ;;  %1036 = vmatpush1.bf16.msra.mxu1 %v979_v13  ;;  %v82_v61 = vld [vmem:[%s2171_s0 + $0x220] sm:$0xff]  ;;  %v85_v62 = vld [vmem:[%s2171_s0 + $0x238] sm:$0xff]  ;;  %v84_v1 = vld [vmem:[%s2171_s0 + $0x230] sm:$0xff] }
  0x11   :  { %981 = vmatprep.subr.bf16.mxu0 %v1050_v0  ;;  %1021 = vmatprep.subr.bf16.mxu1 %v1050_v0  ;;  %v87_v2 = vld [vmem:[%s2171_s0 + $0x248] sm:$0xff]  ;;  %v22_v3 = vld [vmem:[%s2171_s0 + $0x40] sm:$0xff]  ;;  %v25_v4 = vld [vmem:[%s2171_s0 + $0x58] sm:$0xff] }
  0x12   :  { %v86_v5 = vld [vmem:[%s2171_s0 + $0x240] sm:$0xff]  ;;  %v89_v6 = vld [vmem:[%s2171_s0 + $0x258] sm:$0xff]  ;;  %v24_v7 = vld [vmem:[%s2171_s0 + $0x50] sm:$0xff] }
  0x13   :  { %v27_v8 = vld [vmem:[%s2171_s0 + $0x68] sm:$0xff]  ;;  %v88_v9 = vld [vmem:[%s2171_s0 + $0x250] sm:$0xff]  ;;  %v26_v11 = vld [vmem:[%s2171_s0 + $0x60] sm:$0xff] }
  0x14   :  { %983 = vmatpush1.bf16.msra.mxu0 %v982_v16  ;;  %1037 = vmatpush1.bf16.msra.mxu1 %v982_v16  ;;  %v91_v10 = vld [vmem:[%s2171_s0 + $0x268] sm:$0xff]  ;;  %v29_v12 = vld [vmem:[%s2171_s0 + $0x78] sm:$0xff]  ;;  %v90_v13 = vld [vmem:[%s2171_s0 + $0x260] sm:$0xff] }
  0x15   :  { %984 = vmatprep.subr.bf16.mxu0 %v1050_v0  ;;  %1022 = vmatprep.subr.bf16.mxu1 %v1050_v0  ;;  %v93_v14 = vld [vmem:[%s2171_s0 + $0x278] sm:$0xff]  ;;  %v28_v15 = vld [vmem:[%s2171_s0 + $0x70] sm:$0xff]  ;;  %v31_v16 = vld [vmem:[%s2171_s0 + $0x88] sm:$0xff] }
  0x16   :  { %v92_v17 = vld [vmem:[%s2171_s0 + $0x270] sm:$0xff]  ;;  %v95_v18 = vld [vmem:[%s2171_s0 + $0x288] sm:$0xff]  ;;  %v33_v20 = vld [vmem:[%s2171_s0 + $0x98] sm:$0xff] }
  0x17   :  { %v94_v21 = vld [vmem:[%s2171_s0 + $0x280] sm:$0xff]  ;;  %v97_v22 = vld [vmem:[%s2171_s0 + $0x298] sm:$0xff]  ;;  %v35_v24 = vld [vmem:[%s2171_s0 + $0xa8] sm:$0xff] }
  0x18   :  { %986 = vmatpush1.bf16.msra.mxu0 %v985_v19  ;;  %1038 = vmatpush1.bf16.msra.mxu1 %v985_v19  ;;  %v30_v19 = vld [vmem:[%s2171_s0 + $0x80] sm:$0xff]  ;;  %v96_v25 = vld [vmem:[%s2171_s0 + $0x290] sm:$0xff]  ;;  %v37_v28 = vld [vmem:[%s2171_s0 + $0xb8] sm:$0xff] }
  0x19   :  { %987 = vmatprep.subr.bf16.mxu0 %v1050_v0  ;;  %1023 = vmatprep.subr.bf16.mxu1 %v1050_v0  ;;  %v34_v27 = vld [vmem:[%s2171_s0 + $0xa0] sm:$0xff]  ;;  %v101_v30 = vld [vmem:[%s2171_s0 + $0x2b8] sm:$0xff]  ;;  %v36_v31 = vld [vmem:[%s2171_s0 + $0xb0] sm:$0xff] }
  0x1a   :  { %v100_v33 = vld [vmem:[%s2171_s0 + $0x2b0] sm:$0xff]  ;;  %v103_v34 = vld [vmem:[%s2171_s0 + $0x2c8] sm:$0xff]  ;;  %v41_v36 = vld [vmem:[%s2171_s0 + $0xd8] sm:$0xff] }
  0x1b   :  { %v102_v37 = vld [vmem:[%s2171_s0 + $0x2c0] sm:$0xff]  ;;  %v40_v39 = vld [vmem:[%s2171_s0 + $0xd0] sm:$0xff]  ;;  %v43_v40 = vld [vmem:[%s2171_s0 + $0xe8] sm:$0xff] }
  0x1c   :  { %989 = vmatpush1.bf16.msra.mxu0 %v988_v23  ;;  %1039 = vmatpush1.bf16.msra.mxu1 %v988_v23  ;;  %v32_v23 = vld [vmem:[%s2171_s0 + $0x90] sm:$0xff]  ;;  %v107_v42 = vld [vmem:[%s2171_s0 + $0x2e8] sm:$0xff]  ;;  %v42_v43 = vld [vmem:[%s2171_s0 + $0xe0] sm:$0xff] }
  0x1d   :  { %990 = vmatprep.subr.bf16.mxu0 %v1050_v0  ;;  %1024 = vmatprep.subr.bf16.mxu1 %v1050_v0  ;;  %v106_v45 = vld [vmem:[%s2171_s0 + $0x2e0] sm:$0xff]  ;;  %v109_v46 = vld [vmem:[%s2171_s0 + $0x2f8] sm:$0xff]  ;;  %v47_v48 = vld [vmem:[%s2171_s0 + $0x108] sm:$0xff] }
  0x1e   :  { %v108_v49 = vld [vmem:[%s2171_s0 + $0x2f0] sm:$0xff] }
  0x20   :  { %992 = vmatpush1.bf16.msra.mxu0 %v991_v26  ;;  %1040 = vmatpush1.bf16.msra.mxu1 %v991_v26  ;;  %v99_v26 = vld [vmem:[%s2171_s0 + $0x2a8] sm:$0xff] }
  0x21   :  { %993 = vmatprep.subr.bf16.mxu0 %v1050_v0  ;;  %1025 = vmatprep.subr.bf16.mxu1 %v1050_v0 }
  0x24   :  { %995 = vmatpush1.bf16.msra.mxu0 %v994_v29  ;;  %1041 = vmatpush1.bf16.msra.mxu1 %v994_v29  ;;  %v98_v29 = vld [vmem:[%s2171_s0 + $0x2a0] sm:$0xff] }
  0x25   :  { %996 = vmatprep.subr.bf16.mxu0 %v1050_v0  ;;  %1026 = vmatprep.subr.bf16.mxu1 %v1050_v0 }
  0x28   :  { %998 = vmatpush1.bf16.msra.mxu0 %v997_v32  ;;  %1042 = vmatpush1.bf16.msra.mxu1 %v997_v32  ;;  %v39_v32 = vld [vmem:[%s2171_s0 + $0xc8] sm:$0xff] }
  0x29   :  { %999 = vmatprep.subr.bf16.mxu0 %v1050_v0  ;;  %1027 = vmatprep.subr.bf16.mxu1 %v1050_v0 }
  0x2c   :  { %1001 = vmatpush1.bf16.msra.mxu0 %v1000_v35  ;;  %1043 = vmatpush1.bf16.msra.mxu1 %v1000_v35  ;;  %v38_v35 = vld [vmem:[%s2171_s0 + $0xc0] sm:$0xff] }
  0x2d   :  { %1002 = vmatprep.subr.bf16.mxu0 %v1050_v0  ;;  %1028 = vmatprep.subr.bf16.mxu1 %v1050_v0 }
  0x30   :  { %1004 = vmatpush1.bf16.msra.mxu0 %v1003_v38  ;;  %1044 = vmatpush1.bf16.msra.mxu1 %v1003_v38  ;;  %v105_v38 = vld [vmem:[%s2171_s0 + $0x2d8] sm:$0xff] }
  0x31   :  { %1005 = vmatprep.subr.bf16.mxu0 %v1050_v0  ;;  %1029 = vmatprep.subr.bf16.mxu1 %v1050_v0 }
  0x34   :  { %1007 = vmatpush1.bf16.msra.mxu0 %v1006_v41  ;;  %1045 = vmatpush1.bf16.msra.mxu1 %v1006_v41  ;;  %v104_v41 = vld [vmem:[%s2171_s0 + $0x2d0] sm:$0xff] }
  0x35   :  { %1008 = vmatprep.subr.bf16.mxu0 %v1050_v0  ;;  %1030 = vmatprep.subr.bf16.mxu1 %v1050_v0 }
  0x38   :  { %1010 = vmatpush1.bf16.msra.mxu0 %v1009_v44  ;;  %1046 = vmatpush1.bf16.msra.mxu1 %v1009_v44  ;;  %v45_v44 = vld [vmem:[%s2171_s0 + $0xf8] sm:$0xff] }
  0x39   :  { %1011 = vmatprep.subr.bf16.mxu0 %v1050_v0  ;;  %1031 = vmatprep.subr.bf16.mxu1 %v1050_v0 }
  0x3c   :  { %1013 = vmatpush1.bf16.msra.mxu0 %v1012_v47  ;;  %1047 = vmatpush1.bf16.msra.mxu1 %v1012_v47  ;;  %v44_v47 = vld [vmem:[%s2171_s0 + $0xf0] sm:$0xff] }
  0x3d   :  { %1014 = vmatprep.subr.bf16.mxu0 %v1050_v0  ;;  %1032 = vmatprep.subr.bf16.mxu1 %v1050_v0  ;;  %v23_v0 = vld [vmem:[%s2171_s0 + $0x48] sm:$0xff] }
  0x40   :  { %1016 = vmatpush1.bf16.msra.mxu0 %v1015_v50  ;;  %1048 = vmatpush1.bf16.msra.mxu1 %v1015_v50  ;;  %v111_v50 = vld [vmem:[%s2171_s0 + $0x308] sm:$0xff] }
  0x43   :  { %239 = vmatmul.mubr.f32.vlgmr.msra.gmra.mrb[0].mxu0 %v14_v51  ;;  %399 = vmatmul.mubr.f32.vlgmr.msra.gmra.mrb[0].mxu1 %v78_v53  ;;  %v46_v51 = vld [vmem:[%s2171_s0 + $0x100] sm:$0xff] }
  0x44   :  { %243 = vmatprep.mubr.f32.mxu0 %v17_v52  ;;  %403 = vmatprep.mubr.f32.mxu1 %v81_v54  ;;  %v49_v52 = vld [vmem:[%s2171_s0 + $0x118] sm:$0xff]  ;;  %v110_v53 = vld [vmem:[%s2171_s0 + $0x300] sm:$0xff] }
  0x45   :  { %v113_v54 = vld [vmem:[%s2171_s0 + $0x318] sm:$0xff] }
  0x47   :  { %244 = vmatmul.mubr.f32.gmra.mrb[2].mxu0 %v16_v55  ;;  %404 = vmatmul.mubr.f32.gmra.mrb[2].mxu1 %v80_v57  ;;  %v48_v55 = vld [vmem:[%s2171_s0 + $0x110] sm:$0xff] }
  0x48   :  { %248 = vmatprep.mubr.f32.mxu0 %v19_v56  ;;  %408 = vmatprep.mubr.f32.mxu1 %v83_v58  ;;  %v51_v56 = vld [vmem:[%s2171_s0 + $0x128] sm:$0xff]  ;;  %v112_v57 = vld [vmem:[%s2171_s0 + $0x310] sm:$0xff] }
  0x49   :  { %v115_v58 = vld [vmem:[%s2171_s0 + $0x328] sm:$0xff] }
  0x4b   :  { %249 = vmatmul.mubr.f32.gmra.mrb[4].mxu0 %v18_v59  ;;  %409 = vmatmul.mubr.f32.gmra.mrb[4].mxu1 %v82_v61  ;;  %v50_v59 = vld [vmem:[%s2171_s0 + $0x120] sm:$0xff] }
  0x4c   :  { %253 = vmatprep.mubr.f32.mxu0 %v21_v60  ;;  %413 = vmatprep.mubr.f32.mxu1 %v85_v62  ;;  %v53_v60 = vld [vmem:[%s2171_s0 + $0x138] sm:$0xff]  ;;  %v114_v61 = vld [vmem:[%s2171_s0 + $0x320] sm:$0xff] }
  0x4d   :  { %v117_v62 = vld [vmem:[%s2171_s0 + $0x338] sm:$0xff] }
  0x4f   :  { %254 = vmatmul.mubr.f32.gmra.mrb[6].mxu0 %v20_v63  ;;  %414 = vmatmul.mubr.f32.gmra.mrb[6].mxu1 %v84_v1  ;;  %v52_v63 = vld [vmem:[%s2171_s0 + $0x130] sm:$0xff] }
  0x50   :  { %258 = vmatprep.mubr.f32.mxu0 %v23_v0  ;;  %418 = vmatprep.mubr.f32.mxu1 %v87_v2  ;;  %v55_v0 = vld [vmem:[%s2171_s0 + $0x148] sm:$0xff]  ;;  %v116_v1 = vld [vmem:[%s2171_s0 + $0x330] sm:$0xff] }
  0x51   :  { %v119_v2 = vld [vmem:[%s2171_s0 + $0x348] sm:$0xff] }
  0x53   :  { %259 = vmatmul.mubr.f32.gmra.mrb[8].mxu0 %v22_v3  ;;  %419 = vmatmul.mubr.f32.gmra.mrb[8].mxu1 %v86_v5  ;;  %v54_v3 = vld [vmem:[%s2171_s0 + $0x140] sm:$0xff] }
  0x54   :  { %263 = vmatprep.mubr.f32.mxu0 %v25_v4  ;;  %423 = vmatprep.mubr.f32.mxu1 %v89_v6  ;;  %v57_v4 = vld [vmem:[%s2171_s0 + $0x158] sm:$0xff]  ;;  %v118_v5 = vld [vmem:[%s2171_s0 + $0x340] sm:$0xff] }
  0x55   :  { %v121_v6 = vld [vmem:[%s2171_s0 + $0x358] sm:$0xff] }
  0x57   :  { %264 = vmatmul.mubr.f32.gmra.mrb[10].mxu0 %v24_v7  ;;  %424 = vmatmul.mubr.f32.gmra.mrb[10].mxu1 %v88_v9  ;;  %v56_v7 = vld [vmem:[%s2171_s0 + $0x150] sm:$0xff] }
  0x58   :  { %268 = vmatprep.mubr.f32.mxu0 %v27_v8  ;;  %428 = vmatprep.mubr.f32.mxu1 %v91_v10  ;;  %v59_v8 = vld [vmem:[%s2171_s0 + $0x168] sm:$0xff]  ;;  %v120_v9 = vld [vmem:[%s2171_s0 + $0x350] sm:$0xff] }
  0x59   :  { %v123_v10 = vld [vmem:[%s2171_s0 + $0x368] sm:$0xff] }
  0x5b   :  { %269 = vmatmul.mubr.f32.gmra.mrb[12].mxu0 %v26_v11  ;;  %429 = vmatmul.mubr.f32.gmra.mrb[12].mxu1 %v90_v13  ;;  %v58_v11 = vld [vmem:[%s2171_s0 + $0x160] sm:$0xff] }
  0x5c   :  { %273 = vmatprep.mubr.f32.mxu0 %v29_v12  ;;  %433 = vmatprep.mubr.f32.mxu1 %v93_v14  ;;  %v61_v12 = vld [vmem:[%s2171_s0 + $0x178] sm:$0xff]  ;;  %v122_v13 = vld [vmem:[%s2171_s0 + $0x360] sm:$0xff] }
  0x5d   :  { %v125_v14 = vld [vmem:[%s2171_s0 + $0x378] sm:$0xff] }
  0x5f   :  { %274 = vmatmul.mubr.f32.gmra.mrb[14].mxu0 %v28_v15  ;;  %434 = vmatmul.mubr.f32.gmra.mrb[14].mxu1 %v92_v17  ;;  %v60_v15 = vld [vmem:[%s2171_s0 + $0x170] sm:$0xff] }
  0x60   :  { %278 = vmatprep.mubr.f32.mxu0 %v31_v16  ;;  %438 = vmatprep.mubr.f32.mxu1 %v95_v18  ;;  %v63_v16 = vld [vmem:[%s2171_s0 + $0x188] sm:$0xff]  ;;  %v124_v17 = vld [vmem:[%s2171_s0 + $0x370] sm:$0xff] }
  0x61   :  { %v127_v18 = vld [vmem:[%s2171_s0 + $0x388] sm:$0xff] }
  0x63   :  { %279 = vmatmul.mubr.f32.gmra.mrb[16].mxu0 %v30_v19  ;;  %439 = vmatmul.mubr.f32.gmra.mrb[16].mxu1 %v94_v21  ;;  %v62_v19 = vld [vmem:[%s2171_s0 + $0x180] sm:$0xff] }
  0x64   :  { %283 = vmatprep.mubr.f32.mxu0 %v33_v20  ;;  %443 = vmatprep.mubr.f32.mxu1 %v97_v22  ;;  %v65_v20 = vld [vmem:[%s2171_s0 + $0x198] sm:$0xff]  ;;  %v126_v21 = vld [vmem:[%s2171_s0 + $0x380] sm:$0xff] }
  0x65   :  { %v129_v22 = vld [vmem:[%s2171_s0 + $0x398] sm:$0xff] }
  0x67   :  { %284 = vmatmul.mubr.f32.gmra.mrb[18].mxu0 %v32_v23  ;;  %444 = vmatmul.mubr.f32.gmra.mrb[18].mxu1 %v96_v25  ;;  %v64_v23 = vld [vmem:[%s2171_s0 + $0x190] sm:$0xff] }
  0x68   :  { %288 = vmatprep.mubr.f32.mxu0 %v35_v24  ;;  %448 = vmatprep.mubr.f32.mxu1 %v99_v26  ;;  %v67_v24 = vld [vmem:[%s2171_s0 + $0x1a8] sm:$0xff]  ;;  %v128_v25 = vld [vmem:[%s2171_s0 + $0x390] sm:$0xff] }
  0x69   :  { %v131_v26 = vld [vmem:[%s2171_s0 + $0x3a8] sm:$0xff] }
  0x6b   :  { %289 = vmatmul.mubr.f32.gmra.mrb[20].mxu0 %v34_v27  ;;  %449 = vmatmul.mubr.f32.gmra.mrb[20].mxu1 %v98_v29  ;;  %v66_v27 = vld [vmem:[%s2171_s0 + $0x1a0] sm:$0xff] }
  0x6c   :  { %293 = vmatprep.mubr.f32.mxu0 %v37_v28  ;;  %453 = vmatprep.mubr.f32.mxu1 %v101_v30  ;;  %v69_v28 = vld [vmem:[%s2171_s0 + $0x1b8] sm:$0xff]  ;;  %v130_v29 = vld [vmem:[%s2171_s0 + $0x3a0] sm:$0xff] }
  0x6d   :  { %v133_v30 = vld [vmem:[%s2171_s0 + $0x3b8] sm:$0xff] }
  0x6f   :  { %294 = vmatmul.mubr.f32.gmra.mrb[22].mxu0 %v36_v31  ;;  %454 = vmatmul.mubr.f32.gmra.mrb[22].mxu1 %v100_v33  ;;  %v68_v31 = vld [vmem:[%s2171_s0 + $0x1b0] sm:$0xff] }
  0x70   :  { %298 = vmatprep.mubr.f32.mxu0 %v39_v32  ;;  %458 = vmatprep.mubr.f32.mxu1 %v103_v34  ;;  %v71_v32 = vld [vmem:[%s2171_s0 + $0x1c8] sm:$0xff]  ;;  %v132_v33 = vld [vmem:[%s2171_s0 + $0x3b0] sm:$0xff] }
  0x71   :  { %v135_v34 = vld [vmem:[%s2171_s0 + $0x3c8] sm:$0xff] }
  0x73   :  { %299 = vmatmul.mubr.f32.gmra.mrb[24].mxu0 %v38_v35  ;;  %459 = vmatmul.mubr.f32.gmra.mrb[24].mxu1 %v102_v37  ;;  %v70_v35 = vld [vmem:[%s2171_s0 + $0x1c0] sm:$0xff] }
  0x74   :  { %303 = vmatprep.mubr.f32.mxu0 %v41_v36  ;;  %463 = vmatprep.mubr.f32.mxu1 %v105_v38  ;;  %v73_v36 = vld [vmem:[%s2171_s0 + $0x1d8] sm:$0xff]  ;;  %v134_v37 = vld [vmem:[%s2171_s0 + $0x3c0] sm:$0xff] }
  0x75   :  { %v137_v38 = vld [vmem:[%s2171_s0 + $0x3d8] sm:$0xff] }
  0x77   :  { %304 = vmatmul.mubr.f32.gmra.mrb[26].mxu0 %v40_v39  ;;  %464 = vmatmul.mubr.f32.gmra.mrb[26].mxu1 %v104_v41  ;;  %v72_v39 = vld [vmem:[%s2171_s0 + $0x1d0] sm:$0xff] }
  0x78   :  { %308 = vmatprep.mubr.f32.mxu0 %v43_v40  ;;  %468 = vmatprep.mubr.f32.mxu1 %v107_v42  ;;  %v75_v40 = vld [vmem:[%s2171_s0 + $0x1e8] sm:$0xff]  ;;  %v136_v41 = vld [vmem:[%s2171_s0 + $0x3d0] sm:$0xff] }
  0x79   :  { %v139_v42 = vld [vmem:[%s2171_s0 + $0x3e8] sm:$0xff] }
  0x7b   :  { %309 = vmatmul.mubr.f32.gmra.mrb[28].mxu0 %v42_v43  ;;  %469 = vmatmul.mubr.f32.gmra.mrb[28].mxu1 %v106_v45  ;;  %v74_v43 = vld [vmem:[%s2171_s0 + $0x1e0] sm:$0xff] }
  0x7c   :  { %313 = vmatprep.mubr.f32.mxu0 %v45_v44  ;;  %473 = vmatprep.mubr.f32.mxu1 %v109_v46  ;;  %v77_v44 = vld [vmem:[%s2171_s0 + $0x1f8] sm:$0xff]  ;;  %v138_v45 = vld [vmem:[%s2171_s0 + $0x3e0] sm:$0xff] }
  0x7d   :  { %v141_v46 = vld [vmem:[%s2171_s0 + $0x3f8] sm:$0xff] }
  0x7f   :  { %314 = vmatmul.mubr.f32.gmra.mrb[30].mxu0 %v44_v47  ;;  %474 = vmatmul.mubr.f32.gmra.mrb[30].mxu1 %v108_v49  ;;  %v76_v47 = vld [vmem:[%s2171_s0 + $0x1f0] sm:$0xff] }
  0x80   :  { %318 = vmatprep.mubr.f32.mxu0 %v47_v48  ;;  %478 = vmatprep.mubr.f32.mxu1 %v111_v50  ;;  %v140_v48 = vld [vmem:[%s2171_s0 + $0x3f0] sm:$0xff] }
  0x83   :  { %319 = vmatmul.mubr.f32.gmra.mrb[32].mxu0 %v46_v51  ;;  %479 = vmatmul.mubr.f32.gmra.mrb[32].mxu1 %v110_v53 }
  0x84   :  { %323 = vmatprep.mubr.f32.mxu0 %v49_v52  ;;  %483 = vmatprep.mubr.f32.mxu1 %v113_v54 }
  0x87   :  { %324 = vmatmul.mubr.f32.gmra.mrb[34].mxu0 %v48_v55  ;;  %484 = vmatmul.mubr.f32.gmra.mrb[34].mxu1 %v112_v57 }
  0x88   :  { %328 = vmatprep.mubr.f32.mxu0 %v51_v56  ;;  %488 = vmatprep.mubr.f32.mxu1 %v115_v58 }
  0x8b   :  { %329 = vmatmul.mubr.f32.gmra.mrb[36].mxu0 %v50_v59  ;;  %489 = vmatmul.mubr.f32.gmra.mrb[36].mxu1 %v114_v61 }
  0x8c   :  { %333 = vmatprep.mubr.f32.mxu0 %v53_v60  ;;  %493 = vmatprep.mubr.f32.mxu1 %v117_v62 }
  0x8f   :  { %334 = vmatmul.mubr.f32.gmra.mrb[38].mxu0 %v52_v63  ;;  %494 = vmatmul.mubr.f32.gmra.mrb[38].mxu1 %v116_v1 }
  0x90   :  { %338 = vmatprep.mubr.f32.mxu0 %v55_v0  ;;  %498 = vmatprep.mubr.f32.mxu1 %v119_v2 }
  0x93   :  { %339 = vmatmul.mubr.f32.gmra.mrb[40].mxu0 %v54_v3  ;;  %499 = vmatmul.mubr.f32.gmra.mrb[40].mxu1 %v118_v5 }
  0x94   :  { %343 = vmatprep.mubr.f32.mxu0 %v57_v4  ;;  %503 = vmatprep.mubr.f32.mxu1 %v121_v6 }
  0x97   :  { %344 = vmatmul.mubr.f32.gmra.mrb[42].mxu0 %v56_v7  ;;  %504 = vmatmul.mubr.f32.gmra.mrb[42].mxu1 %v120_v9 }
  0x98   :  { %348 = vmatprep.mubr.f32.mxu0 %v59_v8  ;;  %508 = vmatprep.mubr.f32.mxu1 %v123_v10 }
  0x9b   :  { %349 = vmatmul.mubr.f32.gmra.mrb[44].mxu0 %v58_v11  ;;  %509 = vmatmul.mubr.f32.gmra.mrb[44].mxu1 %v122_v13 }
  0x9c   :  { %353 = vmatprep.mubr.f32.mxu0 %v61_v12  ;;  %513 = vmatprep.mubr.f32.mxu1 %v125_v14 }
  0x9f   :  { %354 = vmatmul.mubr.f32.gmra.mrb[46].mxu0 %v60_v15  ;;  %514 = vmatmul.mubr.f32.gmra.mrb[46].mxu1 %v124_v17 }
  0xa0   :  { %358 = vmatprep.mubr.f32.mxu0 %v63_v16  ;;  %518 = vmatprep.mubr.f32.mxu1 %v127_v18 }
  0xa3   :  { %359 = vmatmul.mubr.f32.gmra.mrb[48].mxu0 %v62_v19  ;;  %519 = vmatmul.mubr.f32.gmra.mrb[48].mxu1 %v126_v21 }
  0xa4   :  { %363 = vmatprep.mubr.f32.mxu0 %v65_v20  ;;  %523 = vmatprep.mubr.f32.mxu1 %v129_v22 }
  0xa7   :  { %364 = vmatmul.mubr.f32.gmra.mrb[50].mxu0 %v64_v23  ;;  %524 = vmatmul.mubr.f32.gmra.mrb[50].mxu1 %v128_v25 }
  0xa8   :  { %368 = vmatprep.mubr.f32.mxu0 %v67_v24  ;;  %528 = vmatprep.mubr.f32.mxu1 %v131_v26 }
  0xab   :  { %369 = vmatmul.mubr.f32.gmra.mrb[52].mxu0 %v66_v27  ;;  %529 = vmatmul.mubr.f32.gmra.mrb[52].mxu1 %v130_v29 }
  0xac   :  { %373 = vmatprep.mubr.f32.mxu0 %v69_v28  ;;  %533 = vmatprep.mubr.f32.mxu1 %v133_v30 }
  0xaf   :  { %374 = vmatmul.mubr.f32.gmra.mrb[54].mxu0 %v68_v31  ;;  %534 = vmatmul.mubr.f32.gmra.mrb[54].mxu1 %v132_v33 }
  0xb0   :  { %378 = vmatprep.mubr.f32.mxu0 %v71_v32  ;;  %538 = vmatprep.mubr.f32.mxu1 %v135_v34 }
  0xb3   :  { %379 = vmatmul.mubr.f32.gmra.mrb[56].mxu0 %v70_v35  ;;  %539 = vmatmul.mubr.f32.gmra.mrb[56].mxu1 %v134_v37 }
  0xb4   :  { %383 = vmatprep.mubr.f32.mxu0 %v73_v36  ;;  %543 = vmatprep.mubr.f32.mxu1 %v137_v38 }
  0xb7   :  { %384 = vmatmul.mubr.f32.gmra.mrb[58].mxu0 %v72_v39  ;;  %544 = vmatmul.mubr.f32.gmra.mrb[58].mxu1 %v136_v41 }
  0xb8   :  { %388 = vmatprep.mubr.f32.mxu0 %v75_v40  ;;  %548 = vmatprep.mubr.f32.mxu1 %v139_v42 }
  0xbb   :  { %389 = vmatmul.mubr.f32.gmra.mrb[60].mxu0 %v74_v43  ;;  %549 = vmatmul.mubr.f32.gmra.mrb[60].mxu1 %v138_v45 }
  0xbc   :  { %393 = vmatprep.mubr.f32.mxu0 %v77_v44  ;;  %553 = vmatprep.mubr.f32.mxu1 %v141_v46 }
  0xbf   :  { %394 = vmatmul.mubr.f32.gmra.mrb[62].mxu0 %v76_v47  ;;  %554 = vmatmul.mubr.f32.gmra.mrb[62].mxu1 %v140_v48 }
 0x116   :  { %v240_v49 = vpop.f32.mrb[0].mxu0  ;;  %v1592_v51 = vpop.f32.mrb[0].mxu1 }
 0x117   :  { %560 = vst.msk [vmem:[%s2172_s2] sm:$0xff] %vm559_vm0, %v240_v49  ;;  %v242_v50 = vpop.f32.mrb[1].mxu0  ;;  %592 = vst.msk [vmem:[%s2172_s2 + $0x100] sm:$0xff] %vm559_vm0, %v1592_v51  ;;  %v402_v52 = vpop.f32.mrb[1].mxu1  ;;  %v759_v53 = vmul.f32 %v240_v49, %v240_v49  ;;  %v624_v55 = vsel %vm559_vm0, %v240_v49, 0.0 }
 0x119   :  { %v823_v62 = vsel %vm559_vm0, %v759_v53, 0.0 }
 0x11a   :  { %v245_v54 = vpop.f32.mrb[2].mxu0  ;;  %v1605_v59 = vpop.f32.mrb[2].mxu1 }
 0x11b   :  { %561 = vst.msk [vmem:[%s2172_s2 + $0x8] sm:$0xff] %vm559_vm0, %v245_v54  ;;  %v625_v56 = vsel %vm559_vm0, %v245_v54, 0.0  ;;  %v760_v57 = vmul.f32 %v245_v54, %v245_v54  ;;  %v247_v58 = vpop.f32.mrb[3].mxu0  ;;  %593 = vst.msk [vmem:[%s2172_s2 + $0x108] sm:$0xff] %vm559_vm0, %v1605_v59  ;;  %v407_v61 = vpop.f32.mrb[3].mxu1 }
 0x11c   :  { %v626_v60 = vadd.f32 %v625_v56, %v624_v55 }
 0x11d   :  { %v824_v63 = vsel %vm559_vm0, %v760_v57, 0.0 }
 0x11e   :  { %v825_v0 = vadd.f32 %v824_v63, %v823_v62  ;;  %v250_v1 = vpop.f32.mrb[4].mxu0  ;;  %v1619_v5 = vpop.f32.mrb[4].mxu1 }
 0x11f   :  { %562 = vst.msk [vmem:[%s2172_s2 + $0x10] sm:$0xff] %vm559_vm0, %v250_v1  ;;  %v627_v2 = vsel %vm559_vm0, %v250_v1, 0.0  ;;  %v761_v3 = vmul.f32 %v250_v1, %v250_v1  ;;  %v252_v4 = vpop.f32.mrb[5].mxu0  ;;  %594 = vst.msk [vmem:[%s2172_s2 + $0x110] sm:$0xff] %vm559_vm0, %v1619_v5  ;;  %v412_v7 = vpop.f32.mrb[5].mxu1 }
 0x120   :  { %v628_v6 = vadd.f32 %v627_v2, %v626_v60 }
 0x121   :  { %v826_v8 = vsel %vm559_vm0, %v761_v3, 0.0 }
 0x122   :  { %v827_v9 = vadd.f32 %v826_v8, %v825_v0  ;;  %v255_v10 = vpop.f32.mrb[6].mxu0  ;;  %v1632_v14 = vpop.f32.mrb[6].mxu1 }
 0x123   :  { %563 = vst.msk [vmem:[%s2172_s2 + $0x18] sm:$0xff] %vm559_vm0, %v255_v10  ;;  %v629_v11 = vsel %vm559_vm0, %v255_v10, 0.0  ;;  %v762_v12 = vmul.f32 %v255_v10, %v255_v10  ;;  %v257_v13 = vpop.f32.mrb[7].mxu0  ;;  %595 = vst.msk [vmem:[%s2172_s2 + $0x118] sm:$0xff] %vm559_vm0, %v1632_v14  ;;  %v417_v16 = vpop.f32.mrb[7].mxu1 }
 0x124   :  { %v630_v15 = vadd.f32 %v629_v11, %v628_v6 }
 0x125   :  { %v828_v17 = vsel %vm559_vm0, %v762_v12, 0.0 }
 0x126   :  { %v829_v18 = vadd.f32 %v828_v17, %v827_v9  ;;  %v260_v19 = vpop.f32.mrb[8].mxu0  ;;  %v1645_v23 = vpop.f32.mrb[8].mxu1 }
 0x127   :  { %564 = vst.msk [vmem:[%s2172_s2 + $0x20] sm:$0xff] %vm559_vm0, %v260_v19  ;;  %v631_v20 = vsel %vm559_vm0, %v260_v19, 0.0  ;;  %v763_v21 = vmul.f32 %v260_v19, %v260_v19  ;;  %v262_v22 = vpop.f32.mrb[9].mxu0  ;;  %596 = vst.msk [vmem:[%s2172_s2 + $0x120] sm:$0xff] %vm559_vm0, %v1645_v23  ;;  %v422_v25 = vpop.f32.mrb[9].mxu1 }
 0x128   :  { %v632_v24 = vadd.f32 %v631_v20, %v630_v15 }
 0x129   :  { %v830_v26 = vsel %vm559_vm0, %v763_v21, 0.0 }
 0x12a   :  { %v831_v27 = vadd.f32 %v830_v26, %v829_v18  ;;  %v265_v28 = vpop.f32.mrb[10].mxu0  ;;  %v1658_v32 = vpop.f32.mrb[10].mxu1 }
 0x12b   :  { %565 = vst.msk [vmem:[%s2172_s2 + $0x28] sm:$0xff] %vm559_vm0, %v265_v28  ;;  %v633_v29 = vsel %vm559_vm0, %v265_v28, 0.0  ;;  %v764_v30 = vmul.f32 %v265_v28, %v265_v28  ;;  %v267_v31 = vpop.f32.mrb[11].mxu0  ;;  %597 = vst.msk [vmem:[%s2172_s2 + $0x128] sm:$0xff] %vm559_vm0, %v1658_v32  ;;  %v427_v34 = vpop.f32.mrb[11].mxu1 }
 0x12c   :  { %v634_v33 = vadd.f32 %v633_v29, %v632_v24 }
 0x12d   :  { %v832_v35 = vsel %vm559_vm0, %v764_v30, 0.0 }
 0x12e   :  { %v833_v36 = vadd.f32 %v832_v35, %v831_v27  ;;  %v270_v37 = vpop.f32.mrb[12].mxu0  ;;  %v1671_v41 = vpop.f32.mrb[12].mxu1 }
 0x12f   :  { %566 = vst.msk [vmem:[%s2172_s2 + $0x30] sm:$0xff] %vm559_vm0, %v270_v37  ;;  %v635_v38 = vsel %vm559_vm0, %v270_v37, 0.0  ;;  %v765_v39 = vmul.f32 %v270_v37, %v270_v37  ;;  %v272_v40 = vpop.f32.mrb[13].mxu0  ;;  %598 = vst.msk [vmem:[%s2172_s2 + $0x130] sm:$0xff] %vm559_vm0, %v1671_v41  ;;  %v432_v43 = vpop.f32.mrb[13].mxu1 }
 0x130   :  { %v636_v42 = vadd.f32 %v635_v38, %v634_v33 }
 0x131   :  { %v834_v44 = vsel %vm559_vm0, %v765_v39, 0.0 }
 0x132   :  { %v835_v45 = vadd.f32 %v834_v44, %v833_v36  ;;  %v275_v46 = vpop.f32.mrb[14].mxu0  ;;  %v1684_v50 = vpop.f32.mrb[14].mxu1 }
 0x133   :  { %567 = vst.msk [vmem:[%s2172_s2 + $0x38] sm:$0xff] %vm559_vm0, %v275_v46  ;;  %v637_v47 = vsel %vm559_vm0, %v275_v46, 0.0  ;;  %v766_v48 = vmul.f32 %v275_v46, %v275_v46  ;;  %v277_v49 = vpop.f32.mrb[15].mxu0  ;;  %599 = vst.msk [vmem:[%s2172_s2 + $0x138] sm:$0xff] %vm559_vm0, %v1684_v50  ;;  %v437_v53 = vpop.f32.mrb[15].mxu1 }
 0x134   :  { %v638_v52 = vadd.f32 %v637_v47, %v636_v42 }
 0x135   :  { %v836_v54 = vsel %vm559_vm0, %v766_v48, 0.0 }
 0x136   :  { %v837_v55 = vadd.f32 %v836_v54, %v835_v45  ;;  %v280_v56 = vpop.f32.mrb[16].mxu0  ;;  %v1697_v61 = vpop.f32.mrb[16].mxu1 }
 0x137   :  { %568 = vst.msk [vmem:[%s2172_s2 + $0x40] sm:$0xff] %vm559_vm0, %v280_v56  ;;  %v639_v57 = vsel %vm559_vm0, %v280_v56, 0.0  ;;  %v767_v58 = vmul.f32 %v280_v56, %v280_v56  ;;  %v282_v60 = vpop.f32.mrb[17].mxu0  ;;  %600 = vst.msk [vmem:[%s2172_s2 + $0x140] sm:$0xff] %vm559_vm0, %v1697_v61  ;;  %v442_v63 = vpop.f32.mrb[17].mxu1 }
 0x138   :  { %v640_v62 = vadd.f32 %v639_v57, %v638_v52 }
 0x139   :  { %v838_v0 = vsel %vm559_vm0, %v767_v58, 0.0 }
 0x13a   :  { %v839_v1 = vadd.f32 %v838_v0, %v837_v55  ;;  %v285_v2 = vpop.f32.mrb[18].mxu0  ;;  %v1710_v7 = vpop.f32.mrb[18].mxu1 }
 0x13b   :  { %569 = vst.msk [vmem:[%s2172_s2 + $0x48] sm:$0xff] %vm559_vm0, %v285_v2  ;;  %v641_v3 = vsel %vm559_vm0, %v285_v2, 0.0  ;;  %v768_v4 = vmul.f32 %v285_v2, %v285_v2  ;;  %v287_v6 = vpop.f32.mrb[19].mxu0  ;;  %601 = vst.msk [vmem:[%s2172_s2 + $0x148] sm:$0xff] %vm559_vm0, %v1710_v7  ;;  %v447_v9 = vpop.f32.mrb[19].mxu1 }
 0x13c   :  { %v642_v8 = vadd.f32 %v641_v3, %v640_v62 }
 0x13d   :  { %v840_v10 = vsel %vm559_vm0, %v768_v4, 0.0 }
 0x13e   :  { %v841_v11 = vadd.f32 %v840_v10, %v839_v1  ;;  %v290_v12 = vpop.f32.mrb[20].mxu0  ;;  %v1723_v17 = vpop.f32.mrb[20].mxu1 }
 0x13f   :  { %570 = vst.msk [vmem:[%s2172_s2 + $0x50] sm:$0xff] %vm559_vm0, %v290_v12  ;;  %v643_v13 = vsel %vm559_vm0, %v290_v12, 0.0  ;;  %v769_v15 = vmul.f32 %v290_v12, %v290_v12  ;;  %v292_v16 = vpop.f32.mrb[21].mxu0  ;;  %602 = vst.msk [vmem:[%s2172_s2 + $0x150] sm:$0xff] %vm559_vm0, %v1723_v17  ;;  %v452_v19 = vpop.f32.mrb[21].mxu1 }
 0x140   :  { %v644_v18 = vadd.f32 %v643_v13, %v642_v8 }
 0x141   :  { %v842_v20 = vsel %vm559_vm0, %v769_v15, 0.0 }
 0x142   :  { %v843_v21 = vadd.f32 %v842_v20, %v841_v11  ;;  %v295_v22 = vpop.f32.mrb[22].mxu0  ;;  %v1736_v27 = vpop.f32.mrb[22].mxu1 }
 0x143   :  { %571 = vst.msk [vmem:[%s2172_s2 + $0x58] sm:$0xff] %vm559_vm0, %v295_v22  ;;  %v645_v24 = vsel %vm559_vm0, %v295_v22, 0.0  ;;  %v770_v25 = vmul.f32 %v295_v22, %v295_v22  ;;  %v297_v26 = vpop.f32.mrb[23].mxu0  ;;  %603 = vst.msk [vmem:[%s2172_s2 + $0x158] sm:$0xff] %vm559_vm0, %v1736_v27  ;;  %v457_v29 = vpop.f32.mrb[23].mxu1 }
 0x144   :  { %v646_v28 = vadd.f32 %v645_v24, %v644_v18 }
 0x145   :  { %v844_v30 = vsel %vm559_vm0, %v770_v25, 0.0 }
 0x146   :  { %v845_v31 = vadd.f32 %v844_v30, %v843_v21  ;;  %v300_v33 = vpop.f32.mrb[24].mxu0  ;;  %v1749_v37 = vpop.f32.mrb[24].mxu1 }
 0x147   :  { %572 = vst.msk [vmem:[%s2172_s2 + $0x60] sm:$0xff] %vm559_vm0, %v300_v33  ;;  %v647_v34 = vsel %vm559_vm0, %v300_v33, 0.0  ;;  %v771_v35 = vmul.f32 %v300_v33, %v300_v33  ;;  %v302_v36 = vpop.f32.mrb[25].mxu0  ;;  %604 = vst.msk [vmem:[%s2172_s2 + $0x160] sm:$0xff] %vm559_vm0, %v1749_v37  ;;  %v462_v39 = vpop.f32.mrb[25].mxu1 }
 0x148   :  { %v648_v38 = vadd.f32 %v647_v34, %v646_v28 }
 0x149   :  { %v846_v40 = vsel %vm559_vm0, %v771_v35, 0.0 }
 0x14a   :  { %v847_v42 = vadd.f32 %v846_v40, %v845_v31  ;;  %v305_v43 = vpop.f32.mrb[26].mxu0  ;;  %v1762_v47 = vpop.f32.mrb[26].mxu1 }
 0x14b   :  { %573 = vst.msk [vmem:[%s2172_s2 + $0x68] sm:$0xff] %vm559_vm0, %v305_v43  ;;  %v649_v44 = vsel %vm559_vm0, %v305_v43, 0.0  ;;  %v772_v45 = vmul.f32 %v305_v43, %v305_v43  ;;  %v307_v46 = vpop.f32.mrb[27].mxu0  ;;  %605 = vst.msk [vmem:[%s2172_s2 + $0x168] sm:$0xff] %vm559_vm0, %v1762_v47  ;;  %v467_v49 = vpop.f32.mrb[27].mxu1 }
 0x14c   :  { %v650_v48 = vadd.f32 %v649_v44, %v648_v38 }
 0x14d   :  { %v848_v52 = vsel %vm559_vm0, %v772_v45, 0.0 }
 0x14e   :  { %v849_v53 = vadd.f32 %v848_v52, %v847_v42  ;;  %v310_v54 = vpop.f32.mrb[28].mxu0  ;;  %v1775_v58 = vpop.f32.mrb[28].mxu1 }
 0x14f   :  { %574 = vst.msk [vmem:[%s2172_s2 + $0x70] sm:$0xff] %vm559_vm0, %v310_v54  ;;  %v651_v55 = vsel %vm559_vm0, %v310_v54, 0.0  ;;  %v773_v56 = vmul.f32 %v310_v54, %v310_v54  ;;  %v312_v57 = vpop.f32.mrb[29].mxu0  ;;  %606 = vst.msk [vmem:[%s2172_s2 + $0x170] sm:$0xff] %vm559_vm0, %v1775_v58  ;;  %v472_v62 = vpop.f32.mrb[29].mxu1 }
 0x150   :  { %v652_v60 = vadd.f32 %v651_v55, %v650_v48 }
 0x151   :  { %v850_v63 = vsel %vm559_vm0, %v773_v56, 0.0 }
 0x152   :  { %v851_v0 = vadd.f32 %v850_v63, %v849_v53  ;;  %v315_v1 = vpop.f32.mrb[30].mxu0  ;;  %v1788_v6 = vpop.f32.mrb[30].mxu1 }
 0x153   :  { %575 = vst.msk [vmem:[%s2172_s2 + $0x78] sm:$0xff] %vm559_vm0, %v315_v1  ;;  %v653_v2 = vsel %vm559_vm0, %v315_v1, 0.0  ;;  %v774_v3 = vmul.f32 %v315_v1, %v315_v1  ;;  %v317_v4 = vpop.f32.mrb[31].mxu0  ;;  %607 = vst.msk [vmem:[%s2172_s2 + $0x178] sm:$0xff] %vm559_vm0, %v1788_v6  ;;  %v477_v9 = vpop.f32.mrb[31].mxu1 }
 0x154   :  { %v654_v8 = vadd.f32 %v653_v2, %v652_v60 }
 0x155   :  { %v852_v10 = vsel %vm559_vm0, %v774_v3, 0.0 }
 0x156   :  { %v853_v11 = vadd.f32 %v852_v10, %v851_v0  ;;  %v320_v12 = vpop.f32.mrb[32].mxu0  ;;  %v1801_v18 = vpop.f32.mrb[32].mxu1 }
 0x157   :  { %576 = vst.msk [vmem:[%s2172_s2 + $0x80] sm:$0xff] %vm559_vm0, %v320_v12  ;;  %v655_v13 = vsel %vm559_vm0, %v320_v12, 0.0  ;;  %v775_v15 = vmul.f32 %v320_v12, %v320_v12  ;;  %v322_v16 = vpop.f32.mrb[33].mxu0  ;;  %608 = vst.msk [vmem:[%s2172_s2 + $0x180] sm:$0xff] %vm559_vm0, %v1801_v18  ;;  %v482_v20 = vpop.f32.mrb[33].mxu1 }
 0x158   :  { %v656_v19 = vadd.f32 %v655_v13, %v654_v8 }
 0x159   :  { %v854_v21 = vsel %vm559_vm0, %v775_v15, 0.0 }
 0x15a   :  { %v855_v22 = vadd.f32 %v854_v21, %v853_v11  ;;  %v325_v24 = vpop.f32.mrb[34].mxu0  ;;  %v1814_v29 = vpop.f32.mrb[34].mxu1 }
 0x15b   :  { %577 = vst.msk [vmem:[%s2172_s2 + $0x88] sm:$0xff] %vm559_vm0, %v325_v24  ;;  %v657_v25 = vsel %vm559_vm0, %v325_v24, 0.0  ;;  %v776_v26 = vmul.f32 %v325_v24, %v325_v24  ;;  %v327_v28 = vpop.f32.mrb[35].mxu0  ;;  %609 = vst.msk [vmem:[%s2172_s2 + $0x188] sm:$0xff] %vm559_vm0, %v1814_v29  ;;  %v487_v31 = vpop.f32.mrb[35].mxu1 }
 0x15c   :  { %v658_v30 = vadd.f32 %v657_v25, %v656_v19 }
 0x15d   :  { %v856_v33 = vsel %vm559_vm0, %v776_v26, 0.0 }
 0x15e   :  { %v857_v34 = vadd.f32 %v856_v33, %v855_v22  ;;  %v330_v35 = vpop.f32.mrb[36].mxu0  ;;  %v1827_v40 = vpop.f32.mrb[36].mxu1 }
 0x15f   :  { %578 = vst.msk [vmem:[%s2172_s2 + $0x90] sm:$0xff] %vm559_vm0, %v330_v35  ;;  %v659_v36 = vsel %vm559_vm0, %v330_v35, 0.0  ;;  %v777_v38 = vmul.f32 %v330_v35, %v330_v35  ;;  %v332_v39 = vpop.f32.mrb[37].mxu0  ;;  %610 = vst.msk [vmem:[%s2172_s2 + $0x190] sm:$0xff] %vm559_vm0, %v1827_v40  ;;  %v492_v43 = vpop.f32.mrb[37].mxu1 }
 0x160   :  { %v660_v42 = vadd.f32 %v659_v36, %v658_v30 }
 0x161   :  { %v858_v44 = vsel %vm559_vm0, %v777_v38, 0.0 }
 0x162   :  { %v859_v45 = vadd.f32 %v858_v44, %v857_v34  ;;  %v335_v46 = vpop.f32.mrb[38].mxu0  ;;  %v1840_v53 = vpop.f32.mrb[38].mxu1 }
 0x163   :  { %579 = vst.msk [vmem:[%s2172_s2 + $0x98] sm:$0xff] %vm559_vm0, %v335_v46  ;;  %v661_v48 = vsel %vm559_vm0, %v335_v46, 0.0  ;;  %v778_v49 = vmul.f32 %v335_v46, %v335_v46  ;;  %v337_v52 = vpop.f32.mrb[39].mxu0  ;;  %611 = vst.msk [vmem:[%s2172_s2 + $0x198] sm:$0xff] %vm559_vm0, %v1840_v53  ;;  %v497_v55 = vpop.f32.mrb[39].mxu1 }
 0x164   :  { %v662_v54 = vadd.f32 %v661_v48, %v660_v42 }
 0x165   :  { %v860_v56 = vsel %vm559_vm0, %v778_v49, 0.0 }
 0x166   :  { %v861_v57 = vadd.f32 %v860_v56, %v859_v45  ;;  %v340_v60 = vpop.f32.mrb[40].mxu0  ;;  %v1853_v1 = vpop.f32.mrb[40].mxu1 }
 0x167   :  { %580 = vst.msk [vmem:[%s2172_s2 + $0xa0] sm:$0xff] %vm559_vm0, %v340_v60  ;;  %v663_v62 = vsel %vm559_vm0, %v340_v60, 0.0  ;;  %v779_v63 = vmul.f32 %v340_v60, %v340_v60  ;;  %v342_v0 = vpop.f32.mrb[41].mxu0  ;;  %612 = vst.msk [vmem:[%s2172_s2 + $0x1a0] sm:$0xff] %vm559_vm0, %v1853_v1  ;;  %v502_v3 = vpop.f32.mrb[41].mxu1 }
 0x168   :  { %v664_v2 = vadd.f32 %v663_v62, %v662_v54 }
 0x169   :  { %v862_v4 = vsel %vm559_vm0, %v779_v63, 0.0 }
 0x16a   :  { %v863_v8 = vadd.f32 %v862_v4, %v861_v57  ;;  %v345_v9 = vpop.f32.mrb[42].mxu0  ;;  %v1866_v13 = vpop.f32.mrb[42].mxu1 }
 0x16b   :  { %581 = vst.msk [vmem:[%s2172_s2 + $0xa8] sm:$0xff] %vm559_vm0, %v345_v9  ;;  %v665_v10 = vsel %vm559_vm0, %v345_v9, 0.0  ;;  %v780_v11 = vmul.f32 %v345_v9, %v345_v9  ;;  %v347_v12 = vpop.f32.mrb[43].mxu0  ;;  %613 = vst.msk [vmem:[%s2172_s2 + $0x1a8] sm:$0xff] %vm559_vm0, %v1866_v13  ;;  %v507_v16 = vpop.f32.mrb[43].mxu1 }
 0x16c   :  { %v666_v15 = vadd.f32 %v665_v10, %v664_v2 }
 0x16d   :  { %v864_v19 = vsel %vm559_vm0, %v780_v11, 0.0 }
 0x16e   :  { %v865_v20 = vadd.f32 %v864_v19, %v863_v8  ;;  %v350_v21 = vpop.f32.mrb[44].mxu0  ;;  %v1879_v26 = vpop.f32.mrb[44].mxu1 }
 0x16f   :  { %582 = vst.msk [vmem:[%s2172_s2 + $0xb0] sm:$0xff] %vm559_vm0, %v350_v21  ;;  %v667_v22 = vsel %vm559_vm0, %v350_v21, 0.0  ;;  %v781_v24 = vmul.f32 %v350_v21, %v350_v21  ;;  %v352_v25 = vpop.f32.mrb[45].mxu0  ;;  %614 = vst.msk [vmem:[%s2172_s2 + $0x1b0] sm:$0xff] %vm559_vm0, %v1879_v26  ;;  %v512_v30 = vpop.f32.mrb[45].mxu1 }
 0x170   :  { %v668_v28 = vadd.f32 %v667_v22, %v666_v15 }
 0x171   :  { %v866_v31 = vsel %vm559_vm0, %v781_v24, 0.0 }
 0x172   :  { %v867_v33 = vadd.f32 %v866_v31, %v865_v20  ;;  %v355_v34 = vpop.f32.mrb[46].mxu0  ;;  %v1892_v39 = vpop.f32.mrb[46].mxu1 }
 0x173   :  { %583 = vst.msk [vmem:[%s2172_s2 + $0xb8] sm:$0xff] %vm559_vm0, %v355_v34  ;;  %v669_v35 = vsel %vm559_vm0, %v355_v34, 0.0  ;;  %v782_v36 = vmul.f32 %v355_v34, %v355_v34  ;;  %v357_v38 = vpop.f32.mrb[47].mxu0  ;;  %615 = vst.msk [vmem:[%s2172_s2 + $0x1b8] sm:$0xff] %vm559_vm0, %v1892_v39  ;;  %v517_v43 = vpop.f32.mrb[47].mxu1 }
 0x174   :  { %v670_v42 = vadd.f32 %v669_v35, %v668_v28 }
 0x175   :  { %v868_v44 = vsel %vm559_vm0, %v782_v36, 0.0 }
 0x176   :  { %v869_v45 = vadd.f32 %v868_v44, %v867_v33  ;;  %v360_v46 = vpop.f32.mrb[48].mxu0  ;;  %v1905_v54 = vpop.f32.mrb[48].mxu1 }
 0x177   :  { %584 = vst.msk [vmem:[%s2172_s2 + $0xc0] sm:$0xff] %vm559_vm0, %v360_v46  ;;  %v671_v48 = vsel %vm559_vm0, %v360_v46, 0.0  ;;  %v783_v49 = vmul.f32 %v360_v46, %v360_v46  ;;  %v362_v52 = vpop.f32.mrb[49].mxu0  ;;  %616 = vst.msk [vmem:[%s2172_s2 + $0x1c0] sm:$0xff] %vm559_vm0, %v1905_v54  ;;  %v522_v56 = vpop.f32.mrb[49].mxu1 }
 0x178   :  { %v672_v55 = vadd.f32 %v671_v48, %v670_v42 }
 0x179   :  { %v870_v57 = vsel %vm559_vm0, %v783_v49, 0.0 }
 0x17a   :  { %v871_v60 = vadd.f32 %v870_v57, %v869_v45  ;;  %v365_v62 = vpop.f32.mrb[50].mxu0  ;;  %v1918_v3 = vpop.f32.mrb[50].mxu1 }
 0x17b   :  { %585 = vst.msk [vmem:[%s2172_s2 + $0xc8] sm:$0xff] %vm559_vm0, %v365_v62  ;;  %v673_v63 = vsel %vm559_vm0, %v365_v62, 0.0  ;;  %v784_v0 = vmul.f32 %v365_v62, %v365_v62  ;;  %v367_v2 = vpop.f32.mrb[51].mxu0  ;;  %617 = vst.msk [vmem:[%s2172_s2 + $0x1c8] sm:$0xff] %vm559_vm0, %v1918_v3  ;;  %v527_v8 = vpop.f32.mrb[51].mxu1 }
 0x17c   :  { %v674_v4 = vadd.f32 %v673_v63, %v672_v55 }
 0x17d   :  { %v872_v9 = vsel %vm559_vm0, %v784_v0, 0.0 }
 0x17e   :  { %v873_v10 = vadd.f32 %v872_v9, %v871_v60  ;;  %v370_v11 = vpop.f32.mrb[52].mxu0  ;;  %v1931_v19 = vpop.f32.mrb[52].mxu1 }
 0x17f   :  { %586 = vst.msk [vmem:[%s2172_s2 + $0xd0] sm:$0xff] %vm559_vm0, %v370_v11  ;;  %v675_v12 = vsel %vm559_vm0, %v370_v11, 0.0  ;;  %v785_v15 = vmul.f32 %v370_v11, %v370_v11  ;;  %v372_v16 = vpop.f32.mrb[53].mxu0  ;;  %618 = vst.msk [vmem:[%s2172_s2 + $0x1d0] sm:$0xff] %vm559_vm0, %v1931_v19  ;;  %v532_v21 = vpop.f32.mrb[53].mxu1 }
 0x180   :  { %v676_v20 = vadd.f32 %v675_v12, %v674_v4 }
 0x181   :  { %v874_v22 = vsel %vm559_vm0, %v785_v15, 0.0 }
 0x182   :  { %v875_v24 = vadd.f32 %v874_v22, %v873_v10  ;;  %v375_v25 = vpop.f32.mrb[54].mxu0  ;;  %v1944_v33 = vpop.f32.mrb[54].mxu1 }
 0x183   :  { %587 = vst.msk [vmem:[%s2172_s2 + $0xd8] sm:$0xff] %vm559_vm0, %v375_v25  ;;  %v677_v28 = vsel %vm559_vm0, %v375_v25, 0.0  ;;  %v786_v30 = vmul.f32 %v375_v25, %v375_v25  ;;  %v377_v31 = vpop.f32.mrb[55].mxu0  ;;  %619 = vst.msk [vmem:[%s2172_s2 + $0x1d8] sm:$0xff] %vm559_vm0, %v1944_v33  ;;  %v537_v35 = vpop.f32.mrb[55].mxu1  ;;  %v791_v25 = vmul.f32 %v1592_v51, %v1592_v51 }
 0x184   :  { %v678_v34 = vadd.f32 %v677_v28, %v676_v20 }
 0x185   :  { %v876_v36 = vsel %vm559_vm0, %v786_v30, 0.0 }
 0x186   :  { %v877_v38 = vadd.f32 %v876_v36, %v875_v24  ;;  %v380_v42 = vpop.f32.mrb[56].mxu0  ;;  %v1957_v46 = vpop.f32.mrb[56].mxu1 }
 0x187   :  { %588 = vst.msk [vmem:[%s2172_s2 + $0xe0] sm:$0xff] %vm559_vm0, %v380_v42  ;;  %v679_v43 = vsel %vm559_vm0, %v380_v42, 0.0  ;;  %v787_v44 = vmul.f32 %v380_v42, %v380_v42  ;;  %v382_v45 = vpop.f32.mrb[57].mxu0  ;;  %620 = vst.msk [vmem:[%s2172_s2 + $0x1e0] sm:$0xff] %vm559_vm0, %v1957_v46  ;;  %v542_v49 = vpop.f32.mrb[57].mxu1  ;;  %v792_v42 = vmul.f32 %v1605_v59, %v1605_v59 }
 0x188   :  { %v680_v48 = vadd.f32 %v679_v43, %v678_v34  ;;  %v689_v49 = vsel %vm559_vm0, %v1605_v59, 0.0  ;;  %v693_v59 = vsel %vm559_vm0, %v1632_v14, 0.0 }
 0x189   :  { %v878_v52 = vsel %vm559_vm0, %v787_v44, 0.0 }
 0x18a   :  { %v879_v55 = vadd.f32 %v878_v52, %v877_v38  ;;  %v385_v56 = vpop.f32.mrb[58].mxu0  ;;  %v1970_v63 = vpop.f32.mrb[58].mxu1  ;;  %v687_v38 = vsel %vm559_vm0, %v1592_v51, 0.0  ;;  %v793_v52 = vmul.f32 %v1619_v5, %v1619_v5  ;;  %v691_v51 = vsel %vm559_vm0, %v1619_v5, 0.0 }
 0x18b   :  { %589 = vst.msk [vmem:[%s2172_s2 + $0xe8] sm:$0xff] %vm559_vm0, %v385_v56  ;;  %v681_v57 = vsel %vm559_vm0, %v385_v56, 0.0  ;;  %v788_v60 = vmul.f32 %v385_v56, %v385_v56  ;;  %v387_v62 = vpop.f32.mrb[59].mxu0  ;;  %621 = vst.msk [vmem:[%s2172_s2 + $0x1e8] sm:$0xff] %vm559_vm0, %v1970_v63  ;;  %v547_v2 = vpop.f32.mrb[59].mxu1  ;;  %v695_v5 = vsel %vm559_vm0, %v1645_v23, 0.0 }
 0x18c   :  { %v682_v0 = vadd.f32 %v681_v57, %v680_v48  ;;  %v886_v48 = vsel %vm559_vm0, %v791_v25, 0.0  ;;  %v888_v57 = vsel %vm559_vm0, %v792_v42, 0.0  ;;  %v890_v2 = vsel %vm559_vm0, %v793_v52, 0.0 }
 0x18d   :  { %v880_v4 = vsel %vm559_vm0, %v788_v60, 0.0  ;;  %v794_v60 = vmul.f32 %v1632_v14, %v1632_v14  ;;  %v697_v14 = vsel %vm559_vm0, %v1658_v32, 0.0  ;;  %v801_v52 = vmul.f32 %v1723_v17, %v1723_v17 }
 0x18e   :  { %v881_v8 = vadd.f32 %v880_v4, %v879_v55  ;;  %v390_v9 = vpop.f32.mrb[60].mxu0  ;;  %v1983_v15 = vpop.f32.mrb[60].mxu1  ;;  %v795_v4 = vmul.f32 %v1645_v23, %v1645_v23  ;;  %v699_v23 = vsel %vm559_vm0, %v1671_v41, 0.0 }
 0x18f   :  { %590 = vst.msk [vmem:[%s2172_s2 + $0xf0] sm:$0xff] %vm559_vm0, %v390_v9  ;;  %v683_v10 = vsel %vm559_vm0, %v390_v9, 0.0  ;;  %v789_v11 = vmul.f32 %v390_v9, %v390_v9  ;;  %v392_v12 = vpop.f32.mrb[61].mxu0  ;;  %622 = vst.msk [vmem:[%s2172_s2 + $0x1f0] sm:$0xff] %vm559_vm0, %v1983_v15  ;;  %v552_v20 = vpop.f32.mrb[61].mxu1 }
 0x190   :  { %v684_v16 = vadd.f32 %v683_v10, %v682_v0  ;;  %v892_v10 = vsel %vm559_vm0, %v794_v60, 0.0  ;;  %v894_v20 = vsel %vm559_vm0, %v795_v4, 0.0 }
 0x191   :  { %v882_v21 = vsel %vm559_vm0, %v789_v11, 0.0  ;;  %v796_v11 = vmul.f32 %v1658_v32, %v1658_v32  ;;  %v701_v32 = vsel %vm559_vm0, %v1684_v50, 0.0 }
 0x192   :  { %v883_v22 = vadd.f32 %v882_v21, %v881_v8  ;;  %v395_v24 = vpop.f32.mrb[62].mxu0  ;;  %v1998_v34 = vpop.f32.mrb[62].mxu1  ;;  %v797_v21 = vmul.f32 %v1671_v41, %v1671_v41  ;;  %v703_v41 = vsel %vm559_vm0, %v1697_v61, 0.0 }
 0x193   :  { %591 = vst.msk [vmem:[%s2172_s2 + $0xf8] sm:$0xff] %vm559_vm0, %v395_v24  ;;  %v685_v28 = vsel %vm559_vm0, %v395_v24, 0.0  ;;  %v790_v30 = vmul.f32 %v395_v24, %v395_v24  ;;  %v397_v31 = vpop.f32.mrb[63].mxu0  ;;  %623 = vst.msk [vmem:[%s2172_s2 + $0x1f8] sm:$0xff] %vm559_vm0, %v1998_v34  ;;  %v557_v36 = vpop.f32.mrb[63].mxu1  ;;  %v896_v25 = vsel %vm559_vm0, %v796_v11, 0.0 }
 0x194   :  { %v686_v35 = vadd.f32 %v685_v28, %v684_v16  ;;  %v798_v28 = vmul.f32 %v1684_v50, %v1684_v50  ;;  %v799_v36 = vmul.f32 %v1697_v61, %v1697_v61  ;;  %v705_v50 = vsel %vm559_vm0, %v1710_v7, 0.0 }
 0x195   :  { %v884_v43 = vsel %vm559_vm0, %v790_v30, 0.0  ;;  %v707_v61 = vsel %vm559_vm0, %v1723_v17, 0.0  ;;  %v711_v17 = vsel %vm559_vm0, %v1749_v37, 0.0 }
 0x196   :  { %v688_v44 = vadd.f32 %v687_v38, %v686_v35  ;;  %v885_v45 = vadd.f32 %v884_v43, %v883_v22  ;;  %v898_v35 = vsel %vm559_vm0, %v797_v21, 0.0  ;;  %v900_v43 = vsel %vm559_vm0, %v798_v28, 0.0 }
 0x197   :  { %v806_v21 = vmul.f32 %v1788_v6, %v1788_v6 }
 0x198   :  { %v690_v55 = vadd.f32 %v689_v49, %v688_v44  ;;  %v887_v56 = vadd.f32 %v886_v48, %v885_v45  ;;  %v800_v44 = vmul.f32 %v1710_v7, %v1710_v7  ;;  %v902_v49 = vsel %vm559_vm0, %v799_v36, 0.0 }
 0x199   :  { %v709_v7 = vsel %vm559_vm0, %v1736_v27, 0.0 }
 0x19a   :  { %v692_v62 = vadd.f32 %v691_v51, %v690_v55  ;;  %v889_v0 = vadd.f32 %v888_v57, %v887_v56  ;;  %v904_v57 = vsel %vm559_vm0, %v800_v44, 0.0  ;;  %v802_v51 = vmul.f32 %v1736_v27, %v1736_v27 }
 0x19b   :  { %v713_v27 = vsel %vm559_vm0, %v1762_v47, 0.0 }
 0x19c   :  { %v694_v8 = vadd.f32 %v693_v59, %v692_v62  ;;  %v891_v9 = vadd.f32 %v890_v2, %v889_v0  ;;  %v906_v0 = vsel %vm559_vm0, %v801_v52, 0.0  ;;  %v803_v2 = vmul.f32 %v1749_v37, %v1749_v37 }
 0x19d   :  { %v715_v37 = vsel %vm559_vm0, %v1775_v58, 0.0  ;;  %v811_v52 = vmul.f32 %v1853_v1, %v1853_v1 }
 0x19e   :  { %v696_v12 = vadd.f32 %v695_v5, %v694_v8  ;;  %v893_v16 = vadd.f32 %v892_v10, %v891_v9  ;;  %v908_v8 = vsel %vm559_vm0, %v802_v51, 0.0  ;;  %v804_v9 = vmul.f32 %v1762_v47, %v1762_v47 }
 0x19f   :  { %v910_v11 = vsel %vm559_vm0, %v803_v2, 0.0  ;;  %v717_v47 = vsel %vm559_vm0, %v1788_v6, 0.0  ;;  %v721_v6 = vsel %vm559_vm0, %v1814_v29, 0.0 }
 0x1a0   :  { %v698_v22 = vadd.f32 %v697_v14, %v696_v12  ;;  %v895_v24 = vadd.f32 %v894_v20, %v893_v16  ;;  %v805_v12 = vmul.f32 %v1775_v58, %v1775_v58  ;;  %v912_v14 = vsel %vm559_vm0, %v804_v9, 0.0 }
 0x1a1   :  { %v719_v58 = vsel %vm559_vm0, %v1801_v18, 0.0 }
 0x1a2   :  { %v700_v30 = vadd.f32 %v699_v23, %v698_v22  ;;  %v897_v31 = vadd.f32 %v896_v25, %v895_v24  ;;  %v914_v25 = vsel %vm559_vm0, %v805_v12, 0.0  ;;  %v807_v23 = vmul.f32 %v1801_v18, %v1801_v18 }
 0x1a3   :  { %v723_v18 = vsel %vm559_vm0, %v1827_v40, 0.0  ;;  %v816_v12 = vmul.f32 %v1918_v3, %v1918_v3 }
 0x1a4   :  { %v702_v38 = vadd.f32 %v701_v32, %v700_v30  ;;  %v899_v42 = vadd.f32 %v898_v35, %v897_v31  ;;  %v916_v31 = vsel %vm559_vm0, %v806_v21, 0.0  ;;  %v808_v35 = vmul.f32 %v1814_v29, %v1814_v29 }
 0x1a5   :  { %v725_v29 = vsel %vm559_vm0, %v1840_v53, 0.0 }
 0x1a6   :  { %v901_v45 = vadd.f32 %v900_v43, %v899_v42  ;;  %v704_v48 = vadd.f32 %v703_v41, %v702_v38  ;;  %v918_v38 = vsel %vm559_vm0, %v807_v23, 0.0  ;;  %v809_v42 = vmul.f32 %v1827_v40, %v1827_v40 }
 0x1a7   :  { %v920_v44 = vsel %vm559_vm0, %v808_v35, 0.0  ;;  %v727_v40 = vsel %vm559_vm0, %v1853_v1, 0.0  ;;  %v731_v1 = vsel %vm559_vm0, %v1879_v26, 0.0 }
 0x1a8   :  { %v706_v55 = vadd.f32 %v705_v50, %v704_v48  ;;  %v903_v56 = vadd.f32 %v902_v49, %v901_v45  ;;  %v810_v45 = vmul.f32 %v1840_v53, %v1840_v53  ;;  %v922_v50 = vsel %vm559_vm0, %v809_v42, 0.0 }
 0x1a9   :  { %v729_v53 = vsel %vm559_vm0, %v1866_v13, 0.0  ;;  %v821_v42 = vmul.f32 %v1983_v15, %v1983_v15 }
 0x1aa   :  { %v708_v60 = vadd.f32 %v707_v61, %v706_v55  ;;  %v905_v62 = vadd.f32 %v904_v57, %v903_v56  ;;  %v924_v57 = vsel %vm559_vm0, %v810_v45, 0.0  ;;  %v812_v61 = vmul.f32 %v1866_v13, %v1866_v13 }
 0x1ab   :  { %v733_v13 = vsel %vm559_vm0, %v1892_v39, 0.0  ;;  %v749_v45 = vsel %vm559_vm0, %v1998_v34, 0.0 }
 0x1ac   :  { %v710_v59 = vadd.f32 %v709_v7, %v708_v60  ;;  %v907_v4 = vadd.f32 %v906_v0, %v905_v62  ;;  %v926_v62 = vsel %vm559_vm0, %v811_v52, 0.0  ;;  %v813_v0 = vmul.f32 %v1879_v26, %v1879_v26 }
 0x1ad   :  { %v735_v26 = vsel %vm559_vm0, %v1905_v54, 0.0 }
 0x1ae   :  { %v712_v10 = vadd.f32 %v711_v17, %v710_v59  ;;  %v909_v5 = vadd.f32 %v908_v8, %v907_v4  ;;  %v928_v59 = vsel %vm559_vm0, %v812_v61, 0.0  ;;  %v814_v4 = vmul.f32 %v1892_v39, %v1892_v39 }
 0x1af   :  { %v930_v9 = vsel %vm559_vm0, %v813_v0, 0.0  ;;  %v737_v39 = vsel %vm559_vm0, %v1918_v3, 0.0  ;;  %v741_v3 = vsel %vm559_vm0, %v1944_v33, 0.0 }
 0x1b0   :  { %v714_v16 = vadd.f32 %v713_v27, %v712_v10  ;;  %v911_v20 = vadd.f32 %v910_v11, %v909_v5  ;;  %v815_v10 = vmul.f32 %v1905_v54, %v1905_v54  ;;  %v932_v27 = vsel %vm559_vm0, %v814_v4, 0.0 }
 0x1b1   :  { %v739_v54 = vsel %vm559_vm0, %v1931_v19, 0.0 }
 0x1b2   :  { %v716_v22 = vadd.f32 %v715_v37, %v714_v16  ;;  %v913_v24 = vadd.f32 %v912_v14, %v911_v20  ;;  %v934_v14 = vsel %vm559_vm0, %v815_v10, 0.0  ;;  %v817_v37 = vmul.f32 %v1931_v19, %v1931_v19 }
 0x1b3   :  { %v743_v19 = vsel %vm559_vm0, %v1957_v46, 0.0 }
 0x1b4   :  { %v718_v28 = vadd.f32 %v717_v47, %v716_v22  ;;  %v915_v30 = vadd.f32 %v914_v25, %v913_v24  ;;  %v936_v24 = vsel %vm559_vm0, %v816_v12, 0.0  ;;  %v818_v25 = vmul.f32 %v1944_v33, %v1944_v33 }
 0x1b5   :  { %v745_v33 = vsel %vm559_vm0, %v1970_v63, 0.0 }
 0x1b6   :  { %v720_v32 = vadd.f32 %v719_v58, %v718_v28  ;;  %v917_v36 = vadd.f32 %v916_v31, %v915_v30  ;;  %v938_v28 = vsel %vm559_vm0, %v817_v37, 0.0  ;;  %v819_v30 = vmul.f32 %v1957_v46, %v1957_v46 }
 0x1b7   :  { %v940_v35 = vsel %vm559_vm0, %v818_v25, 0.0 }
 0x1b8   :  { %v919_v43 = vadd.f32 %v918_v38, %v917_v36  ;;  %v722_v41 = vadd.f32 %v721_v6, %v720_v32  ;;  %v820_v32 = vmul.f32 %v1970_v63, %v1970_v63  ;;  %v942_v6 = vsel %vm559_vm0, %v819_v30, 0.0 }
 0x1b9   :  { %v946_v63 = vsel %vm559_vm0, %v821_v42, 0.0 }
 0x1ba   :  { %v921_v48 = vadd.f32 %v920_v44, %v919_v43  ;;  %v724_v49 = vadd.f32 %v723_v18, %v722_v41  ;;  %v822_v43 = vmul.f32 %v1998_v34, %v1998_v34  ;;  %v944_v46 = vsel %vm559_vm0, %v820_v32, 0.0 }
 0x1bb   :  { %v747_v18 = vsel %vm559_vm0, %v1983_v15, 0.0 }
 0x1bc   :  { %v923_v55 = vadd.f32 %v922_v50, %v921_v48  ;;  %v726_v56 = vadd.f32 %v725_v29, %v724_v49  ;;  %v948_v50 = vsel %vm559_vm0, %v822_v43, 0.0 }
 0x1be   :  { %v925_v51 = vadd.f32 %v924_v57, %v923_v55  ;;  %v728_v60 = vadd.f32 %v727_v40, %v726_v56 }
 0x1c0   :  { %v927_v7 = vadd.f32 %v926_v62, %v925_v51  ;;  %v730_v2 = vadd.f32 %v729_v53, %v728_v60 }
 0x1c2   :  { %v929_v8 = vadd.f32 %v928_v59, %v927_v7  ;;  %v732_v17 = vadd.f32 %v731_v1, %v730_v2 }
 0x1c4   :  { %v931_v5 = vadd.f32 %v930_v9, %v929_v8  ;;  %v734_v11 = vadd.f32 %v733_v13, %v732_v17 }
 0x1c6   :  { %v933_v16 = vadd.f32 %v932_v27, %v931_v5  ;;  %v736_v20 = vadd.f32 %v735_v26, %v734_v11 }
 0x1c8   :  { %v935_v21 = vadd.f32 %v934_v14, %v933_v16  ;;  %v738_v22 = vadd.f32 %v737_v39, %v736_v20 }
 0x1ca   :  { %v937_v47 = vadd.f32 %v936_v24, %v935_v21  ;;  %v740_v23 = vadd.f32 %v739_v54, %v738_v22 }
 0x1cc   :  { %v939_v31 = vadd.f32 %v938_v28, %v937_v47  ;;  %v742_v58 = vadd.f32 %v741_v3, %v740_v23 }
 0x1ce   :  { %v941_v36 = vadd.f32 %v940_v35, %v939_v31  ;;  %v744_v38 = vadd.f32 %v743_v19, %v742_v58 }
 0x1d0   :  { %v943_v41 = vadd.f32 %v942_v6, %v941_v36  ;;  %v746_v44 = vadd.f32 %v745_v33, %v744_v38 }
 0x1d2   :  { %v945_v48 = vadd.f32 %v944_v46, %v943_v41  ;;  %v748_v49 = vadd.f32 %v747_v18, %v746_v44 }
 0x1d4   :  { %v947_v29 = vadd.f32 %v946_v63, %v945_v48  ;;  %v750_v52 = vadd.f32 %v749_v45, %v748_v49 }
 0x1d6   :  { %v751_v55 = vrot.slane %v750_v52, 4  ;;  %v949_v56 = vadd.f32 %v948_v50, %v947_v29 }
 0x1d8   :  { %v752_v57 = vadd.f32 %v751_v55, %v750_v52  ;;  %v950_v40 = vrot.slane %v949_v56, 4 }
 0x1da   :  { %v753_v61 = vrot.slane %v752_v57, 2  ;;  %v951_v51 = vadd.f32 %v950_v40, %v949_v56 }
 0x1dc   :  { %v754_v60 = vadd.f32 %v753_v61, %v752_v57  ;;  %v952_v62 = vrot.slane %v951_v51, 2 }
 0x1de   :  { %v755_v15 = vrot.slane %v754_v60, 1  ;;  %v953_v53 = vadd.f32 %v952_v62, %v951_v51 }
 0x1e0   :  { %v756_v34 = vadd.f32 %v755_v15, %v754_v60  ;;  %v954_v0 = vrot.slane %v953_v53, 1 }
 0x1e2   :  { %758 = vst.msk [vmem:[%s2173_s3] sm:$0x1] %vm757_vm1, %v756_v34  ;;  %v955_v7 = vadd.f32 %v954_v0, %v953_v53 }
 0x1e4   :  { %956 = vst.msk [vmem:[%s2174_s4] sm:$0x1] %vm757_vm1, %v955_v7 }

// kernel: rgression_net_forward.14
= control target key start
LH: loop header
LB: loop body
LE: loop exit
PB: predicated region body
PF: predicated region fallthrough
CT: control target
= control target key end

     0   :  { %vm304_vm0 = vcmask 523264   ;;  %s871_s0 = inlined_call_operand.vmem [shape: f32[128,64], index: 0, kind: input, shape index: {}]   ;;  %s872_s1 = inlined_call_operand.vmem [shape: f32[128,64], index: 1, kind: input, shape index: {}]   ;;  %s873_s2 = inlined_call_operand.vmem [shape: f32[128,64], index: 2, kind: input, shape index: {}]   ;;  %s874_s3 = inlined_call_operand.vmem [shape: f32[128,64], index: 3, kind: input, shape index: {}]   ;;  %s875_s4 = inlined_call_operand.vmem [shape: f32[128,64], index: 4, kind: input, shape index: {}]   ;;  %s876_s5 = inlined_call_operand.vmem [shape: f32[128,64], index: 5, kind: input, shape index: {}]   ;;  %s877_s6 = inlined_call_operand.vmem [shape: f32[128,64], index: 6, kind: input, shape index: {}]   ;;  %s878_s7 = inlined_call_operand.vmem [shape: f32[128,64], index: 7, kind: input, shape index: {}]   ;;  %s879_s8 = inlined_call_operand.vmem [shape: f32[128,64], index: 8, kind: input, shape index: {}]   ;;  %s880_s9 = inlined_call_operand.vmem [shape: f32[128,64], index: 9, kind: output, shape index: {}]  }
   0x1   :  { %v32_v0 = vld [vmem:[%s871_s0] sm:$0xff]  ;;  %v33_v6 = vld [vmem:[%s871_s0 + $0x8] sm:$0xff]  ;;  %v34_v15 = vld [vmem:[%s871_s0 + $0x10] sm:$0xff] }
   0x2   :  { %v48_v1 = vld [vmem:[%s872_s1] sm:$0xff]  ;;  %v49_v7 = vld [vmem:[%s872_s1 + $0x8] sm:$0xff]  ;;  %v50_v16 = vld [vmem:[%s872_s1 + $0x10] sm:$0xff] }
   0x3   :  { %v80_v2 = vld [vmem:[%s873_s2] sm:$0xff]  ;;  %v64_v3 = vmax.f32 %v32_v0, %v48_v1  ;;  %v81_v8 = vld [vmem:[%s873_s2 + $0x8] sm:$0xff]  ;;  %v65_v10 = vmax.f32 %v33_v6, %v49_v7  ;;  %v82_v17 = vld [vmem:[%s873_s2 + $0x10] sm:$0xff]  ;;  %v66_v20 = vmax.f32 %v34_v15, %v50_v16 }
   0x4   :  { %v112_v4 = vld [vmem:[%s874_s3] sm:$0xff]  ;;  %v113_v13 = vld [vmem:[%s874_s3 + $0x8] sm:$0xff]  ;;  %v114_v24 = vld [vmem:[%s874_s3 + $0x10] sm:$0xff] }
   0x5   :  { %v96_v5 = vmax.f32 %v64_v3, %v80_v2  ;;  %v144_v9 = vld [vmem:[%s875_s4] sm:$0xff]  ;;  %v97_v14 = vmax.f32 %v65_v10, %v81_v8  ;;  %v145_v19 = vld [vmem:[%s875_s4 + $0x8] sm:$0xff]  ;;  %v98_v26 = vmax.f32 %v66_v20, %v82_v17  ;;  %v35_v27 = vld [vmem:[%s871_s0 + $0x18] sm:$0xff] }
   0x6   :  { %v176_v12 = vld [vmem:[%s876_s5] sm:$0xff]  ;;  %v177_v23 = vld [vmem:[%s876_s5 + $0x8] sm:$0xff]  ;;  %v51_v28 = vld [vmem:[%s872_s1 + $0x18] sm:$0xff] }
   0x7   :  { %v128_v11 = vmax.f32 %v96_v5, %v112_v4  ;;  %v208_v21 = vld [vmem:[%s877_s6] sm:$0xff]  ;;  %v129_v22 = vmax.f32 %v97_v14, %v113_v13  ;;  %v83_v29 = vld [vmem:[%s873_s2 + $0x18] sm:$0xff]  ;;  %v146_v33 = vld [vmem:[%s875_s4 + $0x10] sm:$0xff]  ;;  %v67_v34 = vmax.f32 %v35_v27, %v51_v28  ;;  %v130_v37 = vmax.f32 %v98_v26, %v114_v24 }
   0x8   :  { %v240_v30 = vld [vmem:[%s878_s7] sm:$0xff]  ;;  %v209_v36 = vld [vmem:[%s877_s6 + $0x8] sm:$0xff]  ;;  %v178_v38 = vld [vmem:[%s876_s5 + $0x10] sm:$0xff] }
   0x9   :  { %v160_v18 = vmax.f32 %v128_v11, %v144_v9  ;;  %v272_v31 = vld [vmem:[%s879_s8] sm:$0xff]  ;;  %v161_v32 = vmax.f32 %v129_v22, %v145_v19  ;;  %v115_v39 = vld [vmem:[%s874_s3 + $0x18] sm:$0xff]  ;;  %v99_v41 = vmax.f32 %v67_v34, %v83_v29  ;;  %v241_v46 = vld [vmem:[%s878_s7 + $0x8] sm:$0xff]  ;;  %v162_v48 = vmax.f32 %v130_v37, %v146_v33 }
   0xa   :  { %v36_v42 = vld [vmem:[%s871_s0 + $0x20] sm:$0xff]  ;;  %v273_v47 = vld [vmem:[%s879_s8 + $0x8] sm:$0xff]  ;;  %v147_v49 = vld [vmem:[%s875_s4 + $0x18] sm:$0xff] }
   0xb   :  { %v192_v25 = vmax.f32 %v160_v18, %v176_v12  ;;  %v193_v40 = vmax.f32 %v161_v32, %v177_v23  ;;  %v52_v43 = vld [vmem:[%s872_s1 + $0x20] sm:$0xff]  ;;  %v210_v52 = vld [vmem:[%s877_s6 + $0x10] sm:$0xff]  ;;  %v131_v53 = vmax.f32 %v99_v41, %v115_v39  ;;  %v179_v54 = vld [vmem:[%s876_s5 + $0x18] sm:$0xff]  ;;  %v194_v57 = vmax.f32 %v162_v48, %v178_v38 }
   0xc   :  { %v84_v44 = vld [vmem:[%s873_s2 + $0x20] sm:$0xff]  ;;  %v68_v50 = vmax.f32 %v36_v42, %v52_v43  ;;  %v37_v59 = vld [vmem:[%s871_s0 + $0x28] sm:$0xff]  ;;  %v242_v63 = vld [vmem:[%s878_s7 + $0x10] sm:$0xff] }
   0xd   :  { %v224_v35 = vmax.f32 %v192_v25, %v208_v21  ;;  %v225_v51 = vmax.f32 %v193_v40, %v209_v36  ;;  %v116_v55 = vld [vmem:[%s874_s3 + $0x20] sm:$0xff]  ;;  %v53_v60 = vld [vmem:[%s872_s1 + $0x28] sm:$0xff]  ;;  %v274_v0 = vld [vmem:[%s879_s8 + $0x10] sm:$0xff]  ;;  %v163_v1 = vmax.f32 %v131_v53, %v147_v49  ;;  %v226_v4 = vmax.f32 %v194_v57, %v210_v52 }
   0xe   :  { %v100_v58 = vmax.f32 %v68_v50, %v84_v44  ;;  %v85_v61 = vld [vmem:[%s873_s2 + $0x28] sm:$0xff]  ;;  %v148_v2 = vld [vmem:[%s875_s4 + $0x20] sm:$0xff]  ;;  %v69_v3 = vmax.f32 %v37_v59, %v53_v60  ;;  %v211_v5 = vld [vmem:[%s877_s6 + $0x18] sm:$0xff] }
   0xf   :  { %v256_v45 = vmax.f32 %v224_v35, %v240_v30  ;;  %v257_v62 = vmax.f32 %v225_v51, %v241_v46  ;;  %v180_v7 = vld [vmem:[%s876_s5 + $0x20] sm:$0xff]  ;;  %v117_v8 = vld [vmem:[%s874_s3 + $0x28] sm:$0xff]  ;;  %v195_v10 = vmax.f32 %v163_v1, %v179_v54  ;;  %v38_v12 = vld [vmem:[%s871_s0 + $0x30] sm:$0xff]  ;;  %v258_v15 = vmax.f32 %v226_v4, %v242_v63 }
  0x10   :  { %v132_v6 = vmax.f32 %v100_v58, %v116_v55  ;;  %v101_v11 = vmax.f32 %v69_v3, %v85_v61  ;;  %v54_v13 = vld [vmem:[%s872_s1 + $0x30] sm:$0xff]  ;;  %v243_v16 = vld [vmem:[%s878_s7 + $0x18] sm:$0xff]  ;;  %v149_v19 = vld [vmem:[%s875_s4 + $0x28] sm:$0xff] }
  0x11   :  { %v288_v56 = vmax.f32 %v256_v45, %v272_v31  ;;  %v289_v9 = vmax.f32 %v257_v62, %v273_v47  ;;  %v86_v14 = vld [vmem:[%s873_s2 + $0x30] sm:$0xff]  ;;  %v275_v17 = vld [vmem:[%s879_s8 + $0x18] sm:$0xff]  ;;  %v70_v20 = vmax.f32 %v38_v12, %v54_v13  ;;  %v227_v21 = vmax.f32 %v195_v10, %v211_v5  ;;  %v212_v22 = vld [vmem:[%s877_s6 + $0x20] sm:$0xff] }
  0x12   :  { %v164_v18 = vmax.f32 %v132_v6, %v148_v2  ;;  %v133_v23 = vmax.f32 %v101_v11, %v117_v8  ;;  %v181_v24 = vld [vmem:[%s876_s5 + $0x28] sm:$0xff]  ;;  %v118_v25 = vld [vmem:[%s874_s3 + $0x30] sm:$0xff]  ;;  %v290_v26 = vmax.f32 %v258_v15, %v274_v0  ;;  %v39_v29 = vld [vmem:[%s871_s0 + $0x38] sm:$0xff] }
  0x13   :  { %305 = vst.msk [vmem:[%s880_s9] sm:$0xff] %vm304_vm0, %v288_v56  ;;  %306 = vst.msk [vmem:[%s880_s9 + $0x8] sm:$0xff] %vm304_vm0, %v289_v9  ;;  %v102_v28 = vmax.f32 %v70_v20, %v86_v14  ;;  %v55_v30 = vld [vmem:[%s872_s1 + $0x38] sm:$0xff]  ;;  %v259_v32 = vmax.f32 %v227_v21, %v243_v16  ;;  %v244_v33 = vld [vmem:[%s878_s7 + $0x20] sm:$0xff] }
  0x14   :  { %v196_v27 = vmax.f32 %v164_v18, %v180_v7  ;;  %v87_v31 = vld [vmem:[%s873_s2 + $0x38] sm:$0xff]  ;;  %v276_v34 = vld [vmem:[%s879_s8 + $0x20] sm:$0xff]  ;;  %v165_v35 = vmax.f32 %v133_v23, %v149_v19  ;;  %v150_v36 = vld [vmem:[%s875_s4 + $0x30] sm:$0xff]  ;;  %v71_v37 = vmax.f32 %v39_v29, %v55_v30  ;;  %307 = vst.msk [vmem:[%s880_s9 + $0x10] sm:$0xff] %vm304_vm0, %v290_v26 }
  0x15   :  { %v213_v39 = vld [vmem:[%s877_s6 + $0x28] sm:$0xff]  ;;  %v134_v40 = vmax.f32 %v102_v28, %v118_v25  ;;  %v182_v41 = vld [vmem:[%s876_s5 + $0x30] sm:$0xff]  ;;  %v119_v42 = vld [vmem:[%s874_s3 + $0x38] sm:$0xff]  ;;  %v291_v43 = vmax.f32 %v259_v32, %v275_v17 }
  0x16   :  { %v228_v38 = vmax.f32 %v196_v27, %v212_v22  ;;  %v197_v44 = vmax.f32 %v165_v35, %v181_v24  ;;  %v103_v45 = vmax.f32 %v71_v37, %v87_v31  ;;  %v40_v46 = vld [vmem:[%s871_s0 + $0x40] sm:$0xff]  ;;  %v245_v50 = vld [vmem:[%s878_s7 + $0x28] sm:$0xff]  ;;  %v151_v53 = vld [vmem:[%s875_s4 + $0x38] sm:$0xff] }
  0x17   :  { %v56_v47 = vld [vmem:[%s872_s1 + $0x40] sm:$0xff]  ;;  %v277_v51 = vld [vmem:[%s879_s8 + $0x28] sm:$0xff]  ;;  %v166_v52 = vmax.f32 %v134_v40, %v150_v36  ;;  %308 = vst.msk [vmem:[%s880_s9 + $0x18] sm:$0xff] %vm304_vm0, %v291_v43  ;;  %v214_v56 = vld [vmem:[%s877_s6 + $0x30] sm:$0xff] }
  0x18   :  { %v88_v48 = vld [vmem:[%s873_s2 + $0x40] sm:$0xff]  ;;  %v260_v49 = vmax.f32 %v228_v38, %v244_v33  ;;  %v72_v54 = vmax.f32 %v40_v46, %v56_v47  ;;  %v229_v55 = vmax.f32 %v197_v44, %v213_v39  ;;  %v135_v57 = vmax.f32 %v103_v45, %v119_v42  ;;  %v183_v58 = vld [vmem:[%s876_s5 + $0x38] sm:$0xff]  ;;  %v41_v63 = vld [vmem:[%s871_s0 + $0x48] sm:$0xff] }
  0x19   :  { %v120_v59 = vld [vmem:[%s874_s3 + $0x40] sm:$0xff]  ;;  %v198_v61 = vmax.f32 %v166_v52, %v182_v41  ;;  %v57_v0 = vld [vmem:[%s872_s1 + $0x48] sm:$0xff]  ;;  %v246_v3 = vld [vmem:[%s878_s7 + $0x30] sm:$0xff] }
  0x1a   :  { %v292_v60 = vmax.f32 %v260_v49, %v276_v34  ;;  %v104_v62 = vmax.f32 %v72_v54, %v88_v48  ;;  %v89_v1 = vld [vmem:[%s873_s2 + $0x48] sm:$0xff]  ;;  %v261_v2 = vmax.f32 %v229_v55, %v245_v50  ;;  %v278_v4 = vld [vmem:[%s879_s8 + $0x30] sm:$0xff]  ;;  %v167_v5 = vmax.f32 %v135_v57, %v151_v53  ;;  %v152_v6 = vld [vmem:[%s875_s4 + $0x40] sm:$0xff] }
  0x1b   :  { %v73_v7 = vmax.f32 %v41_v63, %v57_v0  ;;  %v230_v8 = vmax.f32 %v198_v61, %v214_v56  ;;  %v215_v9 = vld [vmem:[%s877_s6 + $0x38] sm:$0xff]  ;;  %v184_v11 = vld [vmem:[%s876_s5 + $0x40] sm:$0xff]  ;;  %v121_v12 = vld [vmem:[%s874_s3 + $0x48] sm:$0xff] }
  0x1c   :  { %309 = vst.msk [vmem:[%s880_s9 + $0x20] sm:$0xff] %vm304_vm0, %v292_v60  ;;  %v136_v10 = vmax.f32 %v104_v62, %v120_v59  ;;  %v293_v13 = vmax.f32 %v261_v2, %v277_v51  ;;  %v199_v14 = vmax.f32 %v167_v5, %v183_v58  ;;  %v42_v16 = vld [vmem:[%s871_s0 + $0x50] sm:$0xff]  ;;  %v247_v20 = vld [vmem:[%s878_s7 + $0x38] sm:$0xff]  ;;  %v153_v23 = vld [vmem:[%s875_s4 + $0x48] sm:$0xff] }
  0x1d   :  { %v105_v15 = vmax.f32 %v73_v7, %v89_v1  ;;  %v58_v17 = vld [vmem:[%s872_s1 + $0x50] sm:$0xff]  ;;  %v262_v19 = vmax.f32 %v230_v8, %v246_v3  ;;  %v279_v21 = vld [vmem:[%s879_s8 + $0x38] sm:$0xff]  ;;  %v216_v26 = vld [vmem:[%s877_s6 + $0x40] sm:$0xff] }
  0x1e   :  { %v90_v18 = vld [vmem:[%s873_s2 + $0x50] sm:$0xff]  ;;  %v168_v22 = vmax.f32 %v136_v10, %v152_v6  ;;  %v74_v24 = vmax.f32 %v42_v16, %v58_v17  ;;  %310 = vst.msk [vmem:[%s880_s9 + $0x28] sm:$0xff] %vm304_vm0, %v293_v13  ;;  %v231_v25 = vmax.f32 %v199_v14, %v215_v9  ;;  %v185_v28 = vld [vmem:[%s876_s5 + $0x48] sm:$0xff]  ;;  %v43_v33 = vld [vmem:[%s871_s0 + $0x58] sm:$0xff] }
  0x1f   :  { %v137_v27 = vmax.f32 %v105_v15, %v121_v12  ;;  %v122_v29 = vld [vmem:[%s874_s3 + $0x50] sm:$0xff]  ;;  %v294_v30 = vmax.f32 %v262_v19, %v278_v4  ;;  %v59_v34 = vld [vmem:[%s872_s1 + $0x58] sm:$0xff]  ;;  %v248_v37 = vld [vmem:[%s878_s7 + $0x40] sm:$0xff] }
  0x20   :  { %v200_v31 = vmax.f32 %v168_v22, %v184_v11  ;;  %v106_v32 = vmax.f32 %v74_v24, %v90_v18  ;;  %v91_v35 = vld [vmem:[%s873_s2 + $0x58] sm:$0xff]  ;;  %v263_v36 = vmax.f32 %v231_v25, %v247_v20  ;;  %v280_v38 = vld [vmem:[%s879_s8 + $0x40] sm:$0xff]  ;;  %v154_v40 = vld [vmem:[%s875_s4 + $0x50] sm:$0xff]  ;;  %v75_v41 = vmax.f32 %v43_v33, %v59_v34 }
  0x21   :  { %v169_v39 = vmax.f32 %v137_v27, %v153_v23  ;;  %311 = vst.msk [vmem:[%s880_s9 + $0x30] sm:$0xff] %vm304_vm0, %v294_v30  ;;  %v217_v43 = vld [vmem:[%s877_s6 + $0x48] sm:$0xff]  ;;  %v186_v45 = vld [vmem:[%s876_s5 + $0x50] sm:$0xff]  ;;  %v123_v46 = vld [vmem:[%s874_s3 + $0x58] sm:$0xff] }
  0x22   :  { %v232_v42 = vmax.f32 %v200_v31, %v216_v26  ;;  %v138_v44 = vmax.f32 %v106_v32, %v122_v29  ;;  %v295_v47 = vmax.f32 %v263_v36, %v279_v21  ;;  %v107_v49 = vmax.f32 %v75_v41, %v91_v35  ;;  %v44_v50 = vld [vmem:[%s871_s0 + $0x60] sm:$0xff]  ;;  %v249_v54 = vld [vmem:[%s878_s7 + $0x48] sm:$0xff]  ;;  %v155_v57 = vld [vmem:[%s875_s4 + $0x58] sm:$0xff] }
  0x23   :  { %v201_v48 = vmax.f32 %v169_v39, %v185_v28  ;;  %v60_v51 = vld [vmem:[%s872_s1 + $0x60] sm:$0xff]  ;;  %v281_v55 = vld [vmem:[%s879_s8 + $0x48] sm:$0xff]  ;;  %v218_v60 = vld [vmem:[%s877_s6 + $0x50] sm:$0xff] }
  0x24   :  { %v92_v52 = vld [vmem:[%s873_s2 + $0x60] sm:$0xff]  ;;  %v264_v53 = vmax.f32 %v232_v42, %v248_v37  ;;  %v170_v56 = vmax.f32 %v138_v44, %v154_v40  ;;  %v76_v58 = vmax.f32 %v44_v50, %v60_v51  ;;  %312 = vst.msk [vmem:[%s880_s9 + $0x38] sm:$0xff] %vm304_vm0, %v295_v47  ;;  %v139_v61 = vmax.f32 %v107_v49, %v123_v46  ;;  %v187_v62 = vld [vmem:[%s876_s5 + $0x58] sm:$0xff]  ;;  %v45_v3 = vld [vmem:[%s871_s0 + $0x68] sm:$0xff] }
  0x25   :  { %v233_v59 = vmax.f32 %v201_v48, %v217_v43  ;;  %v124_v63 = vld [vmem:[%s874_s3 + $0x60] sm:$0xff]  ;;  %v61_v4 = vld [vmem:[%s872_s1 + $0x68] sm:$0xff]  ;;  %v250_v7 = vld [vmem:[%s878_s7 + $0x50] sm:$0xff] }
  0x26   :  { %v296_v0 = vmax.f32 %v264_v53, %v280_v38  ;;  %v202_v1 = vmax.f32 %v170_v56, %v186_v45  ;;  %v108_v2 = vmax.f32 %v76_v58, %v92_v52  ;;  %v93_v5 = vld [vmem:[%s873_s2 + $0x68] sm:$0xff]  ;;  %v282_v8 = vld [vmem:[%s879_s8 + $0x50] sm:$0xff]  ;;  %v171_v9 = vmax.f32 %v139_v61, %v155_v57  ;;  %v156_v10 = vld [vmem:[%s875_s4 + $0x60] sm:$0xff] }
  0x27   :  { %v265_v6 = vmax.f32 %v233_v59, %v249_v54  ;;  %v77_v11 = vmax.f32 %v45_v3, %v61_v4  ;;  %v219_v13 = vld [vmem:[%s877_s6 + $0x58] sm:$0xff]  ;;  %v188_v15 = vld [vmem:[%s876_s5 + $0x60] sm:$0xff]  ;;  %v125_v16 = vld [vmem:[%s874_s3 + $0x68] sm:$0xff] }
  0x28   :  { %313 = vst.msk [vmem:[%s880_s9 + $0x40] sm:$0xff] %vm304_vm0, %v296_v0  ;;  %v234_v12 = vmax.f32 %v202_v1, %v218_v60  ;;  %v140_v14 = vmax.f32 %v108_v2, %v124_v63  ;;  %v203_v18 = vmax.f32 %v171_v9, %v187_v62  ;;  %v46_v20 = vld [vmem:[%s871_s0 + $0x70] sm:$0xff]  ;;  %v251_v24 = vld [vmem:[%s878_s7 + $0x58] sm:$0xff]  ;;  %v157_v27 = vld [vmem:[%s875_s4 + $0x68] sm:$0xff] }
  0x29   :  { %v297_v17 = vmax.f32 %v265_v6, %v281_v55  ;;  %v109_v19 = vmax.f32 %v77_v11, %v93_v5  ;;  %v62_v21 = vld [vmem:[%s872_s1 + $0x70] sm:$0xff]  ;;  %v283_v25 = vld [vmem:[%s879_s8 + $0x58] sm:$0xff]  ;;  %v220_v30 = vld [vmem:[%s877_s6 + $0x60] sm:$0xff] }
  0x2a   :  { %v94_v22 = vld [vmem:[%s873_s2 + $0x70] sm:$0xff]  ;;  %v266_v23 = vmax.f32 %v234_v12, %v250_v7  ;;  %v172_v26 = vmax.f32 %v140_v14, %v156_v10  ;;  %v78_v28 = vmax.f32 %v46_v20, %v62_v21  ;;  %v235_v29 = vmax.f32 %v203_v18, %v219_v13  ;;  %v189_v32 = vld [vmem:[%s876_s5 + $0x68] sm:$0xff]  ;;  %v47_v37 = vld [vmem:[%s871_s0 + $0x78] sm:$0xff] }
  0x2b   :  { %314 = vst.msk [vmem:[%s880_s9 + $0x48] sm:$0xff] %vm304_vm0, %v297_v17  ;;  %v141_v31 = vmax.f32 %v109_v19, %v125_v16  ;;  %v126_v33 = vld [vmem:[%s874_s3 + $0x70] sm:$0xff]  ;;  %v63_v38 = vld [vmem:[%s872_s1 + $0x78] sm:$0xff]  ;;  %v252_v41 = vld [vmem:[%s878_s7 + $0x60] sm:$0xff] }
  0x2c   :  { %v298_v34 = vmax.f32 %v266_v23, %v282_v8  ;;  %v204_v35 = vmax.f32 %v172_v26, %v188_v15  ;;  %v110_v36 = vmax.f32 %v78_v28, %v94_v22  ;;  %v95_v39 = vld [vmem:[%s873_s2 + $0x78] sm:$0xff]  ;;  %v267_v40 = vmax.f32 %v235_v29, %v251_v24  ;;  %v158_v43 = vld [vmem:[%s875_s4 + $0x70] sm:$0xff]  ;;  %v221_v46 = vld [vmem:[%s877_s6 + $0x68] sm:$0xff] }
  0x2d   :  { %v173_v42 = vmax.f32 %v141_v31, %v157_v27  ;;  %v79_v44 = vmax.f32 %v47_v37, %v63_v38  ;;  %v127_v48 = vld [vmem:[%s874_s3 + $0x78] sm:$0xff]  ;;  %v284_v50 = vld [vmem:[%s879_s8 + $0x60] sm:$0xff]  ;;  %v190_v52 = vld [vmem:[%s876_s5 + $0x70] sm:$0xff] }
  0x2e   :  { %315 = vst.msk [vmem:[%s880_s9 + $0x50] sm:$0xff] %vm304_vm0, %v298_v34  ;;  %v236_v45 = vmax.f32 %v204_v35, %v220_v30  ;;  %v142_v47 = vmax.f32 %v110_v36, %v126_v33  ;;  %v299_v49 = vmax.f32 %v267_v40, %v283_v25  ;;  %v253_v55 = vld [vmem:[%s878_s7 + $0x68] sm:$0xff]  ;;  %v159_v57 = vld [vmem:[%s875_s4 + $0x78] sm:$0xff]  ;;  %v222_v59 = vld [vmem:[%s877_s6 + $0x70] sm:$0xff] }
  0x2f   :  { %v205_v51 = vmax.f32 %v173_v42, %v189_v32  ;;  %v111_v53 = vmax.f32 %v79_v44, %v95_v39  ;;  %v285_v62 = vld [vmem:[%s879_s8 + $0x68] sm:$0xff]  ;;  %v191_v0 = vld [vmem:[%s876_s5 + $0x78] sm:$0xff]  ;;  %v254_v2 = vld [vmem:[%s878_s7 + $0x70] sm:$0xff] }
  0x30   :  { %v268_v54 = vmax.f32 %v236_v45, %v252_v41  ;;  %v174_v56 = vmax.f32 %v142_v47, %v158_v43  ;;  %316 = vst.msk [vmem:[%s880_s9 + $0x58] sm:$0xff] %vm304_vm0, %v299_v49  ;;  %v223_v5 = vld [vmem:[%s877_s6 + $0x78] sm:$0xff]  ;;  %v286_v7 = vld [vmem:[%s879_s8 + $0x70] sm:$0xff] }
  0x31   :  { %v237_v58 = vmax.f32 %v205_v51, %v221_v46  ;;  %v143_v60 = vmax.f32 %v111_v53, %v127_v48  ;;  %v255_v10 = vld [vmem:[%s878_s7 + $0x78] sm:$0xff] }
  0x32   :  { %v300_v61 = vmax.f32 %v268_v54, %v284_v50  ;;  %v206_v63 = vmax.f32 %v174_v56, %v190_v52  ;;  %v287_v13 = vld [vmem:[%s879_s8 + $0x78] sm:$0xff] }
  0x33   :  { %v269_v1 = vmax.f32 %v237_v58, %v253_v55  ;;  %v175_v3 = vmax.f32 %v143_v60, %v159_v57 }
  0x34   :  { %317 = vst.msk [vmem:[%s880_s9 + $0x60] sm:$0xff] %vm304_vm0, %v300_v61  ;;  %v238_v4 = vmax.f32 %v206_v63, %v222_v59 }
  0x35   :  { %v301_v6 = vmax.f32 %v269_v1, %v285_v62  ;;  %v207_v8 = vmax.f32 %v175_v3, %v191_v0 }
  0x36   :  { %v270_v9 = vmax.f32 %v238_v4, %v254_v2 }
  0x37   :  { %318 = vst.msk [vmem:[%s880_s9 + $0x68] sm:$0xff] %vm304_vm0, %v301_v6  ;;  %v239_v11 = vmax.f32 %v207_v8, %v223_v5 }
  0x38   :  { %v302_v12 = vmax.f32 %v270_v9, %v286_v7 }
  0x39   :  { %v271_v14 = vmax.f32 %v239_v11, %v255_v10 }
  0x3a   :  { %319 = vst.msk [vmem:[%s880_s9 + $0x70] sm:$0xff] %vm304_vm0, %v302_v12 }
  0x3b   :  { %v303_v15 = vmax.f32 %v271_v14, %v287_v13 }
  0x3d   :  { %320 = vst.msk [vmem:[%s880_s9 + $0x78] sm:$0xff] %vm304_vm0, %v303_v15 }

// kernel: rgression_net_forward.15
= control target key start
LH: loop header
LB: loop body
LE: loop exit
PB: predicated region body
PF: predicated region fallthrough
CT: control target
= control target key end

     0   :  { %s1010_s1 = inlined_call_operand.vmem [shape: f32[640,128], index: 1, kind: input, shape index: {}]   ;;  %s1011_s0 = inlined_call_operand.vmem [shape: f32[32,640], index: 0, kind: input, shape index: {}]   ;;  %s1012_s2 = inlined_call_operand.vmem [shape: f32[32,128], index: 2, kind: output, shape index: {0}]   ;;  %s1013_s3 = inlined_call_operand.vmem [shape: f32[1,128], index: 3, kind: output, shape index: {1}]   ;;  %s1014_s4 = inlined_call_operand.vmem [shape: f32[1,128], index: 4, kind: output, shape index: {2}]  }
   0x1   :  { %v50_v0 = vld [vmem:[%s1010_s1 + $0x80] sm:$0xff]  ;;  %v51_v1 = vld [vmem:[%s1010_s1 + $0x88] sm:$0xff]  ;;  %v52_v11 = vld [vmem:[%s1010_s1 + $0x90] sm:$0xff] }
   0x2   :  { %v82_v2 = vld [vmem:[%s1010_s1 + $0x180] sm:$0xff]  ;;  %v555_v3 = vpack.c.bf16 %v51_v1, %v50_v0  ;;  %v83_v4 = vld [vmem:[%s1010_s1 + $0x188] sm:$0xff]  ;;  %v53_v13 = vld [vmem:[%s1010_s1 + $0x98] sm:$0xff] }
   0x3   :  { %v34_v5 = vld [vmem:[%s1010_s1] sm:$0xff]  ;;  %v35_v6 = vld [vmem:[%s1010_s1 + $0x8] sm:$0xff]  ;;  %v587_v7 = vpack.c.bf16 %v83_v4, %v82_v2  ;;  %v84_v14 = vld [vmem:[%s1010_s1 + $0x190] sm:$0xff]  ;;  %v559_v16 = vpack.c.bf16 %v53_v13, %v52_v11 }
   0x4   :  { %v557_v8 = vpack.c.bf16 %v35_v6, %v34_v5  ;;  %v66_v9 = vld [vmem:[%s1010_s1 + $0x100] sm:$0xff]  ;;  %v67_v10 = vld [vmem:[%s1010_s1 + $0x108] sm:$0xff]  ;;  %556 = vmatprep.subr.bf16.mxu0 %v555_v3  ;;  %v85_v15 = vld [vmem:[%s1010_s1 + $0x198] sm:$0xff] }
   0x5   :  { %v589_v12 = vpack.c.bf16 %v67_v10, %v66_v9  ;;  %588 = vmatprep.subr.bf16.mxu1 %v587_v7  ;;  %v591_v17 = vpack.c.bf16 %v85_v15, %v84_v14  ;;  %v36_v18 = vld [vmem:[%s1010_s1 + $0x10] sm:$0xff]  ;;  %v37_v19 = vld [vmem:[%s1010_s1 + $0x18] sm:$0xff]  ;;  %v54_v23 = vld [vmem:[%s1010_s1 + $0xa0] sm:$0xff] }
   0x6   :  { %558 = vmatpush3.bf16.msra.mxu0 %v557_v8  ;;  %v68_v20 = vld [vmem:[%s1010_s1 + $0x110] sm:$0xff]  ;;  %v561_v21 = vpack.c.bf16 %v37_v19, %v36_v18  ;;  %v69_v22 = vld [vmem:[%s1010_s1 + $0x118] sm:$0xff]  ;;  %v55_v24 = vld [vmem:[%s1010_s1 + $0xa8] sm:$0xff] }
   0x7   :  { %590 = vmatpush3.bf16.msra.mxu1 %v589_v12  ;;  %560 = vmatprep.subr.bf16.mxu0 %v559_v16  ;;  %v593_v25 = vpack.c.bf16 %v69_v22, %v68_v20  ;;  %v563_v26 = vpack.c.bf16 %v55_v24, %v54_v23  ;;  %v86_v27 = vld [vmem:[%s1010_s1 + $0x1a0] sm:$0xff]  ;;  %v87_v28 = vld [vmem:[%s1010_s1 + $0x1a8] sm:$0xff]  ;;  %v56_v35 = vld [vmem:[%s1010_s1 + $0xb0] sm:$0xff] }
   0x8   :  { %592 = vmatprep.subr.bf16.mxu1 %v591_v17  ;;  %v38_v29 = vld [vmem:[%s1010_s1 + $0x20] sm:$0xff]  ;;  %v595_v30 = vpack.c.bf16 %v87_v28, %v86_v27  ;;  %v39_v31 = vld [vmem:[%s1010_s1 + $0x28] sm:$0xff]  ;;  %v57_v36 = vld [vmem:[%s1010_s1 + $0xb8] sm:$0xff] }
   0x9   :  { %v70_v32 = vld [vmem:[%s1010_s1 + $0x120] sm:$0xff]  ;;  %v71_v33 = vld [vmem:[%s1010_s1 + $0x128] sm:$0xff]  ;;  %v565_v34 = vpack.c.bf16 %v39_v31, %v38_v29  ;;  %v88_v37 = vld [vmem:[%s1010_s1 + $0x1b0] sm:$0xff]  ;;  %v567_v39 = vpack.c.bf16 %v57_v36, %v56_v35 }
   0xa   :  { %562 = vmatpush3.bf16.msra.mxu0 %v561_v21  ;;  %v597_v38 = vpack.c.bf16 %v71_v33, %v70_v32  ;;  %v89_v40 = vld [vmem:[%s1010_s1 + $0x1b8] sm:$0xff]  ;;  %v40_v41 = vld [vmem:[%s1010_s1 + $0x30] sm:$0xff]  ;;  %v58_v46 = vld [vmem:[%s1010_s1 + $0xc0] sm:$0xff] }
   0xb   :  { %594 = vmatpush3.bf16.msra.mxu1 %v593_v25  ;;  %564 = vmatprep.subr.bf16.mxu0 %v563_v26  ;;  %v41_v42 = vld [vmem:[%s1010_s1 + $0x38] sm:$0xff]  ;;  %v599_v43 = vpack.c.bf16 %v89_v40, %v88_v37  ;;  %v72_v44 = vld [vmem:[%s1010_s1 + $0x130] sm:$0xff]  ;;  %v59_v47 = vld [vmem:[%s1010_s1 + $0xc8] sm:$0xff] }
   0xc   :  { %596 = vmatprep.subr.bf16.mxu1 %v595_v30  ;;  %v73_v45 = vld [vmem:[%s1010_s1 + $0x138] sm:$0xff]  ;;  %v90_v48 = vld [vmem:[%s1010_s1 + $0x1c0] sm:$0xff]  ;;  %v91_v49 = vld [vmem:[%s1010_s1 + $0x1c8] sm:$0xff]  ;;  %v569_v50 = vpack.c.bf16 %v41_v42, %v40_v41  ;;  %v571_v52 = vpack.c.bf16 %v59_v47, %v58_v46 }
   0xd   :  { %v601_v51 = vpack.c.bf16 %v73_v45, %v72_v44  ;;  %v42_v53 = vld [vmem:[%s1010_s1 + $0x40] sm:$0xff]  ;;  %v43_v54 = vld [vmem:[%s1010_s1 + $0x48] sm:$0xff]  ;;  %v603_v56 = vpack.c.bf16 %v91_v49, %v90_v48  ;;  %v60_v58 = vld [vmem:[%s1010_s1 + $0xd0] sm:$0xff] }
   0xe   :  { %566 = vmatpush3.bf16.msra.mxu0 %v565_v34  ;;  %v74_v55 = vld [vmem:[%s1010_s1 + $0x140] sm:$0xff]  ;;  %v75_v57 = vld [vmem:[%s1010_s1 + $0x148] sm:$0xff]  ;;  %v61_v59 = vld [vmem:[%s1010_s1 + $0xd8] sm:$0xff]  ;;  %v573_v62 = vpack.c.bf16 %v43_v54, %v42_v53 }
   0xf   :  { %598 = vmatpush3.bf16.msra.mxu1 %v597_v38  ;;  %568 = vmatprep.subr.bf16.mxu0 %v567_v39  ;;  %v92_v60 = vld [vmem:[%s1010_s1 + $0x1d0] sm:$0xff]  ;;  %v93_v61 = vld [vmem:[%s1010_s1 + $0x1d8] sm:$0xff]  ;;  %v605_v63 = vpack.c.bf16 %v75_v57, %v74_v55  ;;  %v575_v0 = vpack.c.bf16 %v61_v59, %v60_v58  ;;  %v62_v6 = vld [vmem:[%s1010_s1 + $0xe0] sm:$0xff] }
  0x10   :  { %600 = vmatprep.subr.bf16.mxu1 %v599_v43  ;;  %v44_v1 = vld [vmem:[%s1010_s1 + $0x50] sm:$0xff]  ;;  %v45_v2 = vld [vmem:[%s1010_s1 + $0x58] sm:$0xff]  ;;  %v607_v4 = vpack.c.bf16 %v93_v61, %v92_v60  ;;  %v63_v7 = vld [vmem:[%s1010_s1 + $0xe8] sm:$0xff] }
  0x11   :  { %v76_v3 = vld [vmem:[%s1010_s1 + $0x150] sm:$0xff]  ;;  %v77_v5 = vld [vmem:[%s1010_s1 + $0x158] sm:$0xff]  ;;  %v94_v8 = vld [vmem:[%s1010_s1 + $0x1e0] sm:$0xff]  ;;  %v577_v10 = vpack.c.bf16 %v45_v2, %v44_v1  ;;  %v579_v14 = vpack.c.bf16 %v63_v7, %v62_v6 }
  0x12   :  { %570 = vmatpush3.bf16.msra.mxu0 %v569_v50  ;;  %v95_v9 = vld [vmem:[%s1010_s1 + $0x1e8] sm:$0xff]  ;;  %v46_v11 = vld [vmem:[%s1010_s1 + $0x60] sm:$0xff]  ;;  %v609_v13 = vpack.c.bf16 %v77_v5, %v76_v3  ;;  %v17_v17 = vld [vmem:[%s1011_s0 + $0x18] sm:$0xff] }
  0x13   :  { %602 = vmatpush3.bf16.msra.mxu1 %v601_v51  ;;  %572 = vmatprep.subr.bf16.mxu0 %v571_v52  ;;  %v47_v12 = vld [vmem:[%s1010_s1 + $0x68] sm:$0xff]  ;;  %v78_v15 = vld [vmem:[%s1010_s1 + $0x160] sm:$0xff]  ;;  %v611_v18 = vpack.c.bf16 %v95_v9, %v94_v8  ;;  %v64_v20 = vld [vmem:[%s1010_s1 + $0xf0] sm:$0xff] }
  0x14   :  { %604 = vmatprep.subr.bf16.mxu1 %v603_v56  ;;  %v15_v16 = vld [vmem:[%s1011_s0 + $0x8] sm:$0xff]  ;;  %v65_v21 = vld [vmem:[%s1010_s1 + $0xf8] sm:$0xff]  ;;  %v96_v22 = vld [vmem:[%s1010_s1 + $0x1f0] sm:$0xff]  ;;  %263 = vmatprep.mubr.f32.mxu1 %v17_v17  ;;  %v581_v24 = vpack.c.bf16 %v47_v12, %v46_v11 }
  0x15   :  { %v79_v19 = vld [vmem:[%s1010_s1 + $0x168] sm:$0xff]  ;;  %178 = vmatprep.mubr.f32.mxu0 %v15_v16  ;;  %v97_v23 = vld [vmem:[%s1010_s1 + $0x1f8] sm:$0xff]  ;;  %v583_v26 = vpack.c.bf16 %v65_v21, %v64_v20  ;;  %v48_v27 = vld [vmem:[%s1010_s1 + $0x70] sm:$0xff] }
  0x16   :  { %574 = vmatpush3.bf16.msra.mxu0 %v573_v62  ;;  %v613_v25 = vpack.c.bf16 %v79_v19, %v78_v15  ;;  %v49_v28 = vld [vmem:[%s1010_s1 + $0x78] sm:$0xff]  ;;  %v80_v29 = vld [vmem:[%s1010_s1 + $0x170] sm:$0xff]  ;;  %v615_v30 = vpack.c.bf16 %v97_v23, %v96_v22  ;;  %v98_v32 = vld [vmem:[%s1010_s1 + $0x200] sm:$0xff] }
  0x17   :  { %606 = vmatpush3.bf16.msra.mxu1 %v605_v63  ;;  %576 = vmatprep.subr.bf16.mxu0 %v575_v0  ;;  %v81_v31 = vld [vmem:[%s1010_s1 + $0x178] sm:$0xff]  ;;  %v99_v33 = vld [vmem:[%s1010_s1 + $0x208] sm:$0xff]  ;;  %v585_v34 = vpack.c.bf16 %v49_v28, %v48_v27  ;;  %v100_v37 = vld [vmem:[%s1010_s1 + $0x210] sm:$0xff] }
  0x18   :  { %608 = vmatprep.subr.bf16.mxu1 %v607_v4  ;;  %v617_v35 = vpack.c.bf16 %v81_v31, %v80_v29  ;;  %v619_v36 = vpack.c.bf16 %v99_v33, %v98_v32  ;;  %v101_v38 = vld [vmem:[%s1010_s1 + $0x218] sm:$0xff]  ;;  %v14_v39 = vld [vmem:[%s1011_s0] sm:$0xff]  ;;  %v16_v40 = vld [vmem:[%s1011_s0 + $0x10] sm:$0xff] }
  0x19   :  { %v623_v41 = vpack.c.bf16 %v101_v38, %v100_v37  ;;  %v102_v42 = vld [vmem:[%s1010_s1 + $0x220] sm:$0xff]  ;;  %v103_v43 = vld [vmem:[%s1010_s1 + $0x228] sm:$0xff]  ;;  %v20_v44 = vld [vmem:[%s1011_s0 + $0x30] sm:$0xff] }
  0x1a   :  { %578 = vmatpush3.bf16.msra.mxu0 %v577_v10  ;;  %v22_v45 = vld [vmem:[%s1011_s0 + $0x40] sm:$0xff]  ;;  %v19_v46 = vld [vmem:[%s1011_s0 + $0x28] sm:$0xff]  ;;  %v627_v47 = vpack.c.bf16 %v103_v43, %v102_v42  ;;  %v21_v48 = vld [vmem:[%s1011_s0 + $0x38] sm:$0xff] }
  0x1b   :  { %610 = vmatpush3.bf16.msra.mxu1 %v609_v13  ;;  %580 = vmatprep.subr.bf16.mxu0 %v579_v14  ;;  %v104_v49 = vld [vmem:[%s1010_s1 + $0x230] sm:$0xff]  ;;  %v105_v50 = vld [vmem:[%s1010_s1 + $0x238] sm:$0xff]  ;;  %v27_v52 = vld [vmem:[%s1011_s0 + $0x68] sm:$0xff] }
  0x1c   :  { %612 = vmatprep.subr.bf16.mxu1 %v611_v18  ;;  %v25_v51 = vld [vmem:[%s1011_s0 + $0x58] sm:$0xff]  ;;  %v24_v53 = vld [vmem:[%s1011_s0 + $0x50] sm:$0xff]  ;;  %v631_v54 = vpack.c.bf16 %v105_v50, %v104_v49  ;;  %v26_v55 = vld [vmem:[%s1011_s0 + $0x60] sm:$0xff] }
  0x1d   :  { %v106_v56 = vld [vmem:[%s1010_s1 + $0x240] sm:$0xff]  ;;  %v107_v57 = vld [vmem:[%s1010_s1 + $0x248] sm:$0xff]  ;;  %v32_v59 = vld [vmem:[%s1011_s0 + $0x90] sm:$0xff] }
  0x1e   :  { %582 = vmatpush3.bf16.msra.mxu0 %v581_v24  ;;  %v30_v58 = vld [vmem:[%s1011_s0 + $0x80] sm:$0xff]  ;;  %v29_v60 = vld [vmem:[%s1011_s0 + $0x78] sm:$0xff]  ;;  %v635_v61 = vpack.c.bf16 %v107_v57, %v106_v56  ;;  %v31_v62 = vld [vmem:[%s1011_s0 + $0x88] sm:$0xff] }
  0x1f   :  { %614 = vmatpush3.bf16.msra.mxu1 %v613_v25  ;;  %584 = vmatprep.subr.bf16.mxu0 %v583_v26  ;;  %v108_v63 = vld [vmem:[%s1010_s1 + $0x250] sm:$0xff]  ;;  %v109_v0 = vld [vmem:[%s1010_s1 + $0x258] sm:$0xff]  ;;  %v18_v1 = vld [vmem:[%s1011_s0 + $0x20] sm:$0xff] }
  0x20   :  { %616 = vmatprep.subr.bf16.mxu1 %v615_v30  ;;  %v28_v2 = vld [vmem:[%s1011_s0 + $0x70] sm:$0xff]  ;;  %v639_v3 = vpack.c.bf16 %v109_v0, %v108_v63  ;;  %v110_v4 = vld [vmem:[%s1010_s1 + $0x260] sm:$0xff]  ;;  %v111_v5 = vld [vmem:[%s1010_s1 + $0x268] sm:$0xff] }
  0x21   :  { %v643_v6 = vpack.c.bf16 %v111_v5, %v110_v4  ;;  %v112_v7 = vld [vmem:[%s1010_s1 + $0x270] sm:$0xff]  ;;  %v113_v8 = vld [vmem:[%s1010_s1 + $0x278] sm:$0xff]  ;;  %v23_v10 = vld [vmem:[%s1011_s0 + $0x48] sm:$0xff] }
  0x22   :  { %586 = vmatpush3.bf16.msra.mxu0 %v585_v34  ;;  %v647_v9 = vpack.c.bf16 %v113_v8, %v112_v7  ;;  %v33_v11 = vld [vmem:[%s1011_s0 + $0x98] sm:$0xff] }
  0x23   :  { %618 = vmatpush3.bf16.msra.mxu1 %v617_v35  ;;  %620 = vmatprep.subr.bf16.mxu0 %v619_v36 }
  0x24   :  { %651 = vmatprep.subr.bf16.mxu1 %v619_v36 }
  0x25   :  { %179 = vmatmul.mubr.f32.vlgmr.msra.gmra.mrb[0].mxu0 %v14_v39 }
  0x26   :  { %264 = vmatmul.mubr.f32.vlgmr.msra.gmra.mrb[0].mxu1 %v16_v40  ;;  %622 = vmatpush3.bf16.msra.mxu0 %v619_v36 }
  0x27   :  { %659 = vmatpush3.bf16.msra.mxu1 %v619_v36  ;;  %624 = vmatprep.subr.bf16.mxu0 %v623_v41 }
  0x28   :  { %652 = vmatprep.subr.bf16.mxu1 %v623_v41  ;;  %183 = vmatprep.mubr.f32.mxu0 %v20_v44 }
  0x29   :  { %268 = vmatprep.mubr.f32.mxu1 %v22_v45  ;;  %184 = vmatmul.mubr.f32.gmra.mrb[2].mxu0 %v19_v46 }
  0x2a   :  { %626 = vmatpush3.bf16.msra.mxu0 %v623_v41  ;;  %269 = vmatmul.mubr.f32.gmra.mrb[2].mxu1 %v21_v48 }
  0x2b   :  { %660 = vmatpush3.bf16.msra.mxu1 %v623_v41  ;;  %628 = vmatprep.subr.bf16.mxu0 %v627_v47 }
  0x2c   :  { %653 = vmatprep.subr.bf16.mxu1 %v627_v47  ;;  %188 = vmatprep.mubr.f32.mxu0 %v25_v51 }
  0x2d   :  { %273 = vmatprep.mubr.f32.mxu1 %v27_v52  ;;  %189 = vmatmul.mubr.f32.gmra.mrb[4].mxu0 %v24_v53 }
  0x2e   :  { %630 = vmatpush3.bf16.msra.mxu0 %v627_v47  ;;  %274 = vmatmul.mubr.f32.gmra.mrb[4].mxu1 %v26_v55 }
  0x2f   :  { %661 = vmatpush3.bf16.msra.mxu1 %v627_v47  ;;  %632 = vmatprep.subr.bf16.mxu0 %v631_v54 }
  0x30   :  { %654 = vmatprep.subr.bf16.mxu1 %v631_v54  ;;  %193 = vmatprep.mubr.f32.mxu0 %v30_v58 }
  0x31   :  { %278 = vmatprep.mubr.f32.mxu1 %v32_v59  ;;  %194 = vmatmul.mubr.f32.gmra.mrb[6].mxu0 %v29_v60 }
  0x32   :  { %634 = vmatpush3.bf16.msra.mxu0 %v631_v54  ;;  %279 = vmatmul.mubr.f32.gmra.mrb[6].mxu1 %v31_v62 }
  0x33   :  { %662 = vmatpush3.bf16.msra.mxu1 %v631_v54  ;;  %636 = vmatprep.subr.bf16.mxu0 %v635_v61 }
  0x34   :  { %655 = vmatprep.subr.bf16.mxu1 %v635_v61  ;;  %549 = vmatprep.mubr.f32.mxu0 %v18_v1 }
  0x35   :  { %552 = vmatprep.mubr.f32.mxu1 %v28_v2 }
  0x36   :  { %638 = vmatpush3.bf16.msra.mxu0 %v635_v61 }
  0x37   :  { %663 = vmatpush3.bf16.msra.mxu1 %v635_v61  ;;  %640 = vmatprep.subr.bf16.mxu0 %v639_v3 }
  0x38   :  { %656 = vmatprep.subr.bf16.mxu1 %v639_v3 }
  0x3a   :  { %642 = vmatpush3.bf16.msra.mxu0 %v639_v3 }
  0x3b   :  { %664 = vmatpush3.bf16.msra.mxu1 %v639_v3  ;;  %644 = vmatprep.subr.bf16.mxu0 %v643_v6 }
  0x3c   :  { %657 = vmatprep.subr.bf16.mxu1 %v643_v6 }
  0x3e   :  { %646 = vmatpush3.bf16.msra.mxu0 %v643_v6 }
  0x3f   :  { %665 = vmatpush3.bf16.msra.mxu1 %v643_v6  ;;  %648 = vmatprep.subr.bf16.mxu0 %v647_v9 }
  0x40   :  { %658 = vmatprep.subr.bf16.mxu1 %v647_v9 }
  0x42   :  { %650 = vmatpush3.bf16.msra.mxu0 %v647_v9 }
  0x43   :  { %666 = vmatpush3.bf16.msra.mxu1 %v647_v9 }
  0x45   :  { %550 = vmatmul.mubr.f32.vlgmr.msra.gmra.mrb[8].mxu0 %v23_v10 }
  0x46   :  { %553 = vmatmul.mubr.f32.vlgmr.msra.gmra.mrb[8].mxu1 %v33_v11 }
  0xf8   :  { %v441_v12 = vpop.f32.mrb[0].mxu0 }
  0xf9   :  { %v485_v13 = vpop.f32.mrb[0].mxu1  ;;  %v442_v14 = vpop.f32.mrb[1].mxu0 }
  0xfa   :  { %v443_v15 = vadd.f32 %v442_v14, %v441_v12  ;;  %v486_v16 = vpop.f32.mrb[1].mxu1 }
  0xfb   :  { %v487_v17 = vadd.f32 %v486_v16, %v485_v13 }
  0xfc   :  { %v444_v18 = vpop.f32.mrb[2].mxu0 }
  0xfd   :  { %v488_v19 = vpop.f32.mrb[2].mxu1  ;;  %v445_v20 = vpop.f32.mrb[3].mxu0  ;;  %v266_v21 = vadd.f32 %v487_v17, %v443_v15 }
  0xfe   :  { %v446_v22 = vadd.f32 %v445_v20, %v444_v18  ;;  %v489_v23 = vpop.f32.mrb[3].mxu1 }
  0xff   :  { %v490_v24 = vadd.f32 %v489_v23, %v488_v19 }
 0x100   :  { %v447_v25 = vpop.f32.mrb[4].mxu0 }
 0x101   :  { %v491_v26 = vpop.f32.mrb[4].mxu1  ;;  %v448_v27 = vpop.f32.mrb[5].mxu0  ;;  %v271_v28 = vadd.f32 %v490_v24, %v446_v22 }
 0x102   :  { %v449_v29 = vadd.f32 %v448_v27, %v447_v25  ;;  %v492_v30 = vpop.f32.mrb[5].mxu1 }
 0x103   :  { %v493_v31 = vadd.f32 %v492_v30, %v491_v26 }
 0x104   :  { %v450_v32 = vpop.f32.mrb[6].mxu0 }
 0x105   :  { %v494_v33 = vpop.f32.mrb[6].mxu1  ;;  %v451_v34 = vpop.f32.mrb[7].mxu0  ;;  %v276_v35 = vadd.f32 %v493_v31, %v449_v29 }
 0x106   :  { %v452_v36 = vadd.f32 %v451_v34, %v450_v32  ;;  %v495_v37 = vpop.f32.mrb[7].mxu1 }
 0x107   :  { %v496_v38 = vadd.f32 %v495_v37, %v494_v33 }
 0x109   :  { %v281_v39 = vadd.f32 %v496_v38, %v452_v36 }
 0x118   :  { %v551_v40 = vpop.f32.mrb[8].mxu0 }
 0x119   :  { %v356_v41 = vadd.f32 %v551_v40, %v271_v28  ;;  %v554_v42 = vpop.f32.mrb[8].mxu1  ;;  %v350_v43 = vpop.f32.mrb[9].mxu0 }
 0x11a   :  { %v366_v44 = vadd.f32 %v554_v42, %v281_v39  ;;  %v351_v45 = vadd.f32 %v350_v43, %v266_v21  ;;  %v360_v46 = vpop.f32.mrb[9].mxu1 }
 0x11b   :  { %370 = vst [vmem:[%s1012_s2 + $0x8] sm:$0xff] %v356_v41  ;;  %v384_v47 = vmul.f32 %v356_v41, %v356_v41  ;;  %v361_v48 = vadd.f32 %v360_v46, %v276_v35 }
 0x11c   :  { %372 = vst [vmem:[%s1012_s2 + $0x18] sm:$0xff] %v366_v44  ;;  %369 = vst [vmem:[%s1012_s2] sm:$0xff] %v351_v45  ;;  %v373_v49 = vadd.f32 %v356_v41, %v351_v45  ;;  %v383_v50 = vmul.f32 %v351_v45, %v351_v45  ;;  %v386_v54 = vmul.f32 %v366_v44, %v366_v44 }
 0x11d   :  { %371 = vst [vmem:[%s1012_s2 + $0x10] sm:$0xff] %v361_v48  ;;  %v385_v53 = vmul.f32 %v361_v48, %v361_v48 }
 0x11e   :  { %v387_v51 = vadd.f32 %v384_v47, %v383_v50  ;;  %v374_v52 = vadd.f32 %v373_v49, %v361_v48 }
 0x120   :  { %v375_v55 = vadd.f32 %v374_v52, %v366_v44  ;;  %v388_v56 = vadd.f32 %v387_v51, %v385_v53 }
 0x122   :  { %v376_v57 = vrot.slane %v375_v55, 4  ;;  %v389_v58 = vadd.f32 %v388_v56, %v386_v54 }
 0x124   :  { %v377_v59 = vadd.f32 %v376_v57, %v375_v55  ;;  %v390_v60 = vrot.slane %v389_v58, 4 }
 0x126   :  { %v378_v61 = vrot.slane %v377_v59, 2  ;;  %v391_v62 = vadd.f32 %v390_v60, %v389_v58 }
 0x128   :  { %v379_v63 = vadd.f32 %v378_v61, %v377_v59  ;;  %v392_v0 = vrot.slane %v391_v62, 2 }
 0x12a   :  { %v380_v1 = vrot.slane %v379_v63, 1  ;;  %v393_v2 = vadd.f32 %v392_v0, %v391_v62 }
 0x12c   :  { %v381_v3 = vadd.f32 %v380_v1, %v379_v63  ;;  %v394_v4 = vrot.slane %v393_v2, 1 }
 0x12e   :  { %382 = vst [vmem:[%s1013_s3] sm:$0x1] %v381_v3  ;;  %v395_v5 = vadd.f32 %v394_v4, %v393_v2 }
 0x130   :  { %396 = vst [vmem:[%s1014_s4] sm:$0x1] %v395_v5 }

// kernel: rgression_net_forward.16
= control target key start
LH: loop header
LB: loop body
LE: loop exit
PB: predicated region body
PF: predicated region fallthrough
CT: control target
= control target key end

     0   :  { %s132_s0 = inlined_call_operand.vmem [shape: f32[32,128], index: 0, kind: input, shape index: {}]   ;;  %s133_s1 = inlined_call_operand.vmem [shape: f32[1,128], index: 1, kind: input, shape index: {}]   ;;  %s134_s2 = inlined_call_operand.vmem [shape: f32[1,128], index: 2, kind: input, shape index: {}]   ;;  %s135_s3 = inlined_call_operand.vmem [shape: f32[32,128], index: 3, kind: input, shape index: {}]   ;;  %s136_s4 = inlined_call_operand.vmem [shape: f32[32,128], index: 4, kind: output, shape index: {}]  }
   0x1   :  { %v17_v0 = vld [vmem:[%s132_s0] sm:$0xff]  ;;  %v18_v4 = vld [vmem:[%s132_s0 + $0x8] sm:$0xff]  ;;  %v19_v7 = vld [vmem:[%s132_s0 + $0x10] sm:$0xff] }
   0x2   :  { %v63_v1 = vld [vmem:[%s133_s1] ss:$0 sm:$0xff]  ;;  %v20_v8 = vld [vmem:[%s132_s0 + $0x18] sm:$0xff]  ;;  %v44_v10 = vld [vmem:[%s135_s3 + $0x8] sm:$0xff] }
   0x3   :  { %v64_v2 = vld [vmem:[%s134_s2] ss:$0 sm:$0xff]  ;;  %v28_v3 = vmul.f32 %v63_v1, %v17_v0  ;;  %v29_v6 = vmul.f32 %v63_v1, %v18_v4  ;;  %v30_v11 = vmul.f32 %v63_v1, %v19_v7  ;;  %v31_v12 = vmul.f32 %v63_v1, %v20_v8  ;;  %v45_v14 = vld [vmem:[%s135_s3 + $0x10] sm:$0xff]  ;;  %v46_v15 = vld [vmem:[%s135_s3 + $0x18] sm:$0xff] }
   0x4   :  { %v43_v5 = vld [vmem:[%s135_s3] sm:$0xff] }
   0x5   :  { %v39_v9 = vadd.f32 %v64_v2, %v28_v3  ;;  %v40_v13 = vadd.f32 %v64_v2, %v29_v6  ;;  %v41_v17 = vadd.f32 %v64_v2, %v30_v11  ;;  %v42_v18 = vadd.f32 %v64_v2, %v31_v12 }
   0x7   :  { %v47_v16 = vmul.f32 %v43_v5, %v39_v9  ;;  %v48_v19 = vmul.f32 %v44_v10, %v40_v13  ;;  %v49_v21 = vmul.f32 %v45_v14, %v41_v17  ;;  %v50_v22 = vmul.f32 %v46_v15, %v42_v18 }
   0x9   :  { %v51_v20 = vmax.f32 %v47_v16, 0.0  ;;  %v52_v23 = vmax.f32 %v48_v19, 0.0  ;;  %v53_v24 = vmax.f32 %v49_v21, 0.0  ;;  %v54_v25 = vmax.f32 %v50_v22, 0.0 }
   0xb   :  { %55 = vst [vmem:[%s136_s4] sm:$0xff] %v51_v20  ;;  %56 = vst [vmem:[%s136_s4 + $0x8] sm:$0xff] %v52_v23 }
   0xc   :  { %57 = vst [vmem:[%s136_s4 + $0x10] sm:$0xff] %v53_v24  ;;  %58 = vst [vmem:[%s136_s4 + $0x18] sm:$0xff] %v54_v25 }

// kernel: rgression_net_forward.18
= control target key start
LH: loop header
LB: loop body
LE: loop exit
PB: predicated region body
PF: predicated region fallthrough
CT: control target
= control target key end

     0   :  { %v18_v0 = vlaneseq  ;;  %s90_s1 = inlined_call_operand.vmem [shape: f32[1,256], index: 1, kind: input, shape index: {}]   ;;  %s91_s2 = inlined_call_operand.vmem [shape: f32[1,256], index: 2, kind: input, shape index: {}]   ;;  %s92_s0 = inlined_call_operand.vmem [shape: f32[8,256], index: 0, kind: input, shape index: {}]   ;;  %s93_s3 = inlined_call_operand.vmem [shape: f32[8,256], index: 3, kind: output, shape index: {}]  }
   0x1   :  { %v16_v2 = vld [vmem:[%s90_s1] sm:$0x3]  ;;  %v15_v7 = vld [vmem:[%s92_s0 + $0x8] sm:$0xff] }
   0x2   :  { %v19_v1 = vshrl.u32 %v18_v0, 7  ;;  %v30_v3 = vld [vmem:[%s91_s2] sm:$0x3] }
   0x3   :  { %v14_v6 = vld [vmem:[%s92_s0] sm:$0xff] }
   0x4   :  { %v20_v4 = vsub.s32 0, %v19_v1  ;;  %v24_v5 = vsub.s32 1, %v19_v1 }
   0x6   :  { %v21_v8 = vrot.slane %v16_v2, %v20_v4  ;;  %v35_v9 = vrot.slane %v30_v3, %v20_v4  ;;  %v25_v10 = vrot.slane %v16_v2, %v24_v5  ;;  %v39_v11 = vrot.slane %v30_v3, %v24_v5 }
   0x8   :  { %v28_v12 = vmul.f32 %v21_v8, %v14_v6  ;;  %v29_v13 = vmul.f32 %v25_v10, %v15_v7 }
   0xa   :  { %v42_v14 = vadd.f32 %v35_v9, %v28_v12  ;;  %v43_v15 = vadd.f32 %v39_v11, %v29_v13 }
   0xc   :  { %v44_v16 = vmax.f32 %v42_v14, 0.0  ;;  %v45_v17 = vmax.f32 %v43_v15, 0.0 }
   0xe   :  { %46 = vst [vmem:[%s93_s3] sm:$0xff] %v44_v16  ;;  %47 = vst [vmem:[%s93_s3 + $0x8] sm:$0xff] %v45_v17 }

// kernel: rgression_net_forward.17
= control target key start
LH: loop header
LB: loop body
LE: loop exit
PB: predicated region body
PF: predicated region fallthrough
CT: control target
= control target key end

     0   :  { %s1976_s1 = inlined_call_operand.vmem [shape: f32[1152,256], index: 1, kind: input, shape index: {}]   ;;  %s1977_s0 = inlined_call_operand.vmem [shape: f32[8,1152], index: 0, kind: input, shape index: {}]   ;;  %s1978_s2 = inlined_call_operand.vmem [shape: f32[8,256], index: 2, kind: output, shape index: {0}]   ;;  %s1979_s3 = inlined_call_operand.vmem [shape: f32[1,256], index: 3, kind: output, shape index: {1}]   ;;  %s1980_s4 = inlined_call_operand.vmem [shape: f32[1,256], index: 4, kind: output, shape index: {2}]  }
   0x1   :  { %v24_v0 = vld [vmem:[%s1976_s1 + $0x8] sm:$0xff]  ;;  %v26_v1 = vld [vmem:[%s1976_s1 + $0x18] sm:$0xff]  ;;  %v23_v5 = vld [vmem:[%s1976_s1] sm:$0xff] }
   0x2   :  { %v152_v2 = vld [vmem:[%s1976_s1 + $0x408] sm:$0xff]  ;;  %v748_v3 = vpack.c.bf16 %v26_v1, %v24_v0  ;;  %v154_v4 = vld [vmem:[%s1976_s1 + $0x418] sm:$0xff]  ;;  %v25_v6 = vld [vmem:[%s1976_s1 + $0x10] sm:$0xff] }
   0x3   :  { %v876_v7 = vpack.c.bf16 %v154_v4, %v152_v2  ;;  %v750_v8 = vpack.c.bf16 %v25_v6, %v23_v5  ;;  %v151_v9 = vld [vmem:[%s1976_s1 + $0x400] sm:$0xff]  ;;  %v153_v10 = vld [vmem:[%s1976_s1 + $0x410] sm:$0xff]  ;;  %v28_v11 = vld [vmem:[%s1976_s1 + $0x28] sm:$0xff] }
   0x4   :  { %749 = vmatprep.subr.bf16.mxu1 %v748_v3  ;;  %v878_v12 = vpack.c.bf16 %v153_v10, %v151_v9  ;;  %v30_v13 = vld [vmem:[%s1976_s1 + $0x38] sm:$0xff]  ;;  %v156_v14 = vld [vmem:[%s1976_s1 + $0x428] sm:$0xff]  ;;  %v27_v18 = vld [vmem:[%s1976_s1 + $0x20] sm:$0xff] }
   0x5   :  { %v158_v15 = vld [vmem:[%s1976_s1 + $0x438] sm:$0xff]  ;;  %877 = vmatprep.subr.bf16.mxu0 %v876_v7  ;;  %751 = vmatpush1.bf16.msra.mxu1 %v750_v8  ;;  %v752_v16 = vpack.c.bf16 %v30_v13, %v28_v11  ;;  %v29_v19 = vld [vmem:[%s1976_s1 + $0x30] sm:$0xff]  ;;  %v155_v20 = vld [vmem:[%s1976_s1 + $0x420] sm:$0xff] }
   0x6   :  { %v880_v17 = vpack.c.bf16 %v158_v15, %v156_v14  ;;  %879 = vmatpush1.bf16.msra.mxu0 %v878_v12  ;;  %v754_v21 = vpack.c.bf16 %v29_v19, %v27_v18  ;;  %v157_v22 = vld [vmem:[%s1976_s1 + $0x430] sm:$0xff]  ;;  %v32_v23 = vld [vmem:[%s1976_s1 + $0x48] sm:$0xff]  ;;  %v34_v24 = vld [vmem:[%s1976_s1 + $0x58] sm:$0xff] }
   0x7   :  { %753 = vmatprep.subr.bf16.mxu1 %v752_v16  ;;  %v882_v25 = vpack.c.bf16 %v157_v22, %v155_v20  ;;  %v756_v26 = vpack.c.bf16 %v34_v24, %v32_v23  ;;  %v160_v27 = vld [vmem:[%s1976_s1 + $0x448] sm:$0xff]  ;;  %v162_v28 = vld [vmem:[%s1976_s1 + $0x458] sm:$0xff]  ;;  %v31_v29 = vld [vmem:[%s1976_s1 + $0x40] sm:$0xff] }
   0x8   :  { %881 = vmatprep.subr.bf16.mxu0 %v880_v17  ;;  %v884_v30 = vpack.c.bf16 %v162_v28, %v160_v27  ;;  %v33_v31 = vld [vmem:[%s1976_s1 + $0x50] sm:$0xff]  ;;  %v159_v32 = vld [vmem:[%s1976_s1 + $0x440] sm:$0xff]  ;;  %v36_v35 = vld [vmem:[%s1976_s1 + $0x68] sm:$0xff] }
   0x9   :  { %v161_v33 = vld [vmem:[%s1976_s1 + $0x450] sm:$0xff]  ;;  %755 = vmatpush1.bf16.msra.mxu1 %v754_v21  ;;  %v758_v34 = vpack.c.bf16 %v33_v31, %v31_v29  ;;  %v38_v36 = vld [vmem:[%s1976_s1 + $0x78] sm:$0xff]  ;;  %v164_v37 = vld [vmem:[%s1976_s1 + $0x468] sm:$0xff] }
   0xa   :  { %883 = vmatpush1.bf16.msra.mxu0 %v882_v25  ;;  %757 = vmatprep.subr.bf16.mxu1 %v756_v26  ;;  %v886_v38 = vpack.c.bf16 %v161_v33, %v159_v32  ;;  %v760_v39 = vpack.c.bf16 %v38_v36, %v36_v35  ;;  %v166_v40 = vld [vmem:[%s1976_s1 + $0x478] sm:$0xff]  ;;  %v35_v41 = vld [vmem:[%s1976_s1 + $0x60] sm:$0xff]  ;;  %v37_v42 = vld [vmem:[%s1976_s1 + $0x70] sm:$0xff] }
   0xb   :  { %885 = vmatprep.subr.bf16.mxu0 %v884_v30  ;;  %v888_v43 = vpack.c.bf16 %v166_v40, %v164_v37  ;;  %v163_v44 = vld [vmem:[%s1976_s1 + $0x460] sm:$0xff]  ;;  %v165_v45 = vld [vmem:[%s1976_s1 + $0x470] sm:$0xff]  ;;  %v40_v46 = vld [vmem:[%s1976_s1 + $0x88] sm:$0xff]  ;;  %v762_v50 = vpack.c.bf16 %v37_v42, %v35_v41 }
   0xc   :  { %v42_v47 = vld [vmem:[%s1976_s1 + $0x98] sm:$0xff]  ;;  %v168_v48 = vld [vmem:[%s1976_s1 + $0x488] sm:$0xff]  ;;  %v890_v51 = vpack.c.bf16 %v165_v45, %v163_v44  ;;  %v39_v53 = vld [vmem:[%s1976_s1 + $0x80] sm:$0xff] }
   0xd   :  { %v170_v49 = vld [vmem:[%s1976_s1 + $0x498] sm:$0xff]  ;;  %759 = vmatpush1.bf16.msra.mxu1 %v758_v34  ;;  %v764_v52 = vpack.c.bf16 %v42_v47, %v40_v46  ;;  %v41_v54 = vld [vmem:[%s1976_s1 + $0x90] sm:$0xff]  ;;  %v167_v55 = vld [vmem:[%s1976_s1 + $0x480] sm:$0xff] }
   0xe   :  { %887 = vmatpush1.bf16.msra.mxu0 %v886_v38  ;;  %761 = vmatprep.subr.bf16.mxu1 %v760_v39  ;;  %v892_v56 = vpack.c.bf16 %v170_v49, %v168_v48  ;;  %v169_v57 = vld [vmem:[%s1976_s1 + $0x490] sm:$0xff]  ;;  %v44_v58 = vld [vmem:[%s1976_s1 + $0xa8] sm:$0xff]  ;;  %v46_v59 = vld [vmem:[%s1976_s1 + $0xb8] sm:$0xff]  ;;  %v766_v62 = vpack.c.bf16 %v41_v54, %v39_v53 }
   0xf   :  { %889 = vmatprep.subr.bf16.mxu0 %v888_v43  ;;  %v172_v60 = vld [vmem:[%s1976_s1 + $0x4a8] sm:$0xff]  ;;  %v174_v61 = vld [vmem:[%s1976_s1 + $0x4b8] sm:$0xff]  ;;  %v894_v63 = vpack.c.bf16 %v169_v57, %v167_v55  ;;  %v768_v0 = vpack.c.bf16 %v46_v59, %v44_v58  ;;  %v43_v1 = vld [vmem:[%s1976_s1 + $0xa0] sm:$0xff] }
  0x10   :  { %v45_v2 = vld [vmem:[%s1976_s1 + $0xb0] sm:$0xff]  ;;  %v171_v3 = vld [vmem:[%s1976_s1 + $0x4a0] sm:$0xff]  ;;  %v896_v4 = vpack.c.bf16 %v174_v61, %v172_v60  ;;  %v48_v6 = vld [vmem:[%s1976_s1 + $0xc8] sm:$0xff] }
  0x11   :  { %763 = vmatpush1.bf16.msra.mxu1 %v762_v50  ;;  %v173_v5 = vld [vmem:[%s1976_s1 + $0x4b0] sm:$0xff]  ;;  %v50_v7 = vld [vmem:[%s1976_s1 + $0xd8] sm:$0xff]  ;;  %v176_v8 = vld [vmem:[%s1976_s1 + $0x4c8] sm:$0xff]  ;;  %v770_v10 = vpack.c.bf16 %v45_v2, %v43_v1 }
  0x12   :  { %891 = vmatpush1.bf16.msra.mxu0 %v890_v51  ;;  %765 = vmatprep.subr.bf16.mxu1 %v764_v52  ;;  %v178_v9 = vld [vmem:[%s1976_s1 + $0x4d8] sm:$0xff]  ;;  %v898_v11 = vpack.c.bf16 %v173_v5, %v171_v3  ;;  %v772_v12 = vpack.c.bf16 %v50_v7, %v48_v6  ;;  %v47_v13 = vld [vmem:[%s1976_s1 + $0xc0] sm:$0xff]  ;;  %v49_v14 = vld [vmem:[%s1976_s1 + $0xd0] sm:$0xff] }
  0x13   :  { %893 = vmatprep.subr.bf16.mxu0 %v892_v56  ;;  %v175_v15 = vld [vmem:[%s1976_s1 + $0x4c0] sm:$0xff]  ;;  %v900_v16 = vpack.c.bf16 %v178_v9, %v176_v8  ;;  %v177_v17 = vld [vmem:[%s1976_s1 + $0x4d0] sm:$0xff]  ;;  %v52_v18 = vld [vmem:[%s1976_s1 + $0xe8] sm:$0xff]  ;;  %v774_v22 = vpack.c.bf16 %v49_v14, %v47_v13 }
  0x14   :  { %v54_v19 = vld [vmem:[%s1976_s1 + $0xf8] sm:$0xff]  ;;  %v180_v20 = vld [vmem:[%s1976_s1 + $0x4e8] sm:$0xff]  ;;  %v902_v23 = vpack.c.bf16 %v177_v17, %v175_v15  ;;  %v51_v25 = vld [vmem:[%s1976_s1 + $0xe0] sm:$0xff] }
  0x15   :  { %767 = vmatpush1.bf16.msra.mxu1 %v766_v62  ;;  %v182_v21 = vld [vmem:[%s1976_s1 + $0x4f8] sm:$0xff]  ;;  %v776_v24 = vpack.c.bf16 %v54_v19, %v52_v18  ;;  %v53_v26 = vld [vmem:[%s1976_s1 + $0xf0] sm:$0xff]  ;;  %v179_v27 = vld [vmem:[%s1976_s1 + $0x4e0] sm:$0xff] }
  0x16   :  { %895 = vmatpush1.bf16.msra.mxu0 %v894_v63  ;;  %769 = vmatprep.subr.bf16.mxu1 %v768_v0  ;;  %v904_v28 = vpack.c.bf16 %v182_v21, %v180_v20  ;;  %v181_v29 = vld [vmem:[%s1976_s1 + $0x4f0] sm:$0xff]  ;;  %v56_v30 = vld [vmem:[%s1976_s1 + $0x108] sm:$0xff]  ;;  %v58_v31 = vld [vmem:[%s1976_s1 + $0x118] sm:$0xff]  ;;  %v778_v34 = vpack.c.bf16 %v53_v26, %v51_v25 }
  0x17   :  { %897 = vmatprep.subr.bf16.mxu0 %v896_v4  ;;  %v184_v32 = vld [vmem:[%s1976_s1 + $0x508] sm:$0xff]  ;;  %v186_v33 = vld [vmem:[%s1976_s1 + $0x518] sm:$0xff]  ;;  %v906_v35 = vpack.c.bf16 %v181_v29, %v179_v27  ;;  %v780_v36 = vpack.c.bf16 %v58_v31, %v56_v30  ;;  %v55_v37 = vld [vmem:[%s1976_s1 + $0x100] sm:$0xff] }
  0x18   :  { %v57_v38 = vld [vmem:[%s1976_s1 + $0x110] sm:$0xff]  ;;  %v183_v39 = vld [vmem:[%s1976_s1 + $0x500] sm:$0xff]  ;;  %v908_v40 = vpack.c.bf16 %v186_v33, %v184_v32  ;;  %v60_v42 = vld [vmem:[%s1976_s1 + $0x128] sm:$0xff] }
  0x19   :  { %771 = vmatpush1.bf16.msra.mxu1 %v770_v10  ;;  %v185_v41 = vld [vmem:[%s1976_s1 + $0x510] sm:$0xff]  ;;  %v62_v43 = vld [vmem:[%s1976_s1 + $0x138] sm:$0xff]  ;;  %v188_v44 = vld [vmem:[%s1976_s1 + $0x528] sm:$0xff]  ;;  %v782_v46 = vpack.c.bf16 %v57_v38, %v55_v37 }
  0x1a   :  { %899 = vmatpush1.bf16.msra.mxu0 %v898_v11  ;;  %773 = vmatprep.subr.bf16.mxu1 %v772_v12  ;;  %v190_v45 = vld [vmem:[%s1976_s1 + $0x538] sm:$0xff]  ;;  %v910_v47 = vpack.c.bf16 %v185_v41, %v183_v39  ;;  %v784_v48 = vpack.c.bf16 %v62_v43, %v60_v42  ;;  %v59_v49 = vld [vmem:[%s1976_s1 + $0x120] sm:$0xff]  ;;  %v61_v50 = vld [vmem:[%s1976_s1 + $0x130] sm:$0xff] }
  0x1b   :  { %901 = vmatprep.subr.bf16.mxu0 %v900_v16  ;;  %v187_v51 = vld [vmem:[%s1976_s1 + $0x520] sm:$0xff]  ;;  %v912_v52 = vpack.c.bf16 %v190_v45, %v188_v44  ;;  %v189_v53 = vld [vmem:[%s1976_s1 + $0x530] sm:$0xff]  ;;  %v64_v54 = vld [vmem:[%s1976_s1 + $0x148] sm:$0xff]  ;;  %v786_v58 = vpack.c.bf16 %v61_v50, %v59_v49 }
  0x1c   :  { %v66_v55 = vld [vmem:[%s1976_s1 + $0x158] sm:$0xff]  ;;  %v192_v56 = vld [vmem:[%s1976_s1 + $0x548] sm:$0xff]  ;;  %v914_v59 = vpack.c.bf16 %v189_v53, %v187_v51  ;;  %v63_v61 = vld [vmem:[%s1976_s1 + $0x140] sm:$0xff] }
  0x1d   :  { %775 = vmatpush1.bf16.msra.mxu1 %v774_v22  ;;  %v194_v57 = vld [vmem:[%s1976_s1 + $0x558] sm:$0xff]  ;;  %v788_v60 = vpack.c.bf16 %v66_v55, %v64_v54  ;;  %v65_v62 = vld [vmem:[%s1976_s1 + $0x150] sm:$0xff]  ;;  %v191_v63 = vld [vmem:[%s1976_s1 + $0x540] sm:$0xff] }
  0x1e   :  { %903 = vmatpush1.bf16.msra.mxu0 %v902_v23  ;;  %777 = vmatprep.subr.bf16.mxu1 %v776_v24  ;;  %v916_v0 = vpack.c.bf16 %v194_v57, %v192_v56  ;;  %v193_v1 = vld [vmem:[%s1976_s1 + $0x550] sm:$0xff]  ;;  %v68_v2 = vld [vmem:[%s1976_s1 + $0x168] sm:$0xff]  ;;  %v70_v3 = vld [vmem:[%s1976_s1 + $0x178] sm:$0xff]  ;;  %v790_v6 = vpack.c.bf16 %v65_v62, %v63_v61 }
  0x1f   :  { %905 = vmatprep.subr.bf16.mxu0 %v904_v28  ;;  %v196_v4 = vld [vmem:[%s1976_s1 + $0x568] sm:$0xff]  ;;  %v198_v5 = vld [vmem:[%s1976_s1 + $0x578] sm:$0xff]  ;;  %v67_v7 = vld [vmem:[%s1976_s1 + $0x160] sm:$0xff]  ;;  %v918_v8 = vpack.c.bf16 %v193_v1, %v191_v63  ;;  %v792_v9 = vpack.c.bf16 %v70_v3, %v68_v2 }
  0x20   :  { %v69_v10 = vld [vmem:[%s1976_s1 + $0x170] sm:$0xff]  ;;  %v195_v11 = vld [vmem:[%s1976_s1 + $0x560] sm:$0xff]  ;;  %v920_v13 = vpack.c.bf16 %v198_v5, %v196_v4  ;;  %v72_v14 = vld [vmem:[%s1976_s1 + $0x188] sm:$0xff] }
  0x21   :  { %779 = vmatpush1.bf16.msra.mxu1 %v778_v34  ;;  %v197_v12 = vld [vmem:[%s1976_s1 + $0x570] sm:$0xff]  ;;  %v74_v15 = vld [vmem:[%s1976_s1 + $0x198] sm:$0xff]  ;;  %v15_v16 = vld [vmem:[%s1977_s0 + $0x8] sm:$0xff]  ;;  %v794_v20 = vpack.c.bf16 %v69_v10, %v67_v7 }
  0x22   :  { %907 = vmatpush1.bf16.msra.mxu0 %v906_v35  ;;  %781 = vmatprep.subr.bf16.mxu1 %v780_v36  ;;  %v200_v17 = vld [vmem:[%s1976_s1 + $0x588] sm:$0xff]  ;;  %v202_v18 = vld [vmem:[%s1976_s1 + $0x598] sm:$0xff]  ;;  %v922_v21 = vpack.c.bf16 %v197_v12, %v195_v11  ;;  %v796_v22 = vpack.c.bf16 %v74_v15, %v72_v14  ;;  %v71_v23 = vld [vmem:[%s1976_s1 + $0x180] sm:$0xff] }
  0x23   :  { %909 = vmatprep.subr.bf16.mxu0 %v908_v40  ;;  %375 = vmatprep.mubr.f32.mxu1 %v15_v16  ;;  %v19_v19 = vld [vmem:[%s1977_s0 + $0x28] sm:$0xff]  ;;  %v73_v24 = vld [vmem:[%s1976_s1 + $0x190] sm:$0xff]  ;;  %v199_v25 = vld [vmem:[%s1976_s1 + $0x580] sm:$0xff]  ;;  %v924_v26 = vpack.c.bf16 %v202_v18, %v200_v17 }
  0x24   :  { %517 = vmatprep.mubr.f32.mxu0 %v19_v19  ;;  %v201_v27 = vld [vmem:[%s1976_s1 + $0x590] sm:$0xff]  ;;  %v76_v28 = vld [vmem:[%s1976_s1 + $0x1a8] sm:$0xff]  ;;  %v78_v29 = vld [vmem:[%s1976_s1 + $0x1b8] sm:$0xff]  ;;  %v798_v32 = vpack.c.bf16 %v73_v24, %v71_v23 }
  0x25   :  { %783 = vmatpush1.bf16.msra.mxu1 %v782_v46  ;;  %v204_v30 = vld [vmem:[%s1976_s1 + $0x5a8] sm:$0xff]  ;;  %v206_v31 = vld [vmem:[%s1976_s1 + $0x5b8] sm:$0xff]  ;;  %v926_v33 = vpack.c.bf16 %v201_v27, %v199_v25  ;;  %v800_v34 = vpack.c.bf16 %v78_v29, %v76_v28  ;;  %v75_v35 = vld [vmem:[%s1976_s1 + $0x1a0] sm:$0xff] }
  0x26   :  { %911 = vmatpush1.bf16.msra.mxu0 %v910_v47  ;;  %785 = vmatprep.subr.bf16.mxu1 %v784_v48  ;;  %v77_v36 = vld [vmem:[%s1976_s1 + $0x1b0] sm:$0xff]  ;;  %v203_v37 = vld [vmem:[%s1976_s1 + $0x5a0] sm:$0xff]  ;;  %v928_v38 = vpack.c.bf16 %v206_v31, %v204_v30  ;;  %v80_v40 = vld [vmem:[%s1976_s1 + $0x1c8] sm:$0xff] }
  0x27   :  { %913 = vmatprep.subr.bf16.mxu0 %v912_v52  ;;  %v205_v39 = vld [vmem:[%s1976_s1 + $0x5b0] sm:$0xff]  ;;  %v82_v41 = vld [vmem:[%s1976_s1 + $0x1d8] sm:$0xff]  ;;  %v208_v42 = vld [vmem:[%s1976_s1 + $0x5c8] sm:$0xff]  ;;  %v802_v44 = vpack.c.bf16 %v77_v36, %v75_v35 }
  0x28   :  { %v210_v43 = vld [vmem:[%s1976_s1 + $0x5d8] sm:$0xff]  ;;  %v930_v45 = vpack.c.bf16 %v205_v39, %v203_v37  ;;  %v804_v46 = vpack.c.bf16 %v82_v41, %v80_v40  ;;  %v79_v47 = vld [vmem:[%s1976_s1 + $0x1c0] sm:$0xff]  ;;  %v81_v48 = vld [vmem:[%s1976_s1 + $0x1d0] sm:$0xff] }
  0x29   :  { %787 = vmatpush1.bf16.msra.mxu1 %v786_v58  ;;  %v207_v49 = vld [vmem:[%s1976_s1 + $0x5c0] sm:$0xff]  ;;  %v932_v50 = vpack.c.bf16 %v210_v43, %v208_v42  ;;  %v209_v51 = vld [vmem:[%s1976_s1 + $0x5d0] sm:$0xff]  ;;  %v84_v52 = vld [vmem:[%s1976_s1 + $0x1e8] sm:$0xff]  ;;  %v806_v56 = vpack.c.bf16 %v81_v48, %v79_v47 }
  0x2a   :  { %915 = vmatpush1.bf16.msra.mxu0 %v914_v59  ;;  %789 = vmatprep.subr.bf16.mxu1 %v788_v60  ;;  %v86_v53 = vld [vmem:[%s1976_s1 + $0x1f8] sm:$0xff]  ;;  %v212_v54 = vld [vmem:[%s1976_s1 + $0x5e8] sm:$0xff]  ;;  %v934_v57 = vpack.c.bf16 %v209_v51, %v207_v49  ;;  %v83_v59 = vld [vmem:[%s1976_s1 + $0x1e0] sm:$0xff] }
  0x2b   :  { %917 = vmatprep.subr.bf16.mxu0 %v916_v0  ;;  %v214_v55 = vld [vmem:[%s1976_s1 + $0x5f8] sm:$0xff]  ;;  %v808_v58 = vpack.c.bf16 %v86_v53, %v84_v52  ;;  %v85_v60 = vld [vmem:[%s1976_s1 + $0x1f0] sm:$0xff]  ;;  %v211_v61 = vld [vmem:[%s1976_s1 + $0x5e0] sm:$0xff] }
  0x2c   :  { %v936_v62 = vpack.c.bf16 %v214_v55, %v212_v54  ;;  %v213_v63 = vld [vmem:[%s1976_s1 + $0x5f0] sm:$0xff]  ;;  %v88_v0 = vld [vmem:[%s1976_s1 + $0x208] sm:$0xff]  ;;  %v90_v1 = vld [vmem:[%s1976_s1 + $0x218] sm:$0xff]  ;;  %v810_v4 = vpack.c.bf16 %v85_v60, %v83_v59 }
  0x2d   :  { %791 = vmatpush1.bf16.msra.mxu1 %v790_v6  ;;  %v216_v2 = vld [vmem:[%s1976_s1 + $0x608] sm:$0xff]  ;;  %v218_v3 = vld [vmem:[%s1976_s1 + $0x618] sm:$0xff]  ;;  %v938_v5 = vpack.c.bf16 %v213_v63, %v211_v61  ;;  %v812_v6 = vpack.c.bf16 %v90_v1, %v88_v0  ;;  %v87_v7 = vld [vmem:[%s1976_s1 + $0x200] sm:$0xff] }
  0x2e   :  { %919 = vmatpush1.bf16.msra.mxu0 %v918_v8  ;;  %793 = vmatprep.subr.bf16.mxu1 %v792_v9  ;;  %v89_v8 = vld [vmem:[%s1976_s1 + $0x210] sm:$0xff]  ;;  %v215_v9 = vld [vmem:[%s1976_s1 + $0x600] sm:$0xff]  ;;  %v940_v10 = vpack.c.bf16 %v218_v3, %v216_v2  ;;  %v92_v12 = vld [vmem:[%s1976_s1 + $0x228] sm:$0xff] }
  0x2f   :  { %921 = vmatprep.subr.bf16.mxu0 %v920_v13  ;;  %v217_v11 = vld [vmem:[%s1976_s1 + $0x610] sm:$0xff]  ;;  %v94_v13 = vld [vmem:[%s1976_s1 + $0x238] sm:$0xff]  ;;  %v220_v14 = vld [vmem:[%s1976_s1 + $0x628] sm:$0xff]  ;;  %v814_v17 = vpack.c.bf16 %v89_v8, %v87_v7 }
  0x30   :  { %v222_v15 = vld [vmem:[%s1976_s1 + $0x638] sm:$0xff]  ;;  %v14_v16 = vld [vmem:[%s1977_s0] sm:$0xff]  ;;  %v942_v19 = vpack.c.bf16 %v217_v11, %v215_v9  ;;  %v221_v25 = vld [vmem:[%s1976_s1 + $0x630] sm:$0xff] }
  0x31   :  { %795 = vmatpush1.bf16.msra.mxu1 %v794_v20  ;;  %v18_v18 = vld [vmem:[%s1977_s0 + $0x20] sm:$0xff]  ;;  %v816_v20 = vpack.c.bf16 %v94_v13, %v92_v12  ;;  %v944_v24 = vpack.c.bf16 %v222_v15, %v220_v14  ;;  %v98_v27 = vld [vmem:[%s1976_s1 + $0x258] sm:$0xff]  ;;  %v224_v28 = vld [vmem:[%s1976_s1 + $0x648] sm:$0xff] }
  0x32   :  { %923 = vmatpush1.bf16.msra.mxu0 %v922_v21  ;;  %797 = vmatprep.subr.bf16.mxu1 %v796_v22  ;;  %v91_v21 = vld [vmem:[%s1976_s1 + $0x220] sm:$0xff]  ;;  %v93_v22 = vld [vmem:[%s1976_s1 + $0x230] sm:$0xff]  ;;  %v226_v29 = vld [vmem:[%s1976_s1 + $0x658] sm:$0xff] }
  0x33   :  { %925 = vmatprep.subr.bf16.mxu0 %v924_v26  ;;  %v219_v23 = vld [vmem:[%s1976_s1 + $0x620] sm:$0xff]  ;;  %v96_v26 = vld [vmem:[%s1976_s1 + $0x248] sm:$0xff]  ;;  %v818_v30 = vpack.c.bf16 %v93_v22, %v91_v21  ;;  %v948_v36 = vpack.c.bf16 %v226_v29, %v224_v28  ;;  %v225_v37 = vld [vmem:[%s1976_s1 + $0x650] sm:$0xff] }
  0x34   :  { %v946_v31 = vpack.c.bf16 %v221_v25, %v219_v23  ;;  %v223_v35 = vld [vmem:[%s1976_s1 + $0x640] sm:$0xff]  ;;  %v102_v39 = vld [vmem:[%s1976_s1 + $0x278] sm:$0xff]  ;;  %v228_v40 = vld [vmem:[%s1976_s1 + $0x668] sm:$0xff] }
  0x35   :  { %799 = vmatpush1.bf16.msra.mxu1 %v798_v32  ;;  %v820_v32 = vpack.c.bf16 %v98_v27, %v96_v26  ;;  %v230_v41 = vld [vmem:[%s1976_s1 + $0x678] sm:$0xff]  ;;  %v950_v43 = vpack.c.bf16 %v225_v37, %v223_v35  ;;  %v227_v47 = vld [vmem:[%s1976_s1 + $0x660] sm:$0xff]  ;;  %v229_v49 = vld [vmem:[%s1976_s1 + $0x670] sm:$0xff] }
  0x36   :  { %927 = vmatpush1.bf16.msra.mxu0 %v926_v33  ;;  %801 = vmatprep.subr.bf16.mxu1 %v800_v34  ;;  %v95_v33 = vld [vmem:[%s1976_s1 + $0x240] sm:$0xff]  ;;  %v97_v34 = vld [vmem:[%s1976_s1 + $0x250] sm:$0xff]  ;;  %v952_v48 = vpack.c.bf16 %v230_v41, %v228_v40  ;;  %v106_v51 = vld [vmem:[%s1976_s1 + $0x298] sm:$0xff]  ;;  %v954_v55 = vpack.c.bf16 %v229_v49, %v227_v47 }
  0x37   :  { %929 = vmatprep.subr.bf16.mxu0 %v928_v38  ;;  %v100_v38 = vld [vmem:[%s1976_s1 + $0x268] sm:$0xff]  ;;  %v822_v42 = vpack.c.bf16 %v97_v34, %v95_v33  ;;  %v234_v53 = vld [vmem:[%s1976_s1 + $0x698] sm:$0xff]  ;;  %v231_v59 = vld [vmem:[%s1976_s1 + $0x680] sm:$0xff] }
  0x38   :  { %v232_v52 = vld [vmem:[%s1976_s1 + $0x688] sm:$0xff]  ;;  %v233_v61 = vld [vmem:[%s1976_s1 + $0x690] sm:$0xff]  ;;  %v110_v63 = vld [vmem:[%s1976_s1 + $0x2b8] sm:$0xff] }
  0x39   :  { %803 = vmatpush1.bf16.msra.mxu1 %v802_v44  ;;  %v824_v44 = vpack.c.bf16 %v102_v39, %v100_v38  ;;  %v956_v60 = vpack.c.bf16 %v234_v53, %v232_v52  ;;  %v236_v0 = vld [vmem:[%s1976_s1 + $0x6a8] sm:$0xff]  ;;  %v238_v1 = vld [vmem:[%s1976_s1 + $0x6b8] sm:$0xff]  ;;  %v958_v3 = vpack.c.bf16 %v233_v61, %v231_v59  ;;  %v235_v7 = vld [vmem:[%s1976_s1 + $0x6a0] sm:$0xff] }
  0x3a   :  { %931 = vmatpush1.bf16.msra.mxu0 %v930_v45  ;;  %805 = vmatprep.subr.bf16.mxu1 %v804_v46  ;;  %v99_v45 = vld [vmem:[%s1976_s1 + $0x260] sm:$0xff]  ;;  %v101_v46 = vld [vmem:[%s1976_s1 + $0x270] sm:$0xff]  ;;  %v960_v8 = vpack.c.bf16 %v238_v1, %v236_v0  ;;  %v114_v11 = vld [vmem:[%s1976_s1 + $0x2d8] sm:$0xff] }
  0x3b   :  { %933 = vmatprep.subr.bf16.mxu0 %v932_v50  ;;  %v104_v50 = vld [vmem:[%s1976_s1 + $0x288] sm:$0xff]  ;;  %v826_v54 = vpack.c.bf16 %v101_v46, %v99_v45  ;;  %v237_v9 = vld [vmem:[%s1976_s1 + $0x6b0] sm:$0xff]  ;;  %v242_v13 = vld [vmem:[%s1976_s1 + $0x6d8] sm:$0xff] }
  0x3c   :  { %v240_v12 = vld [vmem:[%s1976_s1 + $0x6c8] sm:$0xff]  ;;  %v111_v15 = vld [vmem:[%s1976_s1 + $0x2c0] sm:$0xff]  ;;  %v118_v23 = vld [vmem:[%s1976_s1 + $0x2f8] sm:$0xff] }
  0x3d   :  { %807 = vmatpush1.bf16.msra.mxu1 %v806_v56  ;;  %v828_v56 = vpack.c.bf16 %v106_v51, %v104_v50  ;;  %v964_v21 = vpack.c.bf16 %v242_v13, %v240_v12  ;;  %v116_v22 = vld [vmem:[%s1976_s1 + $0x2e8] sm:$0xff]  ;;  %v246_v26 = vld [vmem:[%s1976_s1 + $0x6f8] sm:$0xff]  ;;  %v243_v33 = vld [vmem:[%s1976_s1 + $0x6e0] sm:$0xff] }
  0x3e   :  { %935 = vmatpush1.bf16.msra.mxu0 %v934_v57  ;;  %809 = vmatprep.subr.bf16.mxu1 %v808_v58  ;;  %v103_v57 = vld [vmem:[%s1976_s1 + $0x280] sm:$0xff]  ;;  %v105_v58 = vld [vmem:[%s1976_s1 + $0x290] sm:$0xff]  ;;  %v244_v25 = vld [vmem:[%s1976_s1 + $0x6e8] sm:$0xff] }
  0x3f   :  { %937 = vmatprep.subr.bf16.mxu0 %v936_v62  ;;  %v108_v62 = vld [vmem:[%s1976_s1 + $0x2a8] sm:$0xff]  ;;  %v830_v2 = vpack.c.bf16 %v105_v58, %v103_v57  ;;  %v21_v27 = vld [vmem:[%s1977_s0 + $0x38] sm:$0xff]  ;;  %v968_v34 = vpack.c.bf16 %v246_v26, %v244_v25  ;;  %v245_v35 = vld [vmem:[%s1976_s1 + $0x6f0] sm:$0xff] }
  0x40   :  { %v122_v37 = vld [vmem:[%s1976_s1 + $0x318] sm:$0xff]  ;;  %v248_v38 = vld [vmem:[%s1976_s1 + $0x708] sm:$0xff]  ;;  %v970_v41 = vpack.c.bf16 %v245_v35, %v243_v33  ;;  %v247_v45 = vld [vmem:[%s1976_s1 + $0x700] sm:$0xff] }
  0x41   :  { %811 = vmatpush1.bf16.msra.mxu1 %v810_v4  ;;  %v832_v4 = vpack.c.bf16 %v110_v63, %v108_v62  ;;  %v250_v39 = vld [vmem:[%s1976_s1 + $0x718] sm:$0xff]  ;;  %v249_v47 = vld [vmem:[%s1976_s1 + $0x710] sm:$0xff]  ;;  %v252_v50 = vld [vmem:[%s1976_s1 + $0x728] sm:$0xff] }
  0x42   :  { %939 = vmatpush1.bf16.msra.mxu0 %v938_v5  ;;  %813 = vmatprep.subr.bf16.mxu1 %v812_v6  ;;  %v107_v5 = vld [vmem:[%s1976_s1 + $0x2a0] sm:$0xff]  ;;  %v109_v6 = vld [vmem:[%s1976_s1 + $0x2b0] sm:$0xff]  ;;  %v972_v46 = vpack.c.bf16 %v250_v39, %v248_v38  ;;  %v126_v49 = vld [vmem:[%s1976_s1 + $0x338] sm:$0xff]  ;;  %v974_v53 = vpack.c.bf16 %v249_v47, %v247_v45 }
  0x43   :  { %941 = vmatprep.subr.bf16.mxu0 %v940_v10  ;;  %v112_v10 = vld [vmem:[%s1976_s1 + $0x2c8] sm:$0xff]  ;;  %v834_v14 = vpack.c.bf16 %v109_v6, %v107_v5  ;;  %v254_v51 = vld [vmem:[%s1976_s1 + $0x738] sm:$0xff]  ;;  %v251_v57 = vld [vmem:[%s1976_s1 + $0x720] sm:$0xff] }
  0x44   :  { %376 = vmatmul.mubr.f32.vlgmr.msra.gmra.mrb[0].mxu1 %v14_v16  ;;  %v962_v16 = vpack.c.bf16 %v237_v9, %v235_v7  ;;  %v976_v58 = vpack.c.bf16 %v254_v51, %v252_v50  ;;  %v253_v59 = vld [vmem:[%s1976_s1 + $0x730] sm:$0xff]  ;;  %v130_v61 = vld [vmem:[%s1976_s1 + $0x358] sm:$0xff]  ;;  %v256_v62 = vld [vmem:[%s1976_s1 + $0x748] sm:$0xff] }
  0x45   :  { %815 = vmatpush1.bf16.msra.mxu1 %v814_v17  ;;  %518 = vmatmul.mubr.f32.vlgmr.msra.gmra.mrb[0].mxu0 %v18_v18  ;;  %v836_v17 = vpack.c.bf16 %v114_v11, %v112_v10  ;;  %v113_v18 = vld [vmem:[%s1976_s1 + $0x2d0] sm:$0xff]  ;;  %v258_v63 = vld [vmem:[%s1976_s1 + $0x758] sm:$0xff]  ;;  %v978_v1 = vpack.c.bf16 %v253_v59, %v251_v57  ;;  %v255_v5 = vld [vmem:[%s1976_s1 + $0x740] sm:$0xff] }
  0x46   :  { %943 = vmatpush1.bf16.msra.mxu0 %v942_v19  ;;  %817 = vmatprep.subr.bf16.mxu1 %v816_v20  ;;  %v239_v19 = vld [vmem:[%s1976_s1 + $0x6c0] sm:$0xff]  ;;  %v241_v20 = vld [vmem:[%s1976_s1 + $0x6d0] sm:$0xff]  ;;  %v838_v28 = vpack.c.bf16 %v113_v18, %v111_v15  ;;  %v980_v6 = vpack.c.bf16 %v258_v63, %v256_v62  ;;  %v134_v9 = vld [vmem:[%s1976_s1 + $0x378] sm:$0xff] }
  0x47   :  { %945 = vmatprep.subr.bf16.mxu0 %v944_v24  ;;  %v17_v24 = vld [vmem:[%s1977_s0 + $0x18] sm:$0xff]  ;;  %588 = vmatprep.mubr.f32.mxu0 %v21_v27  ;;  %v966_v29 = vpack.c.bf16 %v241_v20, %v239_v19  ;;  %v257_v7 = vld [vmem:[%s1976_s1 + $0x750] sm:$0xff]  ;;  %v260_v10 = vld [vmem:[%s1976_s1 + $0x768] sm:$0xff] }
  0x48   :  { %446 = vmatprep.mubr.f32.mxu1 %v17_v24  ;;  %v262_v11 = vld [vmem:[%s1976_s1 + $0x778] sm:$0xff]  ;;  %v982_v13 = vpack.c.bf16 %v257_v7, %v255_v5  ;;  %v131_v15 = vld [vmem:[%s1976_s1 + $0x360] sm:$0xff]  ;;  %v261_v19 = vld [vmem:[%s1976_s1 + $0x770] sm:$0xff] }
  0x49   :  { %819 = vmatpush1.bf16.msra.mxu1 %v818_v30  ;;  %v840_v30 = vpack.c.bf16 %v118_v23, %v116_v22  ;;  %v984_v18 = vpack.c.bf16 %v262_v11, %v260_v10  ;;  %v136_v20 = vld [vmem:[%s1976_s1 + $0x388] sm:$0xff]  ;;  %v266_v23 = vld [vmem:[%s1976_s1 + $0x798] sm:$0xff]  ;;  %v135_v27 = vld [vmem:[%s1976_s1 + $0x380] sm:$0xff] }
  0x4a   :  { %947 = vmatpush1.bf16.msra.mxu0 %v946_v31  ;;  %821 = vmatprep.subr.bf16.mxu1 %v820_v32  ;;  %v115_v31 = vld [vmem:[%s1976_s1 + $0x2e0] sm:$0xff]  ;;  %v117_v32 = vld [vmem:[%s1976_s1 + $0x2f0] sm:$0xff]  ;;  %v264_v22 = vld [vmem:[%s1976_s1 + $0x788] sm:$0xff] }
  0x4b   :  { %949 = vmatprep.subr.bf16.mxu0 %v948_v36  ;;  %v120_v36 = vld [vmem:[%s1976_s1 + $0x308] sm:$0xff]  ;;  %v842_v40 = vpack.c.bf16 %v117_v32, %v115_v31  ;;  %v265_v31 = vld [vmem:[%s1976_s1 + $0x790] sm:$0xff]  ;;  %v142_v33 = vld [vmem:[%s1976_s1 + $0x3b8] sm:$0xff] }
  0x4c   :  { %v140_v32 = vld [vmem:[%s1976_s1 + $0x3a8] sm:$0xff]  ;;  %v270_v35 = vld [vmem:[%s1976_s1 + $0x7b8] sm:$0xff]  ;;  %v139_v39 = vld [vmem:[%s1976_s1 + $0x3a0] sm:$0xff] }
  0x4d   :  { %823 = vmatpush1.bf16.msra.mxu1 %v822_v42  ;;  %v844_v42 = vpack.c.bf16 %v122_v37, %v120_v36  ;;  %v864_v38 = vpack.c.bf16 %v142_v33, %v140_v32  ;;  %v146_v45 = vld [vmem:[%s1976_s1 + $0x3d8] sm:$0xff]  ;;  %v143_v51 = vld [vmem:[%s1976_s1 + $0x3c0] sm:$0xff]  ;;  %v281_v10 = vld [vmem:[%s1976_s1 + $0x810] sm:$0xff] }
  0x4e   :  { %951 = vmatpush1.bf16.msra.mxu0 %v950_v43  ;;  %825 = vmatprep.subr.bf16.mxu1 %v824_v44  ;;  %v119_v43 = vld [vmem:[%s1976_s1 + $0x300] sm:$0xff]  ;;  %v121_v44 = vld [vmem:[%s1976_s1 + $0x310] sm:$0xff]  ;;  %v274_v47 = vld [vmem:[%s1976_s1 + $0x7d8] sm:$0xff] }
  0x4f   :  { %953 = vmatprep.subr.bf16.mxu0 %v952_v48  ;;  %v124_v48 = vld [vmem:[%s1976_s1 + $0x328] sm:$0xff]  ;;  %v846_v52 = vpack.c.bf16 %v121_v44, %v119_v43  ;;  %v269_v43 = vld [vmem:[%s1976_s1 + $0x7b0] sm:$0xff]  ;;  %v150_v57 = vld [vmem:[%s1976_s1 + $0x3f8] sm:$0xff] }
  0x50   :  { %v144_v44 = vld [vmem:[%s1976_s1 + $0x3c8] sm:$0xff]  ;;  %v278_v59 = vld [vmem:[%s1976_s1 + $0x7f8] sm:$0xff]  ;;  %v147_v63 = vld [vmem:[%s1976_s1 + $0x3e0] sm:$0xff] }
  0x51   :  { %827 = vmatpush1.bf16.msra.mxu1 %v826_v54  ;;  %v848_v54 = vpack.c.bf16 %v126_v49, %v124_v48  ;;  %v868_v50 = vpack.c.bf16 %v146_v45, %v144_v44  ;;  %v282_v5 = vld [vmem:[%s1976_s1 + $0x818] sm:$0xff]  ;;  %v284_v11 = vld [vmem:[%s1976_s1 + $0x828] sm:$0xff] }
  0x52   :  { %955 = vmatpush1.bf16.msra.mxu0 %v954_v55  ;;  %829 = vmatprep.subr.bf16.mxu1 %v828_v56  ;;  %v123_v55 = vld [vmem:[%s1976_s1 + $0x320] sm:$0xff]  ;;  %v125_v56 = vld [vmem:[%s1976_s1 + $0x330] sm:$0xff]  ;;  %v296_v32 = vld [vmem:[%s1976_s1 + $0x888] sm:$0xff] }
  0x53   :  { %957 = vmatprep.subr.bf16.mxu0 %v956_v60  ;;  %v128_v60 = vld [vmem:[%s1976_s1 + $0x348] sm:$0xff]  ;;  %v850_v0 = vpack.c.bf16 %v125_v56, %v123_v55  ;;  %v273_v55 = vld [vmem:[%s1976_s1 + $0x7d0] sm:$0xff]  ;;  %v298_v33 = vld [vmem:[%s1976_s1 + $0x898] sm:$0xff] }
  0x54   :  { %v148_v56 = vld [vmem:[%s1976_s1 + $0x3e8] sm:$0xff]  ;;  %v306_v45 = vld [vmem:[%s1976_s1 + $0x8d8] sm:$0xff] }
  0x55   :  { %831 = vmatpush1.bf16.msra.mxu1 %v830_v2  ;;  %v852_v2 = vpack.c.bf16 %v130_v61, %v128_v60  ;;  %v872_v62 = vpack.c.bf16 %v150_v57, %v148_v56  ;;  %v304_v44 = vld [vmem:[%s1976_s1 + $0x8c8] sm:$0xff]  ;;  %v22_v57 = vld [vmem:[%s1977_s0 + $0x40] sm:$0xff] }
  0x56   :  { %959 = vmatpush1.bf16.msra.mxu0 %v958_v3  ;;  %833 = vmatprep.subr.bf16.mxu1 %v832_v4  ;;  %v127_v3 = vld [vmem:[%s1976_s1 + $0x340] sm:$0xff]  ;;  %v129_v4 = vld [vmem:[%s1976_s1 + $0x350] sm:$0xff] }
  0x57   :  { %961 = vmatprep.subr.bf16.mxu0 %v960_v8  ;;  %v132_v8 = vld [vmem:[%s1976_s1 + $0x368] sm:$0xff]  ;;  %v854_v12 = vpack.c.bf16 %v129_v4, %v127_v3  ;;  %v277_v3 = vld [vmem:[%s1976_s1 + $0x7f0] sm:$0xff] }
  0x58   :  { %v280_v4 = vld [vmem:[%s1976_s1 + $0x808] sm:$0xff] }
  0x59   :  { %835 = vmatpush1.bf16.msra.mxu1 %v834_v14  ;;  %v856_v14 = vpack.c.bf16 %v134_v9, %v132_v8  ;;  %v1004_v8 = vpack.c.bf16 %v282_v5, %v280_v4  ;;  %v279_v9 = vld [vmem:[%s1976_s1 + $0x800] sm:$0xff] }
  0x5a   :  { %963 = vmatpush1.bf16.msra.mxu0 %v962_v16  ;;  %837 = vmatprep.subr.bf16.mxu1 %v836_v17  ;;  %v133_v16 = vld [vmem:[%s1976_s1 + $0x370] sm:$0xff]  ;;  %v259_v17 = vld [vmem:[%s1976_s1 + $0x760] sm:$0xff] }
  0x5b   :  { %965 = vmatprep.subr.bf16.mxu0 %v964_v21  ;;  %v138_v21 = vld [vmem:[%s1976_s1 + $0x398] sm:$0xff]  ;;  %v858_v24 = vpack.c.bf16 %v133_v16, %v131_v15  ;;  %v986_v25 = vpack.c.bf16 %v261_v19, %v259_v17  ;;  %v1006_v15 = vpack.c.bf16 %v281_v10, %v279_v9  ;;  %v283_v17 = vld [vmem:[%s1976_s1 + $0x820] sm:$0xff]  ;;  %v288_v19 = vld [vmem:[%s1976_s1 + $0x848] sm:$0xff]  ;;  %v686_v9 = vlaneseq }
  0x5c   :  { %v860_v26 = vpack.c.bf16 %v138_v21, %v136_v20  ;;  %v290_v20 = vld [vmem:[%s1976_s1 + $0x858] sm:$0xff] }
  0x5d   :  { %839 = vmatpush1.bf16.msra.mxu1 %v838_v28  ;;  %v137_v28 = vld [vmem:[%s1976_s1 + $0x390] sm:$0xff]  ;;  %vm700_vm0 = vcmp.lt.s32.totalorder %v686_v9, 256 }
  0x5e   :  { %967 = vmatpush1.bf16.msra.mxu0 %v966_v29  ;;  %841 = vmatprep.subr.bf16.mxu1 %v840_v30  ;;  %v263_v29 = vld [vmem:[%s1976_s1 + $0x780] sm:$0xff]  ;;  %v988_v30 = vpack.c.bf16 %v266_v23, %v264_v22  ;;  %v862_v36 = vpack.c.bf16 %v137_v28, %v135_v27  ;;  %v1046_v22 = vmov 0.0   ;;  %v1012_v23 = vpack.c.bf16 %v290_v20, %v288_v19  ;;  %v294_v27 = vld [vmem:[%s1976_s1 + $0x878] sm:$0xff] }
  0x5f   :  { %969 = vmatprep.subr.bf16.mxu0 %v968_v34  ;;  %v268_v34 = vld [vmem:[%s1976_s1 + $0x7a8] sm:$0xff]  ;;  %v990_v37 = vpack.c.bf16 %v265_v31, %v263_v29  ;;  %v293_v31 = vld [vmem:[%s1976_s1 + $0x870] sm:$0xff]  ;;  %v687_v19 = vshrl.u32 %v686_v9, 7 }
  0x61   :  { %843 = vmatpush1.bf16.msra.mxu1 %v842_v40  ;;  %v141_v40 = vld [vmem:[%s1976_s1 + $0x3b0] sm:$0xff] }
  0x62   :  { %971 = vmatpush1.bf16.msra.mxu0 %v970_v41  ;;  %845 = vmatprep.subr.bf16.mxu1 %v844_v42  ;;  %v267_v41 = vld [vmem:[%s1976_s1 + $0x7a0] sm:$0xff]  ;;  %v992_v42 = vpack.c.bf16 %v270_v35, %v268_v34  ;;  %v866_v48 = vpack.c.bf16 %v141_v40, %v139_v39  ;;  %v1020_v35 = vpack.c.bf16 %v298_v33, %v296_v32  ;;  %v302_v39 = vld [vmem:[%s1976_s1 + $0x8b8] sm:$0xff] }
  0x63   :  { %973 = vmatprep.subr.bf16.mxu0 %v972_v46  ;;  %v272_v46 = vld [vmem:[%s1976_s1 + $0x7c8] sm:$0xff]  ;;  %v994_v49 = vpack.c.bf16 %v269_v43, %v267_v41  ;;  %v301_v43 = vld [vmem:[%s1976_s1 + $0x8b0] sm:$0xff] }
  0x65   :  { %847 = vmatpush1.bf16.msra.mxu1 %v846_v52  ;;  %v145_v52 = vld [vmem:[%s1976_s1 + $0x3d0] sm:$0xff] }
  0x66   :  { %975 = vmatpush1.bf16.msra.mxu0 %v974_v53  ;;  %849 = vmatprep.subr.bf16.mxu1 %v848_v54  ;;  %v271_v53 = vld [vmem:[%s1976_s1 + $0x7c0] sm:$0xff]  ;;  %v996_v54 = vpack.c.bf16 %v274_v47, %v272_v46  ;;  %v870_v60 = vpack.c.bf16 %v145_v52, %v143_v51  ;;  %v1028_v47 = vpack.c.bf16 %v306_v45, %v304_v44  ;;  %v310_v51 = vld [vmem:[%s1976_s1 + $0x8f8] sm:$0xff] }
  0x67   :  { %977 = vmatprep.subr.bf16.mxu0 %v976_v58  ;;  %v276_v58 = vld [vmem:[%s1976_s1 + $0x7e8] sm:$0xff]  ;;  %v998_v61 = vpack.c.bf16 %v273_v55, %v271_v53  ;;  %v309_v55 = vld [vmem:[%s1976_s1 + $0x8f0] sm:$0xff] }
  0x69   :  { %851 = vmatpush1.bf16.msra.mxu1 %v850_v0  ;;  %v149_v0 = vld [vmem:[%s1976_s1 + $0x3f0] sm:$0xff] }
  0x6a   :  { %979 = vmatpush1.bf16.msra.mxu0 %v978_v1  ;;  %853 = vmatprep.subr.bf16.mxu1 %v852_v2  ;;  %v1000_v1 = vpack.c.bf16 %v278_v59, %v276_v58  ;;  %v275_v2 = vld [vmem:[%s1976_s1 + $0x7e0] sm:$0xff] }
  0x6b   :  { %981 = vmatprep.subr.bf16.mxu0 %v980_v6  ;;  %v874_v6 = vpack.c.bf16 %v149_v0, %v147_v63  ;;  %v1002_v7 = vpack.c.bf16 %v277_v3, %v275_v2 }
  0x6d   :  { %855 = vmatpush1.bf16.msra.mxu1 %v854_v12  ;;  %v286_v12 = vld [vmem:[%s1976_s1 + $0x838] sm:$0xff] }
  0x6e   :  { %983 = vmatpush1.bf16.msra.mxu0 %v982_v13  ;;  %857 = vmatprep.subr.bf16.mxu1 %v856_v14  ;;  %v16_v13 = vld [vmem:[%s1977_s0 + $0x10] sm:$0xff]  ;;  %v1008_v16 = vpack.c.bf16 %v286_v12, %v284_v11 }
  0x6f   :  { %985 = vmatprep.subr.bf16.mxu0 %v984_v18  ;;  %v20_v14 = vld [vmem:[%s1977_s0 + $0x30] sm:$0xff] }
  0x70   :  { %v285_v18 = vld [vmem:[%s1976_s1 + $0x830] sm:$0xff] }
  0x71   :  { %859 = vmatpush1.bf16.msra.mxu1 %v858_v24  ;;  %v1010_v21 = vpack.c.bf16 %v285_v18, %v283_v17  ;;  %v287_v24 = vld [vmem:[%s1976_s1 + $0x840] sm:$0xff] }
  0x72   :  { %987 = vmatpush1.bf16.msra.mxu0 %v986_v25  ;;  %861 = vmatprep.subr.bf16.mxu1 %v860_v26  ;;  %v289_v25 = vld [vmem:[%s1976_s1 + $0x850] sm:$0xff]  ;;  %v292_v26 = vld [vmem:[%s1976_s1 + $0x868] sm:$0xff] }
  0x73   :  { %989 = vmatprep.subr.bf16.mxu0 %v988_v30  ;;  %v1014_v28 = vpack.c.bf16 %v289_v25, %v287_v24  ;;  %v1016_v29 = vpack.c.bf16 %v294_v27, %v292_v26  ;;  %v291_v30 = vld [vmem:[%s1976_s1 + $0x860] sm:$0xff] }
  0x74   :  { %v1018_v34 = vpack.c.bf16 %v293_v31, %v291_v30 }
  0x75   :  { %863 = vmatpush1.bf16.msra.mxu1 %v862_v36  ;;  %v295_v36 = vld [vmem:[%s1976_s1 + $0x880] sm:$0xff] }
  0x76   :  { %991 = vmatpush1.bf16.msra.mxu0 %v990_v37  ;;  %865 = vmatprep.subr.bf16.mxu1 %v864_v38  ;;  %v297_v37 = vld [vmem:[%s1976_s1 + $0x890] sm:$0xff]  ;;  %v300_v38 = vld [vmem:[%s1976_s1 + $0x8a8] sm:$0xff] }
  0x77   :  { %993 = vmatprep.subr.bf16.mxu0 %v992_v42  ;;  %v1022_v40 = vpack.c.bf16 %v297_v37, %v295_v36  ;;  %v1024_v41 = vpack.c.bf16 %v302_v39, %v300_v38  ;;  %v299_v42 = vld [vmem:[%s1976_s1 + $0x8a0] sm:$0xff] }
  0x78   :  { %v1026_v46 = vpack.c.bf16 %v301_v43, %v299_v42 }
  0x79   :  { %867 = vmatpush1.bf16.msra.mxu1 %v866_v48  ;;  %v303_v48 = vld [vmem:[%s1976_s1 + $0x8c0] sm:$0xff] }
  0x7a   :  { %995 = vmatpush1.bf16.msra.mxu0 %v994_v49  ;;  %869 = vmatprep.subr.bf16.mxu1 %v868_v50  ;;  %v305_v49 = vld [vmem:[%s1976_s1 + $0x8d0] sm:$0xff]  ;;  %v308_v50 = vld [vmem:[%s1976_s1 + $0x8e8] sm:$0xff] }
  0x7b   :  { %997 = vmatprep.subr.bf16.mxu0 %v996_v54  ;;  %v1030_v52 = vpack.c.bf16 %v305_v49, %v303_v48  ;;  %v1032_v53 = vpack.c.bf16 %v310_v51, %v308_v50  ;;  %v307_v54 = vld [vmem:[%s1976_s1 + $0x8e0] sm:$0xff] }
  0x7c   :  { %v1034_v56 = vpack.c.bf16 %v309_v55, %v307_v54 }
  0x7d   :  { %871 = vmatpush1.bf16.msra.mxu1 %v870_v60 }
  0x7e   :  { %999 = vmatpush1.bf16.msra.mxu0 %v998_v61  ;;  %873 = vmatprep.subr.bf16.mxu1 %v872_v62 }
  0x7f   :  { %1001 = vmatprep.subr.bf16.mxu0 %v1000_v1 }
  0x81   :  { %875 = vmatpush1.bf16.msra.mxu1 %v874_v6 }
  0x82   :  { %1003 = vmatpush1.bf16.msra.mxu0 %v1002_v7  ;;  %v1047_v7 = vmov 1966171168  }
  0x83   :  { %1005 = vmatprep.subr.bf16.mxu0 %v1004_v8  ;;  %v684_v8 = vunpack.c.l.s4 %v1047_v7 }
  0x84   :  { %447 = vmatmul.mubr.f32.vlgmr.msra.gmra.mrb[0].mxu1 %v16_v13 }
  0x85   :  { %589 = vmatmul.mubr.f32.vlgmr.msra.gmra.mrb[0].mxu0 %v20_v14  ;;  %v685_v18 = vunpack.c.0.s8 %v684_v8 }
  0x86   :  { %1007 = vmatpush1.bf16.msra.mxu0 %v1006_v15  ;;  %659 = vmatprep.mubr.f32.mxu0 %v1046_v22 }
  0x87   :  { %1009 = vmatprep.subr.bf16.mxu0 %v1008_v16 }
  0x8a   :  { %1011 = vmatpush1.bf16.msra.mxu0 %v1010_v21 }
  0x8b   :  { %1013 = vmatprep.subr.bf16.mxu0 %v1012_v23 }
  0x8e   :  { %1015 = vmatpush1.bf16.msra.mxu0 %v1014_v28  ;;  %v688_v28 = vsub.s32 %v685_v18, %v687_v19 }
  0x8f   :  { %1017 = vmatprep.subr.bf16.mxu0 %v1016_v29 }
  0x92   :  { %1019 = vmatpush1.bf16.msra.mxu0 %v1018_v34 }
  0x93   :  { %1021 = vmatprep.subr.bf16.mxu0 %v1020_v35 }
  0x96   :  { %1023 = vmatpush1.bf16.msra.mxu0 %v1022_v40 }
  0x97   :  { %1025 = vmatprep.subr.bf16.mxu0 %v1024_v41 }
  0x9a   :  { %1027 = vmatpush1.bf16.msra.mxu0 %v1026_v46 }
  0x9b   :  { %1029 = vmatprep.subr.bf16.mxu0 %v1028_v47 }
  0x9e   :  { %1031 = vmatpush1.bf16.msra.mxu0 %v1030_v52 }
  0x9f   :  { %1033 = vmatprep.subr.bf16.mxu0 %v1032_v53 }
  0xa2   :  { %1035 = vmatpush1.bf16.msra.mxu0 %v1034_v56 }
  0xa5   :  { %660 = vmatmul.mubr.f32.vlgmr.msra.gmra.mrb[0].mxu0 %v22_v57 }
 0x157   :  { %v448_v58 = vpop.f32.mrb[0].mxu1 }
 0x158   :  { %v450_v59 = vpop.f32.mrb[1].mxu1 }
 0x178   :  { %v661_v60 = vpop.f32.mrb[0].mxu0 }
 0x179   :  { %v1036_v61 = vadd.f32 %v661_v60, %v448_v58  ;;  %v663_v62 = vpop.f32.mrb[1].mxu0 }
 0x17a   :  { %v1037_v63 = vadd.f32 %v663_v62, %v450_v59 }
 0x17b   :  { %666 = vst [vmem:[%s1978_s2] sm:$0xff] %v1036_v61  ;;  %v668_v0 = vrot.slane %v1036_v61, 4  ;;  %v703_v1 = vmul.f32 %v1036_v61, %v1036_v61 }
 0x17c   :  { %667 = vst [vmem:[%s1978_s2 + $0x8] sm:$0xff] %v1037_v63  ;;  %v674_v2 = vrot.slane %v1037_v63, 4  ;;  %v704_v3 = vmul.f32 %v1037_v63, %v1037_v63 }
 0x17d   :  { %v669_v4 = vadd.f32 %v1036_v61, %v668_v0  ;;  %v705_v5 = vrot.slane %v703_v1, 4 }
 0x17e   :  { %v675_v6 = vadd.f32 %v1037_v63, %v674_v2  ;;  %v711_v10 = vrot.slane %v704_v3, 4 }
 0x17f   :  { %v670_v11 = vrot.slane %v669_v4, 2  ;;  %v706_v12 = vadd.f32 %v705_v5, %v703_v1 }
 0x180   :  { %v676_v13 = vrot.slane %v675_v6, 2  ;;  %v712_v14 = vadd.f32 %v711_v10, %v704_v3 }
 0x181   :  { %v671_v15 = vadd.f32 %v670_v11, %v669_v4  ;;  %v707_v16 = vrot.slane %v706_v12, 2 }
 0x182   :  { %v677_v17 = vadd.f32 %v676_v13, %v675_v6  ;;  %v713_v20 = vrot.slane %v712_v14, 2 }
 0x183   :  { %v672_v21 = vrot.slane %v671_v15, 1  ;;  %v708_v22 = vadd.f32 %v707_v16, %v706_v12 }
 0x184   :  { %v678_v23 = vrot.slane %v677_v17, 1  ;;  %v714_v24 = vadd.f32 %v713_v20, %v712_v14 }
 0x185   :  { %v673_v25 = vadd.f32 %v672_v21, %v671_v15  ;;  %v709_v26 = vrot.slane %v708_v22, 1 }
 0x186   :  { %v679_v27 = vadd.f32 %v678_v23, %v677_v17  ;;  %v715_v29 = vrot.slane %v714_v24, 1 }
 0x187   :  { %v710_v30 = vadd.f32 %v709_v26, %v708_v22 }
 0x188   :  { %v682_v31 = vcombine.low %v673_v25, %v679_v27  ;;  %v716_v32 = vadd.f32 %v715_v29, %v714_v24 }
 0x18a   :  { %v689_v33 = vrot.slane %v682_v31, %v688_v28  ;;  %v719_v34 = vcombine.low %v710_v30, %v716_v32 }
 0x18c   :  { %v696_v35 = vrot.slane %v689_v33, %v688_v28  ;;  %v726_v36 = vrot.slane %v719_v34, %v688_v28 }
 0x18e   :  { %702 = vst.msk [vmem:[%s1979_s3] sm:$0x3] %vm700_vm0, %v696_v35  ;;  %v733_v37 = vrot.slane %v726_v36, %v688_v28 }
 0x190   :  { %735 = vst.msk [vmem:[%s1980_s4] sm:$0x3] %vm700_vm0, %v733_v37 }

// kernel: rgression_net_forward.20
= control target key start
LH: loop header
LB: loop body
LE: loop exit
PB: predicated region body
PF: predicated region fallthrough
CT: control target
= control target key end

     0   :  { %v20_v0 = vlaneseq  ;;  %v101_v1 = vmov 1983009808   ;;  %s142_s1 = inlined_call_operand.vmem [shape: f32[1,512], index: 1, kind: input, shape index: {}]   ;;  %s143_s2 = inlined_call_operand.vmem [shape: f32[1,512], index: 2, kind: input, shape index: {}]   ;;  %s144_s0 = inlined_call_operand.vmem [shape: f32[2,512], index: 0, kind: input, shape index: {}]   ;;  %s145_s3 = inlined_call_operand.vmem [shape: f32[2,512], index: 3, kind: input, shape index: {}]   ;;  %s146_s4 = inlined_call_operand.vmem [shape: f32[2,512], index: 4, kind: output, shape index: {}]  }
   0x1   :  { %v39_v2 = vunpack.c.l.s4 %v101_v1  ;;  %v18_v4 = vld [vmem:[%s142_s1] sm:$0xf] }
   0x2   :  { %v21_v3 = vshrl.u32 %v20_v0, 7  ;;  %v55_v10 = vld [vmem:[%s143_s2] sm:$0xf] }
   0x3   :  { %v40_v5 = vunpack.c.0.s8 %v39_v2  ;;  %v17_v26 = vld [vmem:[%s144_s0] sm:$0xff] }
   0x4   :  { %v22_v6 = vsub.s32 0, %v21_v3  ;;  %v26_v7 = vsub.s32 1, %v21_v3  ;;  %v30_v8 = vsub.s32 2, %v21_v3  ;;  %v34_v9 = vsub.s32 3, %v21_v3  ;;  %v92_v32 = vld [vmem:[%s145_s3] sm:$0xff] }
   0x5   :  { %v43_v11 = vsub.s32 %v40_v5, %v21_v3 }
   0x6   :  { %v23_v12 = vrot.slane %v18_v4, %v22_v6  ;;  %v27_v13 = vrot.slane %v18_v4, %v26_v7  ;;  %v31_v14 = vrot.slane %v18_v4, %v30_v8  ;;  %v35_v15 = vrot.slane %v18_v4, %v34_v9 }
   0x7   :  { %v60_v16 = vrot.slane %v55_v10, %v22_v6  ;;  %v64_v17 = vrot.slane %v55_v10, %v26_v7  ;;  %v68_v18 = vrot.slane %v55_v10, %v30_v8  ;;  %v72_v19 = vrot.slane %v55_v10, %v34_v9 }
   0x8   :  { %v36_v20 = vcombine.low %v23_v12, %v27_v13  ;;  %v37_v21 = vcombine.low %v31_v14, %v35_v15 }
   0x9   :  { %v73_v22 = vcombine.low %v60_v16, %v64_v17  ;;  %v74_v23 = vcombine.low %v68_v18, %v72_v19 }
   0xa   :  { %v44_v24 = vrot.slane %v36_v20, %v43_v11  ;;  %v51_v25 = vrot.slane %v37_v21, %v43_v11 }
   0xb   :  { %v81_v27 = vrot.slane %v73_v22, %v43_v11  ;;  %v88_v28 = vrot.slane %v74_v23, %v43_v11 }
   0xc   :  { %v52_v29 = vcombine.low %v44_v24, %v51_v25 }
   0xd   :  { %v89_v30 = vcombine.low %v81_v27, %v88_v28 }
   0xe   :  { %v54_v31 = vmul.f32 %v52_v29, %v17_v26 }
  0x10   :  { %v91_v33 = vadd.f32 %v89_v30, %v54_v31 }
  0x12   :  { %v93_v34 = vmul.f32 %v92_v32, %v91_v33 }
  0x14   :  { %v94_v35 = vmax.f32 %v93_v34, 0.0 }
  0x16   :  { %95 = vst [vmem:[%s146_s4] sm:$0xff] %v94_v35 }

// kernel: rgression_net_forward.21
= control target key start
LH: loop header
LB: loop body
LE: loop exit
PB: predicated region body
PF: predicated region fallthrough
CT: control target
= control target key end

     0   :  { %v426_v47 = vmov 1983009808   ;;  %v92_v49 = vlaneseq  ;;  %s658_s0 = inlined_call_operand.vmem [shape: f32[2,512], index: 0, kind: input, shape index: {}]   ;;  %s659_s1 = inlined_call_operand.vmem [shape: f32[512,128], index: 1, kind: input, shape index: {}]   ;;  %s660_s2 = inlined_call_operand.vmem [shape: f32[1,128], index: 2, kind: input, shape index: {}]   ;;  %s661_s3 = inlined_call_operand.hbm [shape: f32[2,128], index: 3, kind: output, shape index: {}]  }
   0x1   :  { %v32_v0 = vld [vmem:[%s659_s1 + $0x80] sm:$0xff]  ;;  %v33_v1 = vld [vmem:[%s659_s1 + $0x88] sm:$0xff]  ;;  %v34_v11 = vld [vmem:[%s659_s1 + $0x90] sm:$0xff]  ;;  %v90_v48 = vunpack.c.l.s4 %v426_v47 }
   0x2   :  { %v16_v2 = vld [vmem:[%s659_s1] sm:$0xff]  ;;  %v335_v3 = vpack.c.bf16 %v33_v1, %v32_v0  ;;  %v17_v4 = vld [vmem:[%s659_s1 + $0x8] sm:$0xff]  ;;  %v35_v13 = vld [vmem:[%s659_s1 + $0x98] sm:$0xff]  ;;  %v93_v0 = vshrl.u32 %v92_v49, 7 }
   0x3   :  { %v64_v5 = vld [vmem:[%s659_s1 + $0x180] sm:$0xff]  ;;  %v65_v6 = vld [vmem:[%s659_s1 + $0x188] sm:$0xff]  ;;  %v337_v7 = vpack.c.bf16 %v17_v4, %v16_v2  ;;  %v18_v14 = vld [vmem:[%s659_s1 + $0x10] sm:$0xff]  ;;  %v339_v16 = vpack.c.bf16 %v35_v13, %v34_v11  ;;  %v91_v63 = vunpack.c.0.s8 %v90_v48 }
   0x4   :  { %v367_v8 = vpack.c.bf16 %v65_v6, %v64_v5  ;;  %v48_v9 = vld [vmem:[%s659_s1 + $0x100] sm:$0xff]  ;;  %v49_v10 = vld [vmem:[%s659_s1 + $0x108] sm:$0xff]  ;;  %336 = vmatprep.subr.bf16.mxu0 %v335_v3  ;;  %v19_v15 = vld [vmem:[%s659_s1 + $0x18] sm:$0xff] }
   0x5   :  { %v369_v12 = vpack.c.bf16 %v49_v10, %v48_v9  ;;  %338 = vmatpush3.bf16.msra.mxu0 %v337_v7  ;;  %v341_v17 = vpack.c.bf16 %v19_v15, %v18_v14  ;;  %v66_v18 = vld [vmem:[%s659_s1 + $0x190] sm:$0xff]  ;;  %v67_v19 = vld [vmem:[%s659_s1 + $0x198] sm:$0xff]  ;;  %v36_v23 = vld [vmem:[%s659_s1 + $0xa0] sm:$0xff]  ;;  %v94_v13 = vsub.s32 %v91_v63, %v93_v0 }
   0x6   :  { %368 = vmatprep.subr.bf16.mxu1 %v367_v8  ;;  %v50_v20 = vld [vmem:[%s659_s1 + $0x110] sm:$0xff]  ;;  %v371_v21 = vpack.c.bf16 %v67_v19, %v66_v18  ;;  %v51_v22 = vld [vmem:[%s659_s1 + $0x118] sm:$0xff]  ;;  %v37_v24 = vld [vmem:[%s659_s1 + $0xa8] sm:$0xff]  ;;  %340 = vmatprep.subr.bf16.mxu0 %v339_v16 }
   0x7   :  { %370 = vmatpush3.bf16.msra.mxu1 %v369_v12  ;;  %v373_v25 = vpack.c.bf16 %v51_v22, %v50_v20  ;;  %v343_v26 = vpack.c.bf16 %v37_v24, %v36_v23  ;;  %v20_v27 = vld [vmem:[%s659_s1 + $0x20] sm:$0xff]  ;;  %v21_v28 = vld [vmem:[%s659_s1 + $0x28] sm:$0xff]  ;;  %v38_v35 = vld [vmem:[%s659_s1 + $0xb0] sm:$0xff] }
   0x8   :  { %v68_v29 = vld [vmem:[%s659_s1 + $0x1a0] sm:$0xff]  ;;  %372 = vmatprep.subr.bf16.mxu1 %v371_v21  ;;  %v69_v30 = vld [vmem:[%s659_s1 + $0x1a8] sm:$0xff]  ;;  %v345_v33 = vpack.c.bf16 %v21_v28, %v20_v27  ;;  %v39_v36 = vld [vmem:[%s659_s1 + $0xb8] sm:$0xff] }
   0x9   :  { %v52_v31 = vld [vmem:[%s659_s1 + $0x120] sm:$0xff]  ;;  %v53_v32 = vld [vmem:[%s659_s1 + $0x128] sm:$0xff]  ;;  %342 = vmatpush3.bf16.msra.mxu0 %v341_v17  ;;  %v375_v34 = vpack.c.bf16 %v69_v30, %v68_v29  ;;  %v22_v37 = vld [vmem:[%s659_s1 + $0x30] sm:$0xff]  ;;  %v347_v39 = vpack.c.bf16 %v39_v36, %v38_v35 }
   0xa   :  { %344 = vmatprep.subr.bf16.mxu0 %v343_v26  ;;  %v377_v38 = vpack.c.bf16 %v53_v32, %v52_v31  ;;  %v23_v40 = vld [vmem:[%s659_s1 + $0x38] sm:$0xff]  ;;  %v70_v41 = vld [vmem:[%s659_s1 + $0x1b0] sm:$0xff]  ;;  %v40_v46 = vld [vmem:[%s659_s1 + $0xc0] sm:$0xff] }
   0xb   :  { %374 = vmatpush3.bf16.msra.mxu1 %v373_v25  ;;  %v71_v42 = vld [vmem:[%s659_s1 + $0x1b8] sm:$0xff]  ;;  %v54_v44 = vld [vmem:[%s659_s1 + $0x130] sm:$0xff]  ;;  %v41_v50 = vld [vmem:[%s659_s1 + $0xc8] sm:$0xff]  ;;  %v349_v51 = vpack.c.bf16 %v23_v40, %v22_v37 }
   0xc   :  { %376 = vmatprep.subr.bf16.mxu1 %v375_v34  ;;  %v379_v43 = vpack.c.bf16 %v71_v42, %v70_v41  ;;  %v55_v45 = vld [vmem:[%s659_s1 + $0x138] sm:$0xff]  ;;  %v72_v52 = vld [vmem:[%s659_s1 + $0x1c0] sm:$0xff]  ;;  %v73_v53 = vld [vmem:[%s659_s1 + $0x1c8] sm:$0xff]  ;;  %v351_v55 = vpack.c.bf16 %v41_v50, %v40_v46 }
   0xd   :  { %346 = vmatpush3.bf16.msra.mxu0 %v345_v33  ;;  %v381_v54 = vpack.c.bf16 %v55_v45, %v54_v44  ;;  %v24_v56 = vld [vmem:[%s659_s1 + $0x40] sm:$0xff]  ;;  %v25_v57 = vld [vmem:[%s659_s1 + $0x48] sm:$0xff]  ;;  %v383_v59 = vpack.c.bf16 %v73_v53, %v72_v52  ;;  %v42_v61 = vld [vmem:[%s659_s1 + $0xd0] sm:$0xff] }
   0xe   :  { %348 = vmatprep.subr.bf16.mxu0 %v347_v39  ;;  %v56_v58 = vld [vmem:[%s659_s1 + $0x140] sm:$0xff]  ;;  %v57_v60 = vld [vmem:[%s659_s1 + $0x148] sm:$0xff]  ;;  %v43_v62 = vld [vmem:[%s659_s1 + $0xd8] sm:$0xff]  ;;  %v353_v3 = vpack.c.bf16 %v25_v57, %v24_v56 }
   0xf   :  { %378 = vmatpush3.bf16.msra.mxu1 %v377_v38  ;;  %v74_v1 = vld [vmem:[%s659_s1 + $0x1d0] sm:$0xff]  ;;  %v75_v2 = vld [vmem:[%s659_s1 + $0x1d8] sm:$0xff]  ;;  %v385_v4 = vpack.c.bf16 %v57_v60, %v56_v58  ;;  %v355_v5 = vpack.c.bf16 %v43_v62, %v42_v61  ;;  %v44_v11 = vld [vmem:[%s659_s1 + $0xe0] sm:$0xff] }
  0x10   :  { %380 = vmatprep.subr.bf16.mxu1 %v379_v43  ;;  %v26_v6 = vld [vmem:[%s659_s1 + $0x50] sm:$0xff]  ;;  %v27_v7 = vld [vmem:[%s659_s1 + $0x58] sm:$0xff]  ;;  %v387_v9 = vpack.c.bf16 %v75_v2, %v74_v1  ;;  %v45_v12 = vld [vmem:[%s659_s1 + $0xe8] sm:$0xff] }
  0x11   :  { %350 = vmatpush3.bf16.msra.mxu0 %v349_v51  ;;  %v58_v8 = vld [vmem:[%s659_s1 + $0x150] sm:$0xff]  ;;  %v59_v10 = vld [vmem:[%s659_s1 + $0x158] sm:$0xff]  ;;  %v76_v14 = vld [vmem:[%s659_s1 + $0x1e0] sm:$0xff]  ;;  %v357_v16 = vpack.c.bf16 %v27_v7, %v26_v6  ;;  %v359_v20 = vpack.c.bf16 %v45_v12, %v44_v11 }
  0x12   :  { %352 = vmatprep.subr.bf16.mxu0 %v351_v55  ;;  %v77_v15 = vld [vmem:[%s659_s1 + $0x1e8] sm:$0xff]  ;;  %v28_v17 = vld [vmem:[%s659_s1 + $0x60] sm:$0xff]  ;;  %v389_v19 = vpack.c.bf16 %v59_v10, %v58_v8 }
  0x13   :  { %382 = vmatpush3.bf16.msra.mxu1 %v381_v54  ;;  %v29_v18 = vld [vmem:[%s659_s1 + $0x68] sm:$0xff]  ;;  %v60_v21 = vld [vmem:[%s659_s1 + $0x160] sm:$0xff] }
  0x14   :  { %384 = vmatprep.subr.bf16.mxu1 %v383_v59  ;;  %v15_v22 = vld [vmem:[%s658_s0] sm:$0xff] }
  0x15   :  { %354 = vmatpush3.bf16.msra.mxu0 %v353_v3 }
  0x16   :  { %356 = vmatprep.subr.bf16.mxu0 %v355_v5 }
  0x17   :  { %386 = vmatpush3.bf16.msra.mxu1 %v385_v4 }
  0x18   :  { %8 = vsyncpa [#allocation3], 0  ;;  %388 = vmatprep.subr.bf16.mxu1 %v387_v9  ;;  %v391_v23 = vpack.c.bf16 %v77_v15, %v76_v14  ;;  %v61_v24 = vld [vmem:[%s659_s1 + $0x168] sm:$0xff]  ;;  %v46_v25 = vld [vmem:[%s659_s1 + $0xf0] sm:$0xff]  ;;  %v95_v27 = vrot.slane %v15_v22, %v94_v13  ;;  %v88_v28 = vcombine.high %v15_v22, %v15_v22  ;;  %v361_v31 = vpack.c.bf16 %v29_v18, %v28_v17 }
  0x19   :  { %v47_v26 = vld [vmem:[%s659_s1 + $0xf8] sm:$0xff]  ;;  %v78_v29 = vld [vmem:[%s659_s1 + $0x1f0] sm:$0xff]  ;;  %358 = vmatpush3.bf16.msra.mxu0 %v357_v16  ;;  %v393_v34 = vpack.c.bf16 %v61_v24, %v60_v21  ;;  %v264_v45 = vld [vmem:[%s660_s2] ss:$0 sm:$0xff] }
  0x1a   :  { %v79_v30 = vld [vmem:[%s659_s1 + $0x1f8] sm:$0xff]  ;;  %v103_v32 = vcombine.high %v95_v27, %v95_v27  ;;  %v102_v33 = vrot.slane %v88_v28, %v94_v13  ;;  %360 = vmatprep.subr.bf16.mxu0 %v359_v20  ;;  %v363_v35 = vpack.c.bf16 %v47_v26, %v46_v25  ;;  %v30_v36 = vld [vmem:[%s659_s1 + $0x70] sm:$0xff] }
  0x1b   :  { %390 = vmatpush3.bf16.msra.mxu1 %v389_v19  ;;  %v31_v37 = vld [vmem:[%s659_s1 + $0x78] sm:$0xff]  ;;  %v395_v38 = vpack.c.bf16 %v79_v30, %v78_v29  ;;  %v62_v39 = vld [vmem:[%s659_s1 + $0x170] sm:$0xff] }
  0x1c   :  { %392 = vmatprep.subr.bf16.mxu1 %v391_v23  ;;  %v63_v40 = vld [vmem:[%s659_s1 + $0x178] sm:$0xff]  ;;  %173 = vmatprep.mubr.f32.mxu0 %v103_v32  ;;  %v104_v41 = vcombine.high %v102_v33, %v102_v33  ;;  %v365_v42 = vpack.c.bf16 %v31_v37, %v30_v36  ;;  %s427_s1 = smov [#allocation2]  }
  0x1d   :  { %362 = vmatpush3.bf16.msra.mxu0 %v361_v31  ;;  %v397_v43 = vpack.c.bf16 %v63_v40, %v62_v39  ;;  %s256_s8 = sshll.u32 %s427_s1, 4  ;;  %s257_s8 = int_to_ptr.vmem [resolvable:$true] %s256_s8 }
  0x1e   :  { %243 = vmatprep.mubr.f32.mxu1 %v104_v41  ;;  %364 = vmatprep.subr.bf16.mxu0 %v363_v35  ;;  %s402_s9 = scalar_lea.vmem %s257_s8, 32  ;;  %p407_p1 = scmp.lt.s32.totalorder %s257_s8, %s257_s8 }
  0x1f   :  { %394 = vmatpush3.bf16.msra.mxu1 %v393_v34  ;;  %p403_p0 = scmp.ne.s32.totalorder %s257_s8, %s402_s9  ;;  %p408_p2 = scmp.lt.s32.totalorder %s402_s9, %s402_s9 }
  0x20   :  { %396 = vmatprep.subr.bf16.mxu1 %v395_v38 }
  0x21   :  { %366 = vmatpush3.bf16.msra.mxu0 %v365_v42  ;;  %p409_p3 = por %p408_p2, %p407_p1 }
  0x23   :  { %398 = vmatpush3.bf16.msra.mxu1 %v397_v43  ;;  %p410_p4 = pnand %p409_p3, %p403_p0 }
  0x24   :  { %174 = vmatmul.mubr.f32.vlgmr.msra.gmra.mrb[0].mxu0 %v95_v27 }
  0x26   :  { %244 = vmatmul.mubr.f32.vlgmr.msra.gmra.mrb[0].mxu1 %v102_v33 }
  0xf7   :  { %v297_v44 = vpop.f32.mrb[0].mxu0 }
  0xf8   :  { %v298_v46 = vpop.f32.mrb[1].mxu0 }
  0xf9   :  { %v332_v47 = vpop.f32.mrb[0].mxu1  ;;  %v299_v48 = vadd.f32 %v298_v46, %v297_v44 }
  0xfa   :  { %v333_v49 = vpop.f32.mrb[1].mxu1 }
  0xfb   :  { %v334_v50 = vadd.f32 %v333_v49, %v332_v47  ;;  %v176_v51 = vadd.f32 %v299_v48, %v264_v45 }
  0xfd   :  { %v246_v52 = vadd.f32 %v334_v50, %v176_v51 }
  0xff   :  { %249 = vst [vmem:[#allocation2] sm:$0x3] %v246_v52 }
 0x100   :  { %413 = shalt.err (!%p410_p4)
}
 0x101   :  { %s414_s11 = scalar_lea.hbm %s661_s3, 32 }
 0x102   :  { %p415_p5 = scmp.ne.s32.totalorder %s661_s3, %s414_s11  ;;  %p418_p6 = scmp.lt.u32.totalorder %s414_s11, %s661_s3 }
 0x104   :  { %p420_p7 = pnand %p418_p6, %p415_p5 }
 0x106   :  { %423 = shalt.err (!%p420_p7)
}
 0x107   :  { %259 = dma.vmem_to_hbm [thread:$0]  %s257_s8, 32, %s661_s3, [#allocation3]  }
 0x108   :  { %424 = dma.done.wait [#allocation3], 32  }
 0x109   :  { %425 = vsyncadd [#allocation3], 4294967264 }
 0x10a   :  { %263 = vsyncpa [#allocation3], 1 }

// kernel: rgression_net_forward.19
= control target key start
LH: loop header
LB: loop body
LE: loop exit
PB: predicated region body
PF: predicated region fallthrough
CT: control target
= control target key end

     0   :  { %vm2571_vm0 = vcmask 1041408   ;;  %s7506_s1 = inlined_call_operand.vmem [shape: f32[2304,512], index: 1, kind: input, shape index: {}]   ;;  %s7507_s0 = inlined_call_operand.vmem [shape: f32[2,2304], index: 0, kind: input, shape index: {}]   ;;  %s7508_s2 = inlined_call_operand.vmem [shape: f32[2,512], index: 2, kind: output, shape index: {0}]   ;;  %s7509_s3 = inlined_call_operand.vmem [shape: f32[1,512], index: 3, kind: output, shape index: {1}]   ;;  %s7510_s4 = inlined_call_operand.vmem [shape: f32[1,512], index: 4, kind: output, shape index: {2}]  }
   0x1   :  { %v20_v0 = vld [vmem:[%s7506_s1 + $0x8] sm:$0xff]  ;;  %v22_v2 = vld [vmem:[%s7506_s1 + $0x18] sm:$0xff]  ;;  %v19_v5 = vld [vmem:[%s7506_s1] sm:$0xff] }
   0x2   :  { %v24_v1 = vld [vmem:[%s7506_s1 + $0x28] sm:$0xff]  ;;  %v26_v4 = vld [vmem:[%s7506_s1 + $0x38] sm:$0xff]  ;;  %v23_v6 = vld [vmem:[%s7506_s1 + $0x20] sm:$0xff] }
   0x3   :  { %v2709_v3 = vpack.c.bf16 %v24_v1, %v20_v0  ;;  %v3285_v7 = vpack.c.bf16 %v26_v4, %v22_v2  ;;  %v2711_v8 = vpack.c.bf16 %v23_v6, %v19_v5  ;;  %v21_v9 = vld [vmem:[%s7506_s1 + $0x10] sm:$0xff]  ;;  %v28_v11 = vld [vmem:[%s7506_s1 + $0x48] sm:$0xff]  ;;  %v30_v14 = vld [vmem:[%s7506_s1 + $0x58] sm:$0xff] }
   0x4   :  { %v25_v10 = vld [vmem:[%s7506_s1 + $0x30] sm:$0xff]  ;;  %v32_v13 = vld [vmem:[%s7506_s1 + $0x68] sm:$0xff]  ;;  %v34_v15 = vld [vmem:[%s7506_s1 + $0x78] sm:$0xff] }
   0x5   :  { %2710 = vmatprep.subr.bf16.mxu0 %v2709_v3  ;;  %v3287_v12 = vpack.c.bf16 %v25_v10, %v21_v9  ;;  %3286 = vmatprep.subr.bf16.mxu1 %v3285_v7  ;;  %v2713_v16 = vpack.c.bf16 %v32_v13, %v28_v11  ;;  %v3289_v17 = vpack.c.bf16 %v34_v15, %v30_v14  ;;  %v27_v18 = vld [vmem:[%s7506_s1 + $0x40] sm:$0xff]  ;;  %v29_v20 = vld [vmem:[%s7506_s1 + $0x50] sm:$0xff]  ;;  %v36_v23 = vld [vmem:[%s7506_s1 + $0x88] sm:$0xff] }
   0x6   :  { %2712 = vmatpush1.bf16.msra.mxu0 %v2711_v8  ;;  %v31_v19 = vld [vmem:[%s7506_s1 + $0x60] sm:$0xff]  ;;  %v33_v22 = vld [vmem:[%s7506_s1 + $0x70] sm:$0xff]  ;;  %v40_v24 = vld [vmem:[%s7506_s1 + $0xa8] sm:$0xff] }
   0x7   :  { %3288 = vmatpush1.bf16.msra.mxu1 %v3287_v12  ;;  %v2715_v21 = vpack.c.bf16 %v31_v19, %v27_v18  ;;  %2714 = vmatprep.subr.bf16.mxu0 %v2713_v16  ;;  %v3291_v25 = vpack.c.bf16 %v33_v22, %v29_v20  ;;  %v2717_v26 = vpack.c.bf16 %v40_v24, %v36_v23  ;;  %v38_v27 = vld [vmem:[%s7506_s1 + $0x98] sm:$0xff]  ;;  %v35_v29 = vld [vmem:[%s7506_s1 + $0x80] sm:$0xff]  ;;  %v37_v32 = vld [vmem:[%s7506_s1 + $0x90] sm:$0xff] }
   0x8   :  { %3290 = vmatprep.subr.bf16.mxu1 %v3289_v17  ;;  %v42_v28 = vld [vmem:[%s7506_s1 + $0xb8] sm:$0xff]  ;;  %v39_v31 = vld [vmem:[%s7506_s1 + $0xa0] sm:$0xff]  ;;  %v41_v33 = vld [vmem:[%s7506_s1 + $0xb0] sm:$0xff] }
   0x9   :  { %v3293_v30 = vpack.c.bf16 %v42_v28, %v38_v27  ;;  %v2719_v34 = vpack.c.bf16 %v39_v31, %v35_v29  ;;  %v44_v35 = vld [vmem:[%s7506_s1 + $0xc8] sm:$0xff]  ;;  %v46_v37 = vld [vmem:[%s7506_s1 + $0xd8] sm:$0xff]  ;;  %v3295_v38 = vpack.c.bf16 %v41_v33, %v37_v32  ;;  %v43_v41 = vld [vmem:[%s7506_s1 + $0xc0] sm:$0xff] }
   0xa   :  { %2716 = vmatpush1.bf16.msra.mxu0 %v2715_v21  ;;  %v48_v36 = vld [vmem:[%s7506_s1 + $0xe8] sm:$0xff]  ;;  %v50_v40 = vld [vmem:[%s7506_s1 + $0xf8] sm:$0xff]  ;;  %v47_v42 = vld [vmem:[%s7506_s1 + $0xe0] sm:$0xff] }
   0xb   :  { %3292 = vmatpush1.bf16.msra.mxu1 %v3291_v25  ;;  %2718 = vmatprep.subr.bf16.mxu0 %v2717_v26  ;;  %v2721_v39 = vpack.c.bf16 %v48_v36, %v44_v35  ;;  %v3297_v43 = vpack.c.bf16 %v50_v40, %v46_v37  ;;  %v45_v44 = vld [vmem:[%s7506_s1 + $0xd0] sm:$0xff]  ;;  %v52_v46 = vld [vmem:[%s7506_s1 + $0x108] sm:$0xff]  ;;  %v54_v48 = vld [vmem:[%s7506_s1 + $0x118] sm:$0xff]  ;;  %v2723_v50 = vpack.c.bf16 %v47_v42, %v43_v41 }
   0xc   :  { %3294 = vmatprep.subr.bf16.mxu1 %v3293_v30  ;;  %v49_v45 = vld [vmem:[%s7506_s1 + $0xf0] sm:$0xff]  ;;  %v56_v47 = vld [vmem:[%s7506_s1 + $0x128] sm:$0xff]  ;;  %v58_v49 = vld [vmem:[%s7506_s1 + $0x138] sm:$0xff] }
   0xd   :  { %v3299_v51 = vpack.c.bf16 %v49_v45, %v45_v44  ;;  %v2725_v52 = vpack.c.bf16 %v56_v47, %v52_v46  ;;  %v51_v53 = vld [vmem:[%s7506_s1 + $0x100] sm:$0xff]  ;;  %v53_v55 = vld [vmem:[%s7506_s1 + $0x110] sm:$0xff]  ;;  %v3301_v56 = vpack.c.bf16 %v58_v49, %v54_v48  ;;  %v60_v58 = vld [vmem:[%s7506_s1 + $0x148] sm:$0xff]  ;;  %v3899_v46 = vmov 1983009808  }
   0xe   :  { %2720 = vmatpush1.bf16.msra.mxu0 %v2719_v34  ;;  %v55_v54 = vld [vmem:[%s7506_s1 + $0x120] sm:$0xff]  ;;  %v57_v57 = vld [vmem:[%s7506_s1 + $0x130] sm:$0xff]  ;;  %v64_v59 = vld [vmem:[%s7506_s1 + $0x168] sm:$0xff]  ;;  %v1178_v47 = vunpack.c.l.s4 %v3899_v46  ;;  %v1180_v48 = vlaneseq }
   0xf   :  { %3296 = vmatpush1.bf16.msra.mxu1 %v3295_v38  ;;  %2722 = vmatprep.subr.bf16.mxu0 %v2721_v39  ;;  %v62_v60 = vld [vmem:[%s7506_s1 + $0x158] sm:$0xff]  ;;  %v2727_v62 = vpack.c.bf16 %v55_v54, %v51_v53  ;;  %v3303_v63 = vpack.c.bf16 %v57_v57, %v53_v55  ;;  %v2729_v0 = vpack.c.bf16 %v64_v59, %v60_v58  ;;  %v59_v1 = vld [vmem:[%s7506_s1 + $0x140] sm:$0xff]  ;;  %v61_v3 = vld [vmem:[%s7506_s1 + $0x150] sm:$0xff] }
  0x10   :  { %3298 = vmatprep.subr.bf16.mxu1 %v3297_v43  ;;  %v66_v61 = vld [vmem:[%s7506_s1 + $0x178] sm:$0xff]  ;;  %v63_v2 = vld [vmem:[%s7506_s1 + $0x160] sm:$0xff]  ;;  %v65_v5 = vld [vmem:[%s7506_s1 + $0x170] sm:$0xff]  ;;  %vm2631_vm1 = vcmp.lt.s32.totalorder %v1180_v48, 512 }
  0x11   :  { %v3305_v4 = vpack.c.bf16 %v66_v61, %v62_v60  ;;  %v68_v6 = vld [vmem:[%s7506_s1 + $0x188] sm:$0xff]  ;;  %v70_v8 = vld [vmem:[%s7506_s1 + $0x198] sm:$0xff]  ;;  %v2731_v10 = vpack.c.bf16 %v63_v2, %v59_v1  ;;  %v3307_v11 = vpack.c.bf16 %v65_v5, %v61_v3  ;;  %v67_v13 = vld [vmem:[%s7506_s1 + $0x180] sm:$0xff]  ;;  %v1179_v61 = vunpack.c.0.s8 %v1178_v47 }
  0x12   :  { %2724 = vmatpush1.bf16.msra.mxu0 %v2723_v50  ;;  %v72_v7 = vld [vmem:[%s7506_s1 + $0x1a8] sm:$0xff]  ;;  %v74_v9 = vld [vmem:[%s7506_s1 + $0x1b8] sm:$0xff]  ;;  %v71_v14 = vld [vmem:[%s7506_s1 + $0x1a0] sm:$0xff] }
  0x13   :  { %3300 = vmatpush1.bf16.msra.mxu1 %v3299_v51  ;;  %2726 = vmatprep.subr.bf16.mxu0 %v2725_v52  ;;  %v2733_v12 = vpack.c.bf16 %v72_v7, %v68_v6  ;;  %v69_v15 = vld [vmem:[%s7506_s1 + $0x190] sm:$0xff]  ;;  %v3309_v16 = vpack.c.bf16 %v74_v9, %v70_v8  ;;  %v76_v18 = vld [vmem:[%s7506_s1 + $0x1c8] sm:$0xff]  ;;  %v78_v20 = vld [vmem:[%s7506_s1 + $0x1d8] sm:$0xff]  ;;  %v2735_v22 = vpack.c.bf16 %v71_v14, %v67_v13 }
  0x14   :  { %3302 = vmatprep.subr.bf16.mxu1 %v3301_v56  ;;  %v73_v17 = vld [vmem:[%s7506_s1 + $0x1b0] sm:$0xff]  ;;  %v80_v19 = vld [vmem:[%s7506_s1 + $0x1e8] sm:$0xff]  ;;  %v82_v21 = vld [vmem:[%s7506_s1 + $0x1f8] sm:$0xff] }
  0x15   :  { %v3311_v23 = vpack.c.bf16 %v73_v17, %v69_v15  ;;  %v2737_v24 = vpack.c.bf16 %v80_v19, %v76_v18  ;;  %v75_v25 = vld [vmem:[%s7506_s1 + $0x1c0] sm:$0xff]  ;;  %v77_v27 = vld [vmem:[%s7506_s1 + $0x1d0] sm:$0xff]  ;;  %v3313_v28 = vpack.c.bf16 %v82_v21, %v78_v20  ;;  %v84_v30 = vld [vmem:[%s7506_s1 + $0x208] sm:$0xff] }
  0x16   :  { %2728 = vmatpush1.bf16.msra.mxu0 %v2727_v62  ;;  %v79_v26 = vld [vmem:[%s7506_s1 + $0x1e0] sm:$0xff]  ;;  %v81_v29 = vld [vmem:[%s7506_s1 + $0x1f0] sm:$0xff]  ;;  %v88_v31 = vld [vmem:[%s7506_s1 + $0x228] sm:$0xff]  ;;  %v4179_v62 = vshrl.u32 %v1180_v48, 7 }
  0x17   :  { %3304 = vmatpush1.bf16.msra.mxu1 %v3303_v63  ;;  %2730 = vmatprep.subr.bf16.mxu0 %v2729_v0  ;;  %v86_v32 = vld [vmem:[%s7506_s1 + $0x218] sm:$0xff]  ;;  %v2739_v34 = vpack.c.bf16 %v79_v26, %v75_v25  ;;  %v3315_v35 = vpack.c.bf16 %v81_v29, %v77_v27  ;;  %v2741_v36 = vpack.c.bf16 %v88_v31, %v84_v30  ;;  %v83_v37 = vld [vmem:[%s7506_s1 + $0x200] sm:$0xff]  ;;  %v85_v39 = vld [vmem:[%s7506_s1 + $0x210] sm:$0xff] }
  0x18   :  { %3306 = vmatprep.subr.bf16.mxu1 %v3305_v4  ;;  %v90_v33 = vld [vmem:[%s7506_s1 + $0x238] sm:$0xff]  ;;  %v87_v38 = vld [vmem:[%s7506_s1 + $0x220] sm:$0xff]  ;;  %v89_v41 = vld [vmem:[%s7506_s1 + $0x230] sm:$0xff] }
  0x19   :  { %v3317_v40 = vpack.c.bf16 %v90_v33, %v86_v32  ;;  %v92_v42 = vld [vmem:[%s7506_s1 + $0x248] sm:$0xff]  ;;  %v94_v44 = vld [vmem:[%s7506_s1 + $0x258] sm:$0xff]  ;;  %v2743_v49 = vpack.c.bf16 %v87_v38, %v83_v37  ;;  %v3319_v50 = vpack.c.bf16 %v89_v41, %v85_v39  ;;  %v91_v52 = vld [vmem:[%s7506_s1 + $0x240] sm:$0xff] }
  0x1a   :  { %2732 = vmatpush1.bf16.msra.mxu0 %v2731_v10  ;;  %v96_v43 = vld [vmem:[%s7506_s1 + $0x268] sm:$0xff]  ;;  %v98_v45 = vld [vmem:[%s7506_s1 + $0x278] sm:$0xff]  ;;  %v95_v53 = vld [vmem:[%s7506_s1 + $0x260] sm:$0xff] }
  0x1b   :  { %3308 = vmatpush1.bf16.msra.mxu1 %v3307_v11  ;;  %2734 = vmatprep.subr.bf16.mxu0 %v2733_v12  ;;  %v2745_v51 = vpack.c.bf16 %v96_v43, %v92_v42  ;;  %v93_v54 = vld [vmem:[%s7506_s1 + $0x250] sm:$0xff]  ;;  %v3321_v55 = vpack.c.bf16 %v98_v45, %v94_v44  ;;  %v100_v57 = vld [vmem:[%s7506_s1 + $0x288] sm:$0xff]  ;;  %v102_v59 = vld [vmem:[%s7506_s1 + $0x298] sm:$0xff]  ;;  %v2747_v63 = vpack.c.bf16 %v95_v53, %v91_v52 }
  0x1c   :  { %3310 = vmatprep.subr.bf16.mxu1 %v3309_v16  ;;  %v97_v56 = vld [vmem:[%s7506_s1 + $0x270] sm:$0xff]  ;;  %v104_v58 = vld [vmem:[%s7506_s1 + $0x2a8] sm:$0xff]  ;;  %v106_v60 = vld [vmem:[%s7506_s1 + $0x2b8] sm:$0xff]  ;;  %v4206_v11 = vsub.s32 %v1179_v61, %v4179_v62 }
  0x1d   :  { %v3323_v0 = vpack.c.bf16 %v97_v56, %v93_v54  ;;  %v2749_v1 = vpack.c.bf16 %v104_v58, %v100_v57  ;;  %v99_v2 = vld [vmem:[%s7506_s1 + $0x280] sm:$0xff]  ;;  %v101_v4 = vld [vmem:[%s7506_s1 + $0x290] sm:$0xff]  ;;  %v3325_v5 = vpack.c.bf16 %v106_v60, %v102_v59  ;;  %v108_v7 = vld [vmem:[%s7506_s1 + $0x2c8] sm:$0xff] }
  0x1e   :  { %2736 = vmatpush1.bf16.msra.mxu0 %v2735_v22  ;;  %v103_v3 = vld [vmem:[%s7506_s1 + $0x2a0] sm:$0xff]  ;;  %v105_v6 = vld [vmem:[%s7506_s1 + $0x2b0] sm:$0xff]  ;;  %v112_v8 = vld [vmem:[%s7506_s1 + $0x2e8] sm:$0xff] }
  0x1f   :  { %3312 = vmatpush1.bf16.msra.mxu1 %v3311_v23  ;;  %2738 = vmatprep.subr.bf16.mxu0 %v2737_v24  ;;  %v110_v9 = vld [vmem:[%s7506_s1 + $0x2d8] sm:$0xff]  ;;  %v2751_v12 = vpack.c.bf16 %v103_v3, %v99_v2  ;;  %v107_v13 = vld [vmem:[%s7506_s1 + $0x2c0] sm:$0xff]  ;;  %v3327_v14 = vpack.c.bf16 %v105_v6, %v101_v4  ;;  %v2753_v15 = vpack.c.bf16 %v112_v8, %v108_v7  ;;  %v109_v17 = vld [vmem:[%s7506_s1 + $0x2d0] sm:$0xff] }
  0x20   :  { %3314 = vmatprep.subr.bf16.mxu1 %v3313_v28  ;;  %v114_v10 = vld [vmem:[%s7506_s1 + $0x2f8] sm:$0xff]  ;;  %v111_v16 = vld [vmem:[%s7506_s1 + $0x2e0] sm:$0xff]  ;;  %v113_v18 = vld [vmem:[%s7506_s1 + $0x2f0] sm:$0xff] }
  0x21   :  { %v3329_v19 = vpack.c.bf16 %v114_v10, %v110_v9  ;;  %v116_v20 = vld [vmem:[%s7506_s1 + $0x308] sm:$0xff]  ;;  %v4229_v22 = vld [vmem:[%s7507_s0] sm:$0xff]  ;;  %v118_v23 = vld [vmem:[%s7506_s1 + $0x318] sm:$0xff]  ;;  %v2755_v26 = vpack.c.bf16 %v111_v16, %v107_v13  ;;  %v3331_v27 = vpack.c.bf16 %v113_v18, %v109_v17 }
  0x22   :  { %2740 = vmatpush1.bf16.msra.mxu0 %v2739_v34  ;;  %v120_v21 = vld [vmem:[%s7506_s1 + $0x328] sm:$0xff]  ;;  %v122_v24 = vld [vmem:[%s7506_s1 + $0x338] sm:$0xff]  ;;  %v4239_v25 = vrot.slane %v4229_v22, %v4206_v11  ;;  %v115_v29 = vld [vmem:[%s7506_s1 + $0x300] sm:$0xff]  ;;  %v1176_v9 = vcombine.high %v4229_v22, %v4229_v22 }
  0x23   :  { %3316 = vmatpush1.bf16.msra.mxu1 %v3315_v35  ;;  %2742 = vmatprep.subr.bf16.mxu0 %v2741_v36  ;;  %v2757_v28 = vpack.c.bf16 %v120_v21, %v116_v20  ;;  %v119_v30 = vld [vmem:[%s7506_s1 + $0x320] sm:$0xff]  ;;  %v117_v31 = vld [vmem:[%s7506_s1 + $0x310] sm:$0xff]  ;;  %v3333_v33 = vpack.c.bf16 %v122_v24, %v118_v23  ;;  %v124_v35 = vld [vmem:[%s7506_s1 + $0x348] sm:$0xff] }
  0x24   :  { %3318 = vmatprep.subr.bf16.mxu1 %v3317_v40  ;;  %v1191_v32 = vcombine.high %v4239_v25, %v4239_v25  ;;  %v121_v34 = vld [vmem:[%s7506_s1 + $0x330] sm:$0xff]  ;;  %v128_v36 = vld [vmem:[%s7506_s1 + $0x368] sm:$0xff]  ;;  %v126_v37 = vld [vmem:[%s7506_s1 + $0x358] sm:$0xff]  ;;  %v2759_v39 = vpack.c.bf16 %v119_v30, %v115_v29 }
  0x25   :  { %v130_v38 = vld [vmem:[%s7506_s1 + $0x378] sm:$0xff]  ;;  %v3335_v40 = vpack.c.bf16 %v121_v34, %v117_v31  ;;  %v2761_v41 = vpack.c.bf16 %v128_v36, %v124_v35  ;;  %v123_v42 = vld [vmem:[%s7506_s1 + $0x340] sm:$0xff]  ;;  %v125_v44 = vld [vmem:[%s7506_s1 + $0x350] sm:$0xff] }
  0x26   :  { %2744 = vmatpush1.bf16.msra.mxu0 %v2743_v49  ;;  %1334 = vmatprep.mubr.f32.mxu0 %v1191_v32  ;;  %v127_v43 = vld [vmem:[%s7506_s1 + $0x360] sm:$0xff]  ;;  %v3337_v45 = vpack.c.bf16 %v130_v38, %v126_v37  ;;  %v129_v46 = vld [vmem:[%s7506_s1 + $0x370] sm:$0xff]  ;;  %v132_v47 = vld [vmem:[%s7506_s1 + $0x388] sm:$0xff] }
  0x27   :  { %3320 = vmatpush1.bf16.msra.mxu1 %v3319_v50  ;;  %2746 = vmatprep.subr.bf16.mxu0 %v2745_v51  ;;  %v136_v49 = vld [vmem:[%s7506_s1 + $0x3a8] sm:$0xff]  ;;  %v134_v50 = vld [vmem:[%s7506_s1 + $0x398] sm:$0xff]  ;;  %v2763_v52 = vpack.c.bf16 %v127_v43, %v123_v42  ;;  %v3339_v53 = vpack.c.bf16 %v129_v46, %v125_v44  ;;  %v135_v56 = vld [vmem:[%s7506_s1 + $0x3a0] sm:$0xff] }
  0x28   :  { %3322 = vmatprep.subr.bf16.mxu1 %v3321_v55  ;;  %1973 = vmatprep.mubr.f32.mxu1 %v1191_v32  ;;  %v138_v51 = vld [vmem:[%s7506_s1 + $0x3b8] sm:$0xff]  ;;  %v2765_v54 = vpack.c.bf16 %v136_v49, %v132_v47  ;;  %v131_v55 = vld [vmem:[%s7506_s1 + $0x380] sm:$0xff]  ;;  %v133_v57 = vld [vmem:[%s7506_s1 + $0x390] sm:$0xff] }
  0x29   :  { %v3341_v58 = vpack.c.bf16 %v138_v51, %v134_v50  ;;  %v137_v59 = vld [vmem:[%s7506_s1 + $0x3b0] sm:$0xff]  ;;  %v140_v60 = vld [vmem:[%s7506_s1 + $0x3c8] sm:$0xff]  ;;  %v139_v4 = vld [vmem:[%s7506_s1 + $0x3c0] sm:$0xff] }
  0x2a   :  { %2748 = vmatpush1.bf16.msra.mxu0 %v2747_v63  ;;  %v144_v61 = vld [vmem:[%s7506_s1 + $0x3e8] sm:$0xff]  ;;  %v142_v63 = vld [vmem:[%s7506_s1 + $0x3d8] sm:$0xff]  ;;  %v3343_v2 = vpack.c.bf16 %v137_v59, %v133_v57  ;;  %v141_v6 = vld [vmem:[%s7506_s1 + $0x3d0] sm:$0xff] }
  0x2b   :  { %3324 = vmatpush1.bf16.msra.mxu1 %v3323_v0  ;;  %2750 = vmatprep.subr.bf16.mxu0 %v2749_v1  ;;  %v146_v0 = vld [vmem:[%s7506_s1 + $0x3f8] sm:$0xff]  ;;  %v2767_v1 = vpack.c.bf16 %v135_v56, %v131_v55  ;;  %v2769_v3 = vpack.c.bf16 %v144_v61, %v140_v60  ;;  %v145_v8 = vld [vmem:[%s7506_s1 + $0x3f0] sm:$0xff]  ;;  %v148_v10 = vld [vmem:[%s7506_s1 + $0x408] sm:$0xff] }
  0x2c   :  { %3326 = vmatprep.subr.bf16.mxu1 %v3325_v5  ;;  %v143_v5 = vld [vmem:[%s7506_s1 + $0x3e0] sm:$0xff]  ;;  %v3345_v7 = vpack.c.bf16 %v146_v0, %v142_v63  ;;  %v150_v13 = vld [vmem:[%s7506_s1 + $0x418] sm:$0xff]  ;;  %v3347_v16 = vpack.c.bf16 %v145_v8, %v141_v6  ;;  %v149_v20 = vld [vmem:[%s7506_s1 + $0x410] sm:$0xff] }
  0x2d   :  { %v147_v18 = vld [vmem:[%s7506_s1 + $0x400] sm:$0xff]  ;;  %v153_v22 = vld [vmem:[%s7506_s1 + $0x430] sm:$0xff]  ;;  %v156_v23 = vld [vmem:[%s7506_s1 + $0x448] sm:$0xff] }
  0x2e   :  { %2752 = vmatpush1.bf16.msra.mxu0 %v2751_v12  ;;  %v152_v12 = vld [vmem:[%s7506_s1 + $0x428] sm:$0xff]  ;;  %v3351_v30 = vpack.c.bf16 %v153_v22, %v149_v20  ;;  %v155_v32 = vld [vmem:[%s7506_s1 + $0x440] sm:$0xff]  ;;  %v157_v34 = vld [vmem:[%s7506_s1 + $0x450] sm:$0xff] }
  0x2f   :  { %3328 = vmatpush1.bf16.msra.mxu1 %v3327_v14  ;;  %2754 = vmatprep.subr.bf16.mxu0 %v2753_v15  ;;  %v154_v14 = vld [vmem:[%s7506_s1 + $0x438] sm:$0xff]  ;;  %v2771_v15 = vpack.c.bf16 %v143_v5, %v139_v4  ;;  %v2773_v17 = vpack.c.bf16 %v152_v12, %v148_v10  ;;  %v160_v24 = vld [vmem:[%s7506_s1 + $0x468] sm:$0xff]  ;;  %v161_v36 = vld [vmem:[%s7506_s1 + $0x470] sm:$0xff] }
  0x30   :  { %3330 = vmatprep.subr.bf16.mxu1 %v3329_v19  ;;  %v151_v19 = vld [vmem:[%s7506_s1 + $0x420] sm:$0xff]  ;;  %v3349_v21 = vpack.c.bf16 %v154_v14, %v150_v13  ;;  %v2777_v31 = vpack.c.bf16 %v160_v24, %v156_v23  ;;  %v164_v37 = vld [vmem:[%s7506_s1 + $0x488] sm:$0xff]  ;;  %v3355_v43 = vpack.c.bf16 %v161_v36, %v157_v34  ;;  %v165_v47 = vld [vmem:[%s7506_s1 + $0x490] sm:$0xff] }
  0x31   :  { %v2775_v29 = vpack.c.bf16 %v151_v19, %v147_v18  ;;  %v168_v38 = vld [vmem:[%s7506_s1 + $0x4a8] sm:$0xff]  ;;  %v167_v46 = vld [vmem:[%s7506_s1 + $0x4a0] sm:$0xff]  ;;  %v173_v59 = vld [vmem:[%s7506_s1 + $0x4d0] sm:$0xff] }
  0x32   :  { %2756 = vmatpush1.bf16.msra.mxu0 %v2755_v26  ;;  %v4360_v26 = vrot.slane %v1176_v9, %v4206_v11  ;;  %v2781_v44 = vpack.c.bf16 %v168_v38, %v164_v37  ;;  %v172_v50 = vld [vmem:[%s7506_s1 + $0x4c8] sm:$0xff]  ;;  %v171_v57 = vld [vmem:[%s7506_s1 + $0x4c0] sm:$0xff]  ;;  %v177_v61 = vld [vmem:[%s7506_s1 + $0x4f0] sm:$0xff] }
  0x33   :  { %3332 = vmatpush1.bf16.msra.mxu1 %v3331_v27  ;;  %2758 = vmatprep.subr.bf16.mxu0 %v2757_v28  ;;  %v158_v27 = vld [vmem:[%s7506_s1 + $0x458] sm:$0xff]  ;;  %v176_v51 = vld [vmem:[%s7506_s1 + $0x4e8] sm:$0xff]  ;;  %v3363_v4 = vpack.c.bf16 %v177_v61, %v173_v59  ;;  %v179_v6 = vld [vmem:[%s7506_s1 + $0x500] sm:$0xff] }
  0x34   :  { %3334 = vmatprep.subr.bf16.mxu1 %v3333_v33  ;;  %v162_v28 = vld [vmem:[%s7506_s1 + $0x478] sm:$0xff]  ;;  %v159_v33 = vld [vmem:[%s7506_s1 + $0x460] sm:$0xff]  ;;  %v2785_v56 = vpack.c.bf16 %v176_v51, %v172_v50  ;;  %v180_v63 = vld [vmem:[%s7506_s1 + $0x508] sm:$0xff] }
  0x35   :  { %v3353_v35 = vpack.c.bf16 %v162_v28, %v158_v27  ;;  %v2779_v42 = vpack.c.bf16 %v159_v33, %v155_v32  ;;  %v184_v0 = vld [vmem:[%s7506_s1 + $0x528] sm:$0xff]  ;;  %v181_v8 = vld [vmem:[%s7506_s1 + $0x510] sm:$0xff]  ;;  %v190_v14 = vld [vmem:[%s7506_s1 + $0x558] sm:$0xff] }
  0x36   :  { %2760 = vmatpush1.bf16.msra.mxu0 %v2759_v39  ;;  %v1192_v39 = vcombine.high %v4360_v26, %v4360_v26  ;;  %v2789_v5 = vpack.c.bf16 %v184_v0, %v180_v63  ;;  %v185_v10 = vld [vmem:[%s7506_s1 + $0x530] sm:$0xff]  ;;  %v188_v12 = vld [vmem:[%s7506_s1 + $0x548] sm:$0xff]  ;;  %v187_v19 = vld [vmem:[%s7506_s1 + $0x540] sm:$0xff] }
  0x37   :  { %3336 = vmatpush1.bf16.msra.mxu1 %v3335_v40  ;;  %2762 = vmatprep.subr.bf16.mxu0 %v2761_v41  ;;  %v166_v40 = vld [vmem:[%s7506_s1 + $0x498] sm:$0xff]  ;;  %v192_v13 = vld [vmem:[%s7506_s1 + $0x568] sm:$0xff]  ;;  %v191_v20 = vld [vmem:[%s7506_s1 + $0x560] sm:$0xff] }
  0x38   :  { %3338 = vmatprep.subr.bf16.mxu1 %v3337_v45  ;;  %v170_v41 = vld [vmem:[%s7506_s1 + $0x4b8] sm:$0xff]  ;;  %v163_v45 = vld [vmem:[%s7506_s1 + $0x480] sm:$0xff]  ;;  %v2793_v18 = vpack.c.bf16 %v192_v13, %v188_v12  ;;  %v193_v23 = vld [vmem:[%s7506_s1 + $0x570] sm:$0xff] }
  0x39   :  { %v3357_v49 = vpack.c.bf16 %v170_v41, %v166_v40  ;;  %v196_v24 = vld [vmem:[%s7506_s1 + $0x588] sm:$0xff]  ;;  %v198_v28 = vld [vmem:[%s7506_s1 + $0x598] sm:$0xff]  ;;  %v195_v33 = vld [vmem:[%s7506_s1 + $0x580] sm:$0xff] }
  0x3a   :  { %2764 = vmatpush1.bf16.msra.mxu0 %v2763_v52  ;;  %v174_v52 = vld [vmem:[%s7506_s1 + $0x4d8] sm:$0xff]  ;;  %v200_v27 = vld [vmem:[%s7506_s1 + $0x5a8] sm:$0xff]  ;;  %v199_v34 = vld [vmem:[%s7506_s1 + $0x5a0] sm:$0xff] }
  0x3b   :  { %3340 = vmatpush1.bf16.msra.mxu1 %v3339_v53  ;;  %2766 = vmatprep.subr.bf16.mxu0 %v2765_v54  ;;  %v178_v53 = vld [vmem:[%s7506_s1 + $0x4f8] sm:$0xff]  ;;  %v2783_v54 = vpack.c.bf16 %v167_v46, %v163_v45  ;;  %v2797_v32 = vpack.c.bf16 %v200_v27, %v196_v24  ;;  %v201_v37 = vld [vmem:[%s7506_s1 + $0x5b0] sm:$0xff]  ;;  %v204_v38 = vld [vmem:[%s7506_s1 + $0x5c8] sm:$0xff] }
  0x3c   :  { %3342 = vmatprep.subr.bf16.mxu1 %v3341_v58  ;;  %v175_v58 = vld [vmem:[%s7506_s1 + $0x4e0] sm:$0xff]  ;;  %v3361_v60 = vpack.c.bf16 %v178_v53, %v174_v52  ;;  %v206_v40 = vld [vmem:[%s7506_s1 + $0x5d8] sm:$0xff]  ;;  %v212_v50 = vld [vmem:[%s7506_s1 + $0x608] sm:$0xff] }
  0x3d   :  { %v210_v41 = vld [vmem:[%s7506_s1 + $0x5f8] sm:$0xff]  ;;  %v203_v45 = vld [vmem:[%s7506_s1 + $0x5c0] sm:$0xff]  ;;  %v216_v51 = vld [vmem:[%s7506_s1 + $0x628] sm:$0xff] }
  0x3e   :  { %2768 = vmatpush1.bf16.msra.mxu0 %v2767_v1  ;;  %v182_v1 = vld [vmem:[%s7506_s1 + $0x518] sm:$0xff]  ;;  %v207_v46 = vld [vmem:[%s7506_s1 + $0x5e0] sm:$0xff]  ;;  %v213_v59 = vld [vmem:[%s7506_s1 + $0x610] sm:$0xff] }
  0x3f   :  { %3344 = vmatpush1.bf16.msra.mxu1 %v3343_v2  ;;  %2770 = vmatprep.subr.bf16.mxu0 %v2769_v3  ;;  %v186_v2 = vld [vmem:[%s7506_s1 + $0x538] sm:$0xff]  ;;  %v2787_v3 = vpack.c.bf16 %v175_v58, %v171_v57  ;;  %v211_v57 = vld [vmem:[%s7506_s1 + $0x600] sm:$0xff]  ;;  %v217_v61 = vld [vmem:[%s7506_s1 + $0x630] sm:$0xff] }
  0x40   :  { %3346 = vmatprep.subr.bf16.mxu1 %v3345_v7  ;;  %v183_v7 = vld [vmem:[%s7506_s1 + $0x520] sm:$0xff]  ;;  %v3365_v9 = vpack.c.bf16 %v186_v2, %v182_v1  ;;  %v214_v52 = vld [vmem:[%s7506_s1 + $0x618] sm:$0xff]  ;;  %v220_v63 = vld [vmem:[%s7506_s1 + $0x648] sm:$0xff] }
  0x41   :  { %v218_v53 = vld [vmem:[%s7506_s1 + $0x638] sm:$0xff]  ;;  %v215_v58 = vld [vmem:[%s7506_s1 + $0x620] sm:$0xff]  ;;  %v224_v0 = vld [vmem:[%s7506_s1 + $0x668] sm:$0xff] }
  0x42   :  { %2772 = vmatpush1.bf16.msra.mxu0 %v2771_v15  ;;  %v194_v15 = vld [vmem:[%s7506_s1 + $0x578] sm:$0xff]  ;;  %v228_v12 = vld [vmem:[%s7506_s1 + $0x688] sm:$0xff] }
  0x43   :  { %3348 = vmatpush1.bf16.msra.mxu1 %v3347_v16  ;;  %2774 = vmatprep.subr.bf16.mxu0 %v2773_v17  ;;  %v2791_v16 = vpack.c.bf16 %v183_v7, %v179_v6  ;;  %v3367_v17 = vpack.c.bf16 %v185_v10, %v181_v8  ;;  %v3369_v22 = vpack.c.bf16 %v194_v15, %v190_v14  ;;  %v222_v1 = vld [vmem:[%s7506_s1 + $0x658] sm:$0xff]  ;;  %v219_v6 = vld [vmem:[%s7506_s1 + $0x640] sm:$0xff]  ;;  %v221_v8 = vld [vmem:[%s7506_s1 + $0x650] sm:$0xff] }
  0x44   :  { %3350 = vmatprep.subr.bf16.mxu1 %v3349_v21  ;;  %v189_v21 = vld [vmem:[%s7506_s1 + $0x550] sm:$0xff]  ;;  %v226_v2 = vld [vmem:[%s7506_s1 + $0x678] sm:$0xff]  ;;  %v223_v7 = vld [vmem:[%s7506_s1 + $0x660] sm:$0xff] }
  0x45   :  { %1335 = vmatmul.mubr.f32.vlgmr.msra.gmra.mrb[0].mxu0 %v4239_v25  ;;  %v225_v10 = vld [vmem:[%s7506_s1 + $0x670] sm:$0xff]  ;;  %v232_v13 = vld [vmem:[%s7506_s1 + $0x6a8] sm:$0xff]  ;;  %v230_v14 = vld [vmem:[%s7506_s1 + $0x698] sm:$0xff] }
  0x46   :  { %2776 = vmatpush1.bf16.msra.mxu0 %v2775_v29  ;;  %1974 = vmatmul.mubr.f32.vlgmr.msra.gmra.mrb[0].mxu1 %v4239_v25  ;;  %v169_v25 = vld [vmem:[%s7506_s1 + $0x4b0] sm:$0xff]  ;;  %v202_v29 = vld [vmem:[%s7506_s1 + $0x5b8] sm:$0xff]  ;;  %v236_v24 = vld [vmem:[%s7506_s1 + $0x6c8] sm:$0xff] }
  0x47   :  { %3352 = vmatpush1.bf16.msra.mxu1 %v3351_v30  ;;  %2778 = vmatprep.subr.bf16.mxu0 %v2777_v31  ;;  %v3359_v55 = vpack.c.bf16 %v169_v25, %v165_v47  ;;  %v2795_v30 = vpack.c.bf16 %v191_v20, %v187_v19  ;;  %v3371_v31 = vpack.c.bf16 %v193_v23, %v189_v21  ;;  %v205_v47 = vld [vmem:[%s7506_s1 + $0x5d0] sm:$0xff]  ;;  %v234_v15 = vld [vmem:[%s7506_s1 + $0x6b8] sm:$0xff]  ;;  %v227_v19 = vld [vmem:[%s7506_s1 + $0x680] sm:$0xff] }
  0x48   :  { %3354 = vmatprep.subr.bf16.mxu1 %v3353_v35  ;;  %1405 = vmatprep.mubr.f32.mxu0 %v1192_v39  ;;  %v197_v35 = vld [vmem:[%s7506_s1 + $0x590] sm:$0xff]  ;;  %v3373_v36 = vpack.c.bf16 %v202_v29, %v198_v28  ;;  %v231_v20 = vld [vmem:[%s7506_s1 + $0x6a0] sm:$0xff]  ;;  %v240_v27 = vld [vmem:[%s7506_s1 + $0x6e8] sm:$0xff] }
  0x49   :  { %2044 = vmatprep.mubr.f32.mxu1 %v1192_v39  ;;  %v208_v39 = vld [vmem:[%s7506_s1 + $0x5e8] sm:$0xff]  ;;  %v209_v25 = vld [vmem:[%s7506_s1 + $0x5f0] sm:$0xff]  ;;  %v238_v28 = vld [vmem:[%s7506_s1 + $0x6d8] sm:$0xff] }
  0x4a   :  { %2780 = vmatpush1.bf16.msra.mxu0 %v2779_v42  ;;  %v2799_v42 = vpack.c.bf16 %v199_v34, %v195_v33  ;;  %v229_v21 = vld [vmem:[%s7506_s1 + $0x690] sm:$0xff]  ;;  %v242_v29 = vld [vmem:[%s7506_s1 + $0x6f8] sm:$0xff]  ;;  %v235_v33 = vld [vmem:[%s7506_s1 + $0x6c0] sm:$0xff] }
  0x4b   :  { %3356 = vmatpush1.bf16.msra.mxu1 %v3355_v43  ;;  %2782 = vmatprep.subr.bf16.mxu0 %v2781_v44  ;;  %v3375_v43 = vpack.c.bf16 %v201_v37, %v197_v35  ;;  %v2801_v44 = vpack.c.bf16 %v208_v39, %v204_v38  ;;  %v233_v23 = vld [vmem:[%s7506_s1 + $0x6b0] sm:$0xff]  ;;  %v239_v34 = vld [vmem:[%s7506_s1 + $0x6e0] sm:$0xff]  ;;  %v244_v38 = vld [vmem:[%s7506_s1 + $0x708] sm:$0xff] }
  0x4c   :  { %3358 = vmatprep.subr.bf16.mxu1 %v3357_v49  ;;  %v3377_v49 = vpack.c.bf16 %v210_v41, %v206_v40  ;;  %v237_v35 = vld [vmem:[%s7506_s1 + $0x6d0] sm:$0xff]  ;;  %v248_v39 = vld [vmem:[%s7506_s1 + $0x728] sm:$0xff]  ;;  %v246_v40 = vld [vmem:[%s7506_s1 + $0x718] sm:$0xff] }
  0x4d   :  { %v241_v37 = vld [vmem:[%s7506_s1 + $0x6f0] sm:$0xff]  ;;  %v250_v41 = vld [vmem:[%s7506_s1 + $0x738] sm:$0xff] }
  0x4e   :  { %2784 = vmatpush1.bf16.msra.mxu0 %v2783_v54  ;;  %v2803_v54 = vpack.c.bf16 %v207_v46, %v203_v45  ;;  %v243_v45 = vld [vmem:[%s7506_s1 + $0x700] sm:$0xff] }
  0x4f   :  { %3360 = vmatpush1.bf16.msra.mxu1 %v3359_v55  ;;  %2786 = vmatprep.subr.bf16.mxu0 %v2785_v56  ;;  %v3379_v55 = vpack.c.bf16 %v209_v25, %v205_v47  ;;  %v2805_v56 = vpack.c.bf16 %v216_v51, %v212_v50  ;;  %v247_v46 = vld [vmem:[%s7506_s1 + $0x720] sm:$0xff]  ;;  %v245_v47 = vld [vmem:[%s7506_s1 + $0x710] sm:$0xff]  ;;  %v252_v50 = vld [vmem:[%s7506_s1 + $0x748] sm:$0xff] }
  0x50   :  { %3362 = vmatprep.subr.bf16.mxu1 %v3361_v60  ;;  %v3381_v60 = vpack.c.bf16 %v218_v53, %v214_v52  ;;  %v249_v25 = vld [vmem:[%s7506_s1 + $0x730] sm:$0xff]  ;;  %v256_v51 = vld [vmem:[%s7506_s1 + $0x768] sm:$0xff]  ;;  %v254_v52 = vld [vmem:[%s7506_s1 + $0x758] sm:$0xff] }
  0x51   :  { %v258_v53 = vld [vmem:[%s7506_s1 + $0x778] sm:$0xff] }
  0x52   :  { %2788 = vmatpush1.bf16.msra.mxu0 %v2787_v3  ;;  %v2807_v3 = vpack.c.bf16 %v215_v58, %v211_v57  ;;  %v251_v57 = vld [vmem:[%s7506_s1 + $0x740] sm:$0xff] }
  0x53   :  { %3364 = vmatpush1.bf16.msra.mxu1 %v3363_v4  ;;  %2790 = vmatprep.subr.bf16.mxu0 %v2789_v5  ;;  %v3383_v4 = vpack.c.bf16 %v217_v61, %v213_v59  ;;  %v2809_v5 = vpack.c.bf16 %v224_v0, %v220_v63  ;;  %v255_v58 = vld [vmem:[%s7506_s1 + $0x760] sm:$0xff]  ;;  %v253_v59 = vld [vmem:[%s7506_s1 + $0x750] sm:$0xff]  ;;  %v260_v63 = vld [vmem:[%s7506_s1 + $0x788] sm:$0xff] }
  0x54   :  { %3366 = vmatprep.subr.bf16.mxu1 %v3365_v9  ;;  %v3385_v9 = vpack.c.bf16 %v226_v2, %v222_v1  ;;  %v257_v61 = vld [vmem:[%s7506_s1 + $0x770] sm:$0xff]  ;;  %v264_v0 = vld [vmem:[%s7506_s1 + $0x7a8] sm:$0xff]  ;;  %v262_v1 = vld [vmem:[%s7506_s1 + $0x798] sm:$0xff] }
  0x55   :  { %v266_v2 = vld [vmem:[%s7506_s1 + $0x7b8] sm:$0xff] }
  0x56   :  { %2792 = vmatpush1.bf16.msra.mxu0 %v2791_v16  ;;  %v2811_v16 = vpack.c.bf16 %v223_v7, %v219_v6  ;;  %v259_v6 = vld [vmem:[%s7506_s1 + $0x780] sm:$0xff] }
  0x57   :  { %3368 = vmatpush1.bf16.msra.mxu1 %v3367_v17  ;;  %2794 = vmatprep.subr.bf16.mxu0 %v2793_v18  ;;  %v3387_v17 = vpack.c.bf16 %v225_v10, %v221_v8  ;;  %v2813_v18 = vpack.c.bf16 %v232_v13, %v228_v12  ;;  %v263_v7 = vld [vmem:[%s7506_s1 + $0x7a0] sm:$0xff]  ;;  %v261_v8 = vld [vmem:[%s7506_s1 + $0x790] sm:$0xff]  ;;  %v268_v12 = vld [vmem:[%s7506_s1 + $0x7c8] sm:$0xff] }
  0x58   :  { %3370 = vmatprep.subr.bf16.mxu1 %v3369_v22  ;;  %v3389_v22 = vpack.c.bf16 %v234_v15, %v230_v14  ;;  %v265_v10 = vld [vmem:[%s7506_s1 + $0x7b0] sm:$0xff]  ;;  %v272_v13 = vld [vmem:[%s7506_s1 + $0x7e8] sm:$0xff]  ;;  %v270_v14 = vld [vmem:[%s7506_s1 + $0x7d8] sm:$0xff] }
  0x59   :  { %v274_v15 = vld [vmem:[%s7506_s1 + $0x7f8] sm:$0xff] }
  0x5a   :  { %2796 = vmatpush1.bf16.msra.mxu0 %v2795_v30  ;;  %v2815_v30 = vpack.c.bf16 %v231_v20, %v227_v19  ;;  %v267_v19 = vld [vmem:[%s7506_s1 + $0x7c0] sm:$0xff] }
  0x5b   :  { %3372 = vmatpush1.bf16.msra.mxu1 %v3371_v31  ;;  %2798 = vmatprep.subr.bf16.mxu0 %v2797_v32  ;;  %v3391_v31 = vpack.c.bf16 %v233_v23, %v229_v21  ;;  %v2817_v32 = vpack.c.bf16 %v240_v27, %v236_v24  ;;  %v271_v20 = vld [vmem:[%s7506_s1 + $0x7e0] sm:$0xff]  ;;  %v269_v21 = vld [vmem:[%s7506_s1 + $0x7d0] sm:$0xff]  ;;  %v276_v24 = vld [vmem:[%s7506_s1 + $0x808] sm:$0xff] }
  0x5c   :  { %3374 = vmatprep.subr.bf16.mxu1 %v3373_v36  ;;  %v3393_v36 = vpack.c.bf16 %v242_v29, %v238_v28  ;;  %v273_v23 = vld [vmem:[%s7506_s1 + $0x7f0] sm:$0xff]  ;;  %v280_v27 = vld [vmem:[%s7506_s1 + $0x828] sm:$0xff]  ;;  %v278_v28 = vld [vmem:[%s7506_s1 + $0x818] sm:$0xff] }
  0x5d   :  { %v282_v29 = vld [vmem:[%s7506_s1 + $0x838] sm:$0xff] }
  0x5e   :  { %2800 = vmatpush1.bf16.msra.mxu0 %v2799_v42  ;;  %v2819_v42 = vpack.c.bf16 %v239_v34, %v235_v33  ;;  %v275_v33 = vld [vmem:[%s7506_s1 + $0x800] sm:$0xff] }
  0x5f   :  { %3376 = vmatpush1.bf16.msra.mxu1 %v3375_v43  ;;  %2802 = vmatprep.subr.bf16.mxu0 %v2801_v44  ;;  %v3395_v43 = vpack.c.bf16 %v241_v37, %v237_v35  ;;  %v2821_v44 = vpack.c.bf16 %v248_v39, %v244_v38  ;;  %v279_v34 = vld [vmem:[%s7506_s1 + $0x820] sm:$0xff]  ;;  %v277_v35 = vld [vmem:[%s7506_s1 + $0x810] sm:$0xff]  ;;  %v284_v38 = vld [vmem:[%s7506_s1 + $0x848] sm:$0xff] }
  0x60   :  { %3378 = vmatprep.subr.bf16.mxu1 %v3377_v49  ;;  %v3397_v49 = vpack.c.bf16 %v250_v41, %v246_v40  ;;  %v281_v37 = vld [vmem:[%s7506_s1 + $0x830] sm:$0xff]  ;;  %v288_v39 = vld [vmem:[%s7506_s1 + $0x868] sm:$0xff]  ;;  %v286_v40 = vld [vmem:[%s7506_s1 + $0x858] sm:$0xff] }
  0x61   :  { %v290_v41 = vld [vmem:[%s7506_s1 + $0x878] sm:$0xff] }
  0x62   :  { %2804 = vmatpush1.bf16.msra.mxu0 %v2803_v54  ;;  %v2823_v54 = vpack.c.bf16 %v247_v46, %v243_v45  ;;  %v2841_v45 = vpack.c.bf16 %v288_v39, %v284_v38  ;;  %v283_v46 = vld [vmem:[%s7506_s1 + $0x840] sm:$0xff]  ;;  %v321_v39 = vld [vmem:[%s7506_s1 + $0x970] sm:$0xff] }
  0x63   :  { %3380 = vmatpush1.bf16.msra.mxu1 %v3379_v55  ;;  %2806 = vmatprep.subr.bf16.mxu0 %v2805_v56  ;;  %v3399_v55 = vpack.c.bf16 %v249_v25, %v245_v47  ;;  %v2825_v56 = vpack.c.bf16 %v256_v51, %v252_v50  ;;  %v287_v47 = vld [vmem:[%s7506_s1 + $0x860] sm:$0xff]  ;;  %v3417_v50 = vpack.c.bf16 %v290_v41, %v286_v40  ;;  %v289_v51 = vld [vmem:[%s7506_s1 + $0x870] sm:$0xff]  ;;  %v324_v40 = vld [vmem:[%s7506_s1 + $0x988] sm:$0xff] }
  0x64   :  { %3382 = vmatprep.subr.bf16.mxu1 %v3381_v60  ;;  %v3401_v60 = vpack.c.bf16 %v258_v53, %v254_v52  ;;  %v292_v52 = vld [vmem:[%s7506_s1 + $0x888] sm:$0xff] }
  0x65   :  { %v296_v53 = vld [vmem:[%s7506_s1 + $0x8a8] sm:$0xff] }
  0x66   :  { %2808 = vmatpush1.bf16.msra.mxu0 %v2807_v3  ;;  %v2827_v3 = vpack.c.bf16 %v255_v58, %v251_v57  ;;  %v2843_v57 = vpack.c.bf16 %v287_v47, %v283_v46  ;;  %v328_v41 = vld [vmem:[%s7506_s1 + $0x9a8] sm:$0xff] }
  0x67   :  { %3384 = vmatpush1.bf16.msra.mxu1 %v3383_v4  ;;  %2810 = vmatprep.subr.bf16.mxu0 %v2809_v5  ;;  %v3403_v4 = vpack.c.bf16 %v257_v61, %v253_v59  ;;  %v2829_v5 = vpack.c.bf16 %v264_v0, %v260_v63  ;;  %v2845_v59 = vpack.c.bf16 %v296_v53, %v292_v52  ;;  %v295_v61 = vld [vmem:[%s7506_s1 + $0x8a0] sm:$0xff]  ;;  %v293_v63 = vld [vmem:[%s7506_s1 + $0x890] sm:$0xff] }
  0x68   :  { %3386 = vmatprep.subr.bf16.mxu1 %v3385_v9  ;;  %v3405_v9 = vpack.c.bf16 %v266_v2, %v262_v1  ;;  %v300_v1 = vld [vmem:[%s7506_s1 + $0x8c8] sm:$0xff]  ;;  %v2861_v47 = vpack.c.bf16 %v328_v41, %v324_v40  ;;  %v329_v53 = vld [vmem:[%s7506_s1 + $0x9b0] sm:$0xff] }
  0x69   :  { %v304_v2 = vld [vmem:[%s7506_s1 + $0x8e8] sm:$0xff]  ;;  %v361_v40 = vld [vmem:[%s7506_s1 + $0xab0] sm:$0xff] }
  0x6a   :  { %2812 = vmatpush1.bf16.msra.mxu0 %v2811_v16  ;;  %v2831_v16 = vpack.c.bf16 %v263_v7, %v259_v6  ;;  %v2849_v7 = vpack.c.bf16 %v304_v2, %v300_v1  ;;  %v337_v1 = vld [vmem:[%s7506_s1 + $0x9f0] sm:$0xff]  ;;  %v340_v2 = vld [vmem:[%s7506_s1 + $0xa08] sm:$0xff] }
  0x6b   :  { %3388 = vmatpush1.bf16.msra.mxu1 %v3387_v17  ;;  %2814 = vmatprep.subr.bf16.mxu0 %v2813_v18  ;;  %v3407_v17 = vpack.c.bf16 %v265_v10, %v261_v8  ;;  %v2833_v18 = vpack.c.bf16 %v272_v13, %v268_v12  ;;  %v299_v8 = vld [vmem:[%s7506_s1 + $0x8c0] sm:$0xff]  ;;  %v301_v10 = vld [vmem:[%s7506_s1 + $0x8d0] sm:$0xff]  ;;  %v364_v41 = vld [vmem:[%s7506_s1 + $0xac8] sm:$0xff] }
  0x6c   :  { %3390 = vmatprep.subr.bf16.mxu1 %v3389_v22  ;;  %v3409_v22 = vpack.c.bf16 %v274_v15, %v270_v14  ;;  %v305_v13 = vld [vmem:[%s7506_s1 + $0x8f0] sm:$0xff]  ;;  %v308_v14 = vld [vmem:[%s7506_s1 + $0x908] sm:$0xff] }
  0x6d   :  { %v312_v15 = vld [vmem:[%s7506_s1 + $0x928] sm:$0xff] }
  0x6e   :  { %2816 = vmatpush1.bf16.msra.mxu0 %v2815_v30  ;;  %v2835_v30 = vpack.c.bf16 %v271_v20, %v267_v19  ;;  %v3427_v19 = vpack.c.bf16 %v305_v13, %v301_v10  ;;  %v2853_v20 = vpack.c.bf16 %v312_v15, %v308_v14  ;;  %v343_v10 = vld [vmem:[%s7506_s1 + $0xa20] sm:$0xff]  ;;  %v345_v14 = vld [vmem:[%s7506_s1 + $0xa30] sm:$0xff]  ;;  %v348_v15 = vld [vmem:[%s7506_s1 + $0xa48] sm:$0xff] }
  0x6f   :  { %3392 = vmatpush1.bf16.msra.mxu1 %v3391_v31  ;;  %2818 = vmatprep.subr.bf16.mxu0 %v2817_v32  ;;  %v3411_v31 = vpack.c.bf16 %v273_v23, %v269_v21  ;;  %v2837_v32 = vpack.c.bf16 %v280_v27, %v276_v24  ;;  %v307_v21 = vld [vmem:[%s7506_s1 + $0x900] sm:$0xff]  ;;  %v309_v23 = vld [vmem:[%s7506_s1 + $0x910] sm:$0xff] }
  0x70   :  { %3394 = vmatprep.subr.bf16.mxu1 %v3393_v36  ;;  %v3413_v36 = vpack.c.bf16 %v282_v29, %v278_v28  ;;  %v313_v27 = vld [vmem:[%s7506_s1 + $0x930] sm:$0xff]  ;;  %v316_v28 = vld [vmem:[%s7506_s1 + $0x948] sm:$0xff] }
  0x71   :  { %v320_v29 = vld [vmem:[%s7506_s1 + $0x968] sm:$0xff] }
  0x72   :  { %2820 = vmatpush1.bf16.msra.mxu0 %v2819_v42  ;;  %v2839_v42 = vpack.c.bf16 %v279_v34, %v275_v33  ;;  %v3431_v33 = vpack.c.bf16 %v313_v27, %v309_v23  ;;  %v2857_v34 = vpack.c.bf16 %v320_v29, %v316_v28  ;;  %v351_v23 = vld [vmem:[%s7506_s1 + $0xa60] sm:$0xff]  ;;  %v353_v28 = vld [vmem:[%s7506_s1 + $0xa70] sm:$0xff]  ;;  %v356_v29 = vld [vmem:[%s7506_s1 + $0xa88] sm:$0xff] }
  0x73   :  { %3396 = vmatpush1.bf16.msra.mxu1 %v3395_v43  ;;  %2822 = vmatprep.subr.bf16.mxu0 %v2821_v44  ;;  %v4759_v43 = vld [vmem:[%s7507_s0 + $0x8] sm:$0xff]  ;;  %v3415_v44 = vpack.c.bf16 %v281_v37, %v277_v35  ;;  %v315_v35 = vld [vmem:[%s7506_s1 + $0x940] sm:$0xff]  ;;  %v317_v37 = vld [vmem:[%s7506_s1 + $0x950] sm:$0xff] }
  0x74   :  { %3398 = vmatprep.subr.bf16.mxu1 %v3397_v49  ;;  %v285_v49 = vld [vmem:[%s7506_s1 + $0x850] sm:$0xff]  ;;  %v4772_v25 = vrot.slane %v4759_v43, %v4206_v11  ;;  %v3435_v46 = vpack.c.bf16 %v321_v39, %v317_v37  ;;  %v359_v37 = vld [vmem:[%s7506_s1 + $0xaa0] sm:$0xff] }
  0x75   :  { %v3419_v58 = vpack.c.bf16 %v289_v51, %v285_v49  ;;  %v323_v49 = vld [vmem:[%s7506_s1 + $0x980] sm:$0xff]  ;;  %v325_v51 = vld [vmem:[%s7506_s1 + $0x990] sm:$0xff] }
  0x76   :  { %2824 = vmatpush1.bf16.msra.mxu0 %v2823_v54  ;;  %v294_v54 = vld [vmem:[%s7506_s1 + $0x898] sm:$0xff] }
  0x77   :  { %3400 = vmatpush1.bf16.msra.mxu1 %v3399_v55  ;;  %2826 = vmatprep.subr.bf16.mxu0 %v2825_v56  ;;  %v298_v55 = vld [vmem:[%s7506_s1 + $0x8b8] sm:$0xff]  ;;  %v1208_v56 = vcombine.high %v4772_v25, %v4772_v25 }
  0x78   :  { %3402 = vmatprep.subr.bf16.mxu1 %v3401_v60  ;;  %v291_v60 = vld [vmem:[%s7506_s1 + $0x880] sm:$0xff]  ;;  %v3421_v0 = vpack.c.bf16 %v298_v55, %v294_v54  ;;  %v332_v54 = vld [vmem:[%s7506_s1 + $0x9c8] sm:$0xff] }
  0x79   :  { %v336_v55 = vld [vmem:[%s7506_s1 + $0x9e8] sm:$0xff] }
  0x7a   :  { %2828 = vmatpush1.bf16.msra.mxu0 %v2827_v3  ;;  %v302_v3 = vld [vmem:[%s7506_s1 + $0x8d8] sm:$0xff] }
  0x7b   :  { %3404 = vmatpush1.bf16.msra.mxu1 %v3403_v4  ;;  %2830 = vmatprep.subr.bf16.mxu0 %v2829_v5  ;;  %v306_v4 = vld [vmem:[%s7506_s1 + $0x8f8] sm:$0xff]  ;;  %v2847_v5 = vpack.c.bf16 %v295_v61, %v291_v60  ;;  %v2865_v60 = vpack.c.bf16 %v336_v55, %v332_v54  ;;  %v331_v61 = vld [vmem:[%s7506_s1 + $0x9c0] sm:$0xff]  ;;  %v369_v54 = vld [vmem:[%s7506_s1 + $0xaf0] sm:$0xff] }
  0x7c   :  { %3406 = vmatprep.subr.bf16.mxu1 %v3405_v9  ;;  %v303_v9 = vld [vmem:[%s7506_s1 + $0x8e0] sm:$0xff]  ;;  %v3425_v12 = vpack.c.bf16 %v306_v4, %v302_v3  ;;  %v344_v3 = vld [vmem:[%s7506_s1 + $0xa28] sm:$0xff]  ;;  %v342_v4 = vld [vmem:[%s7506_s1 + $0xa18] sm:$0xff] }
  0x7d   :  { %v372_v55 = vld [vmem:[%s7506_s1 + $0xb08] sm:$0xff] }
  0x7e   :  { %2832 = vmatpush1.bf16.msra.mxu0 %v2831_v16  ;;  %v310_v16 = vld [vmem:[%s7506_s1 + $0x918] sm:$0xff] }
  0x7f   :  { %3408 = vmatpush1.bf16.msra.mxu1 %v3407_v17  ;;  %2834 = vmatprep.subr.bf16.mxu0 %v2833_v18  ;;  %v314_v17 = vld [vmem:[%s7506_s1 + $0x938] sm:$0xff]  ;;  %v2851_v18 = vpack.c.bf16 %v303_v9, %v299_v8  ;;  %v2869_v8 = vpack.c.bf16 %v344_v3, %v340_v2  ;;  %v339_v9 = vld [vmem:[%s7506_s1 + $0xa00] sm:$0xff]  ;;  %v377_v2 = vld [vmem:[%s7506_s1 + $0xb30] sm:$0xff] }
  0x80   :  { %3410 = vmatprep.subr.bf16.mxu1 %v3409_v22  ;;  %v311_v22 = vld [vmem:[%s7506_s1 + $0x920] sm:$0xff]  ;;  %v3429_v24 = vpack.c.bf16 %v314_v17, %v310_v16  ;;  %v352_v16 = vld [vmem:[%s7506_s1 + $0xa68] sm:$0xff]  ;;  %v350_v17 = vld [vmem:[%s7506_s1 + $0xa58] sm:$0xff] }
  0x81   :  { %v380_v3 = vld [vmem:[%s7506_s1 + $0xb48] sm:$0xff] }
  0x82   :  { %2836 = vmatpush1.bf16.msra.mxu0 %v2835_v30  ;;  %v318_v30 = vld [vmem:[%s7506_s1 + $0x958] sm:$0xff] }
  0x83   :  { %3412 = vmatpush1.bf16.msra.mxu1 %v3411_v31  ;;  %2838 = vmatprep.subr.bf16.mxu0 %v2837_v32  ;;  %v322_v31 = vld [vmem:[%s7506_s1 + $0x978] sm:$0xff]  ;;  %v2855_v32 = vpack.c.bf16 %v311_v22, %v307_v21  ;;  %v2873_v21 = vpack.c.bf16 %v352_v16, %v348_v15  ;;  %v347_v22 = vld [vmem:[%s7506_s1 + $0xa40] sm:$0xff]  ;;  %v385_v15 = vld [vmem:[%s7506_s1 + $0xb70] sm:$0xff] }
  0x84   :  { %3414 = vmatprep.subr.bf16.mxu1 %v3413_v36  ;;  %v319_v36 = vld [vmem:[%s7506_s1 + $0x960] sm:$0xff]  ;;  %v3433_v38 = vpack.c.bf16 %v322_v31, %v318_v30  ;;  %v360_v30 = vld [vmem:[%s7506_s1 + $0xaa8] sm:$0xff]  ;;  %v358_v31 = vld [vmem:[%s7506_s1 + $0xa98] sm:$0xff] }
  0x85   :  { %1406 = vmatmul.mubr.f32.vlgmr.msra.gmra.mrb[0].mxu0 %v4360_v26  ;;  %v388_v16 = vld [vmem:[%s7506_s1 + $0xb88] sm:$0xff] }
  0x86   :  { %2840 = vmatpush1.bf16.msra.mxu0 %v2839_v42  ;;  %2045 = vmatmul.mubr.f32.vlgmr.msra.gmra.mrb[0].mxu1 %v4360_v26  ;;  %v297_v26 = vld [vmem:[%s7506_s1 + $0x8b0] sm:$0xff]  ;;  %v326_v42 = vld [vmem:[%s7506_s1 + $0x998] sm:$0xff] }
  0x87   :  { %3416 = vmatpush1.bf16.msra.mxu1 %v3415_v44  ;;  %2842 = vmatprep.subr.bf16.mxu0 %v2841_v45  ;;  %v3423_v6 = vpack.c.bf16 %v297_v26, %v293_v63  ;;  %v330_v44 = vld [vmem:[%s7506_s1 + $0x9b8] sm:$0xff]  ;;  %v2859_v45 = vpack.c.bf16 %v319_v36, %v315_v35  ;;  %v335_v63 = vld [vmem:[%s7506_s1 + $0x9e0] sm:$0xff]  ;;  %v2877_v35 = vpack.c.bf16 %v360_v30, %v356_v29  ;;  %v393_v29 = vld [vmem:[%s7506_s1 + $0xbb0] sm:$0xff] }
  0x88   :  { %3418 = vmatprep.subr.bf16.mxu1 %v3417_v50  ;;  %1476 = vmatprep.mubr.f32.mxu0 %v1208_v56  ;;  %v327_v50 = vld [vmem:[%s7506_s1 + $0x9a0] sm:$0xff]  ;;  %v3437_v52 = vpack.c.bf16 %v330_v44, %v326_v42  ;;  %v368_v42 = vld [vmem:[%s7506_s1 + $0xae8] sm:$0xff]  ;;  %v366_v44 = vld [vmem:[%s7506_s1 + $0xad8] sm:$0xff] }
  0x89   :  { %2115 = vmatprep.mubr.f32.mxu1 %v1208_v56  ;;  %v334_v56 = vld [vmem:[%s7506_s1 + $0x9d8] sm:$0xff]  ;;  %v355_v36 = vld [vmem:[%s7506_s1 + $0xa80] sm:$0xff]  ;;  %v396_v30 = vld [vmem:[%s7506_s1 + $0xbc8] sm:$0xff] }
  0x8a   :  { %2844 = vmatpush1.bf16.msra.mxu0 %v2843_v57  ;;  %v338_v57 = vld [vmem:[%s7506_s1 + $0x9f8] sm:$0xff] }
  0x8b   :  { %3420 = vmatpush1.bf16.msra.mxu1 %v3419_v58  ;;  %2846 = vmatprep.subr.bf16.mxu0 %v2845_v59  ;;  %v2863_v58 = vpack.c.bf16 %v327_v50, %v323_v49  ;;  %v3439_v59 = vpack.c.bf16 %v329_v53, %v325_v51  ;;  %v3441_v26 = vpack.c.bf16 %v338_v57, %v334_v56  ;;  %v363_v50 = vld [vmem:[%s7506_s1 + $0xac0] sm:$0xff]  ;;  %v376_v56 = vld [vmem:[%s7506_s1 + $0xb28] sm:$0xff]  ;;  %v374_v57 = vld [vmem:[%s7506_s1 + $0xb18] sm:$0xff] }
  0x8c   :  { %3422 = vmatprep.subr.bf16.mxu1 %v3421_v0  ;;  %v333_v0 = vld [vmem:[%s7506_s1 + $0x9d0] sm:$0xff]  ;;  %v2881_v49 = vpack.c.bf16 %v368_v42, %v364_v41  ;;  %v367_v51 = vld [vmem:[%s7506_s1 + $0xae0] sm:$0xff]  ;;  %v404_v42 = vld [vmem:[%s7506_s1 + $0xc08] sm:$0xff] }
  0x8d   :  { %v401_v41 = vld [vmem:[%s7506_s1 + $0xbf0] sm:$0xff] }
  0x8e   :  { %2848 = vmatpush1.bf16.msra.mxu0 %v2847_v5  ;;  %v346_v5 = vld [vmem:[%s7506_s1 + $0xa38] sm:$0xff] }
  0x8f   :  { %3424 = vmatpush1.bf16.msra.mxu1 %v3423_v6  ;;  %2850 = vmatprep.subr.bf16.mxu0 %v2849_v7  ;;  %v2867_v6 = vpack.c.bf16 %v335_v63, %v331_v61  ;;  %v3443_v7 = vpack.c.bf16 %v337_v1, %v333_v0  ;;  %v3445_v13 = vpack.c.bf16 %v346_v5, %v342_v4  ;;  %v371_v63 = vld [vmem:[%s7506_s1 + $0xb00] sm:$0xff]  ;;  %v384_v4 = vld [vmem:[%s7506_s1 + $0xb68] sm:$0xff]  ;;  %v382_v5 = vld [vmem:[%s7506_s1 + $0xb58] sm:$0xff] }
  0x90   :  { %3426 = vmatprep.subr.bf16.mxu1 %v3425_v12  ;;  %v341_v12 = vld [vmem:[%s7506_s1 + $0xa10] sm:$0xff]  ;;  %v2885_v61 = vpack.c.bf16 %v376_v56, %v372_v55  ;;  %v375_v0 = vld [vmem:[%s7506_s1 + $0xb20] sm:$0xff]  ;;  %v412_v56 = vld [vmem:[%s7506_s1 + $0xc48] sm:$0xff] }
  0x91   :  { %v409_v55 = vld [vmem:[%s7506_s1 + $0xc30] sm:$0xff] }
  0x92   :  { %2852 = vmatpush1.bf16.msra.mxu0 %v2851_v18  ;;  %v354_v18 = vld [vmem:[%s7506_s1 + $0xa78] sm:$0xff] }
  0x93   :  { %3428 = vmatpush1.bf16.msra.mxu1 %v3427_v19  ;;  %2854 = vmatprep.subr.bf16.mxu0 %v2853_v20  ;;  %v2871_v19 = vpack.c.bf16 %v343_v10, %v339_v9  ;;  %v3447_v20 = vpack.c.bf16 %v345_v14, %v341_v12  ;;  %v3449_v27 = vpack.c.bf16 %v354_v18, %v350_v17  ;;  %v379_v10 = vld [vmem:[%s7506_s1 + $0xb40] sm:$0xff]  ;;  %v392_v17 = vld [vmem:[%s7506_s1 + $0xba8] sm:$0xff]  ;;  %v390_v18 = vld [vmem:[%s7506_s1 + $0xb98] sm:$0xff] }
  0x94   :  { %3430 = vmatprep.subr.bf16.mxu1 %v3429_v24  ;;  %v349_v24 = vld [vmem:[%s7506_s1 + $0xa50] sm:$0xff]  ;;  %v2889_v9 = vpack.c.bf16 %v384_v4, %v380_v3  ;;  %v383_v12 = vld [vmem:[%s7506_s1 + $0xb60] sm:$0xff] }
  0x95   :  { %v417_v4 = vld [vmem:[%s7506_s1 + $0xc70] sm:$0xff] }
  0x96   :  { %2856 = vmatpush1.bf16.msra.mxu0 %v2855_v32  ;;  %v362_v32 = vld [vmem:[%s7506_s1 + $0xab8] sm:$0xff] }
  0x97   :  { %3432 = vmatpush1.bf16.msra.mxu1 %v3431_v33  ;;  %2858 = vmatprep.subr.bf16.mxu0 %v2857_v34  ;;  %v2875_v33 = vpack.c.bf16 %v351_v23, %v347_v22  ;;  %v3451_v34 = vpack.c.bf16 %v353_v28, %v349_v24  ;;  %v3453_v39 = vpack.c.bf16 %v362_v32, %v358_v31  ;;  %v387_v23 = vld [vmem:[%s7506_s1 + $0xb80] sm:$0xff]  ;;  %v400_v31 = vld [vmem:[%s7506_s1 + $0xbe8] sm:$0xff]  ;;  %v398_v32 = vld [vmem:[%s7506_s1 + $0xbd8] sm:$0xff] }
  0x98   :  { %3434 = vmatprep.subr.bf16.mxu1 %v3433_v38  ;;  %v357_v38 = vld [vmem:[%s7506_s1 + $0xa90] sm:$0xff]  ;;  %v2893_v22 = vpack.c.bf16 %v392_v17, %v388_v16  ;;  %v391_v24 = vld [vmem:[%s7506_s1 + $0xba0] sm:$0xff] }
  0x99   :  { %v421_v16 = vld [vmem:[%s7506_s1 + $0xc90] sm:$0xff] }
  0x9a   :  { %2860 = vmatpush1.bf16.msra.mxu0 %v2859_v45  ;;  %v370_v45 = vld [vmem:[%s7506_s1 + $0xaf8] sm:$0xff] }
  0x9b   :  { %3436 = vmatpush1.bf16.msra.mxu1 %v3435_v46  ;;  %2862 = vmatprep.subr.bf16.mxu0 %v2861_v47  ;;  %v2879_v46 = vpack.c.bf16 %v359_v37, %v355_v36  ;;  %v3455_v47 = vpack.c.bf16 %v361_v40, %v357_v38  ;;  %v3457_v53 = vpack.c.bf16 %v370_v45, %v366_v44  ;;  %v395_v37 = vld [vmem:[%s7506_s1 + $0xbc0] sm:$0xff]  ;;  %v408_v44 = vld [vmem:[%s7506_s1 + $0xc28] sm:$0xff] }
  0x9c   :  { %3438 = vmatprep.subr.bf16.mxu1 %v3437_v52  ;;  %v365_v52 = vld [vmem:[%s7506_s1 + $0xad0] sm:$0xff]  ;;  %v2897_v36 = vpack.c.bf16 %v400_v31, %v396_v30  ;;  %v399_v38 = vld [vmem:[%s7506_s1 + $0xbe0] sm:$0xff]  ;;  %v1193_v45 = vcombine.high %v4759_v43, %v4759_v43 }
  0x9d   :  { %v407_v43 = vld [vmem:[%s7506_s1 + $0xc20] sm:$0xff]  ;;  %v433_v31 = vld [vmem:[%s7506_s1 + $0xcf0] sm:$0xff] }
  0x9e   :  { %2864 = vmatpush1.bf16.msra.mxu0 %v2863_v58  ;;  %v378_v58 = vld [vmem:[%s7506_s1 + $0xb38] sm:$0xff] }
  0x9f   :  { %3440 = vmatpush1.bf16.msra.mxu1 %v3439_v59  ;;  %2866 = vmatprep.subr.bf16.mxu0 %v2865_v60  ;;  %v2883_v59 = vpack.c.bf16 %v367_v51, %v363_v50  ;;  %v3459_v60 = vpack.c.bf16 %v369_v54, %v365_v52  ;;  %v3461_v1 = vpack.c.bf16 %v378_v58, %v374_v57  ;;  %v403_v52 = vld [vmem:[%s7506_s1 + $0xc00] sm:$0xff]  ;;  %v416_v57 = vld [vmem:[%s7506_s1 + $0xc68] sm:$0xff] }
  0xa0   :  { %3442 = vmatprep.subr.bf16.mxu1 %v3441_v26  ;;  %v373_v26 = vld [vmem:[%s7506_s1 + $0xb10] sm:$0xff]  ;;  %v2901_v51 = vpack.c.bf16 %v408_v44, %v404_v42  ;;  %v5150_v58 = vrot.slane %v1193_v45, %v4206_v11  ;;  %v444_v45 = vld [vmem:[%s7506_s1 + $0xd48] sm:$0xff] }
  0xa1   :  { %v441_v44 = vld [vmem:[%s7506_s1 + $0xd30] sm:$0xff] }
  0xa2   :  { %2868 = vmatpush1.bf16.msra.mxu0 %v2867_v6  ;;  %v386_v6 = vld [vmem:[%s7506_s1 + $0xb78] sm:$0xff] }
  0xa3   :  { %3444 = vmatpush1.bf16.msra.mxu1 %v3443_v7  ;;  %2870 = vmatprep.subr.bf16.mxu0 %v2869_v8  ;;  %v2887_v7 = vpack.c.bf16 %v375_v0, %v371_v63  ;;  %v3463_v8 = vpack.c.bf16 %v377_v2, %v373_v26  ;;  %v3465_v14 = vpack.c.bf16 %v386_v6, %v382_v5  ;;  %v411_v26 = vld [vmem:[%s7506_s1 + $0xc40] sm:$0xff]  ;;  %v413_v2 = vld [vmem:[%s7506_s1 + $0xc50] sm:$0xff]  ;;  %v420_v5 = vld [vmem:[%s7506_s1 + $0xc88] sm:$0xff] }
  0xa4   :  { %3446 = vmatprep.subr.bf16.mxu1 %v3445_v13  ;;  %v381_v13 = vld [vmem:[%s7506_s1 + $0xb50] sm:$0xff]  ;;  %v2905_v0 = vpack.c.bf16 %v416_v57, %v412_v56  ;;  %v424_v6 = vld [vmem:[%s7506_s1 + $0xca8] sm:$0xff] }
  0xa5   :  { %v449_v56 = vld [vmem:[%s7506_s1 + $0xd70] sm:$0xff]  ;;  %v452_v57 = vld [vmem:[%s7506_s1 + $0xd88] sm:$0xff] }
  0xa6   :  { %2872 = vmatpush1.bf16.msra.mxu0 %v2871_v19  ;;  %v394_v19 = vld [vmem:[%s7506_s1 + $0xbb8] sm:$0xff] }
  0xa7   :  { %3448 = vmatpush1.bf16.msra.mxu1 %v3447_v20  ;;  %2874 = vmatprep.subr.bf16.mxu0 %v2873_v21  ;;  %v2891_v20 = vpack.c.bf16 %v383_v12, %v379_v10  ;;  %v3467_v21 = vpack.c.bf16 %v385_v15, %v381_v13  ;;  %v3469_v28 = vpack.c.bf16 %v394_v19, %v390_v18  ;;  %v423_v15 = vld [vmem:[%s7506_s1 + $0xca0] sm:$0xff]  ;;  %v428_v18 = vld [vmem:[%s7506_s1 + $0xcc8] sm:$0xff] }
  0xa8   :  { %3450 = vmatprep.subr.bf16.mxu1 %v3449_v27  ;;  %v389_v27 = vld [vmem:[%s7506_s1 + $0xb90] sm:$0xff]  ;;  %v3483_v12 = vpack.c.bf16 %v417_v4, %v413_v2  ;;  %v2909_v13 = vpack.c.bf16 %v424_v6, %v420_v5  ;;  %v432_v19 = vld [vmem:[%s7506_s1 + $0xce8] sm:$0xff]  ;;  %v455_v2 = vld [vmem:[%s7506_s1 + $0xda0] sm:$0xff] }
  0xa9   :  { %v457_v5 = vld [vmem:[%s7506_s1 + $0xdb0] sm:$0xff]  ;;  %v460_v6 = vld [vmem:[%s7506_s1 + $0xdc8] sm:$0xff] }
  0xaa   :  { %2876 = vmatpush1.bf16.msra.mxu0 %v2875_v33  ;;  %v402_v33 = vld [vmem:[%s7506_s1 + $0xbf8] sm:$0xff] }
  0xab   :  { %3452 = vmatpush1.bf16.msra.mxu1 %v3451_v34  ;;  %2878 = vmatprep.subr.bf16.mxu0 %v2877_v35  ;;  %v2895_v34 = vpack.c.bf16 %v391_v24, %v387_v23  ;;  %v3471_v35 = vpack.c.bf16 %v393_v29, %v389_v27  ;;  %v3473_v40 = vpack.c.bf16 %v402_v33, %v398_v32  ;;  %v427_v27 = vld [vmem:[%s7506_s1 + $0xcc0] sm:$0xff]  ;;  %v429_v29 = vld [vmem:[%s7506_s1 + $0xcd0] sm:$0xff]  ;;  %v436_v32 = vld [vmem:[%s7506_s1 + $0xd08] sm:$0xff] }
  0xac   :  { %3454 = vmatprep.subr.bf16.mxu1 %v3453_v39  ;;  %v397_v39 = vld [vmem:[%s7506_s1 + $0xbd0] sm:$0xff]  ;;  %v2913_v24 = vpack.c.bf16 %v432_v19, %v428_v18  ;;  %v440_v33 = vld [vmem:[%s7506_s1 + $0xd28] sm:$0xff] }
  0xad   :  { %v3475_v50 = vpack.c.bf16 %v401_v41, %v397_v39  ;;  %v435_v39 = vld [vmem:[%s7506_s1 + $0xd00] sm:$0xff]  ;;  %v437_v41 = vld [vmem:[%s7506_s1 + $0xd10] sm:$0xff]  ;;  %v468_v18 = vld [vmem:[%s7506_s1 + $0xe08] sm:$0xff] }
  0xae   :  { %2880 = vmatpush1.bf16.msra.mxu0 %v2879_v46  ;;  %v406_v46 = vld [vmem:[%s7506_s1 + $0xc18] sm:$0xff]  ;;  %v472_v19 = vld [vmem:[%s7506_s1 + $0xe28] sm:$0xff] }
  0xaf   :  { %3456 = vmatpush1.bf16.msra.mxu1 %v3455_v47  ;;  %2882 = vmatprep.subr.bf16.mxu0 %v2881_v49  ;;  %v410_v47 = vld [vmem:[%s7506_s1 + $0xc38] sm:$0xff]  ;;  %v2899_v49 = vpack.c.bf16 %v399_v38, %v395_v37  ;;  %v3491_v37 = vpack.c.bf16 %v433_v31, %v429_v29  ;;  %v2917_v38 = vpack.c.bf16 %v440_v33, %v436_v32  ;;  %v469_v29 = vld [vmem:[%s7506_s1 + $0xe10] sm:$0xff]  ;;  %v476_v32 = vld [vmem:[%s7506_s1 + $0xe48] sm:$0xff] }
  0xb0   :  { %3458 = vmatprep.subr.bf16.mxu1 %v3457_v53  ;;  %v405_v53 = vld [vmem:[%s7506_s1 + $0xc10] sm:$0xff]  ;;  %v3477_v54 = vpack.c.bf16 %v410_v47, %v406_v46  ;;  %v448_v46 = vld [vmem:[%s7506_s1 + $0xd68] sm:$0xff]  ;;  %v446_v47 = vld [vmem:[%s7506_s1 + $0xd58] sm:$0xff] }
  0xb1   :  { %v3479_v63 = vpack.c.bf16 %v409_v55, %v405_v53  ;;  %v447_v53 = vld [vmem:[%s7506_s1 + $0xd60] sm:$0xff]  ;;  %v473_v31 = vld [vmem:[%s7506_s1 + $0xe30] sm:$0xff]  ;;  %v480_v33 = vld [vmem:[%s7506_s1 + $0xe68] sm:$0xff] }
  0xb2   :  { %2884 = vmatpush1.bf16.msra.mxu0 %v2883_v59  ;;  %v414_v59 = vld [vmem:[%s7506_s1 + $0xc58] sm:$0xff] }
  0xb3   :  { %3460 = vmatpush1.bf16.msra.mxu1 %v3459_v60  ;;  %2886 = vmatprep.subr.bf16.mxu0 %v2885_v61  ;;  %v418_v60 = vld [vmem:[%s7506_s1 + $0xc78] sm:$0xff]  ;;  %v2903_v61 = vpack.c.bf16 %v407_v43, %v403_v52  ;;  %v2921_v52 = vpack.c.bf16 %v448_v46, %v444_v45  ;;  %v443_v43 = vld [vmem:[%s7506_s1 + $0xd40] sm:$0xff]  ;;  %v484_v45 = vld [vmem:[%s7506_s1 + $0xe88] sm:$0xff] }
  0xb4   :  { %3462 = vmatprep.subr.bf16.mxu1 %v3461_v1  ;;  %v415_v1 = vld [vmem:[%s7506_s1 + $0xc60] sm:$0xff]  ;;  %v3481_v3 = vpack.c.bf16 %v418_v60, %v414_v59  ;;  %v456_v59 = vld [vmem:[%s7506_s1 + $0xda8] sm:$0xff]  ;;  %v454_v60 = vld [vmem:[%s7506_s1 + $0xd98] sm:$0xff] }
  0xb5   :  { %v2907_v10 = vpack.c.bf16 %v415_v1, %v411_v26  ;;  %v2925_v26 = vpack.c.bf16 %v456_v59, %v452_v57  ;;  %v451_v1 = vld [vmem:[%s7506_s1 + $0xd80] sm:$0xff]  ;;  %v488_v46 = vld [vmem:[%s7506_s1 + $0xea8] sm:$0xff] }
  0xb6   :  { %2888 = vmatpush1.bf16.msra.mxu0 %v2887_v7  ;;  %v1209_v7 = vcombine.high %v5150_v58, %v5150_v58  ;;  %v492_v57 = vld [vmem:[%s7506_s1 + $0xec8] sm:$0xff] }
  0xb7   :  { %3464 = vmatpush1.bf16.msra.mxu1 %v3463_v8  ;;  %2890 = vmatprep.subr.bf16.mxu0 %v2889_v9  ;;  %v422_v8 = vld [vmem:[%s7506_s1 + $0xc98] sm:$0xff]  ;;  %v496_v59 = vld [vmem:[%s7506_s1 + $0xee8] sm:$0xff] }
  0xb8   :  { %3466 = vmatprep.subr.bf16.mxu1 %v3465_v14  ;;  %v426_v9 = vld [vmem:[%s7506_s1 + $0xcb8] sm:$0xff]  ;;  %v419_v14 = vld [vmem:[%s7506_s1 + $0xc80] sm:$0xff] }
  0xb9   :  { %v3485_v17 = vpack.c.bf16 %v426_v9, %v422_v8  ;;  %v462_v8 = vld [vmem:[%s7506_s1 + $0xdd8] sm:$0xff] }
  0xba   :  { %2892 = vmatpush1.bf16.msra.mxu0 %v2891_v20  ;;  %v430_v20 = vld [vmem:[%s7506_s1 + $0xcd8] sm:$0xff] }
  0xbb   :  { %3468 = vmatpush1.bf16.msra.mxu1 %v3467_v21  ;;  %2894 = vmatprep.subr.bf16.mxu0 %v2893_v22  ;;  %v434_v21 = vld [vmem:[%s7506_s1 + $0xcf8] sm:$0xff]  ;;  %v2911_v22 = vpack.c.bf16 %v423_v15, %v419_v14  ;;  %v459_v14 = vld [vmem:[%s7506_s1 + $0xdc0] sm:$0xff] }
  0xbc   :  { %3470 = vmatprep.subr.bf16.mxu1 %v3469_v28  ;;  %v431_v28 = vld [vmem:[%s7506_s1 + $0xce0] sm:$0xff]  ;;  %v3489_v30 = vpack.c.bf16 %v434_v21, %v430_v20  ;;  %v466_v9 = vld [vmem:[%s7506_s1 + $0xdf8] sm:$0xff] }
  0xbd   :  { %v463_v15 = vld [vmem:[%s7506_s1 + $0xde0] sm:$0xff]  ;;  %v470_v20 = vld [vmem:[%s7506_s1 + $0xe18] sm:$0xff] }
  0xbe   :  { %2896 = vmatpush1.bf16.msra.mxu0 %v2895_v34  ;;  %v438_v34 = vld [vmem:[%s7506_s1 + $0xd18] sm:$0xff] }
  0xbf   :  { %3472 = vmatpush1.bf16.msra.mxu1 %v3471_v35  ;;  %2898 = vmatprep.subr.bf16.mxu0 %v2897_v36  ;;  %v442_v35 = vld [vmem:[%s7506_s1 + $0xd38] sm:$0xff]  ;;  %v2915_v36 = vpack.c.bf16 %v431_v28, %v427_v27  ;;  %v467_v27 = vld [vmem:[%s7506_s1 + $0xe00] sm:$0xff] }
  0xc0   :  { %3474 = vmatprep.subr.bf16.mxu1 %v3473_v40  ;;  %v439_v40 = vld [vmem:[%s7506_s1 + $0xd20] sm:$0xff]  ;;  %v3493_v42 = vpack.c.bf16 %v442_v35, %v438_v34  ;;  %v474_v21 = vld [vmem:[%s7506_s1 + $0xe38] sm:$0xff] }
  0xc1   :  { %v471_v28 = vld [vmem:[%s7506_s1 + $0xe20] sm:$0xff]  ;;  %v478_v34 = vld [vmem:[%s7506_s1 + $0xe58] sm:$0xff] }
  0xc2   :  { %2900 = vmatpush1.bf16.msra.mxu0 %v2899_v49  ;;  %v450_v49 = vld [vmem:[%s7506_s1 + $0xd78] sm:$0xff] }
  0xc3   :  { %3476 = vmatpush1.bf16.msra.mxu1 %v3475_v50  ;;  %2902 = vmatprep.subr.bf16.mxu0 %v2901_v51  ;;  %v2919_v50 = vpack.c.bf16 %v439_v40, %v435_v39  ;;  %v3495_v51 = vpack.c.bf16 %v441_v44, %v437_v41  ;;  %v3497_v55 = vpack.c.bf16 %v450_v49, %v446_v47  ;;  %v482_v35 = vld [vmem:[%s7506_s1 + $0xe78] sm:$0xff]  ;;  %v475_v39 = vld [vmem:[%s7506_s1 + $0xe40] sm:$0xff]  ;;  %v477_v41 = vld [vmem:[%s7506_s1 + $0xe50] sm:$0xff] }
  0xc4   :  { %3478 = vmatprep.subr.bf16.mxu1 %v3477_v54  ;;  %v445_v54 = vld [vmem:[%s7506_s1 + $0xd50] sm:$0xff]  ;;  %v479_v40 = vld [vmem:[%s7506_s1 + $0xe60] sm:$0xff]  ;;  %v486_v47 = vld [vmem:[%s7506_s1 + $0xe98] sm:$0xff] }
  0xc5   :  { %1477 = vmatmul.mubr.f32.vlgmr.msra.gmra.mrb[0].mxu0 %v4772_v25  ;;  %v481_v44 = vld [vmem:[%s7506_s1 + $0xe70] sm:$0xff]  ;;  %v490_v49 = vld [vmem:[%s7506_s1 + $0xeb8] sm:$0xff] }
  0xc6   :  { %2904 = vmatpush1.bf16.msra.mxu0 %v2903_v61  ;;  %2116 = vmatmul.mubr.f32.vlgmr.msra.gmra.mrb[0].mxu1 %v4772_v25  ;;  %v425_v25 = vld [vmem:[%s7506_s1 + $0xcb0] sm:$0xff]  ;;  %v458_v61 = vld [vmem:[%s7506_s1 + $0xdb8] sm:$0xff] }
  0xc7   :  { %3480 = vmatpush1.bf16.msra.mxu1 %v3479_v63  ;;  %2906 = vmatprep.subr.bf16.mxu0 %v2905_v0  ;;  %v3487_v23 = vpack.c.bf16 %v425_v25, %v421_v16  ;;  %v2923_v63 = vpack.c.bf16 %v447_v53, %v443_v43  ;;  %v3499_v0 = vpack.c.bf16 %v449_v56, %v445_v54  ;;  %v461_v16 = vld [vmem:[%s7506_s1 + $0xdd0] sm:$0xff]  ;;  %v483_v43 = vld [vmem:[%s7506_s1 + $0xe80] sm:$0xff] }
  0xc8   :  { %3482 = vmatprep.subr.bf16.mxu1 %v3481_v3  ;;  %1547 = vmatprep.mubr.f32.mxu0 %v1209_v7  ;;  %v453_v3 = vld [vmem:[%s7506_s1 + $0xd90] sm:$0xff]  ;;  %v3501_v4 = vpack.c.bf16 %v458_v61, %v454_v60  ;;  %v487_v53 = vld [vmem:[%s7506_s1 + $0xea0] sm:$0xff]  ;;  %v494_v60 = vld [vmem:[%s7506_s1 + $0xed8] sm:$0xff] }
  0xc9   :  { %2186 = vmatprep.mubr.f32.mxu1 %v1209_v7  ;;  %v464_v7 = vld [vmem:[%s7506_s1 + $0xde8] sm:$0xff]  ;;  %v465_v25 = vld [vmem:[%s7506_s1 + $0xdf0] sm:$0xff]  ;;  %v498_v61 = vld [vmem:[%s7506_s1 + $0xef8] sm:$0xff] }
  0xca   :  { %2908 = vmatpush1.bf16.msra.mxu0 %v2907_v10  ;;  %v2927_v10 = vpack.c.bf16 %v455_v2, %v451_v1  ;;  %v485_v54 = vld [vmem:[%s7506_s1 + $0xe90] sm:$0xff]  ;;  %v491_v1 = vld [vmem:[%s7506_s1 + $0xec0] sm:$0xff] }
  0xcb   :  { %3484 = vmatpush1.bf16.msra.mxu1 %v3483_v12  ;;  %2910 = vmatprep.subr.bf16.mxu0 %v2909_v13  ;;  %v3503_v12 = vpack.c.bf16 %v457_v5, %v453_v3  ;;  %v2929_v13 = vpack.c.bf16 %v464_v7, %v460_v6  ;;  %v489_v56 = vld [vmem:[%s7506_s1 + $0xeb0] sm:$0xff]  ;;  %v495_v2 = vld [vmem:[%s7506_s1 + $0xee0] sm:$0xff]  ;;  %v500_v6 = vld [vmem:[%s7506_s1 + $0xf08] sm:$0xff] }
  0xcc   :  { %3486 = vmatprep.subr.bf16.mxu1 %v3485_v17  ;;  %v3505_v17 = vpack.c.bf16 %v466_v9, %v462_v8  ;;  %v493_v3 = vld [vmem:[%s7506_s1 + $0xed0] sm:$0xff]  ;;  %v504_v7 = vld [vmem:[%s7506_s1 + $0xf28] sm:$0xff]  ;;  %v502_v8 = vld [vmem:[%s7506_s1 + $0xf18] sm:$0xff] }
  0xcd   :  { %v497_v5 = vld [vmem:[%s7506_s1 + $0xef0] sm:$0xff]  ;;  %v506_v9 = vld [vmem:[%s7506_s1 + $0xf38] sm:$0xff] }
  0xce   :  { %2912 = vmatpush1.bf16.msra.mxu0 %v2911_v22  ;;  %v2931_v22 = vpack.c.bf16 %v463_v15, %v459_v14  ;;  %v499_v14 = vld [vmem:[%s7506_s1 + $0xf00] sm:$0xff] }
  0xcf   :  { %3488 = vmatpush1.bf16.msra.mxu1 %v3487_v23  ;;  %2914 = vmatprep.subr.bf16.mxu0 %v2913_v24  ;;  %v3507_v23 = vpack.c.bf16 %v465_v25, %v461_v16  ;;  %v2933_v24 = vpack.c.bf16 %v472_v19, %v468_v18  ;;  %v503_v15 = vld [vmem:[%s7506_s1 + $0xf20] sm:$0xff]  ;;  %v501_v16 = vld [vmem:[%s7506_s1 + $0xf10] sm:$0xff]  ;;  %v508_v18 = vld [vmem:[%s7506_s1 + $0xf48] sm:$0xff] }
  0xd0   :  { %3490 = vmatprep.subr.bf16.mxu1 %v3489_v30  ;;  %v3509_v30 = vpack.c.bf16 %v474_v21, %v470_v20  ;;  %v505_v25 = vld [vmem:[%s7506_s1 + $0xf30] sm:$0xff]  ;;  %v512_v19 = vld [vmem:[%s7506_s1 + $0xf68] sm:$0xff]  ;;  %v510_v20 = vld [vmem:[%s7506_s1 + $0xf58] sm:$0xff] }
  0xd1   :  { %v514_v21 = vld [vmem:[%s7506_s1 + $0xf78] sm:$0xff] }
  0xd2   :  { %2916 = vmatpush1.bf16.msra.mxu0 %v2915_v36  ;;  %v2935_v36 = vpack.c.bf16 %v471_v28, %v467_v27  ;;  %v507_v27 = vld [vmem:[%s7506_s1 + $0xf40] sm:$0xff] }
  0xd3   :  { %3492 = vmatpush1.bf16.msra.mxu1 %v3491_v37  ;;  %2918 = vmatprep.subr.bf16.mxu0 %v2917_v38  ;;  %v3511_v37 = vpack.c.bf16 %v473_v31, %v469_v29  ;;  %v2937_v38 = vpack.c.bf16 %v480_v33, %v476_v32  ;;  %v511_v28 = vld [vmem:[%s7506_s1 + $0xf60] sm:$0xff]  ;;  %v509_v29 = vld [vmem:[%s7506_s1 + $0xf50] sm:$0xff]  ;;  %v516_v32 = vld [vmem:[%s7506_s1 + $0xf88] sm:$0xff] }
  0xd4   :  { %3494 = vmatprep.subr.bf16.mxu1 %v3493_v42  ;;  %v3513_v42 = vpack.c.bf16 %v482_v35, %v478_v34  ;;  %v513_v31 = vld [vmem:[%s7506_s1 + $0xf70] sm:$0xff]  ;;  %v520_v33 = vld [vmem:[%s7506_s1 + $0xfa8] sm:$0xff]  ;;  %v518_v34 = vld [vmem:[%s7506_s1 + $0xf98] sm:$0xff] }
  0xd5   :  { %v522_v35 = vld [vmem:[%s7506_s1 + $0xfb8] sm:$0xff] }
  0xd6   :  { %2920 = vmatpush1.bf16.msra.mxu0 %v2919_v50  ;;  %v2939_v50 = vpack.c.bf16 %v479_v40, %v475_v39  ;;  %v515_v39 = vld [vmem:[%s7506_s1 + $0xf80] sm:$0xff] }
  0xd7   :  { %3496 = vmatpush1.bf16.msra.mxu1 %v3495_v51  ;;  %2922 = vmatprep.subr.bf16.mxu0 %v2921_v52  ;;  %v3515_v51 = vpack.c.bf16 %v481_v44, %v477_v41  ;;  %v2941_v52 = vpack.c.bf16 %v488_v46, %v484_v45  ;;  %v519_v40 = vld [vmem:[%s7506_s1 + $0xfa0] sm:$0xff]  ;;  %v517_v41 = vld [vmem:[%s7506_s1 + $0xf90] sm:$0xff]  ;;  %v524_v45 = vld [vmem:[%s7506_s1 + $0xfc8] sm:$0xff] }
  0xd8   :  { %3498 = vmatprep.subr.bf16.mxu1 %v3497_v55  ;;  %v3517_v55 = vpack.c.bf16 %v490_v49, %v486_v47  ;;  %v521_v44 = vld [vmem:[%s7506_s1 + $0xfb0] sm:$0xff]  ;;  %v528_v46 = vld [vmem:[%s7506_s1 + $0xfe8] sm:$0xff]  ;;  %v526_v47 = vld [vmem:[%s7506_s1 + $0xfd8] sm:$0xff] }
  0xd9   :  { %v530_v49 = vld [vmem:[%s7506_s1 + $0xff8] sm:$0xff] }
  0xda   :  { %2924 = vmatpush1.bf16.msra.mxu0 %v2923_v63  ;;  %v2943_v63 = vpack.c.bf16 %v487_v53, %v483_v43  ;;  %v523_v43 = vld [vmem:[%s7506_s1 + $0xfc0] sm:$0xff] }
  0xdb   :  { %3500 = vmatpush1.bf16.msra.mxu1 %v3499_v0  ;;  %2926 = vmatprep.subr.bf16.mxu0 %v2925_v26  ;;  %v3519_v0 = vpack.c.bf16 %v489_v56, %v485_v54  ;;  %v2945_v26 = vpack.c.bf16 %v496_v59, %v492_v57  ;;  %v527_v53 = vld [vmem:[%s7506_s1 + $0xfe0] sm:$0xff]  ;;  %v525_v54 = vld [vmem:[%s7506_s1 + $0xfd0] sm:$0xff]  ;;  %v532_v57 = vld [vmem:[%s7506_s1 + $0x1008] sm:$0xff] }
  0xdc   :  { %3502 = vmatprep.subr.bf16.mxu1 %v3501_v4  ;;  %v3521_v4 = vpack.c.bf16 %v498_v61, %v494_v60  ;;  %v529_v56 = vld [vmem:[%s7506_s1 + $0xff0] sm:$0xff]  ;;  %v536_v59 = vld [vmem:[%s7506_s1 + $0x1028] sm:$0xff]  ;;  %v534_v60 = vld [vmem:[%s7506_s1 + $0x1018] sm:$0xff] }
  0xdd   :  { %v538_v61 = vld [vmem:[%s7506_s1 + $0x1038] sm:$0xff] }
  0xde   :  { %2928 = vmatpush1.bf16.msra.mxu0 %v2927_v10  ;;  %v2947_v10 = vpack.c.bf16 %v495_v2, %v491_v1  ;;  %v2965_v1 = vpack.c.bf16 %v536_v59, %v532_v57  ;;  %v531_v2 = vld [vmem:[%s7506_s1 + $0x1000] sm:$0xff]  ;;  %v569_v59 = vld [vmem:[%s7506_s1 + $0x1130] sm:$0xff] }
  0xdf   :  { %3504 = vmatpush1.bf16.msra.mxu1 %v3503_v12  ;;  %2930 = vmatprep.subr.bf16.mxu0 %v2929_v13  ;;  %v3523_v12 = vpack.c.bf16 %v497_v5, %v493_v3  ;;  %v2949_v13 = vpack.c.bf16 %v504_v7, %v500_v6  ;;  %v535_v3 = vld [vmem:[%s7506_s1 + $0x1020] sm:$0xff]  ;;  %v3541_v5 = vpack.c.bf16 %v538_v61, %v534_v60  ;;  %v537_v6 = vld [vmem:[%s7506_s1 + $0x1030] sm:$0xff]  ;;  %v540_v7 = vld [vmem:[%s7506_s1 + $0x1048] sm:$0xff] }
  0xe0   :  { %3506 = vmatprep.subr.bf16.mxu1 %v3505_v17  ;;  %v3525_v17 = vpack.c.bf16 %v506_v9, %v502_v8  ;;  %v544_v8 = vld [vmem:[%s7506_s1 + $0x1068] sm:$0xff] }
  0xe1   :  { %v572_v60 = vld [vmem:[%s7506_s1 + $0x1148] sm:$0xff] }
  0xe2   :  { %2932 = vmatpush1.bf16.msra.mxu0 %v2931_v22  ;;  %v2951_v22 = vpack.c.bf16 %v503_v15, %v499_v14  ;;  %v2969_v15 = vpack.c.bf16 %v544_v8, %v540_v7  ;;  %v576_v61 = vld [vmem:[%s7506_s1 + $0x1168] sm:$0xff]  ;;  %v577_v8 = vld [vmem:[%s7506_s1 + $0x1170] sm:$0xff] }
  0xe3   :  { %3508 = vmatpush1.bf16.msra.mxu1 %v3507_v23  ;;  %2934 = vmatprep.subr.bf16.mxu0 %v2933_v24  ;;  %v3527_v23 = vpack.c.bf16 %v505_v25, %v501_v16  ;;  %v2953_v24 = vpack.c.bf16 %v512_v19, %v508_v18  ;;  %v539_v16 = vld [vmem:[%s7506_s1 + $0x1040] sm:$0xff]  ;;  %v541_v25 = vld [vmem:[%s7506_s1 + $0x1050] sm:$0xff] }
  0xe4   :  { %3510 = vmatprep.subr.bf16.mxu1 %v3509_v30  ;;  %v3529_v30 = vpack.c.bf16 %v514_v21, %v510_v20  ;;  %v545_v19 = vld [vmem:[%s7506_s1 + $0x1070] sm:$0xff]  ;;  %v548_v20 = vld [vmem:[%s7506_s1 + $0x1088] sm:$0xff] }
  0xe5   :  { %v552_v21 = vld [vmem:[%s7506_s1 + $0x10a8] sm:$0xff] }
  0xe6   :  { %2936 = vmatpush1.bf16.msra.mxu0 %v2935_v36  ;;  %v2955_v36 = vpack.c.bf16 %v511_v28, %v507_v27  ;;  %v3547_v28 = vpack.c.bf16 %v545_v19, %v541_v25  ;;  %v579_v25 = vld [vmem:[%s7506_s1 + $0x1180] sm:$0xff]  ;;  %v581_v19 = vld [vmem:[%s7506_s1 + $0x1190] sm:$0xff] }
  0xe7   :  { %3512 = vmatpush1.bf16.msra.mxu1 %v3511_v37  ;;  %2938 = vmatprep.subr.bf16.mxu0 %v2937_v38  ;;  %v3531_v37 = vpack.c.bf16 %v513_v31, %v509_v29  ;;  %v2957_v38 = vpack.c.bf16 %v520_v33, %v516_v32  ;;  %v2973_v29 = vpack.c.bf16 %v552_v21, %v548_v20  ;;  %v551_v31 = vld [vmem:[%s7506_s1 + $0x10a0] sm:$0xff]  ;;  %v549_v32 = vld [vmem:[%s7506_s1 + $0x1090] sm:$0xff] }
  0xe8   :  { %3514 = vmatprep.subr.bf16.mxu1 %v3513_v42  ;;  %v3533_v42 = vpack.c.bf16 %v522_v35, %v518_v34  ;;  %v556_v34 = vld [vmem:[%s7506_s1 + $0x10c8] sm:$0xff]  ;;  %v585_v21 = vld [vmem:[%s7506_s1 + $0x11b0] sm:$0xff] }
  0xe9   :  { %v560_v35 = vld [vmem:[%s7506_s1 + $0x10e8] sm:$0xff] }
  0xea   :  { %2940 = vmatpush1.bf16.msra.mxu0 %v2939_v50  ;;  %v2959_v50 = vpack.c.bf16 %v519_v40, %v515_v39  ;;  %v2977_v40 = vpack.c.bf16 %v560_v35, %v556_v34  ;;  %v593_v34 = vld [vmem:[%s7506_s1 + $0x11f0] sm:$0xff]  ;;  %v596_v35 = vld [vmem:[%s7506_s1 + $0x1208] sm:$0xff] }
  0xeb   :  { %3516 = vmatpush1.bf16.msra.mxu1 %v3515_v51  ;;  %2942 = vmatprep.subr.bf16.mxu0 %v2941_v52  ;;  %v3535_v51 = vpack.c.bf16 %v521_v44, %v517_v41  ;;  %v2961_v52 = vpack.c.bf16 %v528_v46, %v524_v45  ;;  %v555_v41 = vld [vmem:[%s7506_s1 + $0x10c0] sm:$0xff]  ;;  %v557_v44 = vld [vmem:[%s7506_s1 + $0x10d0] sm:$0xff] }
  0xec   :  { %3518 = vmatprep.subr.bf16.mxu1 %v3517_v55  ;;  %v3537_v55 = vpack.c.bf16 %v530_v49, %v526_v47  ;;  %v561_v46 = vld [vmem:[%s7506_s1 + $0x10f0] sm:$0xff]  ;;  %v564_v47 = vld [vmem:[%s7506_s1 + $0x1108] sm:$0xff] }
  0xed   :  { %v568_v49 = vld [vmem:[%s7506_s1 + $0x1128] sm:$0xff] }
  0xee   :  { %2944 = vmatpush1.bf16.msra.mxu0 %v2943_v63  ;;  %v5525_v63 = vld [vmem:[%s7507_s0 + $0x10] sm:$0xff] }
  0xef   :  { %3520 = vmatpush1.bf16.msra.mxu1 %v3519_v0  ;;  %2946 = vmatprep.subr.bf16.mxu0 %v2945_v26  ;;  %v2963_v0 = vpack.c.bf16 %v527_v53, %v523_v43  ;;  %v3539_v26 = vpack.c.bf16 %v529_v56, %v525_v54  ;;  %v5547_v9 = vrot.slane %v5525_v63, %v4206_v11  ;;  %v563_v54 = vld [vmem:[%s7506_s1 + $0x1100] sm:$0xff]  ;;  %v565_v56 = vld [vmem:[%s7506_s1 + $0x1110] sm:$0xff] }
  0xf0   :  { %3522 = vmatprep.subr.bf16.mxu1 %v3521_v4  ;;  %v533_v4 = vld [vmem:[%s7506_s1 + $0x1010] sm:$0xff]  ;;  %v3555_v43 = vpack.c.bf16 %v561_v46, %v557_v44  ;;  %v2981_v53 = vpack.c.bf16 %v568_v49, %v564_v47  ;;  %v599_v44 = vld [vmem:[%s7506_s1 + $0x1220] sm:$0xff]  ;;  %v604_v49 = vld [vmem:[%s7506_s1 + $0x1248] sm:$0xff] }
  0xf1   :  { %v3543_v14 = vpack.c.bf16 %v537_v6, %v533_v4  ;;  %v571_v4 = vld [vmem:[%s7506_s1 + $0x1140] sm:$0xff]  ;;  %v573_v6 = vld [vmem:[%s7506_s1 + $0x1150] sm:$0xff] }
  0xf2   :  { %2948 = vmatpush1.bf16.msra.mxu0 %v2947_v10  ;;  %v542_v10 = vld [vmem:[%s7506_s1 + $0x1058] sm:$0xff]  ;;  %v601_v47 = vld [vmem:[%s7506_s1 + $0x1230] sm:$0xff] }
  0xf3   :  { %3524 = vmatpush1.bf16.msra.mxu1 %v3523_v12  ;;  %2950 = vmatprep.subr.bf16.mxu0 %v2949_v13  ;;  %v546_v12 = vld [vmem:[%s7506_s1 + $0x1078] sm:$0xff]  ;;  %v2967_v13 = vpack.c.bf16 %v535_v3, %v531_v2  ;;  %v3559_v2 = vpack.c.bf16 %v569_v59, %v565_v56  ;;  %v2985_v3 = vpack.c.bf16 %v576_v61, %v572_v60  ;;  %v607_v56 = vld [vmem:[%s7506_s1 + $0x1260] sm:$0xff]  ;;  %v609_v60 = vld [vmem:[%s7506_s1 + $0x1270] sm:$0xff] }
  0xf4   :  { %3526 = vmatprep.subr.bf16.mxu1 %v3525_v17  ;;  %v543_v17 = vld [vmem:[%s7506_s1 + $0x1060] sm:$0xff]  ;;  %v3545_v18 = vpack.c.bf16 %v546_v12, %v542_v10  ;;  %v580_v10 = vld [vmem:[%s7506_s1 + $0x1188] sm:$0xff] }
  0xf5   :  { %v2971_v27 = vpack.c.bf16 %v543_v17, %v539_v16  ;;  %v584_v12 = vld [vmem:[%s7506_s1 + $0x11a8] sm:$0xff]  ;;  %v3563_v16 = vpack.c.bf16 %v577_v8, %v573_v6  ;;  %v615_v6 = vld [vmem:[%s7506_s1 + $0x12a0] sm:$0xff] }
  0xf6   :  { %2952 = vmatpush1.bf16.msra.mxu0 %v2951_v22  ;;  %v1225_v22 = vcombine.high %v5547_v9, %v5547_v9  ;;  %v2989_v17 = vpack.c.bf16 %v584_v12, %v580_v10  ;;  %v612_v61 = vld [vmem:[%s7506_s1 + $0x1288] sm:$0xff]  ;;  %v617_v10 = vld [vmem:[%s7506_s1 + $0x12b0] sm:$0xff] }
  0xf7   :  { %3528 = vmatpush1.bf16.msra.mxu1 %v3527_v23  ;;  %2954 = vmatprep.subr.bf16.mxu0 %v2953_v24  ;;  %v550_v23 = vld [vmem:[%s7506_s1 + $0x1098] sm:$0xff]  ;;  %v620_v12 = vld [vmem:[%s7506_s1 + $0x12c8] sm:$0xff] }
  0xf8   :  { %3530 = vmatprep.subr.bf16.mxu1 %v3529_v30  ;;  %v554_v24 = vld [vmem:[%s7506_s1 + $0x10b8] sm:$0xff]  ;;  %v547_v30 = vld [vmem:[%s7506_s1 + $0x1080] sm:$0xff] }
  0xf9   :  { %v3549_v33 = vpack.c.bf16 %v554_v24, %v550_v23  ;;  %v592_v23 = vld [vmem:[%s7506_s1 + $0x11e8] sm:$0xff]  ;;  %v590_v24 = vld [vmem:[%s7506_s1 + $0x11d8] sm:$0xff] }
  0xfa   :  { %2956 = vmatpush1.bf16.msra.mxu0 %v2955_v36  ;;  %v558_v36 = vld [vmem:[%s7506_s1 + $0x10d8] sm:$0xff] }
  0xfb   :  { %3532 = vmatpush1.bf16.msra.mxu1 %v3531_v37  ;;  %2958 = vmatprep.subr.bf16.mxu0 %v2957_v38  ;;  %v562_v37 = vld [vmem:[%s7506_s1 + $0x10f8] sm:$0xff]  ;;  %v2975_v38 = vpack.c.bf16 %v551_v31, %v547_v30  ;;  %v587_v31 = vld [vmem:[%s7506_s1 + $0x11c0] sm:$0xff] }
  0xfc   :  { %3534 = vmatprep.subr.bf16.mxu1 %v3533_v42  ;;  %v559_v42 = vld [vmem:[%s7506_s1 + $0x10e0] sm:$0xff]  ;;  %v3553_v45 = vpack.c.bf16 %v562_v37, %v558_v36  ;;  %v600_v36 = vld [vmem:[%s7506_s1 + $0x1228] sm:$0xff]  ;;  %v598_v37 = vld [vmem:[%s7506_s1 + $0x1218] sm:$0xff] }
  0xfe   :  { %2960 = vmatpush1.bf16.msra.mxu0 %v2959_v50  ;;  %v566_v50 = vld [vmem:[%s7506_s1 + $0x1118] sm:$0xff] }
  0xff   :  { %3536 = vmatpush1.bf16.msra.mxu1 %v3535_v51  ;;  %2962 = vmatprep.subr.bf16.mxu0 %v2961_v52  ;;  %v570_v51 = vld [vmem:[%s7506_s1 + $0x1138] sm:$0xff]  ;;  %v2979_v52 = vpack.c.bf16 %v559_v42, %v555_v41  ;;  %v2997_v41 = vpack.c.bf16 %v600_v36, %v596_v35  ;;  %v595_v42 = vld [vmem:[%s7506_s1 + $0x1200] sm:$0xff]  ;;  %v633_v35 = vld [vmem:[%s7506_s1 + $0x1330] sm:$0xff] }
 0x100   :  { %3538 = vmatprep.subr.bf16.mxu1 %v3537_v55  ;;  %v567_v55 = vld [vmem:[%s7506_s1 + $0x1120] sm:$0xff]  ;;  %v3557_v57 = vpack.c.bf16 %v570_v51, %v566_v50  ;;  %v608_v50 = vld [vmem:[%s7506_s1 + $0x1268] sm:$0xff]  ;;  %v606_v51 = vld [vmem:[%s7506_s1 + $0x1258] sm:$0xff] }
 0x101   :  { %v636_v36 = vld [vmem:[%s7506_s1 + $0x1348] sm:$0xff] }
 0x102   :  { %2964 = vmatpush1.bf16.msra.mxu0 %v2963_v0  ;;  %v574_v0 = vld [vmem:[%s7506_s1 + $0x1158] sm:$0xff] }
 0x103   :  { %3540 = vmatpush1.bf16.msra.mxu1 %v3539_v26  ;;  %2966 = vmatprep.subr.bf16.mxu0 %v2965_v1  ;;  %v578_v26 = vld [vmem:[%s7506_s1 + $0x1178] sm:$0xff]  ;;  %v2983_v1 = vpack.c.bf16 %v567_v55, %v563_v54  ;;  %v3001_v54 = vpack.c.bf16 %v608_v50, %v604_v49  ;;  %v603_v55 = vld [vmem:[%s7506_s1 + $0x1240] sm:$0xff]  ;;  %v641_v49 = vld [vmem:[%s7506_s1 + $0x1370] sm:$0xff] }
 0x104   :  { %3542 = vmatprep.subr.bf16.mxu1 %v3541_v5  ;;  %v575_v5 = vld [vmem:[%s7506_s1 + $0x1160] sm:$0xff]  ;;  %v3561_v7 = vpack.c.bf16 %v578_v26, %v574_v0  ;;  %v616_v0 = vld [vmem:[%s7506_s1 + $0x12a8] sm:$0xff]  ;;  %v614_v26 = vld [vmem:[%s7506_s1 + $0x1298] sm:$0xff] }
 0x105   :  { %1548 = vmatmul.mubr.f32.vlgmr.msra.gmra.mrb[0].mxu0 %v5150_v58  ;;  %v644_v50 = vld [vmem:[%s7506_s1 + $0x1388] sm:$0xff] }
 0x106   :  { %2968 = vmatpush1.bf16.msra.mxu0 %v2967_v13  ;;  %2187 = vmatmul.mubr.f32.vlgmr.msra.gmra.mrb[0].mxu1 %v5150_v58  ;;  %v553_v58 = vld [vmem:[%s7506_s1 + $0x10b0] sm:$0xff]  ;;  %v582_v13 = vld [vmem:[%s7506_s1 + $0x1198] sm:$0xff] }
 0x107   :  { %3544 = vmatpush1.bf16.msra.mxu1 %v3543_v14  ;;  %2970 = vmatprep.subr.bf16.mxu0 %v2969_v15  ;;  %v3551_v39 = vpack.c.bf16 %v553_v58, %v549_v32  ;;  %v586_v14 = vld [vmem:[%s7506_s1 + $0x11b8] sm:$0xff]  ;;  %v2987_v15 = vpack.c.bf16 %v575_v5, %v571_v4  ;;  %v591_v32 = vld [vmem:[%s7506_s1 + $0x11e0] sm:$0xff]  ;;  %v3005_v4 = vpack.c.bf16 %v616_v0, %v612_v61  ;;  %v649_v61 = vld [vmem:[%s7506_s1 + $0x13b0] sm:$0xff] }
 0x108   :  { %3546 = vmatprep.subr.bf16.mxu1 %v3545_v18  ;;  %1618 = vmatprep.mubr.f32.mxu0 %v1225_v22  ;;  %v583_v18 = vld [vmem:[%s7506_s1 + $0x11a0] sm:$0xff]  ;;  %v3565_v20 = vpack.c.bf16 %v586_v14, %v582_v13  ;;  %v624_v13 = vld [vmem:[%s7506_s1 + $0x12e8] sm:$0xff]  ;;  %v622_v14 = vld [vmem:[%s7506_s1 + $0x12d8] sm:$0xff] }
 0x109   :  { %2257 = vmatprep.mubr.f32.mxu1 %v1225_v22  ;;  %v588_v22 = vld [vmem:[%s7506_s1 + $0x11c8] sm:$0xff]  ;;  %v611_v5 = vld [vmem:[%s7506_s1 + $0x1280] sm:$0xff] }
 0x10a   :  { %2972 = vmatpush1.bf16.msra.mxu0 %v2971_v27  ;;  %v594_v27 = vld [vmem:[%s7506_s1 + $0x11f8] sm:$0xff]  ;;  %v2993_v30 = vpack.c.bf16 %v592_v23, %v588_v22  ;;  %v625_v22 = vld [vmem:[%s7506_s1 + $0x12f0] sm:$0xff]  ;;  %v628_v23 = vld [vmem:[%s7506_s1 + $0x1308] sm:$0xff] }
 0x10b   :  { %3548 = vmatpush1.bf16.msra.mxu1 %v3547_v28  ;;  %2974 = vmatprep.subr.bf16.mxu0 %v2973_v29  ;;  %v2991_v28 = vpack.c.bf16 %v583_v18, %v579_v25  ;;  %v3567_v29 = vpack.c.bf16 %v585_v21, %v581_v19  ;;  %v3569_v58 = vpack.c.bf16 %v594_v27, %v590_v24  ;;  %v619_v18 = vld [vmem:[%s7506_s1 + $0x12c0] sm:$0xff]  ;;  %v632_v24 = vld [vmem:[%s7506_s1 + $0x1328] sm:$0xff]  ;;  %v630_v27 = vld [vmem:[%s7506_s1 + $0x1318] sm:$0xff] }
 0x10c   :  { %3550 = vmatprep.subr.bf16.mxu1 %v3549_v33  ;;  %v589_v33 = vld [vmem:[%s7506_s1 + $0x11d0] sm:$0xff]  ;;  %v3009_v25 = vpack.c.bf16 %v624_v13, %v620_v12  ;;  %v623_v19 = vld [vmem:[%s7506_s1 + $0x12e0] sm:$0xff]  ;;  %v652_v0 = vld [vmem:[%s7506_s1 + $0x13c8] sm:$0xff] }
 0x10d   :  { %v657_v12 = vld [vmem:[%s7506_s1 + $0x13f0] sm:$0xff]  ;;  %v660_v13 = vld [vmem:[%s7506_s1 + $0x1408] sm:$0xff] }
 0x10e   :  { %2976 = vmatpush1.bf16.msra.mxu0 %v2975_v38  ;;  %v602_v38 = vld [vmem:[%s7506_s1 + $0x1238] sm:$0xff] }
 0x10f   :  { %3552 = vmatpush1.bf16.msra.mxu1 %v3551_v39  ;;  %2978 = vmatprep.subr.bf16.mxu0 %v2977_v40  ;;  %v2995_v39 = vpack.c.bf16 %v591_v32, %v587_v31  ;;  %v3571_v40 = vpack.c.bf16 %v593_v34, %v589_v33  ;;  %v3573_v46 = vpack.c.bf16 %v602_v38, %v598_v37  ;;  %v627_v32 = vld [vmem:[%s7506_s1 + $0x1300] sm:$0xff]  ;;  %v640_v37 = vld [vmem:[%s7506_s1 + $0x1368] sm:$0xff]  ;;  %v638_v38 = vld [vmem:[%s7506_s1 + $0x1358] sm:$0xff] }
 0x110   :  { %3554 = vmatprep.subr.bf16.mxu1 %v3553_v45  ;;  %v597_v45 = vld [vmem:[%s7506_s1 + $0x1210] sm:$0xff]  ;;  %v3013_v31 = vpack.c.bf16 %v632_v24, %v628_v23  ;;  %v631_v33 = vld [vmem:[%s7506_s1 + $0x1320] sm:$0xff]  ;;  %v668_v24 = vld [vmem:[%s7506_s1 + $0x1448] sm:$0xff] }
 0x111   :  { %v665_v23 = vld [vmem:[%s7506_s1 + $0x1430] sm:$0xff] }
 0x112   :  { %2980 = vmatpush1.bf16.msra.mxu0 %v2979_v52  ;;  %v610_v52 = vld [vmem:[%s7506_s1 + $0x1278] sm:$0xff] }
 0x113   :  { %3556 = vmatpush1.bf16.msra.mxu1 %v3555_v43  ;;  %2982 = vmatprep.subr.bf16.mxu0 %v2981_v53  ;;  %v2999_v43 = vpack.c.bf16 %v599_v44, %v595_v42  ;;  %v3575_v53 = vpack.c.bf16 %v601_v47, %v597_v45  ;;  %v3577_v59 = vpack.c.bf16 %v610_v52, %v606_v51  ;;  %v635_v44 = vld [vmem:[%s7506_s1 + $0x1340] sm:$0xff]  ;;  %v648_v51 = vld [vmem:[%s7506_s1 + $0x13a8] sm:$0xff]  ;;  %v646_v52 = vld [vmem:[%s7506_s1 + $0x1398] sm:$0xff] }
 0x114   :  { %3558 = vmatprep.subr.bf16.mxu1 %v3557_v57  ;;  %v605_v57 = vld [vmem:[%s7506_s1 + $0x1250] sm:$0xff]  ;;  %v3017_v42 = vpack.c.bf16 %v640_v37, %v636_v36  ;;  %v639_v45 = vld [vmem:[%s7506_s1 + $0x1360] sm:$0xff] }
 0x115   :  { %v673_v37 = vld [vmem:[%s7506_s1 + $0x1470] sm:$0xff] }
 0x116   :  { %2984 = vmatpush1.bf16.msra.mxu0 %v2983_v1  ;;  %v618_v1 = vld [vmem:[%s7506_s1 + $0x12b8] sm:$0xff] }
 0x117   :  { %3560 = vmatpush1.bf16.msra.mxu1 %v3559_v2  ;;  %2986 = vmatprep.subr.bf16.mxu0 %v2985_v3  ;;  %v3003_v2 = vpack.c.bf16 %v607_v56, %v603_v55  ;;  %v3579_v3 = vpack.c.bf16 %v609_v60, %v605_v57  ;;  %v3581_v8 = vpack.c.bf16 %v618_v1, %v614_v26  ;;  %v643_v56 = vld [vmem:[%s7506_s1 + $0x1380] sm:$0xff]  ;;  %v656_v26 = vld [vmem:[%s7506_s1 + $0x13e8] sm:$0xff]  ;;  %v654_v1 = vld [vmem:[%s7506_s1 + $0x13d8] sm:$0xff] }
 0x118   :  { %3562 = vmatprep.subr.bf16.mxu1 %v3561_v7  ;;  %v613_v7 = vld [vmem:[%s7506_s1 + $0x1290] sm:$0xff]  ;;  %v3021_v55 = vpack.c.bf16 %v648_v51, %v644_v50  ;;  %v647_v57 = vld [vmem:[%s7506_s1 + $0x13a0] sm:$0xff] }
 0x119   :  { %v677_v50 = vld [vmem:[%s7506_s1 + $0x1490] sm:$0xff] }
 0x11a   :  { %2988 = vmatpush1.bf16.msra.mxu0 %v2987_v15  ;;  %v626_v15 = vld [vmem:[%s7506_s1 + $0x12f8] sm:$0xff] }
 0x11b   :  { %3564 = vmatpush1.bf16.msra.mxu1 %v3563_v16  ;;  %2990 = vmatprep.subr.bf16.mxu0 %v2989_v17  ;;  %v3007_v16 = vpack.c.bf16 %v615_v6, %v611_v5  ;;  %v3583_v17 = vpack.c.bf16 %v617_v10, %v613_v7  ;;  %v3585_v21 = vpack.c.bf16 %v626_v15, %v622_v14  ;;  %v651_v6 = vld [vmem:[%s7506_s1 + $0x13c0] sm:$0xff]  ;;  %v664_v14 = vld [vmem:[%s7506_s1 + $0x1428] sm:$0xff] }
 0x11c   :  { %3566 = vmatprep.subr.bf16.mxu1 %v3565_v20  ;;  %v621_v20 = vld [vmem:[%s7506_s1 + $0x12d0] sm:$0xff]  ;;  %v3025_v5 = vpack.c.bf16 %v656_v26, %v652_v0  ;;  %v655_v7 = vld [vmem:[%s7506_s1 + $0x13e0] sm:$0xff]  ;;  %v1210_v15 = vcombine.high %v5525_v63, %v5525_v63 }
 0x11d   :  { %v663_v63 = vld [vmem:[%s7506_s1 + $0x1420] sm:$0xff]  ;;  %v689_v26 = vld [vmem:[%s7506_s1 + $0x14f0] sm:$0xff] }
 0x11e   :  { %2992 = vmatpush1.bf16.msra.mxu0 %v2991_v28  ;;  %v634_v28 = vld [vmem:[%s7506_s1 + $0x1338] sm:$0xff] }
 0x11f   :  { %3568 = vmatpush1.bf16.msra.mxu1 %v3567_v29  ;;  %2994 = vmatprep.subr.bf16.mxu0 %v2993_v30  ;;  %v3011_v29 = vpack.c.bf16 %v623_v19, %v619_v18  ;;  %v3587_v30 = vpack.c.bf16 %v625_v22, %v621_v20  ;;  %v3589_v34 = vpack.c.bf16 %v634_v28, %v630_v27  ;;  %v659_v20 = vld [vmem:[%s7506_s1 + $0x1400] sm:$0xff]  ;;  %v672_v27 = vld [vmem:[%s7506_s1 + $0x1468] sm:$0xff] }
 0x120   :  { %3570 = vmatprep.subr.bf16.mxu1 %v3569_v58  ;;  %v629_v58 = vld [vmem:[%s7506_s1 + $0x1310] sm:$0xff]  ;;  %v3029_v19 = vpack.c.bf16 %v664_v14, %v660_v13  ;;  %v5940_v28 = vrot.slane %v1210_v15, %v4206_v11  ;;  %v700_v15 = vld [vmem:[%s7506_s1 + $0x1548] sm:$0xff] }
 0x121   :  { %v697_v14 = vld [vmem:[%s7506_s1 + $0x1530] sm:$0xff] }
 0x122   :  { %2996 = vmatpush1.bf16.msra.mxu0 %v2995_v39  ;;  %v642_v39 = vld [vmem:[%s7506_s1 + $0x1378] sm:$0xff] }
 0x123   :  { %3572 = vmatpush1.bf16.msra.mxu1 %v3571_v40  ;;  %2998 = vmatprep.subr.bf16.mxu0 %v2997_v41  ;;  %v3015_v40 = vpack.c.bf16 %v631_v33, %v627_v32  ;;  %v3591_v41 = vpack.c.bf16 %v633_v35, %v629_v58  ;;  %v3593_v47 = vpack.c.bf16 %v642_v39, %v638_v38  ;;  %v667_v58 = vld [vmem:[%s7506_s1 + $0x1440] sm:$0xff]  ;;  %v669_v35 = vld [vmem:[%s7506_s1 + $0x1450] sm:$0xff]  ;;  %v676_v38 = vld [vmem:[%s7506_s1 + $0x1488] sm:$0xff] }
 0x124   :  { %3574 = vmatprep.subr.bf16.mxu1 %v3573_v46  ;;  %v637_v46 = vld [vmem:[%s7506_s1 + $0x1350] sm:$0xff]  ;;  %v3033_v33 = vpack.c.bf16 %v672_v27, %v668_v24  ;;  %v680_v39 = vld [vmem:[%s7506_s1 + $0x14a8] sm:$0xff] }
 0x125   :  { %v705_v24 = vld [vmem:[%s7506_s1 + $0x1570] sm:$0xff]  ;;  %v708_v27 = vld [vmem:[%s7506_s1 + $0x1588] sm:$0xff] }
 0x126   :  { %3000 = vmatpush1.bf16.msra.mxu0 %v2999_v43  ;;  %v650_v43 = vld [vmem:[%s7506_s1 + $0x13b8] sm:$0xff] }
 0x127   :  { %3576 = vmatpush1.bf16.msra.mxu1 %v3575_v53  ;;  %3002 = vmatprep.subr.bf16.mxu0 %v3001_v54  ;;  %v3019_v53 = vpack.c.bf16 %v639_v45, %v635_v44  ;;  %v3595_v54 = vpack.c.bf16 %v641_v49, %v637_v46  ;;  %v3597_v60 = vpack.c.bf16 %v650_v43, %v646_v52  ;;  %v679_v49 = vld [vmem:[%s7506_s1 + $0x14a0] sm:$0xff]  ;;  %v684_v52 = vld [vmem:[%s7506_s1 + $0x14c8] sm:$0xff] }
 0x128   :  { %3578 = vmatprep.subr.bf16.mxu1 %v3577_v59  ;;  %v645_v59 = vld [vmem:[%s7506_s1 + $0x1390] sm:$0xff]  ;;  %v3611_v45 = vpack.c.bf16 %v673_v37, %v669_v35  ;;  %v3037_v46 = vpack.c.bf16 %v680_v39, %v676_v38  ;;  %v688_v43 = vld [vmem:[%s7506_s1 + $0x14e8] sm:$0xff]  ;;  %v711_v35 = vld [vmem:[%s7506_s1 + $0x15a0] sm:$0xff] }
 0x129   :  { %v713_v38 = vld [vmem:[%s7506_s1 + $0x15b0] sm:$0xff]  ;;  %v716_v39 = vld [vmem:[%s7506_s1 + $0x15c8] sm:$0xff] }
 0x12a   :  { %3004 = vmatpush1.bf16.msra.mxu0 %v3003_v2  ;;  %v658_v2 = vld [vmem:[%s7506_s1 + $0x13f8] sm:$0xff] }
 0x12b   :  { %3580 = vmatpush1.bf16.msra.mxu1 %v3579_v3  ;;  %3006 = vmatprep.subr.bf16.mxu0 %v3005_v4  ;;  %v3023_v3 = vpack.c.bf16 %v647_v57, %v643_v56  ;;  %v3599_v4 = vpack.c.bf16 %v649_v61, %v645_v59  ;;  %v3601_v10 = vpack.c.bf16 %v658_v2, %v654_v1  ;;  %v683_v59 = vld [vmem:[%s7506_s1 + $0x14c0] sm:$0xff]  ;;  %v685_v61 = vld [vmem:[%s7506_s1 + $0x14d0] sm:$0xff]  ;;  %v692_v1 = vld [vmem:[%s7506_s1 + $0x1508] sm:$0xff] }
 0x12c   :  { %3582 = vmatprep.subr.bf16.mxu1 %v3581_v8  ;;  %v653_v8 = vld [vmem:[%s7506_s1 + $0x13d0] sm:$0xff]  ;;  %v3041_v57 = vpack.c.bf16 %v688_v43, %v684_v52  ;;  %v696_v2 = vld [vmem:[%s7506_s1 + $0x1528] sm:$0xff] }
 0x12d   :  { %v3603_v18 = vpack.c.bf16 %v657_v12, %v653_v8  ;;  %v691_v8 = vld [vmem:[%s7506_s1 + $0x1500] sm:$0xff]  ;;  %v693_v12 = vld [vmem:[%s7506_s1 + $0x1510] sm:$0xff]  ;;  %v724_v52 = vld [vmem:[%s7506_s1 + $0x1608] sm:$0xff] }
 0x12e   :  { %3008 = vmatpush1.bf16.msra.mxu0 %v3007_v16  ;;  %v662_v16 = vld [vmem:[%s7506_s1 + $0x1418] sm:$0xff]  ;;  %v728_v43 = vld [vmem:[%s7506_s1 + $0x1628] sm:$0xff] }
 0x12f   :  { %3584 = vmatpush1.bf16.msra.mxu1 %v3583_v17  ;;  %3010 = vmatprep.subr.bf16.mxu0 %v3009_v25  ;;  %v666_v17 = vld [vmem:[%s7506_s1 + $0x1438] sm:$0xff]  ;;  %v3027_v25 = vpack.c.bf16 %v655_v7, %v651_v6  ;;  %v3619_v6 = vpack.c.bf16 %v689_v26, %v685_v61  ;;  %v3045_v7 = vpack.c.bf16 %v696_v2, %v692_v1  ;;  %v725_v61 = vld [vmem:[%s7506_s1 + $0x1610] sm:$0xff]  ;;  %v732_v1 = vld [vmem:[%s7506_s1 + $0x1648] sm:$0xff] }
 0x130   :  { %3586 = vmatprep.subr.bf16.mxu1 %v3585_v21  ;;  %v661_v21 = vld [vmem:[%s7506_s1 + $0x1410] sm:$0xff]  ;;  %v3605_v22 = vpack.c.bf16 %v666_v17, %v662_v16  ;;  %v704_v16 = vld [vmem:[%s7506_s1 + $0x1568] sm:$0xff]  ;;  %v702_v17 = vld [vmem:[%s7506_s1 + $0x1558] sm:$0xff] }
 0x131   :  { %v3607_v32 = vpack.c.bf16 %v665_v23, %v661_v21  ;;  %v703_v21 = vld [vmem:[%s7506_s1 + $0x1560] sm:$0xff]  ;;  %v729_v26 = vld [vmem:[%s7506_s1 + $0x1630] sm:$0xff]  ;;  %v736_v2 = vld [vmem:[%s7506_s1 + $0x1668] sm:$0xff] }
 0x132   :  { %3012 = vmatpush1.bf16.msra.mxu0 %v3011_v29  ;;  %v670_v29 = vld [vmem:[%s7506_s1 + $0x1458] sm:$0xff] }
 0x133   :  { %3588 = vmatpush1.bf16.msra.mxu1 %v3587_v30  ;;  %3014 = vmatprep.subr.bf16.mxu0 %v3013_v31  ;;  %v674_v30 = vld [vmem:[%s7506_s1 + $0x1478] sm:$0xff]  ;;  %v3031_v31 = vpack.c.bf16 %v663_v63, %v659_v20  ;;  %v3049_v20 = vpack.c.bf16 %v704_v16, %v700_v15  ;;  %v699_v63 = vld [vmem:[%s7506_s1 + $0x1540] sm:$0xff]  ;;  %v740_v15 = vld [vmem:[%s7506_s1 + $0x1688] sm:$0xff] }
 0x134   :  { %3590 = vmatprep.subr.bf16.mxu1 %v3589_v34  ;;  %v671_v34 = vld [vmem:[%s7506_s1 + $0x1460] sm:$0xff]  ;;  %v3609_v36 = vpack.c.bf16 %v674_v30, %v670_v29  ;;  %v712_v29 = vld [vmem:[%s7506_s1 + $0x15a8] sm:$0xff]  ;;  %v710_v30 = vld [vmem:[%s7506_s1 + $0x1598] sm:$0xff] }
 0x135   :  { %v3035_v44 = vpack.c.bf16 %v671_v34, %v667_v58  ;;  %v3053_v58 = vpack.c.bf16 %v712_v29, %v708_v27  ;;  %v707_v34 = vld [vmem:[%s7506_s1 + $0x1580] sm:$0xff]  ;;  %v744_v16 = vld [vmem:[%s7506_s1 + $0x16a8] sm:$0xff] }
 0x136   :  { %3016 = vmatpush1.bf16.msra.mxu0 %v3015_v40  ;;  %v1226_v40 = vcombine.high %v5940_v28, %v5940_v28  ;;  %v748_v27 = vld [vmem:[%s7506_s1 + $0x16c8] sm:$0xff] }
 0x137   :  { %3592 = vmatpush1.bf16.msra.mxu1 %v3591_v41  ;;  %3018 = vmatprep.subr.bf16.mxu0 %v3017_v42  ;;  %v678_v41 = vld [vmem:[%s7506_s1 + $0x1498] sm:$0xff]  ;;  %v752_v29 = vld [vmem:[%s7506_s1 + $0x16e8] sm:$0xff] }
 0x138   :  { %3594 = vmatprep.subr.bf16.mxu1 %v3593_v47  ;;  %v682_v42 = vld [vmem:[%s7506_s1 + $0x14b8] sm:$0xff]  ;;  %v675_v47 = vld [vmem:[%s7506_s1 + $0x1480] sm:$0xff] }
 0x139   :  { %v3613_v51 = vpack.c.bf16 %v682_v42, %v678_v41  ;;  %v718_v41 = vld [vmem:[%s7506_s1 + $0x15d8] sm:$0xff] }
 0x13a   :  { %3020 = vmatpush1.bf16.msra.mxu0 %v3019_v53  ;;  %v686_v53 = vld [vmem:[%s7506_s1 + $0x14d8] sm:$0xff] }
 0x13b   :  { %3596 = vmatpush1.bf16.msra.mxu1 %v3595_v54  ;;  %3022 = vmatprep.subr.bf16.mxu0 %v3021_v55  ;;  %v690_v54 = vld [vmem:[%s7506_s1 + $0x14f8] sm:$0xff]  ;;  %v3039_v55 = vpack.c.bf16 %v679_v49, %v675_v47  ;;  %v715_v47 = vld [vmem:[%s7506_s1 + $0x15c0] sm:$0xff] }
 0x13c   :  { %3598 = vmatprep.subr.bf16.mxu1 %v3597_v60  ;;  %v687_v60 = vld [vmem:[%s7506_s1 + $0x14e0] sm:$0xff]  ;;  %v3617_v0 = vpack.c.bf16 %v690_v54, %v686_v53  ;;  %v722_v42 = vld [vmem:[%s7506_s1 + $0x15f8] sm:$0xff] }
 0x13d   :  { %v719_v49 = vld [vmem:[%s7506_s1 + $0x15e0] sm:$0xff]  ;;  %v726_v53 = vld [vmem:[%s7506_s1 + $0x1618] sm:$0xff] }
 0x13e   :  { %3024 = vmatpush1.bf16.msra.mxu0 %v3023_v3  ;;  %v694_v3 = vld [vmem:[%s7506_s1 + $0x1518] sm:$0xff] }
 0x13f   :  { %3600 = vmatpush1.bf16.msra.mxu1 %v3599_v4  ;;  %3026 = vmatprep.subr.bf16.mxu0 %v3025_v5  ;;  %v698_v4 = vld [vmem:[%s7506_s1 + $0x1538] sm:$0xff]  ;;  %v3043_v5 = vpack.c.bf16 %v687_v60, %v683_v59  ;;  %v723_v59 = vld [vmem:[%s7506_s1 + $0x1600] sm:$0xff] }
 0x140   :  { %3602 = vmatprep.subr.bf16.mxu1 %v3601_v10  ;;  %v695_v10 = vld [vmem:[%s7506_s1 + $0x1520] sm:$0xff]  ;;  %v3621_v13 = vpack.c.bf16 %v698_v4, %v694_v3  ;;  %v730_v54 = vld [vmem:[%s7506_s1 + $0x1638] sm:$0xff] }
 0x141   :  { %v727_v60 = vld [vmem:[%s7506_s1 + $0x1620] sm:$0xff]  ;;  %v734_v3 = vld [vmem:[%s7506_s1 + $0x1658] sm:$0xff] }
 0x142   :  { %3028 = vmatpush1.bf16.msra.mxu0 %v3027_v25  ;;  %v706_v25 = vld [vmem:[%s7506_s1 + $0x1578] sm:$0xff] }
 0x143   :  { %3604 = vmatpush1.bf16.msra.mxu1 %v3603_v18  ;;  %3030 = vmatprep.subr.bf16.mxu0 %v3029_v19  ;;  %v3047_v18 = vpack.c.bf16 %v695_v10, %v691_v8  ;;  %v3623_v19 = vpack.c.bf16 %v697_v14, %v693_v12  ;;  %v3625_v23 = vpack.c.bf16 %v706_v25, %v702_v17  ;;  %v738_v4 = vld [vmem:[%s7506_s1 + $0x1678] sm:$0xff]  ;;  %v731_v8 = vld [vmem:[%s7506_s1 + $0x1640] sm:$0xff]  ;;  %v733_v12 = vld [vmem:[%s7506_s1 + $0x1650] sm:$0xff] }
 0x144   :  { %3606 = vmatprep.subr.bf16.mxu1 %v3605_v22  ;;  %v701_v22 = vld [vmem:[%s7506_s1 + $0x1550] sm:$0xff]  ;;  %v735_v10 = vld [vmem:[%s7506_s1 + $0x1660] sm:$0xff]  ;;  %v742_v17 = vld [vmem:[%s7506_s1 + $0x1698] sm:$0xff] }
 0x145   :  { %1619 = vmatmul.mubr.f32.vlgmr.msra.gmra.mrb[0].mxu0 %v5547_v9  ;;  %v737_v14 = vld [vmem:[%s7506_s1 + $0x1670] sm:$0xff]  ;;  %v746_v25 = vld [vmem:[%s7506_s1 + $0x16b8] sm:$0xff] }
 0x146   :  { %3032 = vmatpush1.bf16.msra.mxu0 %v3031_v31  ;;  %2258 = vmatmul.mubr.f32.vlgmr.msra.gmra.mrb[0].mxu1 %v5547_v9  ;;  %v681_v9 = vld [vmem:[%s7506_s1 + $0x14b0] sm:$0xff]  ;;  %v714_v31 = vld [vmem:[%s7506_s1 + $0x15b8] sm:$0xff] }
 0x147   :  { %3608 = vmatpush1.bf16.msra.mxu1 %v3607_v32  ;;  %3034 = vmatprep.subr.bf16.mxu0 %v3033_v33  ;;  %v3615_v56 = vpack.c.bf16 %v681_v9, %v677_v50  ;;  %v3051_v32 = vpack.c.bf16 %v703_v21, %v699_v63  ;;  %v3627_v33 = vpack.c.bf16 %v705_v24, %v701_v22  ;;  %v717_v50 = vld [vmem:[%s7506_s1 + $0x15d0] sm:$0xff]  ;;  %v739_v63 = vld [vmem:[%s7506_s1 + $0x1680] sm:$0xff] }
 0x148   :  { %3610 = vmatprep.subr.bf16.mxu1 %v3609_v36  ;;  %1689 = vmatprep.mubr.f32.mxu0 %v1226_v40  ;;  %v709_v36 = vld [vmem:[%s7506_s1 + $0x1590] sm:$0xff]  ;;  %v3629_v37 = vpack.c.bf16 %v714_v31, %v710_v30  ;;  %v743_v21 = vld [vmem:[%s7506_s1 + $0x16a0] sm:$0xff]  ;;  %v750_v30 = vld [vmem:[%s7506_s1 + $0x16d8] sm:$0xff] }
 0x149   :  { %2328 = vmatprep.mubr.f32.mxu1 %v1226_v40  ;;  %v720_v40 = vld [vmem:[%s7506_s1 + $0x15e8] sm:$0xff]  ;;  %v721_v9 = vld [vmem:[%s7506_s1 + $0x15f0] sm:$0xff]  ;;  %v754_v31 = vld [vmem:[%s7506_s1 + $0x16f8] sm:$0xff] }
 0x14a   :  { %3036 = vmatpush1.bf16.msra.mxu0 %v3035_v44  ;;  %v3055_v44 = vpack.c.bf16 %v711_v35, %v707_v34  ;;  %v741_v22 = vld [vmem:[%s7506_s1 + $0x1690] sm:$0xff]  ;;  %v747_v34 = vld [vmem:[%s7506_s1 + $0x16c0] sm:$0xff] }
 0x14b   :  { %3612 = vmatpush1.bf16.msra.mxu1 %v3611_v45  ;;  %3038 = vmatprep.subr.bf16.mxu0 %v3037_v46  ;;  %v3631_v45 = vpack.c.bf16 %v713_v38, %v709_v36  ;;  %v3057_v46 = vpack.c.bf16 %v720_v40, %v716_v39  ;;  %v745_v24 = vld [vmem:[%s7506_s1 + $0x16b0] sm:$0xff]  ;;  %v751_v35 = vld [vmem:[%s7506_s1 + $0x16e0] sm:$0xff]  ;;  %v756_v39 = vld [vmem:[%s7506_s1 + $0x1708] sm:$0xff] }
 0x14c   :  { %3614 = vmatprep.subr.bf16.mxu1 %v3613_v51  ;;  %v3633_v51 = vpack.c.bf16 %v722_v42, %v718_v41  ;;  %v749_v36 = vld [vmem:[%s7506_s1 + $0x16d0] sm:$0xff]  ;;  %v760_v40 = vld [vmem:[%s7506_s1 + $0x1728] sm:$0xff]  ;;  %v758_v41 = vld [vmem:[%s7506_s1 + $0x1718] sm:$0xff] }
 0x14d   :  { %v753_v38 = vld [vmem:[%s7506_s1 + $0x16f0] sm:$0xff]  ;;  %v762_v42 = vld [vmem:[%s7506_s1 + $0x1738] sm:$0xff] }
 0x14e   :  { %3040 = vmatpush1.bf16.msra.mxu0 %v3039_v55  ;;  %v3059_v55 = vpack.c.bf16 %v719_v49, %v715_v47  ;;  %v755_v47 = vld [vmem:[%s7506_s1 + $0x1700] sm:$0xff] }
 0x14f   :  { %3616 = vmatpush1.bf16.msra.mxu1 %v3615_v56  ;;  %3042 = vmatprep.subr.bf16.mxu0 %v3041_v57  ;;  %v3635_v56 = vpack.c.bf16 %v721_v9, %v717_v50  ;;  %v3061_v57 = vpack.c.bf16 %v728_v43, %v724_v52  ;;  %v759_v49 = vld [vmem:[%s7506_s1 + $0x1720] sm:$0xff]  ;;  %v757_v50 = vld [vmem:[%s7506_s1 + $0x1710] sm:$0xff]  ;;  %v764_v52 = vld [vmem:[%s7506_s1 + $0x1748] sm:$0xff] }
 0x150   :  { %3618 = vmatprep.subr.bf16.mxu1 %v3617_v0  ;;  %v3637_v0 = vpack.c.bf16 %v730_v54, %v726_v53  ;;  %v761_v9 = vld [vmem:[%s7506_s1 + $0x1730] sm:$0xff]  ;;  %v768_v43 = vld [vmem:[%s7506_s1 + $0x1768] sm:$0xff]  ;;  %v766_v53 = vld [vmem:[%s7506_s1 + $0x1758] sm:$0xff] }
 0x151   :  { %v770_v54 = vld [vmem:[%s7506_s1 + $0x1778] sm:$0xff] }
 0x152   :  { %3044 = vmatpush1.bf16.msra.mxu0 %v3043_v5  ;;  %v3063_v5 = vpack.c.bf16 %v727_v60, %v723_v59  ;;  %v763_v59 = vld [vmem:[%s7506_s1 + $0x1740] sm:$0xff] }
 0x153   :  { %3620 = vmatpush1.bf16.msra.mxu1 %v3619_v6  ;;  %3046 = vmatprep.subr.bf16.mxu0 %v3045_v7  ;;  %v3639_v6 = vpack.c.bf16 %v729_v26, %v725_v61  ;;  %v3065_v7 = vpack.c.bf16 %v736_v2, %v732_v1  ;;  %v767_v60 = vld [vmem:[%s7506_s1 + $0x1760] sm:$0xff]  ;;  %v765_v61 = vld [vmem:[%s7506_s1 + $0x1750] sm:$0xff]  ;;  %v772_v1 = vld [vmem:[%s7506_s1 + $0x1788] sm:$0xff] }
 0x154   :  { %3622 = vmatprep.subr.bf16.mxu1 %v3621_v13  ;;  %v3641_v13 = vpack.c.bf16 %v738_v4, %v734_v3  ;;  %v769_v26 = vld [vmem:[%s7506_s1 + $0x1770] sm:$0xff]  ;;  %v776_v2 = vld [vmem:[%s7506_s1 + $0x17a8] sm:$0xff]  ;;  %v774_v3 = vld [vmem:[%s7506_s1 + $0x1798] sm:$0xff] }
 0x155   :  { %v778_v4 = vld [vmem:[%s7506_s1 + $0x17b8] sm:$0xff] }
 0x156   :  { %3048 = vmatpush1.bf16.msra.mxu0 %v3047_v18  ;;  %v3067_v18 = vpack.c.bf16 %v735_v10, %v731_v8  ;;  %v771_v8 = vld [vmem:[%s7506_s1 + $0x1780] sm:$0xff] }
 0x157   :  { %3624 = vmatpush1.bf16.msra.mxu1 %v3623_v19  ;;  %3050 = vmatprep.subr.bf16.mxu0 %v3049_v20  ;;  %v3643_v19 = vpack.c.bf16 %v737_v14, %v733_v12  ;;  %v3069_v20 = vpack.c.bf16 %v744_v16, %v740_v15  ;;  %v775_v10 = vld [vmem:[%s7506_s1 + $0x17a0] sm:$0xff]  ;;  %v773_v12 = vld [vmem:[%s7506_s1 + $0x1790] sm:$0xff]  ;;  %v780_v15 = vld [vmem:[%s7506_s1 + $0x17c8] sm:$0xff] }
 0x158   :  { %3626 = vmatprep.subr.bf16.mxu1 %v3625_v23  ;;  %v3645_v23 = vpack.c.bf16 %v746_v25, %v742_v17  ;;  %v777_v14 = vld [vmem:[%s7506_s1 + $0x17b0] sm:$0xff]  ;;  %v784_v16 = vld [vmem:[%s7506_s1 + $0x17e8] sm:$0xff]  ;;  %v782_v17 = vld [vmem:[%s7506_s1 + $0x17d8] sm:$0xff] }
 0x159   :  { %v786_v25 = vld [vmem:[%s7506_s1 + $0x17f8] sm:$0xff] }
 0x15a   :  { %3052 = vmatpush1.bf16.msra.mxu0 %v3051_v32  ;;  %v3071_v32 = vpack.c.bf16 %v743_v21, %v739_v63  ;;  %v779_v63 = vld [vmem:[%s7506_s1 + $0x17c0] sm:$0xff] }
 0x15b   :  { %3628 = vmatpush1.bf16.msra.mxu1 %v3627_v33  ;;  %3054 = vmatprep.subr.bf16.mxu0 %v3053_v58  ;;  %v3647_v33 = vpack.c.bf16 %v745_v24, %v741_v22  ;;  %v3073_v58 = vpack.c.bf16 %v752_v29, %v748_v27  ;;  %v783_v21 = vld [vmem:[%s7506_s1 + $0x17e0] sm:$0xff]  ;;  %v781_v22 = vld [vmem:[%s7506_s1 + $0x17d0] sm:$0xff]  ;;  %v788_v27 = vld [vmem:[%s7506_s1 + $0x1808] sm:$0xff] }
 0x15c   :  { %3630 = vmatprep.subr.bf16.mxu1 %v3629_v37  ;;  %v3649_v37 = vpack.c.bf16 %v754_v31, %v750_v30  ;;  %v785_v24 = vld [vmem:[%s7506_s1 + $0x17f0] sm:$0xff]  ;;  %v792_v29 = vld [vmem:[%s7506_s1 + $0x1828] sm:$0xff]  ;;  %v790_v30 = vld [vmem:[%s7506_s1 + $0x1818] sm:$0xff] }
 0x15d   :  { %v794_v31 = vld [vmem:[%s7506_s1 + $0x1838] sm:$0xff] }
 0x15e   :  { %3056 = vmatpush1.bf16.msra.mxu0 %v3055_v44  ;;  %v3075_v44 = vpack.c.bf16 %v751_v35, %v747_v34  ;;  %v3093_v34 = vpack.c.bf16 %v792_v29, %v788_v27  ;;  %v787_v35 = vld [vmem:[%s7506_s1 + $0x1800] sm:$0xff]  ;;  %v825_v29 = vld [vmem:[%s7506_s1 + $0x1930] sm:$0xff] }
 0x15f   :  { %3632 = vmatpush1.bf16.msra.mxu1 %v3631_v45  ;;  %3058 = vmatprep.subr.bf16.mxu0 %v3057_v46  ;;  %v3651_v45 = vpack.c.bf16 %v753_v38, %v749_v36  ;;  %v3077_v46 = vpack.c.bf16 %v760_v40, %v756_v39  ;;  %v791_v36 = vld [vmem:[%s7506_s1 + $0x1820] sm:$0xff]  ;;  %v3669_v38 = vpack.c.bf16 %v794_v31, %v790_v30  ;;  %v793_v39 = vld [vmem:[%s7506_s1 + $0x1830] sm:$0xff]  ;;  %v796_v40 = vld [vmem:[%s7506_s1 + $0x1848] sm:$0xff] }
 0x160   :  { %3634 = vmatprep.subr.bf16.mxu1 %v3633_v51  ;;  %v3653_v51 = vpack.c.bf16 %v762_v42, %v758_v41  ;;  %v800_v41 = vld [vmem:[%s7506_s1 + $0x1868] sm:$0xff] }
 0x161   :  { %v828_v30 = vld [vmem:[%s7506_s1 + $0x1948] sm:$0xff] }
 0x162   :  { %3060 = vmatpush1.bf16.msra.mxu0 %v3059_v55  ;;  %v3079_v55 = vpack.c.bf16 %v759_v49, %v755_v47  ;;  %v3097_v49 = vpack.c.bf16 %v800_v41, %v796_v40  ;;  %v832_v31 = vld [vmem:[%s7506_s1 + $0x1968] sm:$0xff]  ;;  %v833_v41 = vld [vmem:[%s7506_s1 + $0x1970] sm:$0xff] }
 0x163   :  { %3636 = vmatpush1.bf16.msra.mxu1 %v3635_v56  ;;  %3062 = vmatprep.subr.bf16.mxu0 %v3061_v57  ;;  %v3655_v56 = vpack.c.bf16 %v761_v9, %v757_v50  ;;  %v3081_v57 = vpack.c.bf16 %v768_v43, %v764_v52  ;;  %v795_v50 = vld [vmem:[%s7506_s1 + $0x1840] sm:$0xff]  ;;  %v797_v9 = vld [vmem:[%s7506_s1 + $0x1850] sm:$0xff] }
 0x164   :  { %3638 = vmatprep.subr.bf16.mxu1 %v3637_v0  ;;  %v3657_v0 = vpack.c.bf16 %v770_v54, %v766_v53  ;;  %v801_v43 = vld [vmem:[%s7506_s1 + $0x1870] sm:$0xff]  ;;  %v804_v53 = vld [vmem:[%s7506_s1 + $0x1888] sm:$0xff] }
 0x165   :  { %v808_v54 = vld [vmem:[%s7506_s1 + $0x18a8] sm:$0xff] }
 0x166   :  { %3064 = vmatpush1.bf16.msra.mxu0 %v3063_v5  ;;  %v3083_v5 = vpack.c.bf16 %v767_v60, %v763_v59  ;;  %v3675_v60 = vpack.c.bf16 %v801_v43, %v797_v9  ;;  %v835_v9 = vld [vmem:[%s7506_s1 + $0x1980] sm:$0xff]  ;;  %v837_v43 = vld [vmem:[%s7506_s1 + $0x1990] sm:$0xff] }
 0x167   :  { %3640 = vmatpush1.bf16.msra.mxu1 %v3639_v6  ;;  %3066 = vmatprep.subr.bf16.mxu0 %v3065_v7  ;;  %v3659_v6 = vpack.c.bf16 %v769_v26, %v765_v61  ;;  %v3085_v7 = vpack.c.bf16 %v776_v2, %v772_v1  ;;  %v3101_v61 = vpack.c.bf16 %v808_v54, %v804_v53  ;;  %v807_v26 = vld [vmem:[%s7506_s1 + $0x18a0] sm:$0xff]  ;;  %v805_v1 = vld [vmem:[%s7506_s1 + $0x1890] sm:$0xff] }
 0x168   :  { %3642 = vmatprep.subr.bf16.mxu1 %v3641_v13  ;;  %v3661_v13 = vpack.c.bf16 %v778_v4, %v774_v3  ;;  %v812_v3 = vld [vmem:[%s7506_s1 + $0x18c8] sm:$0xff]  ;;  %v841_v54 = vld [vmem:[%s7506_s1 + $0x19b0] sm:$0xff] }
 0x169   :  { %v816_v4 = vld [vmem:[%s7506_s1 + $0x18e8] sm:$0xff] }
 0x16a   :  { %3068 = vmatpush1.bf16.msra.mxu0 %v3067_v18  ;;  %v3087_v18 = vpack.c.bf16 %v775_v10, %v771_v8  ;;  %v3105_v10 = vpack.c.bf16 %v816_v4, %v812_v3  ;;  %v849_v3 = vld [vmem:[%s7506_s1 + $0x19f0] sm:$0xff]  ;;  %v852_v4 = vld [vmem:[%s7506_s1 + $0x1a08] sm:$0xff] }
 0x16b   :  { %3644 = vmatpush1.bf16.msra.mxu1 %v3643_v19  ;;  %3070 = vmatprep.subr.bf16.mxu0 %v3069_v20  ;;  %v3663_v19 = vpack.c.bf16 %v777_v14, %v773_v12  ;;  %v3089_v20 = vpack.c.bf16 %v784_v16, %v780_v15  ;;  %v811_v12 = vld [vmem:[%s7506_s1 + $0x18c0] sm:$0xff]  ;;  %v813_v14 = vld [vmem:[%s7506_s1 + $0x18d0] sm:$0xff] }
 0x16c   :  { %3646 = vmatprep.subr.bf16.mxu1 %v3645_v23  ;;  %v3665_v23 = vpack.c.bf16 %v786_v25, %v782_v17  ;;  %v817_v16 = vld [vmem:[%s7506_s1 + $0x18f0] sm:$0xff]  ;;  %v820_v17 = vld [vmem:[%s7506_s1 + $0x1908] sm:$0xff] }
 0x16d   :  { %v824_v25 = vld [vmem:[%s7506_s1 + $0x1928] sm:$0xff] }
 0x16e   :  { %3072 = vmatpush1.bf16.msra.mxu0 %v3071_v32  ;;  %v6315_v32 = vld [vmem:[%s7507_s0 + $0x18] sm:$0xff] }
 0x16f   :  { %3648 = vmatpush1.bf16.msra.mxu1 %v3647_v33  ;;  %3074 = vmatprep.subr.bf16.mxu0 %v3073_v58  ;;  %v3091_v33 = vpack.c.bf16 %v783_v21, %v779_v63  ;;  %v3667_v58 = vpack.c.bf16 %v785_v24, %v781_v22  ;;  %v6337_v42 = vrot.slane %v6315_v32, %v4206_v11  ;;  %v819_v22 = vld [vmem:[%s7506_s1 + $0x1900] sm:$0xff]  ;;  %v821_v24 = vld [vmem:[%s7506_s1 + $0x1910] sm:$0xff] }
 0x170   :  { %3650 = vmatprep.subr.bf16.mxu1 %v3649_v37  ;;  %v789_v37 = vld [vmem:[%s7506_s1 + $0x1810] sm:$0xff]  ;;  %v3683_v63 = vpack.c.bf16 %v817_v16, %v813_v14  ;;  %v3109_v21 = vpack.c.bf16 %v824_v25, %v820_v17  ;;  %v855_v14 = vld [vmem:[%s7506_s1 + $0x1a20] sm:$0xff]  ;;  %v860_v25 = vld [vmem:[%s7506_s1 + $0x1a48] sm:$0xff] }
 0x171   :  { %v3671_v47 = vpack.c.bf16 %v793_v39, %v789_v37  ;;  %v827_v37 = vld [vmem:[%s7506_s1 + $0x1940] sm:$0xff]  ;;  %v829_v39 = vld [vmem:[%s7506_s1 + $0x1950] sm:$0xff] }
 0x172   :  { %3076 = vmatpush1.bf16.msra.mxu0 %v3075_v44  ;;  %v798_v44 = vld [vmem:[%s7506_s1 + $0x1858] sm:$0xff]  ;;  %v857_v17 = vld [vmem:[%s7506_s1 + $0x1a30] sm:$0xff] }
 0x173   :  { %3652 = vmatpush1.bf16.msra.mxu1 %v3651_v45  ;;  %3078 = vmatprep.subr.bf16.mxu0 %v3077_v46  ;;  %v802_v45 = vld [vmem:[%s7506_s1 + $0x1878] sm:$0xff]  ;;  %v3095_v46 = vpack.c.bf16 %v791_v36, %v787_v35  ;;  %v3687_v35 = vpack.c.bf16 %v825_v29, %v821_v24  ;;  %v3113_v36 = vpack.c.bf16 %v832_v31, %v828_v30  ;;  %v863_v24 = vld [vmem:[%s7506_s1 + $0x1a60] sm:$0xff]  ;;  %v865_v30 = vld [vmem:[%s7506_s1 + $0x1a70] sm:$0xff] }
 0x174   :  { %3654 = vmatprep.subr.bf16.mxu1 %v3653_v51  ;;  %v799_v51 = vld [vmem:[%s7506_s1 + $0x1860] sm:$0xff]  ;;  %v3673_v52 = vpack.c.bf16 %v802_v45, %v798_v44  ;;  %v836_v44 = vld [vmem:[%s7506_s1 + $0x1988] sm:$0xff] }
 0x175   :  { %v3099_v59 = vpack.c.bf16 %v799_v51, %v795_v50  ;;  %v840_v45 = vld [vmem:[%s7506_s1 + $0x19a8] sm:$0xff]  ;;  %v3691_v50 = vpack.c.bf16 %v833_v41, %v829_v39  ;;  %v871_v39 = vld [vmem:[%s7506_s1 + $0x1aa0] sm:$0xff] }
 0x176   :  { %3080 = vmatpush1.bf16.msra.mxu0 %v3079_v55  ;;  %v1242_v55 = vcombine.high %v6337_v42, %v6337_v42  ;;  %v3117_v51 = vpack.c.bf16 %v840_v45, %v836_v44  ;;  %v868_v31 = vld [vmem:[%s7506_s1 + $0x1a88] sm:$0xff]  ;;  %v873_v44 = vld [vmem:[%s7506_s1 + $0x1ab0] sm:$0xff] }
 0x177   :  { %3656 = vmatpush1.bf16.msra.mxu1 %v3655_v56  ;;  %3082 = vmatprep.subr.bf16.mxu0 %v3081_v57  ;;  %v806_v56 = vld [vmem:[%s7506_s1 + $0x1898] sm:$0xff]  ;;  %v876_v45 = vld [vmem:[%s7506_s1 + $0x1ac8] sm:$0xff] }
 0x178   :  { %3658 = vmatprep.subr.bf16.mxu1 %v3657_v0  ;;  %v810_v57 = vld [vmem:[%s7506_s1 + $0x18b8] sm:$0xff]  ;;  %v803_v0 = vld [vmem:[%s7506_s1 + $0x1880] sm:$0xff] }
 0x179   :  { %v3677_v2 = vpack.c.bf16 %v810_v57, %v806_v56  ;;  %v848_v56 = vld [vmem:[%s7506_s1 + $0x19e8] sm:$0xff]  ;;  %v846_v57 = vld [vmem:[%s7506_s1 + $0x19d8] sm:$0xff] }
 0x17a   :  { %3084 = vmatpush1.bf16.msra.mxu0 %v3083_v5  ;;  %v814_v5 = vld [vmem:[%s7506_s1 + $0x18d8] sm:$0xff] }
 0x17b   :  { %3660 = vmatpush1.bf16.msra.mxu1 %v3659_v6  ;;  %3086 = vmatprep.subr.bf16.mxu0 %v3085_v7  ;;  %v818_v6 = vld [vmem:[%s7506_s1 + $0x18f8] sm:$0xff]  ;;  %v3103_v7 = vpack.c.bf16 %v807_v26, %v803_v0  ;;  %v843_v26 = vld [vmem:[%s7506_s1 + $0x19c0] sm:$0xff] }
 0x17c   :  { %3662 = vmatprep.subr.bf16.mxu1 %v3661_v13  ;;  %v815_v13 = vld [vmem:[%s7506_s1 + $0x18e0] sm:$0xff]  ;;  %v3681_v15 = vpack.c.bf16 %v818_v6, %v814_v5  ;;  %v856_v5 = vld [vmem:[%s7506_s1 + $0x1a28] sm:$0xff]  ;;  %v854_v6 = vld [vmem:[%s7506_s1 + $0x1a18] sm:$0xff] }
 0x17e   :  { %3088 = vmatpush1.bf16.msra.mxu0 %v3087_v18  ;;  %v822_v18 = vld [vmem:[%s7506_s1 + $0x1918] sm:$0xff] }
 0x17f   :  { %3664 = vmatpush1.bf16.msra.mxu1 %v3663_v19  ;;  %3090 = vmatprep.subr.bf16.mxu0 %v3089_v20  ;;  %v826_v19 = vld [vmem:[%s7506_s1 + $0x1938] sm:$0xff]  ;;  %v3107_v20 = vpack.c.bf16 %v815_v13, %v811_v12  ;;  %v3125_v12 = vpack.c.bf16 %v856_v5, %v852_v4  ;;  %v851_v13 = vld [vmem:[%s7506_s1 + $0x1a00] sm:$0xff]  ;;  %v889_v4 = vld [vmem:[%s7506_s1 + $0x1b30] sm:$0xff] }
 0x180   :  { %3666 = vmatprep.subr.bf16.mxu1 %v3665_v23  ;;  %v823_v23 = vld [vmem:[%s7506_s1 + $0x1920] sm:$0xff]  ;;  %v3685_v27 = vpack.c.bf16 %v826_v19, %v822_v18  ;;  %v864_v18 = vld [vmem:[%s7506_s1 + $0x1a68] sm:$0xff]  ;;  %v862_v19 = vld [vmem:[%s7506_s1 + $0x1a58] sm:$0xff] }
 0x181   :  { %v892_v5 = vld [vmem:[%s7506_s1 + $0x1b48] sm:$0xff] }
 0x182   :  { %3092 = vmatpush1.bf16.msra.mxu0 %v3091_v33  ;;  %v830_v33 = vld [vmem:[%s7506_s1 + $0x1958] sm:$0xff] }
 0x183   :  { %3668 = vmatpush1.bf16.msra.mxu1 %v3667_v58  ;;  %3094 = vmatprep.subr.bf16.mxu0 %v3093_v34  ;;  %v834_v58 = vld [vmem:[%s7506_s1 + $0x1978] sm:$0xff]  ;;  %v3111_v34 = vpack.c.bf16 %v823_v23, %v819_v22  ;;  %v3129_v22 = vpack.c.bf16 %v864_v18, %v860_v25  ;;  %v859_v23 = vld [vmem:[%s7506_s1 + $0x1a40] sm:$0xff]  ;;  %v897_v25 = vld [vmem:[%s7506_s1 + $0x1b70] sm:$0xff] }
 0x184   :  { %3670 = vmatprep.subr.bf16.mxu1 %v3669_v38  ;;  %v831_v38 = vld [vmem:[%s7506_s1 + $0x1960] sm:$0xff]  ;;  %v3689_v40 = vpack.c.bf16 %v834_v58, %v830_v33  ;;  %v872_v33 = vld [vmem:[%s7506_s1 + $0x1aa8] sm:$0xff]  ;;  %v870_v58 = vld [vmem:[%s7506_s1 + $0x1a98] sm:$0xff] }
 0x185   :  { %1690 = vmatmul.mubr.f32.vlgmr.msra.gmra.mrb[0].mxu0 %v5940_v28  ;;  %v900_v18 = vld [vmem:[%s7506_s1 + $0x1b88] sm:$0xff] }
 0x186   :  { %3096 = vmatpush1.bf16.msra.mxu0 %v3095_v46  ;;  %2329 = vmatmul.mubr.f32.vlgmr.msra.gmra.mrb[0].mxu1 %v5940_v28  ;;  %v809_v28 = vld [vmem:[%s7506_s1 + $0x18b0] sm:$0xff]  ;;  %v838_v46 = vld [vmem:[%s7506_s1 + $0x1998] sm:$0xff] }
 0x187   :  { %3672 = vmatpush1.bf16.msra.mxu1 %v3671_v47  ;;  %3098 = vmatprep.subr.bf16.mxu0 %v3097_v49  ;;  %v3679_v8 = vpack.c.bf16 %v809_v28, %v805_v1  ;;  %v842_v47 = vld [vmem:[%s7506_s1 + $0x19b8] sm:$0xff]  ;;  %v3115_v49 = vpack.c.bf16 %v831_v38, %v827_v37  ;;  %v847_v1 = vld [vmem:[%s7506_s1 + $0x19e0] sm:$0xff]  ;;  %v3133_v37 = vpack.c.bf16 %v872_v33, %v868_v31  ;;  %v905_v31 = vld [vmem:[%s7506_s1 + $0x1bb0] sm:$0xff] }
 0x188   :  { %3674 = vmatprep.subr.bf16.mxu1 %v3673_v52  ;;  %1760 = vmatprep.mubr.f32.mxu0 %v1242_v55  ;;  %v839_v52 = vld [vmem:[%s7506_s1 + $0x19a0] sm:$0xff]  ;;  %v3693_v53 = vpack.c.bf16 %v842_v47, %v838_v46  ;;  %v880_v46 = vld [vmem:[%s7506_s1 + $0x1ae8] sm:$0xff]  ;;  %v878_v47 = vld [vmem:[%s7506_s1 + $0x1ad8] sm:$0xff] }
 0x189   :  { %2399 = vmatprep.mubr.f32.mxu1 %v1242_v55  ;;  %v844_v55 = vld [vmem:[%s7506_s1 + $0x19c8] sm:$0xff]  ;;  %v867_v38 = vld [vmem:[%s7506_s1 + $0x1a80] sm:$0xff] }
 0x18a   :  { %3100 = vmatpush1.bf16.msra.mxu0 %v3099_v59  ;;  %v850_v59 = vld [vmem:[%s7506_s1 + $0x19f8] sm:$0xff]  ;;  %v3121_v0 = vpack.c.bf16 %v848_v56, %v844_v55  ;;  %v881_v55 = vld [vmem:[%s7506_s1 + $0x1af0] sm:$0xff]  ;;  %v884_v56 = vld [vmem:[%s7506_s1 + $0x1b08] sm:$0xff] }
 0x18b   :  { %3676 = vmatpush1.bf16.msra.mxu1 %v3675_v60  ;;  %3102 = vmatprep.subr.bf16.mxu0 %v3101_v61  ;;  %v3119_v60 = vpack.c.bf16 %v839_v52, %v835_v9  ;;  %v3695_v61 = vpack.c.bf16 %v841_v54, %v837_v43  ;;  %v3697_v28 = vpack.c.bf16 %v850_v59, %v846_v57  ;;  %v875_v52 = vld [vmem:[%s7506_s1 + $0x1ac0] sm:$0xff]  ;;  %v888_v57 = vld [vmem:[%s7506_s1 + $0x1b28] sm:$0xff]  ;;  %v886_v59 = vld [vmem:[%s7506_s1 + $0x1b18] sm:$0xff] }
 0x18c   :  { %3678 = vmatprep.subr.bf16.mxu1 %v3677_v2  ;;  %v845_v2 = vld [vmem:[%s7506_s1 + $0x19d0] sm:$0xff]  ;;  %v3137_v9 = vpack.c.bf16 %v880_v46, %v876_v45  ;;  %v879_v43 = vld [vmem:[%s7506_s1 + $0x1ae0] sm:$0xff]  ;;  %v908_v33 = vld [vmem:[%s7506_s1 + $0x1bc8] sm:$0xff] }
 0x18d   :  { %v913_v45 = vld [vmem:[%s7506_s1 + $0x1bf0] sm:$0xff]  ;;  %v916_v46 = vld [vmem:[%s7506_s1 + $0x1c08] sm:$0xff] }
 0x18e   :  { %3104 = vmatpush1.bf16.msra.mxu0 %v3103_v7  ;;  %v858_v7 = vld [vmem:[%s7506_s1 + $0x1a38] sm:$0xff] }
 0x18f   :  { %3680 = vmatpush1.bf16.msra.mxu1 %v3679_v8  ;;  %3106 = vmatprep.subr.bf16.mxu0 %v3105_v10  ;;  %v3123_v8 = vpack.c.bf16 %v847_v1, %v843_v26  ;;  %v3699_v10 = vpack.c.bf16 %v849_v3, %v845_v2  ;;  %v3701_v16 = vpack.c.bf16 %v858_v7, %v854_v6  ;;  %v883_v1 = vld [vmem:[%s7506_s1 + $0x1b00] sm:$0xff]  ;;  %v896_v6 = vld [vmem:[%s7506_s1 + $0x1b68] sm:$0xff]  ;;  %v894_v7 = vld [vmem:[%s7506_s1 + $0x1b58] sm:$0xff] }
 0x190   :  { %3682 = vmatprep.subr.bf16.mxu1 %v3681_v15  ;;  %v853_v15 = vld [vmem:[%s7506_s1 + $0x1a10] sm:$0xff]  ;;  %v3141_v26 = vpack.c.bf16 %v888_v57, %v884_v56  ;;  %v887_v2 = vld [vmem:[%s7506_s1 + $0x1b20] sm:$0xff]  ;;  %v924_v57 = vld [vmem:[%s7506_s1 + $0x1c48] sm:$0xff] }
 0x191   :  { %v921_v56 = vld [vmem:[%s7506_s1 + $0x1c30] sm:$0xff] }
 0x192   :  { %3108 = vmatpush1.bf16.msra.mxu0 %v3107_v20  ;;  %v866_v20 = vld [vmem:[%s7506_s1 + $0x1a78] sm:$0xff] }
 0x193   :  { %3684 = vmatpush1.bf16.msra.mxu1 %v3683_v63  ;;  %3110 = vmatprep.subr.bf16.mxu0 %v3109_v21  ;;  %v3127_v63 = vpack.c.bf16 %v855_v14, %v851_v13  ;;  %v3703_v21 = vpack.c.bf16 %v857_v17, %v853_v15  ;;  %v3705_v29 = vpack.c.bf16 %v866_v20, %v862_v19  ;;  %v891_v14 = vld [vmem:[%s7506_s1 + $0x1b40] sm:$0xff]  ;;  %v904_v19 = vld [vmem:[%s7506_s1 + $0x1ba8] sm:$0xff]  ;;  %v902_v20 = vld [vmem:[%s7506_s1 + $0x1b98] sm:$0xff] }
 0x194   :  { %3686 = vmatprep.subr.bf16.mxu1 %v3685_v27  ;;  %v861_v27 = vld [vmem:[%s7506_s1 + $0x1a50] sm:$0xff]  ;;  %v3145_v13 = vpack.c.bf16 %v896_v6, %v892_v5  ;;  %v895_v15 = vld [vmem:[%s7506_s1 + $0x1b60] sm:$0xff] }
 0x195   :  { %v929_v6 = vld [vmem:[%s7506_s1 + $0x1c70] sm:$0xff] }
 0x196   :  { %3112 = vmatpush1.bf16.msra.mxu0 %v3111_v34  ;;  %v874_v34 = vld [vmem:[%s7506_s1 + $0x1ab8] sm:$0xff] }
 0x197   :  { %3688 = vmatpush1.bf16.msra.mxu1 %v3687_v35  ;;  %3114 = vmatprep.subr.bf16.mxu0 %v3113_v36  ;;  %v3131_v35 = vpack.c.bf16 %v863_v24, %v859_v23  ;;  %v3707_v36 = vpack.c.bf16 %v865_v30, %v861_v27  ;;  %v3709_v41 = vpack.c.bf16 %v874_v34, %v870_v58  ;;  %v899_v24 = vld [vmem:[%s7506_s1 + $0x1b80] sm:$0xff]  ;;  %v912_v58 = vld [vmem:[%s7506_s1 + $0x1be8] sm:$0xff]  ;;  %v910_v34 = vld [vmem:[%s7506_s1 + $0x1bd8] sm:$0xff] }
 0x198   :  { %3690 = vmatprep.subr.bf16.mxu1 %v3689_v40  ;;  %v869_v40 = vld [vmem:[%s7506_s1 + $0x1a90] sm:$0xff]  ;;  %v3149_v23 = vpack.c.bf16 %v904_v19, %v900_v18  ;;  %v903_v27 = vld [vmem:[%s7506_s1 + $0x1ba0] sm:$0xff] }
 0x199   :  { %v933_v18 = vld [vmem:[%s7506_s1 + $0x1c90] sm:$0xff] }
 0x19a   :  { %3116 = vmatpush1.bf16.msra.mxu0 %v3115_v49  ;;  %v882_v49 = vld [vmem:[%s7506_s1 + $0x1af8] sm:$0xff] }
 0x19b   :  { %3692 = vmatpush1.bf16.msra.mxu1 %v3691_v50  ;;  %3118 = vmatprep.subr.bf16.mxu0 %v3117_v51  ;;  %v3135_v50 = vpack.c.bf16 %v871_v39, %v867_v38  ;;  %v3711_v51 = vpack.c.bf16 %v873_v44, %v869_v40  ;;  %v3713_v54 = vpack.c.bf16 %v882_v49, %v878_v47  ;;  %v907_v39 = vld [vmem:[%s7506_s1 + $0x1bc0] sm:$0xff]  ;;  %v920_v47 = vld [vmem:[%s7506_s1 + $0x1c28] sm:$0xff] }
 0x19c   :  { %3694 = vmatprep.subr.bf16.mxu1 %v3693_v53  ;;  %v877_v53 = vld [vmem:[%s7506_s1 + $0x1ad0] sm:$0xff]  ;;  %v3153_v38 = vpack.c.bf16 %v912_v58, %v908_v33  ;;  %v911_v40 = vld [vmem:[%s7506_s1 + $0x1be0] sm:$0xff]  ;;  %v1227_v49 = vcombine.high %v6315_v32, %v6315_v32 }
 0x19d   :  { %v919_v32 = vld [vmem:[%s7506_s1 + $0x1c20] sm:$0xff]  ;;  %v945_v58 = vld [vmem:[%s7506_s1 + $0x1cf0] sm:$0xff] }
 0x19e   :  { %3120 = vmatpush1.bf16.msra.mxu0 %v3119_v60  ;;  %v890_v60 = vld [vmem:[%s7506_s1 + $0x1b38] sm:$0xff] }
 0x19f   :  { %3696 = vmatpush1.bf16.msra.mxu1 %v3695_v61  ;;  %3122 = vmatprep.subr.bf16.mxu0 %v3121_v0  ;;  %v3139_v61 = vpack.c.bf16 %v879_v43, %v875_v52  ;;  %v3715_v0 = vpack.c.bf16 %v881_v55, %v877_v53  ;;  %v3717_v3 = vpack.c.bf16 %v890_v60, %v886_v59  ;;  %v915_v53 = vld [vmem:[%s7506_s1 + $0x1c00] sm:$0xff]  ;;  %v928_v59 = vld [vmem:[%s7506_s1 + $0x1c68] sm:$0xff] }
 0x1a0   :  { %3698 = vmatprep.subr.bf16.mxu1 %v3697_v28  ;;  %v885_v28 = vld [vmem:[%s7506_s1 + $0x1b10] sm:$0xff]  ;;  %v3157_v43 = vpack.c.bf16 %v920_v47, %v916_v46  ;;  %v6730_v60 = vrot.slane %v1227_v49, %v4206_v11  ;;  %v956_v49 = vld [vmem:[%s7506_s1 + $0x1d48] sm:$0xff] }
 0x1a1   :  { %v953_v47 = vld [vmem:[%s7506_s1 + $0x1d30] sm:$0xff] }
 0x1a2   :  { %3124 = vmatpush1.bf16.msra.mxu0 %v3123_v8  ;;  %v898_v8 = vld [vmem:[%s7506_s1 + $0x1b78] sm:$0xff] }
 0x1a3   :  { %3700 = vmatpush1.bf16.msra.mxu1 %v3699_v10  ;;  %3126 = vmatprep.subr.bf16.mxu0 %v3125_v12  ;;  %v3143_v10 = vpack.c.bf16 %v887_v2, %v883_v1  ;;  %v3719_v12 = vpack.c.bf16 %v889_v4, %v885_v28  ;;  %v3721_v17 = vpack.c.bf16 %v898_v8, %v894_v7  ;;  %v923_v28 = vld [vmem:[%s7506_s1 + $0x1c40] sm:$0xff]  ;;  %v925_v4 = vld [vmem:[%s7506_s1 + $0x1c50] sm:$0xff]  ;;  %v932_v7 = vld [vmem:[%s7506_s1 + $0x1c88] sm:$0xff] }
 0x1a4   :  { %3702 = vmatprep.subr.bf16.mxu1 %v3701_v16  ;;  %v893_v16 = vld [vmem:[%s7506_s1 + $0x1b50] sm:$0xff]  ;;  %v3161_v2 = vpack.c.bf16 %v928_v59, %v924_v57  ;;  %v936_v8 = vld [vmem:[%s7506_s1 + $0x1ca8] sm:$0xff] }
 0x1a5   :  { %v961_v57 = vld [vmem:[%s7506_s1 + $0x1d70] sm:$0xff]  ;;  %v964_v59 = vld [vmem:[%s7506_s1 + $0x1d88] sm:$0xff] }
 0x1a6   :  { %3128 = vmatpush1.bf16.msra.mxu0 %v3127_v63  ;;  %v906_v63 = vld [vmem:[%s7506_s1 + $0x1bb8] sm:$0xff] }
 0x1a7   :  { %3704 = vmatpush1.bf16.msra.mxu1 %v3703_v21  ;;  %3130 = vmatprep.subr.bf16.mxu0 %v3129_v22  ;;  %v3147_v21 = vpack.c.bf16 %v895_v15, %v891_v14  ;;  %v3723_v22 = vpack.c.bf16 %v897_v25, %v893_v16  ;;  %v3725_v30 = vpack.c.bf16 %v906_v63, %v902_v20  ;;  %v935_v25 = vld [vmem:[%s7506_s1 + $0x1ca0] sm:$0xff]  ;;  %v940_v20 = vld [vmem:[%s7506_s1 + $0x1cc8] sm:$0xff] }
 0x1a8   :  { %3706 = vmatprep.subr.bf16.mxu1 %v3705_v29  ;;  %v901_v29 = vld [vmem:[%s7506_s1 + $0x1b90] sm:$0xff]  ;;  %v3739_v15 = vpack.c.bf16 %v929_v6, %v925_v4  ;;  %v3165_v16 = vpack.c.bf16 %v936_v8, %v932_v7  ;;  %v944_v63 = vld [vmem:[%s7506_s1 + $0x1ce8] sm:$0xff]  ;;  %v967_v4 = vld [vmem:[%s7506_s1 + $0x1da0] sm:$0xff] }
 0x1a9   :  { %v969_v7 = vld [vmem:[%s7506_s1 + $0x1db0] sm:$0xff]  ;;  %v972_v8 = vld [vmem:[%s7506_s1 + $0x1dc8] sm:$0xff] }
 0x1aa   :  { %3132 = vmatpush1.bf16.msra.mxu0 %v3131_v35  ;;  %v914_v35 = vld [vmem:[%s7506_s1 + $0x1bf8] sm:$0xff] }
 0x1ab   :  { %3708 = vmatpush1.bf16.msra.mxu1 %v3707_v36  ;;  %3134 = vmatprep.subr.bf16.mxu0 %v3133_v37  ;;  %v3151_v36 = vpack.c.bf16 %v903_v27, %v899_v24  ;;  %v3727_v37 = vpack.c.bf16 %v905_v31, %v901_v29  ;;  %v3729_v44 = vpack.c.bf16 %v914_v35, %v910_v34  ;;  %v939_v29 = vld [vmem:[%s7506_s1 + $0x1cc0] sm:$0xff]  ;;  %v941_v31 = vld [vmem:[%s7506_s1 + $0x1cd0] sm:$0xff]  ;;  %v948_v34 = vld [vmem:[%s7506_s1 + $0x1d08] sm:$0xff] }
 0x1ac   :  { %3710 = vmatprep.subr.bf16.mxu1 %v3709_v41  ;;  %v909_v41 = vld [vmem:[%s7506_s1 + $0x1bd0] sm:$0xff]  ;;  %v3169_v27 = vpack.c.bf16 %v944_v63, %v940_v20  ;;  %v952_v35 = vld [vmem:[%s7506_s1 + $0x1d28] sm:$0xff] }
 0x1ad   :  { %v3731_v52 = vpack.c.bf16 %v913_v45, %v909_v41  ;;  %v947_v41 = vld [vmem:[%s7506_s1 + $0x1d00] sm:$0xff]  ;;  %v949_v45 = vld [vmem:[%s7506_s1 + $0x1d10] sm:$0xff]  ;;  %v980_v20 = vld [vmem:[%s7506_s1 + $0x1e08] sm:$0xff] }
 0x1ae   :  { %3136 = vmatpush1.bf16.msra.mxu0 %v3135_v50  ;;  %v918_v50 = vld [vmem:[%s7506_s1 + $0x1c18] sm:$0xff]  ;;  %v984_v63 = vld [vmem:[%s7506_s1 + $0x1e28] sm:$0xff] }
 0x1af   :  { %3712 = vmatpush1.bf16.msra.mxu1 %v3711_v51  ;;  %3138 = vmatprep.subr.bf16.mxu0 %v3137_v9  ;;  %v922_v51 = vld [vmem:[%s7506_s1 + $0x1c38] sm:$0xff]  ;;  %v3155_v9 = vpack.c.bf16 %v911_v40, %v907_v39  ;;  %v3747_v39 = vpack.c.bf16 %v945_v58, %v941_v31  ;;  %v3173_v40 = vpack.c.bf16 %v952_v35, %v948_v34  ;;  %v981_v31 = vld [vmem:[%s7506_s1 + $0x1e10] sm:$0xff]  ;;  %v988_v34 = vld [vmem:[%s7506_s1 + $0x1e48] sm:$0xff] }
 0x1b0   :  { %3714 = vmatprep.subr.bf16.mxu1 %v3713_v54  ;;  %v917_v54 = vld [vmem:[%s7506_s1 + $0x1c10] sm:$0xff]  ;;  %v3733_v55 = vpack.c.bf16 %v922_v51, %v918_v50  ;;  %v960_v50 = vld [vmem:[%s7506_s1 + $0x1d68] sm:$0xff]  ;;  %v958_v51 = vld [vmem:[%s7506_s1 + $0x1d58] sm:$0xff] }
 0x1b1   :  { %v3735_v1 = vpack.c.bf16 %v921_v56, %v917_v54  ;;  %v959_v54 = vld [vmem:[%s7506_s1 + $0x1d60] sm:$0xff]  ;;  %v985_v58 = vld [vmem:[%s7506_s1 + $0x1e30] sm:$0xff]  ;;  %v992_v35 = vld [vmem:[%s7506_s1 + $0x1e68] sm:$0xff] }
 0x1b2   :  { %3140 = vmatpush1.bf16.msra.mxu0 %v3139_v61  ;;  %v926_v61 = vld [vmem:[%s7506_s1 + $0x1c58] sm:$0xff] }
 0x1b3   :  { %3716 = vmatpush1.bf16.msra.mxu1 %v3715_v0  ;;  %3142 = vmatprep.subr.bf16.mxu0 %v3141_v26  ;;  %v930_v0 = vld [vmem:[%s7506_s1 + $0x1c78] sm:$0xff]  ;;  %v3159_v26 = vpack.c.bf16 %v919_v32, %v915_v53  ;;  %v3177_v53 = vpack.c.bf16 %v960_v50, %v956_v49  ;;  %v955_v32 = vld [vmem:[%s7506_s1 + $0x1d40] sm:$0xff]  ;;  %v996_v49 = vld [vmem:[%s7506_s1 + $0x1e88] sm:$0xff] }
 0x1b4   :  { %3718 = vmatprep.subr.bf16.mxu1 %v3717_v3  ;;  %v927_v3 = vld [vmem:[%s7506_s1 + $0x1c60] sm:$0xff]  ;;  %v3737_v5 = vpack.c.bf16 %v930_v0, %v926_v61  ;;  %v968_v61 = vld [vmem:[%s7506_s1 + $0x1da8] sm:$0xff]  ;;  %v966_v0 = vld [vmem:[%s7506_s1 + $0x1d98] sm:$0xff] }
 0x1b5   :  { %v3163_v14 = vpack.c.bf16 %v927_v3, %v923_v28  ;;  %v3181_v28 = vpack.c.bf16 %v968_v61, %v964_v59  ;;  %v963_v3 = vld [vmem:[%s7506_s1 + $0x1d80] sm:$0xff]  ;;  %v1000_v50 = vld [vmem:[%s7506_s1 + $0x1ea8] sm:$0xff] }
 0x1b6   :  { %3144 = vmatpush1.bf16.msra.mxu0 %v3143_v10  ;;  %v1243_v10 = vcombine.high %v6730_v60, %v6730_v60  ;;  %v1004_v59 = vld [vmem:[%s7506_s1 + $0x1ec8] sm:$0xff] }
 0x1b7   :  { %3720 = vmatpush1.bf16.msra.mxu1 %v3719_v12  ;;  %3146 = vmatprep.subr.bf16.mxu0 %v3145_v13  ;;  %v934_v12 = vld [vmem:[%s7506_s1 + $0x1c98] sm:$0xff]  ;;  %v1008_v61 = vld [vmem:[%s7506_s1 + $0x1ee8] sm:$0xff] }
 0x1b8   :  { %3722 = vmatprep.subr.bf16.mxu1 %v3721_v17  ;;  %v938_v13 = vld [vmem:[%s7506_s1 + $0x1cb8] sm:$0xff]  ;;  %v931_v17 = vld [vmem:[%s7506_s1 + $0x1c80] sm:$0xff] }
 0x1b9   :  { %v3741_v19 = vpack.c.bf16 %v938_v13, %v934_v12  ;;  %v974_v12 = vld [vmem:[%s7506_s1 + $0x1dd8] sm:$0xff] }
 0x1ba   :  { %3148 = vmatpush1.bf16.msra.mxu0 %v3147_v21  ;;  %v942_v21 = vld [vmem:[%s7506_s1 + $0x1cd8] sm:$0xff] }
 0x1bb   :  { %3724 = vmatpush1.bf16.msra.mxu1 %v3723_v22  ;;  %3150 = vmatprep.subr.bf16.mxu0 %v3149_v23  ;;  %v946_v22 = vld [vmem:[%s7506_s1 + $0x1cf8] sm:$0xff]  ;;  %v3167_v23 = vpack.c.bf16 %v935_v25, %v931_v17  ;;  %v971_v17 = vld [vmem:[%s7506_s1 + $0x1dc0] sm:$0xff] }
 0x1bc   :  { %3726 = vmatprep.subr.bf16.mxu1 %v3725_v30  ;;  %v943_v30 = vld [vmem:[%s7506_s1 + $0x1ce0] sm:$0xff]  ;;  %v3745_v33 = vpack.c.bf16 %v946_v22, %v942_v21  ;;  %v978_v13 = vld [vmem:[%s7506_s1 + $0x1df8] sm:$0xff] }
 0x1bd   :  { %v975_v25 = vld [vmem:[%s7506_s1 + $0x1de0] sm:$0xff]  ;;  %v982_v21 = vld [vmem:[%s7506_s1 + $0x1e18] sm:$0xff] }
 0x1be   :  { %3152 = vmatpush1.bf16.msra.mxu0 %v3151_v36  ;;  %v950_v36 = vld [vmem:[%s7506_s1 + $0x1d18] sm:$0xff] }
 0x1bf   :  { %3728 = vmatpush1.bf16.msra.mxu1 %v3727_v37  ;;  %3154 = vmatprep.subr.bf16.mxu0 %v3153_v38  ;;  %v954_v37 = vld [vmem:[%s7506_s1 + $0x1d38] sm:$0xff]  ;;  %v3171_v38 = vpack.c.bf16 %v943_v30, %v939_v29  ;;  %v979_v29 = vld [vmem:[%s7506_s1 + $0x1e00] sm:$0xff] }
 0x1c0   :  { %3730 = vmatprep.subr.bf16.mxu1 %v3729_v44  ;;  %v951_v44 = vld [vmem:[%s7506_s1 + $0x1d20] sm:$0xff]  ;;  %v3749_v46 = vpack.c.bf16 %v954_v37, %v950_v36  ;;  %v986_v22 = vld [vmem:[%s7506_s1 + $0x1e38] sm:$0xff] }
 0x1c1   :  { %v983_v30 = vld [vmem:[%s7506_s1 + $0x1e20] sm:$0xff]  ;;  %v990_v36 = vld [vmem:[%s7506_s1 + $0x1e58] sm:$0xff] }
 0x1c2   :  { %3156 = vmatpush1.bf16.msra.mxu0 %v3155_v9  ;;  %v962_v9 = vld [vmem:[%s7506_s1 + $0x1d78] sm:$0xff] }
 0x1c3   :  { %3732 = vmatpush1.bf16.msra.mxu1 %v3731_v52  ;;  %3158 = vmatprep.subr.bf16.mxu0 %v3157_v43  ;;  %v3175_v52 = vpack.c.bf16 %v951_v44, %v947_v41  ;;  %v3751_v43 = vpack.c.bf16 %v953_v47, %v949_v45  ;;  %v3753_v56 = vpack.c.bf16 %v962_v9, %v958_v51  ;;  %v994_v37 = vld [vmem:[%s7506_s1 + $0x1e78] sm:$0xff]  ;;  %v987_v41 = vld [vmem:[%s7506_s1 + $0x1e40] sm:$0xff]  ;;  %v989_v45 = vld [vmem:[%s7506_s1 + $0x1e50] sm:$0xff] }
 0x1c4   :  { %3734 = vmatprep.subr.bf16.mxu1 %v3733_v55  ;;  %v957_v55 = vld [vmem:[%s7506_s1 + $0x1d50] sm:$0xff]  ;;  %v991_v44 = vld [vmem:[%s7506_s1 + $0x1e60] sm:$0xff]  ;;  %v998_v51 = vld [vmem:[%s7506_s1 + $0x1e98] sm:$0xff] }
 0x1c5   :  { %1761 = vmatmul.mubr.f32.vlgmr.msra.gmra.mrb[0].mxu0 %v6337_v42  ;;  %v993_v47 = vld [vmem:[%s7506_s1 + $0x1e70] sm:$0xff]  ;;  %v1002_v9 = vld [vmem:[%s7506_s1 + $0x1eb8] sm:$0xff] }
 0x1c6   :  { %3160 = vmatpush1.bf16.msra.mxu0 %v3159_v26  ;;  %2400 = vmatmul.mubr.f32.vlgmr.msra.gmra.mrb[0].mxu1 %v6337_v42  ;;  %v937_v42 = vld [vmem:[%s7506_s1 + $0x1cb0] sm:$0xff]  ;;  %v970_v26 = vld [vmem:[%s7506_s1 + $0x1db8] sm:$0xff] }
 0x1c7   :  { %3736 = vmatpush1.bf16.msra.mxu1 %v3735_v1  ;;  %3162 = vmatprep.subr.bf16.mxu0 %v3161_v2  ;;  %v3743_v24 = vpack.c.bf16 %v937_v42, %v933_v18  ;;  %v3179_v1 = vpack.c.bf16 %v959_v54, %v955_v32  ;;  %v3755_v2 = vpack.c.bf16 %v961_v57, %v957_v55  ;;  %v973_v18 = vld [vmem:[%s7506_s1 + $0x1dd0] sm:$0xff]  ;;  %v995_v32 = vld [vmem:[%s7506_s1 + $0x1e80] sm:$0xff] }
 0x1c8   :  { %3738 = vmatprep.subr.bf16.mxu1 %v3737_v5  ;;  %1831 = vmatprep.mubr.f32.mxu0 %v1243_v10  ;;  %v965_v5 = vld [vmem:[%s7506_s1 + $0x1d90] sm:$0xff]  ;;  %v3757_v6 = vpack.c.bf16 %v970_v26, %v966_v0  ;;  %v999_v54 = vld [vmem:[%s7506_s1 + $0x1ea0] sm:$0xff]  ;;  %v1006_v0 = vld [vmem:[%s7506_s1 + $0x1ed8] sm:$0xff] }
 0x1c9   :  { %2470 = vmatprep.mubr.f32.mxu1 %v1243_v10  ;;  %v976_v10 = vld [vmem:[%s7506_s1 + $0x1de8] sm:$0xff]  ;;  %v977_v42 = vld [vmem:[%s7506_s1 + $0x1df0] sm:$0xff]  ;;  %v1010_v26 = vld [vmem:[%s7506_s1 + $0x1ef8] sm:$0xff] }
 0x1ca   :  { %3164 = vmatpush1.bf16.msra.mxu0 %v3163_v14  ;;  %v3183_v14 = vpack.c.bf16 %v967_v4, %v963_v3  ;;  %v997_v55 = vld [vmem:[%s7506_s1 + $0x1e90] sm:$0xff]  ;;  %v1003_v3 = vld [vmem:[%s7506_s1 + $0x1ec0] sm:$0xff] }
 0x1cb   :  { %3740 = vmatpush1.bf16.msra.mxu1 %v3739_v15  ;;  %3166 = vmatprep.subr.bf16.mxu0 %v3165_v16  ;;  %v3759_v15 = vpack.c.bf16 %v969_v7, %v965_v5  ;;  %v3185_v16 = vpack.c.bf16 %v976_v10, %v972_v8  ;;  %v1001_v57 = vld [vmem:[%s7506_s1 + $0x1eb0] sm:$0xff]  ;;  %v1007_v4 = vld [vmem:[%s7506_s1 + $0x1ee0] sm:$0xff]  ;;  %v1012_v8 = vld [vmem:[%s7506_s1 + $0x1f08] sm:$0xff] }
 0x1cc   :  { %3742 = vmatprep.subr.bf16.mxu1 %v3741_v19  ;;  %v3761_v19 = vpack.c.bf16 %v978_v13, %v974_v12  ;;  %v1005_v5 = vld [vmem:[%s7506_s1 + $0x1ed0] sm:$0xff]  ;;  %v1016_v10 = vld [vmem:[%s7506_s1 + $0x1f28] sm:$0xff]  ;;  %v1014_v12 = vld [vmem:[%s7506_s1 + $0x1f18] sm:$0xff] }
 0x1cd   :  { %v1009_v7 = vld [vmem:[%s7506_s1 + $0x1ef0] sm:$0xff]  ;;  %v1018_v13 = vld [vmem:[%s7506_s1 + $0x1f38] sm:$0xff] }
 0x1ce   :  { %3168 = vmatpush1.bf16.msra.mxu0 %v3167_v23  ;;  %v3187_v23 = vpack.c.bf16 %v975_v25, %v971_v17  ;;  %v1011_v17 = vld [vmem:[%s7506_s1 + $0x1f00] sm:$0xff] }
 0x1cf   :  { %3744 = vmatpush1.bf16.msra.mxu1 %v3743_v24  ;;  %3170 = vmatprep.subr.bf16.mxu0 %v3169_v27  ;;  %v3763_v24 = vpack.c.bf16 %v977_v42, %v973_v18  ;;  %v3189_v27 = vpack.c.bf16 %v984_v63, %v980_v20  ;;  %v1015_v25 = vld [vmem:[%s7506_s1 + $0x1f20] sm:$0xff]  ;;  %v1013_v18 = vld [vmem:[%s7506_s1 + $0x1f10] sm:$0xff]  ;;  %v1020_v20 = vld [vmem:[%s7506_s1 + $0x1f48] sm:$0xff] }
 0x1d0   :  { %3746 = vmatprep.subr.bf16.mxu1 %v3745_v33  ;;  %v3765_v33 = vpack.c.bf16 %v986_v22, %v982_v21  ;;  %v1017_v42 = vld [vmem:[%s7506_s1 + $0x1f30] sm:$0xff]  ;;  %v1024_v63 = vld [vmem:[%s7506_s1 + $0x1f68] sm:$0xff]  ;;  %v1022_v21 = vld [vmem:[%s7506_s1 + $0x1f58] sm:$0xff] }
 0x1d1   :  { %v1026_v22 = vld [vmem:[%s7506_s1 + $0x1f78] sm:$0xff] }
 0x1d2   :  { %3172 = vmatpush1.bf16.msra.mxu0 %v3171_v38  ;;  %v3191_v38 = vpack.c.bf16 %v983_v30, %v979_v29  ;;  %v1019_v29 = vld [vmem:[%s7506_s1 + $0x1f40] sm:$0xff] }
 0x1d3   :  { %3748 = vmatpush1.bf16.msra.mxu1 %v3747_v39  ;;  %3174 = vmatprep.subr.bf16.mxu0 %v3173_v40  ;;  %v3767_v39 = vpack.c.bf16 %v985_v58, %v981_v31  ;;  %v3193_v40 = vpack.c.bf16 %v992_v35, %v988_v34  ;;  %v1023_v30 = vld [vmem:[%s7506_s1 + $0x1f60] sm:$0xff]  ;;  %v1021_v31 = vld [vmem:[%s7506_s1 + $0x1f50] sm:$0xff]  ;;  %v1028_v34 = vld [vmem:[%s7506_s1 + $0x1f88] sm:$0xff] }
 0x1d4   :  { %3750 = vmatprep.subr.bf16.mxu1 %v3749_v46  ;;  %v3769_v46 = vpack.c.bf16 %v994_v37, %v990_v36  ;;  %v1025_v58 = vld [vmem:[%s7506_s1 + $0x1f70] sm:$0xff]  ;;  %v1032_v35 = vld [vmem:[%s7506_s1 + $0x1fa8] sm:$0xff]  ;;  %v1030_v36 = vld [vmem:[%s7506_s1 + $0x1f98] sm:$0xff] }
 0x1d5   :  { %v1034_v37 = vld [vmem:[%s7506_s1 + $0x1fb8] sm:$0xff] }
 0x1d6   :  { %3176 = vmatpush1.bf16.msra.mxu0 %v3175_v52  ;;  %v3195_v52 = vpack.c.bf16 %v991_v44, %v987_v41  ;;  %v1027_v41 = vld [vmem:[%s7506_s1 + $0x1f80] sm:$0xff] }
 0x1d7   :  { %3752 = vmatpush1.bf16.msra.mxu1 %v3751_v43  ;;  %3178 = vmatprep.subr.bf16.mxu0 %v3177_v53  ;;  %v3771_v43 = vpack.c.bf16 %v993_v47, %v989_v45  ;;  %v3197_v53 = vpack.c.bf16 %v1000_v50, %v996_v49  ;;  %v1031_v44 = vld [vmem:[%s7506_s1 + $0x1fa0] sm:$0xff]  ;;  %v1029_v45 = vld [vmem:[%s7506_s1 + $0x1f90] sm:$0xff]  ;;  %v1036_v49 = vld [vmem:[%s7506_s1 + $0x1fc8] sm:$0xff] }
 0x1d8   :  { %3754 = vmatprep.subr.bf16.mxu1 %v3753_v56  ;;  %v3773_v56 = vpack.c.bf16 %v1002_v9, %v998_v51  ;;  %v1033_v47 = vld [vmem:[%s7506_s1 + $0x1fb0] sm:$0xff]  ;;  %v1040_v50 = vld [vmem:[%s7506_s1 + $0x1fe8] sm:$0xff]  ;;  %v1038_v51 = vld [vmem:[%s7506_s1 + $0x1fd8] sm:$0xff] }
 0x1d9   :  { %v1042_v9 = vld [vmem:[%s7506_s1 + $0x1ff8] sm:$0xff] }
 0x1da   :  { %3180 = vmatpush1.bf16.msra.mxu0 %v3179_v1  ;;  %v3199_v1 = vpack.c.bf16 %v999_v54, %v995_v32  ;;  %v1035_v32 = vld [vmem:[%s7506_s1 + $0x1fc0] sm:$0xff] }
 0x1db   :  { %3756 = vmatpush1.bf16.msra.mxu1 %v3755_v2  ;;  %3182 = vmatprep.subr.bf16.mxu0 %v3181_v28  ;;  %v3775_v2 = vpack.c.bf16 %v1001_v57, %v997_v55  ;;  %v3201_v28 = vpack.c.bf16 %v1008_v61, %v1004_v59  ;;  %v1039_v54 = vld [vmem:[%s7506_s1 + $0x1fe0] sm:$0xff]  ;;  %v1037_v55 = vld [vmem:[%s7506_s1 + $0x1fd0] sm:$0xff]  ;;  %v1044_v59 = vld [vmem:[%s7506_s1 + $0x2008] sm:$0xff] }
 0x1dc   :  { %3758 = vmatprep.subr.bf16.mxu1 %v3757_v6  ;;  %v3777_v6 = vpack.c.bf16 %v1010_v26, %v1006_v0  ;;  %v1041_v57 = vld [vmem:[%s7506_s1 + $0x1ff0] sm:$0xff]  ;;  %v1048_v61 = vld [vmem:[%s7506_s1 + $0x2028] sm:$0xff]  ;;  %v1046_v0 = vld [vmem:[%s7506_s1 + $0x2018] sm:$0xff] }
 0x1dd   :  { %v1050_v26 = vld [vmem:[%s7506_s1 + $0x2038] sm:$0xff] }
 0x1de   :  { %3184 = vmatpush1.bf16.msra.mxu0 %v3183_v14  ;;  %v3203_v14 = vpack.c.bf16 %v1007_v4, %v1003_v3  ;;  %v1043_v3 = vld [vmem:[%s7506_s1 + $0x2000] sm:$0xff] }
 0x1df   :  { %3760 = vmatpush1.bf16.msra.mxu1 %v3759_v15  ;;  %3186 = vmatprep.subr.bf16.mxu0 %v3185_v16  ;;  %v3779_v15 = vpack.c.bf16 %v1009_v7, %v1005_v5  ;;  %v3205_v16 = vpack.c.bf16 %v1016_v10, %v1012_v8  ;;  %v1047_v4 = vld [vmem:[%s7506_s1 + $0x2020] sm:$0xff]  ;;  %v1045_v5 = vld [vmem:[%s7506_s1 + $0x2010] sm:$0xff]  ;;  %v1052_v8 = vld [vmem:[%s7506_s1 + $0x2048] sm:$0xff] }
 0x1e0   :  { %3762 = vmatprep.subr.bf16.mxu1 %v3761_v19  ;;  %v3781_v19 = vpack.c.bf16 %v1018_v13, %v1014_v12  ;;  %v1049_v7 = vld [vmem:[%s7506_s1 + $0x2030] sm:$0xff]  ;;  %v1056_v10 = vld [vmem:[%s7506_s1 + $0x2068] sm:$0xff]  ;;  %v1054_v12 = vld [vmem:[%s7506_s1 + $0x2058] sm:$0xff] }
 0x1e1   :  { %v1058_v13 = vld [vmem:[%s7506_s1 + $0x2078] sm:$0xff] }
 0x1e2   :  { %3188 = vmatpush1.bf16.msra.mxu0 %v3187_v23  ;;  %v3207_v23 = vpack.c.bf16 %v1015_v25, %v1011_v17  ;;  %v3225_v17 = vpack.c.bf16 %v1056_v10, %v1052_v8  ;;  %v1051_v25 = vld [vmem:[%s7506_s1 + $0x2040] sm:$0xff]  ;;  %v1089_v8 = vld [vmem:[%s7506_s1 + $0x2170] sm:$0xff]  ;;  %v1092_v10 = vld [vmem:[%s7506_s1 + $0x2188] sm:$0xff] }
 0x1e3   :  { %3764 = vmatpush1.bf16.msra.mxu1 %v3763_v24  ;;  %3190 = vmatprep.subr.bf16.mxu0 %v3189_v27  ;;  %v3783_v24 = vpack.c.bf16 %v1017_v42, %v1013_v18  ;;  %v3209_v27 = vpack.c.bf16 %v1024_v63, %v1020_v20  ;;  %v1055_v18 = vld [vmem:[%s7506_s1 + $0x2060] sm:$0xff]  ;;  %v3801_v42 = vpack.c.bf16 %v1058_v13, %v1054_v12  ;;  %v1057_v20 = vld [vmem:[%s7506_s1 + $0x2070] sm:$0xff]  ;;  %v1060_v63 = vld [vmem:[%s7506_s1 + $0x2088] sm:$0xff] }
 0x1e4   :  { %3766 = vmatprep.subr.bf16.mxu1 %v3765_v33  ;;  %v3785_v33 = vpack.c.bf16 %v1026_v22, %v1022_v21  ;;  %v1064_v21 = vld [vmem:[%s7506_s1 + $0x20a8] sm:$0xff]  ;;  %v1094_v13 = vld [vmem:[%s7506_s1 + $0x2198] sm:$0xff] }
 0x1e5   :  { %v1096_v12 = vld [vmem:[%s7506_s1 + $0x21a8] sm:$0xff] }
 0x1e6   :  { %3192 = vmatpush1.bf16.msra.mxu0 %v3191_v38  ;;  %v3211_v38 = vpack.c.bf16 %v1023_v30, %v1019_v29  ;;  %v3229_v30 = vpack.c.bf16 %v1064_v21, %v1060_v63  ;;  %v1097_v63 = vld [vmem:[%s7506_s1 + $0x21b0] sm:$0xff]  ;;  %v1100_v21 = vld [vmem:[%s7506_s1 + $0x21c8] sm:$0xff] }
 0x1e7   :  { %3768 = vmatpush1.bf16.msra.mxu1 %v3767_v39  ;;  %3194 = vmatprep.subr.bf16.mxu0 %v3193_v40  ;;  %v3787_v39 = vpack.c.bf16 %v1025_v58, %v1021_v31  ;;  %v3213_v40 = vpack.c.bf16 %v1032_v35, %v1028_v34  ;;  %v1059_v31 = vld [vmem:[%s7506_s1 + $0x2080] sm:$0xff]  ;;  %v1061_v58 = vld [vmem:[%s7506_s1 + $0x2090] sm:$0xff]  ;;  %v1068_v35 = vld [vmem:[%s7506_s1 + $0x20c8] sm:$0xff] }
 0x1e8   :  { %3770 = vmatprep.subr.bf16.mxu1 %v3769_v46  ;;  %v3789_v46 = vpack.c.bf16 %v1034_v37, %v1030_v36  ;;  %v1072_v36 = vld [vmem:[%s7506_s1 + $0x20e8] sm:$0xff]  ;;  %v1070_v37 = vld [vmem:[%s7506_s1 + $0x20d8] sm:$0xff] }
 0x1ea   :  { %3196 = vmatpush1.bf16.msra.mxu0 %v3195_v52  ;;  %v3215_v52 = vpack.c.bf16 %v1031_v44, %v1027_v41  ;;  %v3233_v41 = vpack.c.bf16 %v1072_v36, %v1068_v35  ;;  %v1067_v44 = vld [vmem:[%s7506_s1 + $0x20c0] sm:$0xff]  ;;  %v1108_v35 = vld [vmem:[%s7506_s1 + $0x2208] sm:$0xff] }
 0x1eb   :  { %3772 = vmatpush1.bf16.msra.mxu1 %v3771_v43  ;;  %3198 = vmatprep.subr.bf16.mxu0 %v3197_v53  ;;  %v3791_v43 = vpack.c.bf16 %v1033_v47, %v1029_v45  ;;  %v3217_v53 = vpack.c.bf16 %v1040_v50, %v1036_v49  ;;  %v1071_v45 = vld [vmem:[%s7506_s1 + $0x20e0] sm:$0xff]  ;;  %v1073_v49 = vld [vmem:[%s7506_s1 + $0x20f0] sm:$0xff]  ;;  %v1076_v50 = vld [vmem:[%s7506_s1 + $0x2108] sm:$0xff] }
 0x1ec   :  { %3774 = vmatprep.subr.bf16.mxu1 %v3773_v56  ;;  %v3793_v56 = vpack.c.bf16 %v1042_v9, %v1038_v51  ;;  %v1080_v51 = vld [vmem:[%s7506_s1 + $0x2128] sm:$0xff]  ;;  %v1078_v9 = vld [vmem:[%s7506_s1 + $0x2118] sm:$0xff] }
 0x1ed   :  { %v1112_v36 = vld [vmem:[%s7506_s1 + $0x2228] sm:$0xff] }
 0x1ee   :  { %3200 = vmatpush1.bf16.msra.mxu0 %v3199_v1  ;;  %v3219_v1 = vpack.c.bf16 %v1039_v54, %v1035_v32  ;;  %v3237_v32 = vpack.c.bf16 %v1080_v51, %v1076_v50  ;;  %v1075_v54 = vld [vmem:[%s7506_s1 + $0x2100] sm:$0xff]  ;;  %v1116_v50 = vld [vmem:[%s7506_s1 + $0x2248] sm:$0xff] }
 0x1ef   :  { %3776 = vmatpush1.bf16.msra.mxu1 %v3775_v2  ;;  %3202 = vmatprep.subr.bf16.mxu0 %v3201_v28  ;;  %v3795_v2 = vpack.c.bf16 %v1041_v57, %v1037_v55  ;;  %v3221_v28 = vpack.c.bf16 %v1048_v61, %v1044_v59  ;;  %v1079_v55 = vld [vmem:[%s7506_s1 + $0x2120] sm:$0xff]  ;;  %v1081_v59 = vld [vmem:[%s7506_s1 + $0x2130] sm:$0xff]  ;;  %v1084_v61 = vld [vmem:[%s7506_s1 + $0x2148] sm:$0xff] }
 0x1f0   :  { %3778 = vmatprep.subr.bf16.mxu1 %v3777_v6  ;;  %v3797_v6 = vpack.c.bf16 %v1050_v26, %v1046_v0  ;;  %v1088_v0 = vld [vmem:[%s7506_s1 + $0x2168] sm:$0xff]  ;;  %v1086_v26 = vld [vmem:[%s7506_s1 + $0x2158] sm:$0xff] }
 0x1f1   :  { %v1120_v51 = vld [vmem:[%s7506_s1 + $0x2268] sm:$0xff] }
 0x1f2   :  { %3204 = vmatpush1.bf16.msra.mxu0 %v3203_v14  ;;  %v7129_v14 = vld.sshfl [vmem:[%s7507_s0 + $0x20] sm:$0x33 pattern:$0x76325410] }
 0x1f3   :  { %3780 = vmatpush1.bf16.msra.mxu1 %v3779_v15  ;;  %3206 = vmatprep.subr.bf16.mxu0 %v3205_v16  ;;  %v3223_v15 = vpack.c.bf16 %v1047_v4, %v1043_v3  ;;  %v3799_v16 = vpack.c.bf16 %v1049_v7, %v1045_v5  ;;  %v1251_v22 = vcombine.high %v7129_v14, %v7129_v14  ;;  %v1083_v4 = vld [vmem:[%s7506_s1 + $0x2140] sm:$0xff] }
 0x1f4   :  { %3782 = vmatprep.subr.bf16.mxu1 %v3781_v19  ;;  %v1053_v19 = vld [vmem:[%s7506_s1 + $0x2050] sm:$0xff]  ;;  %v3241_v3 = vpack.c.bf16 %v1088_v0, %v1084_v61  ;;  %v1087_v5 = vld [vmem:[%s7506_s1 + $0x2160] sm:$0xff]  ;;  %v1124_v61 = vld [vmem:[%s7506_s1 + $0x2288] sm:$0xff] }
 0x1f5   :  { %v3803_v29 = vpack.c.bf16 %v1057_v20, %v1053_v19  ;;  %v1095_v19 = vld [vmem:[%s7506_s1 + $0x21a0] sm:$0xff]  ;;  %v1128_v0 = vld [vmem:[%s7506_s1 + $0x22a8] sm:$0xff] }
 0x1f6   :  { %3208 = vmatpush1.bf16.msra.mxu0 %v3207_v23  ;;  %v1062_v23 = vld [vmem:[%s7506_s1 + $0x2098] sm:$0xff] }
 0x1f7   :  { %3784 = vmatpush1.bf16.msra.mxu1 %v3783_v24  ;;  %3210 = vmatprep.subr.bf16.mxu0 %v3209_v27  ;;  %v1066_v24 = vld [vmem:[%s7506_s1 + $0x20b8] sm:$0xff]  ;;  %v3227_v27 = vpack.c.bf16 %v1055_v18, %v1051_v25  ;;  %v3245_v25 = vpack.c.bf16 %v1096_v12, %v1092_v10  ;;  %v1091_v18 = vld [vmem:[%s7506_s1 + $0x2180] sm:$0xff]  ;;  %v1132_v10 = vld [vmem:[%s7506_s1 + $0x22c8] sm:$0xff] }
 0x1f8   :  { %3786 = vmatprep.subr.bf16.mxu1 %v3785_v33  ;;  %v1063_v33 = vld [vmem:[%s7506_s1 + $0x20a0] sm:$0xff]  ;;  %v3805_v34 = vpack.c.bf16 %v1066_v24, %v1062_v23  ;;  %v1102_v23 = vld [vmem:[%s7506_s1 + $0x21d8] sm:$0xff]  ;;  %v1136_v12 = vld [vmem:[%s7506_s1 + $0x22e8] sm:$0xff] }
 0x1f9   :  { %v1106_v24 = vld [vmem:[%s7506_s1 + $0x21f8] sm:$0xff] }
 0x1fa   :  { %3212 = vmatpush1.bf16.msra.mxu0 %v3211_v38  ;;  %v1074_v38 = vld [vmem:[%s7506_s1 + $0x20f8] sm:$0xff] }
 0x1fb   :  { %3788 = vmatpush1.bf16.msra.mxu1 %v3787_v39  ;;  %3214 = vmatprep.subr.bf16.mxu0 %v3213_v40  ;;  %v3231_v39 = vpack.c.bf16 %v1063_v33, %v1059_v31  ;;  %v3809_v47 = vpack.c.bf16 %v1074_v38, %v1070_v37  ;;  %v1099_v31 = vld [vmem:[%s7506_s1 + $0x21c0] sm:$0xff]  ;;  %v1110_v37 = vld [vmem:[%s7506_s1 + $0x2218] sm:$0xff] }
 0x1fc   :  { %3790 = vmatprep.subr.bf16.mxu1 %v3789_v46  ;;  %v1069_v46 = vld [vmem:[%s7506_s1 + $0x20d0] sm:$0xff]  ;;  %v1103_v33 = vld [vmem:[%s7506_s1 + $0x21e0] sm:$0xff]  ;;  %v1114_v38 = vld [vmem:[%s7506_s1 + $0x2238] sm:$0xff] }
 0x1fe   :  { %3216 = vmatpush1.bf16.msra.mxu0 %v3215_v52  ;;  %v1082_v52 = vld [vmem:[%s7506_s1 + $0x2138] sm:$0xff] }
 0x1ff   :  { %3792 = vmatpush1.bf16.msra.mxu1 %v3791_v43  ;;  %3218 = vmatprep.subr.bf16.mxu0 %v3217_v53  ;;  %v3235_v43 = vpack.c.bf16 %v1071_v45, %v1067_v44  ;;  %v3811_v53 = vpack.c.bf16 %v1073_v49, %v1069_v46  ;;  %v3813_v57 = vpack.c.bf16 %v1082_v52, %v1078_v9  ;;  %v1107_v44 = vld [vmem:[%s7506_s1 + $0x2200] sm:$0xff]  ;;  %v1109_v46 = vld [vmem:[%s7506_s1 + $0x2210] sm:$0xff]  ;;  %v1118_v9 = vld [vmem:[%s7506_s1 + $0x2258] sm:$0xff] }
 0x200   :  { %3794 = vmatprep.subr.bf16.mxu1 %v3793_v56  ;;  %v1077_v56 = vld [vmem:[%s7506_s1 + $0x2110] sm:$0xff]  ;;  %v1111_v45 = vld [vmem:[%s7506_s1 + $0x2220] sm:$0xff]  ;;  %v1122_v52 = vld [vmem:[%s7506_s1 + $0x2278] sm:$0xff] }
 0x201   :  { %v1113_v49 = vld [vmem:[%s7506_s1 + $0x2230] sm:$0xff] }
 0x202   :  { %3220 = vmatpush1.bf16.msra.mxu0 %v3219_v1  ;;  %v1090_v1 = vld [vmem:[%s7506_s1 + $0x2178] sm:$0xff] }
 0x203   :  { %3796 = vmatpush1.bf16.msra.mxu1 %v3795_v2  ;;  %3222 = vmatprep.subr.bf16.mxu0 %v3221_v28  ;;  %v3239_v2 = vpack.c.bf16 %v1079_v55, %v1075_v54  ;;  %v3815_v28 = vpack.c.bf16 %v1081_v59, %v1077_v56  ;;  %v3817_v7 = vpack.c.bf16 %v1090_v1, %v1086_v26  ;;  %v1115_v54 = vld [vmem:[%s7506_s1 + $0x2240] sm:$0xff]  ;;  %v1117_v56 = vld [vmem:[%s7506_s1 + $0x2250] sm:$0xff]  ;;  %v1126_v26 = vld [vmem:[%s7506_s1 + $0x2298] sm:$0xff] }
 0x204   :  { %3798 = vmatprep.subr.bf16.mxu1 %v3797_v6  ;;  %v1085_v6 = vld [vmem:[%s7506_s1 + $0x2150] sm:$0xff]  ;;  %v1119_v55 = vld [vmem:[%s7506_s1 + $0x2260] sm:$0xff]  ;;  %v1130_v1 = vld [vmem:[%s7506_s1 + $0x22b8] sm:$0xff] }
 0x205   :  { %1832 = vmatmul.mubr.f32.vlgmr.msra.gmra.mrb[0].mxu0 %v6730_v60  ;;  %v1121_v59 = vld [vmem:[%s7506_s1 + $0x2270] sm:$0xff] }
 0x206   :  { %3224 = vmatpush1.bf16.msra.mxu0 %v3223_v15  ;;  %2471 = vmatmul.mubr.f32.vlgmr.msra.gmra.mrb[0].mxu1 %v6730_v60  ;;  %v1065_v60 = vld [vmem:[%s7506_s1 + $0x20b0] sm:$0xff]  ;;  %v1098_v15 = vld [vmem:[%s7506_s1 + $0x21b8] sm:$0xff] }
 0x207   :  { %3800 = vmatpush1.bf16.msra.mxu1 %v3799_v16  ;;  %3226 = vmatprep.subr.bf16.mxu0 %v3225_v17  ;;  %v3807_v40 = vpack.c.bf16 %v1065_v60, %v1061_v58  ;;  %v3243_v16 = vpack.c.bf16 %v1087_v5, %v1083_v4  ;;  %v3819_v17 = vpack.c.bf16 %v1089_v8, %v1085_v6  ;;  %v1101_v58 = vld [vmem:[%s7506_s1 + $0x21d0] sm:$0xff]  ;;  %v1123_v4 = vld [vmem:[%s7506_s1 + $0x2280] sm:$0xff] }
 0x208   :  { %3802 = vmatprep.subr.bf16.mxu1 %v3801_v42  ;;  %1902 = vmatprep.mubr.f32.mxu0 %v1251_v22  ;;  %v1093_v42 = vld [vmem:[%s7506_s1 + $0x2190] sm:$0xff]  ;;  %v3821_v20 = vpack.c.bf16 %v1098_v15, %v1094_v13  ;;  %v1127_v5 = vld [vmem:[%s7506_s1 + $0x22a0] sm:$0xff]  ;;  %v1134_v13 = vld [vmem:[%s7506_s1 + $0x22d8] sm:$0xff] }
 0x209   :  { %2541 = vmatprep.mubr.f32.mxu1 %v1251_v22  ;;  %v1104_v22 = vld [vmem:[%s7506_s1 + $0x21e8] sm:$0xff]  ;;  %v1105_v60 = vld [vmem:[%s7506_s1 + $0x21f0] sm:$0xff]  ;;  %v1138_v15 = vld [vmem:[%s7506_s1 + $0x22f8] sm:$0xff] }
 0x20a   :  { %3228 = vmatpush1.bf16.msra.mxu0 %v3227_v27  ;;  %v3247_v27 = vpack.c.bf16 %v1095_v19, %v1091_v18  ;;  %v1125_v6 = vld [vmem:[%s7506_s1 + $0x2290] sm:$0xff]  ;;  %v1131_v18 = vld [vmem:[%s7506_s1 + $0x22c0] sm:$0xff] }
 0x20b   :  { %3804 = vmatpush1.bf16.msra.mxu1 %v3803_v29  ;;  %3230 = vmatprep.subr.bf16.mxu0 %v3229_v30  ;;  %v3823_v29 = vpack.c.bf16 %v1097_v63, %v1093_v42  ;;  %v3249_v30 = vpack.c.bf16 %v1104_v22, %v1100_v21  ;;  %v1129_v8 = vld [vmem:[%s7506_s1 + $0x22b0] sm:$0xff]  ;;  %v1135_v19 = vld [vmem:[%s7506_s1 + $0x22e0] sm:$0xff]  ;;  %v1140_v21 = vld [vmem:[%s7506_s1 + $0x2308] sm:$0xff] }
 0x20c   :  { %3806 = vmatprep.subr.bf16.mxu1 %v3805_v34  ;;  %v3825_v34 = vpack.c.bf16 %v1106_v24, %v1102_v23  ;;  %v1133_v42 = vld [vmem:[%s7506_s1 + $0x22d0] sm:$0xff]  ;;  %v1144_v22 = vld [vmem:[%s7506_s1 + $0x2328] sm:$0xff]  ;;  %v1142_v23 = vld [vmem:[%s7506_s1 + $0x2318] sm:$0xff] }
 0x20d   :  { %v1137_v63 = vld [vmem:[%s7506_s1 + $0x22f0] sm:$0xff]  ;;  %v1146_v24 = vld [vmem:[%s7506_s1 + $0x2338] sm:$0xff] }
 0x20e   :  { %3232 = vmatpush1.bf16.msra.mxu0 %v3231_v39  ;;  %v3251_v39 = vpack.c.bf16 %v1103_v33, %v1099_v31  ;;  %v1139_v31 = vld [vmem:[%s7506_s1 + $0x2300] sm:$0xff] }
 0x20f   :  { %3808 = vmatpush1.bf16.msra.mxu1 %v3807_v40  ;;  %3234 = vmatprep.subr.bf16.mxu0 %v3233_v41  ;;  %v3827_v40 = vpack.c.bf16 %v1105_v60, %v1101_v58  ;;  %v3253_v41 = vpack.c.bf16 %v1112_v36, %v1108_v35  ;;  %v1143_v33 = vld [vmem:[%s7506_s1 + $0x2320] sm:$0xff]  ;;  %v1141_v58 = vld [vmem:[%s7506_s1 + $0x2310] sm:$0xff]  ;;  %v1148_v35 = vld [vmem:[%s7506_s1 + $0x2348] sm:$0xff] }
 0x210   :  { %3810 = vmatprep.subr.bf16.mxu1 %v3809_v47  ;;  %v3829_v47 = vpack.c.bf16 %v1114_v38, %v1110_v37  ;;  %v1145_v60 = vld [vmem:[%s7506_s1 + $0x2330] sm:$0xff]  ;;  %v1152_v36 = vld [vmem:[%s7506_s1 + $0x2368] sm:$0xff]  ;;  %v1150_v37 = vld [vmem:[%s7506_s1 + $0x2358] sm:$0xff] }
 0x211   :  { %v1154_v38 = vld [vmem:[%s7506_s1 + $0x2378] sm:$0xff] }
 0x212   :  { %3236 = vmatpush1.bf16.msra.mxu0 %v3235_v43  ;;  %v3255_v43 = vpack.c.bf16 %v1111_v45, %v1107_v44  ;;  %v1147_v44 = vld [vmem:[%s7506_s1 + $0x2340] sm:$0xff] }
 0x213   :  { %3812 = vmatpush1.bf16.msra.mxu1 %v3811_v53  ;;  %3238 = vmatprep.subr.bf16.mxu0 %v3237_v32  ;;  %v3831_v53 = vpack.c.bf16 %v1113_v49, %v1109_v46  ;;  %v3257_v32 = vpack.c.bf16 %v1120_v51, %v1116_v50  ;;  %v1151_v45 = vld [vmem:[%s7506_s1 + $0x2360] sm:$0xff]  ;;  %v1149_v46 = vld [vmem:[%s7506_s1 + $0x2350] sm:$0xff]  ;;  %v1156_v50 = vld [vmem:[%s7506_s1 + $0x2388] sm:$0xff] }
 0x214   :  { %3814 = vmatprep.subr.bf16.mxu1 %v3813_v57  ;;  %v3833_v57 = vpack.c.bf16 %v1122_v52, %v1118_v9  ;;  %v1153_v49 = vld [vmem:[%s7506_s1 + $0x2370] sm:$0xff]  ;;  %v1160_v51 = vld [vmem:[%s7506_s1 + $0x23a8] sm:$0xff]  ;;  %v1158_v9 = vld [vmem:[%s7506_s1 + $0x2398] sm:$0xff] }
 0x215   :  { %v1162_v52 = vld [vmem:[%s7506_s1 + $0x23b8] sm:$0xff] }
 0x216   :  { %3240 = vmatpush1.bf16.msra.mxu0 %v3239_v2  ;;  %v3259_v2 = vpack.c.bf16 %v1119_v55, %v1115_v54  ;;  %v1155_v54 = vld [vmem:[%s7506_s1 + $0x2380] sm:$0xff] }
 0x217   :  { %3816 = vmatpush1.bf16.msra.mxu1 %v3815_v28  ;;  %3242 = vmatprep.subr.bf16.mxu0 %v3241_v3  ;;  %v3835_v28 = vpack.c.bf16 %v1121_v59, %v1117_v56  ;;  %v3261_v3 = vpack.c.bf16 %v1128_v0, %v1124_v61  ;;  %v1159_v55 = vld [vmem:[%s7506_s1 + $0x23a0] sm:$0xff]  ;;  %v1157_v56 = vld [vmem:[%s7506_s1 + $0x2390] sm:$0xff]  ;;  %v1164_v61 = vld [vmem:[%s7506_s1 + $0x23c8] sm:$0xff] }
 0x218   :  { %3818 = vmatprep.subr.bf16.mxu1 %v3817_v7  ;;  %v3837_v7 = vpack.c.bf16 %v1130_v1, %v1126_v26  ;;  %v1161_v59 = vld [vmem:[%s7506_s1 + $0x23b0] sm:$0xff]  ;;  %v1168_v0 = vld [vmem:[%s7506_s1 + $0x23e8] sm:$0xff]  ;;  %v1166_v26 = vld [vmem:[%s7506_s1 + $0x23d8] sm:$0xff] }
 0x219   :  { %v1170_v1 = vld [vmem:[%s7506_s1 + $0x23f8] sm:$0xff] }
 0x21a   :  { %3244 = vmatpush1.bf16.msra.mxu0 %v3243_v16  ;;  %v3263_v16 = vpack.c.bf16 %v1127_v5, %v1123_v4  ;;  %v1163_v4 = vld [vmem:[%s7506_s1 + $0x23c0] sm:$0xff] }
 0x21b   :  { %3820 = vmatpush1.bf16.msra.mxu1 %v3819_v17  ;;  %3246 = vmatprep.subr.bf16.mxu0 %v3245_v25  ;;  %v3839_v17 = vpack.c.bf16 %v1129_v8, %v1125_v6  ;;  %v3265_v25 = vpack.c.bf16 %v1136_v12, %v1132_v10  ;;  %v1167_v5 = vld [vmem:[%s7506_s1 + $0x23e0] sm:$0xff]  ;;  %v3857_v6 = vpack.c.bf16 %v1170_v1, %v1166_v26  ;;  %v1169_v8 = vld [vmem:[%s7506_s1 + $0x23f0] sm:$0xff] }
 0x21c   :  { %3822 = vmatprep.subr.bf16.mxu1 %v3821_v20  ;;  %v3841_v20 = vpack.c.bf16 %v1138_v15, %v1134_v13  ;;  %v3283_v10 = vpack.c.bf16 %v1167_v5, %v1163_v4 }
 0x21e   :  { %3248 = vmatpush1.bf16.msra.mxu0 %v3247_v27  ;;  %v3267_v27 = vpack.c.bf16 %v1135_v19, %v1131_v18  ;;  %v3900_v18 = vmov 1966171168  }
 0x21f   :  { %3824 = vmatpush1.bf16.msra.mxu1 %v3823_v29  ;;  %3250 = vmatprep.subr.bf16.mxu0 %v3249_v30  ;;  %v3843_v29 = vpack.c.bf16 %v1137_v63, %v1133_v42  ;;  %v3269_v30 = vpack.c.bf16 %v1144_v22, %v1140_v21  ;;  %v2607_v19 = vunpack.c.l.s4 %v3900_v18 }
 0x220   :  { %3826 = vmatprep.subr.bf16.mxu1 %v3825_v34  ;;  %v3845_v34 = vpack.c.bf16 %v1146_v24, %v1142_v23 }
 0x222   :  { %3252 = vmatpush1.bf16.msra.mxu0 %v3251_v39  ;;  %v3271_v39 = vpack.c.bf16 %v1143_v33, %v1139_v31 }
 0x223   :  { %3828 = vmatpush1.bf16.msra.mxu1 %v3827_v40  ;;  %3254 = vmatprep.subr.bf16.mxu0 %v3253_v41  ;;  %v3847_v40 = vpack.c.bf16 %v1145_v60, %v1141_v58  ;;  %v3273_v41 = vpack.c.bf16 %v1152_v36, %v1148_v35 }
 0x224   :  { %3830 = vmatprep.subr.bf16.mxu1 %v3829_v47  ;;  %v3849_v47 = vpack.c.bf16 %v1154_v38, %v1150_v37 }
 0x226   :  { %3256 = vmatpush1.bf16.msra.mxu0 %v3255_v43  ;;  %v3275_v43 = vpack.c.bf16 %v1151_v45, %v1147_v44 }
 0x227   :  { %3832 = vmatpush1.bf16.msra.mxu1 %v3831_v53  ;;  %3258 = vmatprep.subr.bf16.mxu0 %v3257_v32  ;;  %v3851_v53 = vpack.c.bf16 %v1153_v49, %v1149_v46  ;;  %v3277_v32 = vpack.c.bf16 %v1160_v51, %v1156_v50 }
 0x228   :  { %3834 = vmatprep.subr.bf16.mxu1 %v3833_v57  ;;  %v3853_v57 = vpack.c.bf16 %v1162_v52, %v1158_v9 }
 0x22a   :  { %3260 = vmatpush1.bf16.msra.mxu0 %v3259_v2  ;;  %v3279_v2 = vpack.c.bf16 %v1159_v55, %v1155_v54 }
 0x22b   :  { %3836 = vmatpush1.bf16.msra.mxu1 %v3835_v28  ;;  %3262 = vmatprep.subr.bf16.mxu0 %v3261_v3  ;;  %v3855_v28 = vpack.c.bf16 %v1161_v59, %v1157_v56  ;;  %v3281_v3 = vpack.c.bf16 %v1168_v0, %v1164_v61  ;;  %v2608_v61 = vunpack.c.0.s8 %v2607_v19 }
 0x22c   :  { %3838 = vmatprep.subr.bf16.mxu1 %v3837_v7  ;;  %v1165_v7 = vld [vmem:[%s7506_s1 + $0x23d0] sm:$0xff] }
 0x22d   :  { %v3859_v12 = vpack.c.bf16 %v1169_v8, %v1165_v7 }
 0x22e   :  { %3264 = vmatpush1.bf16.msra.mxu0 %v3263_v16 }
 0x22f   :  { %3840 = vmatpush1.bf16.msra.mxu1 %v3839_v17  ;;  %3266 = vmatprep.subr.bf16.mxu0 %v3265_v25 }
 0x230   :  { %3842 = vmatprep.subr.bf16.mxu1 %v3841_v20 }
 0x232   :  { %3268 = vmatpush1.bf16.msra.mxu0 %v3267_v27 }
 0x233   :  { %3844 = vmatpush1.bf16.msra.mxu1 %v3843_v29  ;;  %3270 = vmatprep.subr.bf16.mxu0 %v3269_v30 }
 0x234   :  { %3846 = vmatprep.subr.bf16.mxu1 %v3845_v34 }
 0x236   :  { %3272 = vmatpush1.bf16.msra.mxu0 %v3271_v39 }
 0x237   :  { %3848 = vmatpush1.bf16.msra.mxu1 %v3847_v40  ;;  %3274 = vmatprep.subr.bf16.mxu0 %v3273_v41 }
 0x238   :  { %3850 = vmatprep.subr.bf16.mxu1 %v3849_v47 }
 0x23a   :  { %3276 = vmatpush1.bf16.msra.mxu0 %v3275_v43 }
 0x23b   :  { %3852 = vmatpush1.bf16.msra.mxu1 %v3851_v53  ;;  %3278 = vmatprep.subr.bf16.mxu0 %v3277_v32 }
 0x23c   :  { %3854 = vmatprep.subr.bf16.mxu1 %v3853_v57 }
 0x23e   :  { %3280 = vmatpush1.bf16.msra.mxu0 %v3279_v2 }
 0x23f   :  { %3856 = vmatpush1.bf16.msra.mxu1 %v3855_v28  ;;  %3282 = vmatprep.subr.bf16.mxu0 %v3281_v3 }
 0x240   :  { %3858 = vmatprep.subr.bf16.mxu1 %v3857_v6 }
 0x242   :  { %3284 = vmatpush1.bf16.msra.mxu0 %v3283_v10 }
 0x243   :  { %3860 = vmatpush1.bf16.msra.mxu1 %v3859_v12  ;;  %v2611_v12 = vsub.s32 %v2608_v61, %v4179_v62 }
 0x245   :  { %1903 = vmatmul.mubr.f32.vlgmr.msra.gmra.mrb[0].mxu0 %v7129_v14 }
 0x246   :  { %2542 = vmatmul.mubr.f32.vlgmr.msra.gmra.mrb[0].mxu1 %v7129_v14 }
 0x318   :  { %v1904_v13 = vpop.f32.mrb[0].mxu0 }
 0x319   :  { %v2572_v15 = vsel %vm2571_vm0, %v1904_v13, 0.0  ;;  %v2634_v16 = vmul.f32 %v1904_v13, %v1904_v13  ;;  %v2543_v17 = vpop.f32.mrb[0].mxu1  ;;  %v1906_v25 = vpop.f32.mrb[1].mxu0 }
 0x31a   :  { %v2573_v42 = vrot.slane %v2572_v15, 4  ;;  %v2586_v20 = vsel %vm2571_vm0, %v2543_v17, 0.0  ;;  %v2636_v63 = vmul.f32 %v2543_v17, %v2543_v17  ;;  %v2552_v21 = vcombine.low %v1904_v13, %v1906_v25  ;;  %v2545_v22 = vpop.f32.mrb[1].mxu1 }
 0x31b   :  { %v2638_v23 = vsel %vm2571_vm0, %v2634_v16, 0.0  ;;  %v2587_v24 = vrot.slane %v2586_v20, 4  ;;  %v2579_v14 = vsel %vm2571_vm0, %v1906_v25, 0.0  ;;  %v2635_v27 = vmul.f32 %v1906_v25, %v1906_v25 }
 0x31c   :  { %v2574_v29 = vadd.f32 %v2573_v42, %v2572_v15  ;;  %v2639_v30 = vrot.slane %v2638_v23, 4  ;;  %v2652_v31 = vsel %vm2571_vm0, %v2636_v63, 0.0  ;;  %v2560_v33 = vrot.slane %v2552_v21, %v4206_v11 }
 0x31d   :  { %v2588_v58 = vadd.f32 %v2587_v24, %v2586_v20  ;;  %v2653_v34 = vrot.slane %v2652_v31, 4  ;;  %v2580_v60 = vrot.slane %v2579_v14, 4  ;;  %v2645_v35 = vsel %vm2571_vm0, %v2635_v27, 0.0 }
 0x31e   :  { %v2575_v36 = vrot.slane %v2574_v29, 2  ;;  %v2640_v37 = vadd.f32 %v2639_v30, %v2638_v23  ;;  %v2646_v38 = vrot.slane %v2645_v35, 4  ;;  %v2553_v39 = vcombine.low %v2543_v17, %v2545_v22 }
 0x31f   :  { %v2589_v40 = vrot.slane %v2588_v58, 2  ;;  %v2654_v41 = vadd.f32 %v2653_v34, %v2652_v31  ;;  %v2581_v44 = vadd.f32 %v2580_v60, %v2579_v14  ;;  %v2593_v45 = vsel %vm2571_vm0, %v2545_v22, 0.0 }
 0x320   :  { %v2576_v46 = vadd.f32 %v2575_v36, %v2574_v29  ;;  %v2641_v47 = vrot.slane %v2640_v37, 2  ;;  %v2647_v49 = vadd.f32 %v2646_v38, %v2645_v35  ;;  %v2567_v50 = vrot.slane %v2553_v39, %v4206_v11 }
 0x321   :  { %v2590_v51 = vadd.f32 %v2589_v40, %v2588_v58  ;;  %v2582_v9 = vrot.slane %v2581_v44, 2  ;;  %v2594_v52 = vrot.slane %v2593_v45, 4  ;;  %v2655_v55 = vrot.slane %v2654_v41, 2 }
 0x322   :  { %v2577_v43 = vrot.slane %v2576_v46, 1  ;;  %v2642_v53 = vadd.f32 %v2641_v47, %v2640_v37  ;;  %v2648_v32 = vrot.slane %v2647_v49, 2  ;;  %v2568_v54 = vcombine.low %v2560_v33, %v2567_v50 }
 0x323   :  { %v2583_v56 = vadd.f32 %v2582_v9, %v2581_v44  ;;  %v2595_v57 = vadd.f32 %v2594_v52, %v2593_v45  ;;  %v2637_v26 = vmul.f32 %v2545_v22, %v2545_v22  ;;  %v2591_v11 = vrot.slane %v2590_v51, 1 }
 0x324   :  { %v2643_v59 = vrot.slane %v2642_v53, 1  ;;  %v2649_v0 = vadd.f32 %v2648_v32, %v2647_v49  ;;  %2570 = vst [vmem:[%s7508_s2] sm:$0xff] %v2568_v54  ;;  %v2578_v1 = vadd.f32 %v2577_v43, %v2576_v46  ;;  %v2656_v6 = vadd.f32 %v2655_v55, %v2654_v41 }
 0x325   :  { %v2584_v2 = vrot.slane %v2583_v56, 1  ;;  %v2596_v28 = vrot.slane %v2595_v57, 2  ;;  %v2659_v5 = vsel %vm2571_vm0, %v2637_v26, 0.0  ;;  %v2592_v15 = vadd.f32 %v2591_v11, %v2590_v51 }
 0x326   :  { %v2644_v3 = vadd.f32 %v2643_v59, %v2642_v53  ;;  %v2650_v4 = vrot.slane %v2649_v0, 1  ;;  %v2660_v10 = vrot.slane %v2659_v5, 4  ;;  %v2657_v19 = vrot.slane %v2656_v6, 1 }
 0x327   :  { %v2585_v7 = vadd.f32 %v2584_v2, %v2583_v56  ;;  %v2597_v8 = vadd.f32 %v2596_v28, %v2595_v57 }
 0x328   :  { %v2651_v13 = vadd.f32 %v2650_v4, %v2649_v0  ;;  %v2661_v25 = vadd.f32 %v2660_v10, %v2659_v5  ;;  %v2658_v23 = vadd.f32 %v2657_v19, %v2656_v6 }
 0x329   :  { %v2604_v16 = vcombine.low %v2578_v1, %v2585_v7  ;;  %v2598_v17 = vrot.slane %v2597_v8, 1 }
 0x32a   :  { %v2670_v18 = vcombine.low %v2644_v3, %v2651_v13  ;;  %v2662_v20 = vrot.slane %v2661_v25, 2 }
 0x32b   :  { %v2599_v42 = vadd.f32 %v2598_v17, %v2597_v8  ;;  %v2612_v63 = vrot.slane %v2604_v16, %v2611_v12 }
 0x32c   :  { %v2663_v22 = vadd.f32 %v2662_v20, %v2661_v25  ;;  %v2678_v62 = vrot.slane %v2670_v18, %v2611_v12 }
 0x32d   :  { %v2605_v21 = vcombine.low %v2592_v15, %v2599_v42 }
 0x32e   :  { %v2664_v14 = vrot.slane %v2663_v22, 1 }
 0x32f   :  { %v2619_v24 = vrot.slane %v2605_v21, %v2611_v12 }
 0x330   :  { %v2665_v29 = vadd.f32 %v2664_v14, %v2663_v22 }
 0x331   :  { %v2620_v27 = vcombine.low %v2612_v63, %v2619_v24 }
 0x332   :  { %v2671_v31 = vcombine.low %v2658_v23, %v2665_v29 }
 0x333   :  { %v2627_v30 = vrot.slane %v2620_v27, %v2611_v12 }
 0x334   :  { %v2685_v33 = vrot.slane %v2671_v31, %v2611_v12 }
 0x335   :  { %2633 = vst.msk [vmem:[%s7509_s3] sm:$0xf] %vm2631_vm1, %v2627_v30 }
 0x336   :  { %v2686_v58 = vcombine.low %v2678_v62, %v2685_v33 }
 0x338   :  { %v2693_v34 = vrot.slane %v2686_v58, %v2611_v12 }
 0x33a   :  { %2695 = vst.msk [vmem:[%s7510_s4] sm:$0xf] %vm2631_vm1, %v2693_v34 }

</bundles_post_ra>
